<compile_context>
chip_gen: v5e
topology: v5e:2x2
jax: 0.10.0
libtpu: 0.0.40
codegen_flags: <defaults>
</compile_context>

<pallas_src>
import functools

import jax
import jax.numpy as jnp
from jax import lax
from jax.experimental import pallas as pl
from jax.experimental.pallas import tpu as pltpu


# ----------------------------------------------------------------------------- kernel
def fused_forecast_kernel(x0_ref, tgt_ref, w1t_ref, b1_ref, w2t_ref, b2_ref,
                          wf_ref, bf_ref, wo_ref, bo_ref,
                          outs_ref, xc_ref, *, L0, is_training):
    """One grid step == one decoder step i of ForecastNetConvModel2.

    x0_ref  : [B, Lmax+6]      initial cell input, zero padded by 3 each side
    tgt_ref : [1, B, D]        target for this step (teacher forcing)
    w1t_ref : [1, 5, H]        conv1 weight (k, out_ch)
    b1_ref  : [1, 1, H]
    w2t_ref : [1, 3, H, H]     conv2 weight (k, in_ch, out_ch)
    b2_ref  : [1, 1, H]
    wf_ref  : [1, Lmax*H, H]   flatten weight, NLC order, zero-padded to Lmax for step 0
    bf_ref  : [1, 1, H]
    wo_ref  : [1, H, D]
    bo_ref  : [1, 1, D]
    outs_ref: [T, B, D]        resident output block (written back once)
    xc_ref  : [B, Lmax+6]      persistent VMEM scratch: padded next_cell_input
    """
    i = pl.program_id(0)
    B, Lp6 = xc_ref.shape
    L = Lp6 - 6                       # Lmax = L0 + H + D
    H = b1_ref.shape[-1]
    D = bo_ref.shape[-1]
    Le = L + 2                        # extended conv1 range (covers conv2's zero pads)

    # step 0: seed the persistent cell input (x with zeros in the hid/out region).
    @pl.when(i == 0)
    def _init():
        xc_ref[...] = x0_ref[...]

    xq = xc_ref[...]                  # [B, L+6]
    w1t = w1t_ref[0]                  # [5, H]

    # ---- conv1: 1 -> H channels, k=5, pad=2, channels-last; acc starts at tap 0 ----
    h1 = xq[:, 0:Le, None] * w1t[0][None, None, :]
    for k in range(1, 5):             # static unroll
        h1 = h1 + xq[:, k:k + Le, None] * w1t[k][None, None, :]
    h1 = jnp.maximum(h1 + b1_ref[0], 0.0)            # [B, Le, H]

    # Extended index j maps to original position j-1.  Valid positions are
    # [0, L_i) with L_i = L0 at step 0 and L afterwards; everything outside is
    # zeroed, which reproduces conv2's zero padding (and step 0's shorter input)
    # exactly — the extra flatten columns of step 0 are zero in wf.
    limit = jnp.where(i == 0, L0, L)
    j_idx = lax.broadcasted_iota(jnp.int32, (1, Le, H), 1)
    h1 = jnp.where((j_idx >= 1) & (j_idx <= limit), h1, 0.0)

    # ---- conv2: H -> H, k=3, pad=1, as 3 accumulated MXU matmuls (acc = tap 0) ----
    w2t = w2t_ref[0]                  # [3, H, H]
    h2 = jnp.dot(h1[:, 0:L, :].reshape(B * L, H), w2t[0],
                 preferred_element_type=jnp.float32)
    for k in range(1, 3):             # static unroll
        h2 = h2 + jnp.dot(h1[:, k:k + L, :].reshape(B * L, H), w2t[k],
                          preferred_element_type=jnp.float32)
    h2 = jnp.maximum(h2.reshape(B, L, H) + b2_ref[0], 0.0)   # [B, L, H]

    # ---- flatten (l*H + c order) + hidden linear + relu: one K = L*H matmul ----
    flat = h2.reshape(B, L * H)
    hid = jnp.maximum(
        jnp.dot(flat, wf_ref[0], preferred_element_type=jnp.float32) + bf_ref[0],
        0.0)                                                  # [B, H]

    # ---- output linear ----
    out = jnp.dot(hid, wo_ref[0], preferred_element_type=jnp.float32) + bo_ref[0]

    # write this step's forecast into the VMEM-resident output slab
    outs_ref[i] = out

    # build next_cell_input = [x | hid | out-or-target]; the x part never changes.
    nxt = tgt_ref[0] if is_training else out
    xc_ref[:, 3 + L0:3 + L0 + H] = hid
    xc_ref[:, 3 + L0 + H:3 + L0 + H + D] = nxt


def build_fused_call(B, L0, H, D, T, is_training):
    Lmax = L0 + H + D
    kern = functools.partial(fused_forecast_kernel, L0=L0, is_training=is_training)
    grid_spec = pltpu.PrefetchScalarGridSpec(
        num_scalar_prefetch=0,
        grid=(T,),
        in_specs=[
            pl.BlockSpec((B, Lmax + 6), lambda i: (0, 0)),             # x0 (resident)
            pl.BlockSpec((1, B, D), lambda i: (i, 0, 0)),              # target[i]
            pl.BlockSpec((1, 5, H), lambda i: (i, 0, 0)),              # w1t
            pl.BlockSpec((1, 1, H), lambda i: (i, 0, 0)),              # b1
            pl.BlockSpec((1, 3, H, H), lambda i: (i, 0, 0, 0)),        # w2t
            pl.BlockSpec((1, 1, H), lambda i: (i, 0, 0)),              # b2
            pl.BlockSpec((1, Lmax * H, H), lambda i: (i, 0, 0)),       # wf (padded)
            pl.BlockSpec((1, 1, H), lambda i: (i, 0, 0)),              # bf
            pl.BlockSpec((1, H, D), lambda i: (i, 0, 0)),              # wo
            pl.BlockSpec((1, 1, D), lambda i: (i, 0, 0)),              # bo
        ],
        out_specs=pl.BlockSpec((T, B, D), lambda i: (0, 0, 0)),        # resident output
        scratch_shapes=[pltpu.VMEM((B, Lmax + 6), jnp.float32)],       # next_cell_input
    )
    return pl.pallas_call(
        kern,
        out_shape=jax.ShapeDtypeStruct((T, B, D), jnp.float32),
        grid_spec=grid_spec,
        compiler_params=pltpu.CompilerParams(
            dimension_semantics=("arbitrary",)),
    )


# ----------------------------------------------------------------------------- glue
def init_params(key, input_dim, in_seq_length, hidden_dim, output_dim, out_seq_length):
    """Deterministic parameter init, PyTorch-layout shapes."""
    L0 = input_dim * in_seq_length
    params = []
    for i in range(out_seq_length):
        Lin = L0 if i == 0 else L0 + hidden_dim + output_dim
        key, *ks = jax.random.split(key, 9)
        W1 = 0.1 * jax.random.normal(ks[0], (hidden_dim, 1, 5), jnp.float32)
        b1 = 0.1 * jax.random.normal(ks[1], (hidden_dim,), jnp.float32)
        W2 = 0.1 * jax.random.normal(ks[2], (hidden_dim, hidden_dim, 3), jnp.float32)
        b2 = 0.1 * jax.random.normal(ks[3], (hidden_dim,), jnp.float32)
        Wf = 0.1 * jax.random.normal(ks[4], (hidden_dim, hidden_dim * Lin), jnp.float32)
        bf = 0.1 * jax.random.normal(ks[5], (hidden_dim,), jnp.float32)
        Wo = 0.1 * jax.random.normal(ks[6], (output_dim, hidden_dim), jnp.float32)
        bo = 0.1 * jax.random.normal(ks[7], (output_dim,), jnp.float32)
        params.append((W1, b1, W2, b2, Wf, bf, Wo, bo))
    return params


def pack_params(params, hidden_dim, output_dim, L0):
    """Stack per-step PyTorch-layout weights into the kernel's NLC / transposed layout."""
    H, D = hidden_dim, output_dim
    Lmax = L0 + H + D
    w1t, b1s, w2t, b2s, wfs, bfs, wos, bos = [], [], [], [], [], [], [], []
    for (W1, b1, W2, b2, Wf, bf, Wo, bo) in params:
        Lin = Wf.shape[1] // H
        w1t.append(W1[:, 0, :].T)                                   # [5, H]
        b1s.append(b1.reshape(1, H))
        w2t.append(jnp.transpose(W2, (2, 1, 0)))                    # [3, C_in, C_out]
        b2s.append(b2.reshape(1, H))
        # PyTorch flatten order is channel-major c*Lin + l; kernel uses l*H + c.
        wf = (Wf.reshape(H, H, Lin)                                 # [H_out, C, L]
                .transpose(0, 2, 1)                                 # [H_out, L, C]
                .reshape(H, Lin * H)).T                             # [L*C, H_out]
        if Lin < Lmax:                                              # step 0: zero-pad
            wf = jnp.pad(wf, ((0, (Lmax - Lin) * H), (0, 0)))
        wfs.append(wf)
        bfs.append(bf.reshape(1, H))
        wos.append(Wo.T)                                            # [H, D]
        bos.append(bo.reshape(1, D))
    stk = lambda xs: jnp.stack(xs, axis=0)
    return (stk(w1t), stk(b1s), stk(w2t), stk(b2s),
            stk(wfs), stk(bfs), stk(wos), stk(bos))


@functools.partial(jax.jit, static_argnames=("hidden_dim", "output_dim",
                                             "out_seq_length", "L0", "is_training"))
def forecastnet_forward_pallas(x, target, kparams, *, hidden_dim, output_dim,
                               out_seq_length, L0, is_training=False):
    """Mirrors ForecastNetConvModel2.forward. x: [B, input_dim*in_seq_length]."""
    B = x.shape[0]
    H, D, T = hidden_dim, output_dim, out_seq_length
    Lmax = L0 + H + D
    # Initial cell input, conv-padded by 3 on each side, hid/out region zero.
    x0 = jnp.zeros((B, Lmax + 6), jnp.float32).at[:, 3:3 + L0].set(x)
    call = build_fused_call(B, L0, H, D, T, is_training)
    w1t, b1, w2t, b2, wf, bf, wo, bo = kparams
    return call(x0, target, w1t, b1, w2t, b2, wf, bf, wo, bo)   # [T, B, D]


# --------------------------------------------------------------------- pure-JAX reference
def forecastnet_forward_ref(x, target, params, hidden_dim, output_dim,
                            out_seq_length, is_training=False):
    """Direct transcription of the PyTorch forward (NCL layout), for validation."""
    B = x.shape[0]
    H = hidden_dim
    outputs = []
    nci = x
    for i in range(out_seq_length):
        W1, b1, W2, b2, Wf, bf, Wo, bo = params[i]
        L = nci.shape[1]
        xp = jnp.pad(nci, ((0, 0), (2, 2)))
        h1 = jnp.zeros((B, H, L), jnp.float32)
        for k in range(5):
            h1 = h1 + W1[None, :, 0, k, None] * xp[:, None, k:k + L]
        h1 = jax.nn.relu(h1 + b1[None, :, None])
        h1p = jnp.pad(h1, ((0, 0), (0, 0), (1, 1)))
        h2 = jnp.zeros((B, H, L), jnp.float32)
        for k in range(3):
            h2 = h2 + jnp.einsum('oc,bcl->bol', W2[:, :, k], h1p[:, :, k:k + L])
        h2 = jax.nn.relu(h2 + b2[None, :, None])
        flat = h2.reshape(B, H * L)                           # channel-major flatten
        hid = jax.nn.relu(flat @ Wf.T + bf)
        out = hid @ Wo.T + bo
        outputs.append(out)
        nxt = target[i] if is_training else out
        nci = jnp.concatenate([x, hid, nxt], axis=1)
    return jnp.stack(outputs, axis=0)


# ----------------------------------------------------------------------------- main
if __name__ == "__main__":
    batch = 8                 # fills the 8-sublane vreg / MXU M dimension
    input_dim = 2
    in_seq_length = 8
    hidden_dim = 16
    output_dim = 2
    out_seq_length = 4
    L0 = input_dim * in_seq_length                            # flattened input length

    key = jax.random.PRNGKey(0)
    kp, kx, kt = jax.random.split(key, 3)

    params = init_params(kp, input_dim, in_seq_length, hidden_dim, output_dim,
                         out_seq_length)
    kparams = pack_params(params, hidden_dim, output_dim, L0)

    x = jax.random.normal(kx, (batch, L0), jnp.float32)
    target = jax.random.normal(kt, (out_seq_length, batch, output_dim), jnp.float32)

    # inference path (feed back own output)
    outs = forecastnet_forward_pallas(
        x, target, kparams, hidden_dim=hidden_dim, output_dim=output_dim,
        out_seq_length=out_seq_length, L0=L0, is_training=False)
    outs = jax.block_until_ready(outs)
    assert outs.shape == (out_seq_length, batch, output_dim), outs.shape

    ref = forecastnet_forward_ref(x, target, params, hidden_dim, output_dim,
                                  out_seq_length, is_training=False)
    err = float(jnp.max(jnp.abs(outs - ref)))
    assert err < 1e-2, f"inference mismatch vs reference: max abs err = {err}"

    # teacher-forcing (training) path
    outs_tr = forecastnet_forward_pallas(
        x, target, kparams, hidden_dim=hidden_dim, output_dim=output_dim,
        out_seq_length=out_seq_length, L0=L0, is_training=True)
    outs_tr = jax.block_until_ready(outs_tr)
    ref_tr = forecastnet_forward_ref(x, target, params, hidden_dim, output_dim,
                                     out_seq_length, is_training=True)
    err_tr = float(jnp.max(jnp.abs(outs_tr - ref_tr)))
    assert err_tr < 1e-2, f"training mismatch vs reference: max abs err = {err_tr}"

    print("KERNEL_OK")
</pallas_src>

<mosaic_0001>
module attributes {stable_mosaic.version = 11 : i64} {
  func.func @fused_forecast_kernel(%arg0: i32, %arg1: memref<8x40xf32, #tpu.memory_space<vmem>>, %arg2: memref<1x8x2xf32, #tpu.memory_space<vmem>>, %arg3: memref<1x5x16xf32, #tpu.memory_space<vmem>>, %arg4: memref<1x1x16xf32, #tpu.memory_space<vmem>>, %arg5: memref<1x3x16x16xf32, #tpu.memory_space<vmem>>, %arg6: memref<1x1x16xf32, #tpu.memory_space<vmem>>, %arg7: memref<1x544x16xf32, #tpu.memory_space<vmem>>, %arg8: memref<1x1x16xf32, #tpu.memory_space<vmem>>, %arg9: memref<1x16x2xf32, #tpu.memory_space<vmem>>, %arg10: memref<1x1x2xf32, #tpu.memory_space<vmem>>, %arg11: memref<4x8x2xf32, #tpu.memory_space<vmem>>, %arg12: memref<8x40xf32, #tpu.memory_space<vmem>>) attributes {dimension_semantics = [#tpu.dimension_semantics<arbitrary>], iteration_bounds = array<i64: 4>, scalar_prefetch = 0 : i64, scratch_operands = 1 : i64, tpu.core_type = #tpu.core_type<tc>, window_params = [{pipeline_mode = #tpu.pipeline_mode<synchronous>, transform_indices = @transform_0, window_bounds = array<i64: 8, 40>}, {transform_indices = @transform_1, window_bounds = array<i64: 1, 8, 2>}, {transform_indices = @transform_2, window_bounds = array<i64: 1, 5, 16>}, {transform_indices = @transform_3, window_bounds = array<i64: 1, 1, 16>}, {transform_indices = @transform_4, window_bounds = array<i64: 1, 3, 16, 16>}, {transform_indices = @transform_5, window_bounds = array<i64: 1, 1, 16>}, {transform_indices = @transform_6, window_bounds = array<i64: 1, 544, 16>}, {transform_indices = @transform_7, window_bounds = array<i64: 1, 1, 16>}, {transform_indices = @transform_8, window_bounds = array<i64: 1, 16, 2>}, {transform_indices = @transform_9, window_bounds = array<i64: 1, 1, 2>}, {pipeline_mode = #tpu.pipeline_mode<synchronous>, transform_indices = @transform_10, window_bounds = array<i64: 4, 8, 2>}]} {
    %c0_i32 = arith.constant 0 : i32
    %0 = arith.cmpi eq, %arg0, %c0_i32 : i32
    %1 = arith.extui %0 : i1 to i32
    %c0_i32_0 = arith.constant 0 : i32
    %2 = arith.cmpi ne, %1, %c0_i32_0 : i32
    scf.if %2 {
      %c0_40 = arith.constant 0 : index
      %c0_41 = arith.constant 0 : index
      %119 = vector.load %arg1[%c0_40, %c0_41] : memref<8x40xf32, #tpu.memory_space<vmem>>, vector<8x40xf32>
      %c0_42 = arith.constant 0 : index
      %c0_43 = arith.constant 0 : index
      %120 = vector.load %arg12[%c0_42, %c0_43] : memref<8x40xf32, #tpu.memory_space<vmem>>, vector<8x40xf32>
      tpu.vector_store %arg12[%c0_42, %c0_43], %119 {strides = array<i32>} : memref<8x40xf32, #tpu.memory_space<vmem>>, vector<8x40xf32>,
    } else {
    }
    %c0 = arith.constant 0 : index
    %c0_1 = arith.constant 0 : index
    %3 = vector.load %arg12[%c0, %c0_1] : memref<8x40xf32, #tpu.memory_space<vmem>>, vector<8x40xf32>
    %c0_2 = arith.constant 0 : index
    %c0_3 = arith.constant 0 : index
    %c0_4 = arith.constant 0 : index
    %4 = vector.load %arg3[%c0_2, %c0_3, %c0_4] : memref<1x5x16xf32, #tpu.memory_space<vmem>>, vector<1x5x16xf32>
    %5 = vector.shape_cast %4 : vector<1x5x16xf32> to vector<5x16xf32>
    %6 = vector.extract_strided_slice %3 {offsets = [0, 0], sizes = [8, 36], strides = [1, 1]} : vector<8x40xf32> to vector<8x36xf32>
    %7 = vector.shape_cast %6 : vector<8x36xf32> to vector<8x36x1xf32>
    %8 = vector.extract_strided_slice %5 {offsets = [0, 0], sizes = [1, 16], strides = [1, 1]} : vector<5x16xf32> to vector<1x16xf32>
    %9 = vector.shape_cast %8 : vector<1x16xf32> to vector<16xf32>
    %10 = vector.shape_cast %9 : vector<16xf32> to vector<1x1x16xf32>
    %11 = vector.broadcast %7 : vector<8x36x1xf32> to vector<8x36x16xf32>
    %12 = vector.broadcast %10 : vector<1x1x16xf32> to vector<8x36x16xf32>
    %13 = arith.mulf %11, %12 : vector<8x36x16xf32>
    %14 = vector.extract_strided_slice %3 {offsets = [0, 1], sizes = [8, 36], strides = [1, 1]} : vector<8x40xf32> to vector<8x36xf32>
    %15 = vector.shape_cast %14 : vector<8x36xf32> to vector<8x36x1xf32>
    %16 = vector.extract_strided_slice %5 {offsets = [1, 0], sizes = [1, 16], strides = [1, 1]} : vector<5x16xf32> to vector<1x16xf32>
    %17 = vector.shape_cast %16 : vector<1x16xf32> to vector<16xf32>
    %18 = vector.shape_cast %17 : vector<16xf32> to vector<1x1x16xf32>
    %19 = vector.broadcast %15 : vector<8x36x1xf32> to vector<8x36x16xf32>
    %20 = vector.broadcast %18 : vector<1x1x16xf32> to vector<8x36x16xf32>
    %21 = arith.mulf %19, %20 : vector<8x36x16xf32>
    %22 = arith.addf %13, %21 : vector<8x36x16xf32>
    %23 = vector.extract_strided_slice %3 {offsets = [0, 2], sizes = [8, 36], strides = [1, 1]} : vector<8x40xf32> to vector<8x36xf32>
    %24 = vector.shape_cast %23 : vector<8x36xf32> to vector<8x36x1xf32>
    %25 = vector.extract_strided_slice %5 {offsets = [2, 0], sizes = [1, 16], strides = [1, 1]} : vector<5x16xf32> to vector<1x16xf32>
    %26 = vector.shape_cast %25 : vector<1x16xf32> to vector<16xf32>
    %27 = vector.shape_cast %26 : vector<16xf32> to vector<1x1x16xf32>
    %28 = vector.broadcast %24 : vector<8x36x1xf32> to vector<8x36x16xf32>
    %29 = vector.broadcast %27 : vector<1x1x16xf32> to vector<8x36x16xf32>
    %30 = arith.mulf %28, %29 : vector<8x36x16xf32>
    %31 = arith.addf %22, %30 : vector<8x36x16xf32>
    %32 = vector.extract_strided_slice %3 {offsets = [0, 3], sizes = [8, 36], strides = [1, 1]} : vector<8x40xf32> to vector<8x36xf32>
    %33 = vector.shape_cast %32 : vector<8x36xf32> to vector<8x36x1xf32>
    %34 = vector.extract_strided_slice %5 {offsets = [3, 0], sizes = [1, 16], strides = [1, 1]} : vector<5x16xf32> to vector<1x16xf32>
    %35 = vector.shape_cast %34 : vector<1x16xf32> to vector<16xf32>
    %36 = vector.shape_cast %35 : vector<16xf32> to vector<1x1x16xf32>
    %37 = vector.broadcast %33 : vector<8x36x1xf32> to vector<8x36x16xf32>
    %38 = vector.broadcast %36 : vector<1x1x16xf32> to vector<8x36x16xf32>
    %39 = arith.mulf %37, %38 : vector<8x36x16xf32>
    %40 = arith.addf %31, %39 : vector<8x36x16xf32>
    %41 = vector.extract_strided_slice %3 {offsets = [0, 4], sizes = [8, 36], strides = [1, 1]} : vector<8x40xf32> to vector<8x36xf32>
    %42 = vector.shape_cast %41 : vector<8x36xf32> to vector<8x36x1xf32>
    %43 = vector.extract_strided_slice %5 {offsets = [4, 0], sizes = [1, 16], strides = [1, 1]} : vector<5x16xf32> to vector<1x16xf32>
    %44 = vector.shape_cast %43 : vector<1x16xf32> to vector<16xf32>
    %45 = vector.shape_cast %44 : vector<16xf32> to vector<1x1x16xf32>
    %46 = vector.broadcast %42 : vector<8x36x1xf32> to vector<8x36x16xf32>
    %47 = vector.broadcast %45 : vector<1x1x16xf32> to vector<8x36x16xf32>
    %48 = arith.mulf %46, %47 : vector<8x36x16xf32>
    %49 = arith.addf %40, %48 : vector<8x36x16xf32>
    %c0_5 = arith.constant 0 : index
    %c0_6 = arith.constant 0 : index
    %c0_7 = arith.constant 0 : index
    %50 = vector.load %arg4[%c0_5, %c0_6, %c0_7] : memref<1x1x16xf32, #tpu.memory_space<vmem>>, vector<1x1x16xf32>
    %51 = vector.shape_cast %50 : vector<1x1x16xf32> to vector<1x16xf32>
    %52 = vector.shape_cast %51 : vector<1x16xf32> to vector<1x1x16xf32>
    %53 = vector.broadcast %52 : vector<1x1x16xf32> to vector<8x36x16xf32>
    %54 = arith.addf %49, %53 : vector<8x36x16xf32>
    %cst = arith.constant 0.000000e+00 : f32
    %55 = vector.broadcast %cst : f32 to vector<8x36x16xf32>
    %56 = arith.maximumf %54, %55 : vector<8x36x16xf32>
    %c0_i32_8 = arith.constant 0 : i32
    %57 = arith.cmpi eq, %arg0, %c0_i32_8 : i32
    %c16_i32 = arith.constant 16 : i32
    %c34_i32 = arith.constant 34 : i32
    %58 = arith.select %57, %c16_i32, %c34_i32 : i32
    %59 = tpu.iota {dimensions = array<i32: 1>} : vector<1x36x16xi32>
    %c1_i32 = arith.constant 1 : i32
    %60 = vector.broadcast %c1_i32 : i32 to vector<1x36x16xi32>
    %61 = arith.cmpi sge, %59, %60 : vector<1x36x16xi32>
    %62 = vector.broadcast %58 : i32 to vector<1x36x16xi32>
    %63 = arith.cmpi sle, %59, %62 : vector<1x36x16xi32>
    %64 = arith.andi %61, %63 : vector<1x36x16xi1>
    %cst_9 = arith.constant 0.000000e+00 : f32
    %65 = vector.shape_cast %64 : vector<1x36x16xi1> to vector<1x36x16xi1>
    %66 = vector.broadcast %65 : vector<1x36x16xi1> to vector<8x36x16xi1>
    %67 = vector.broadcast %cst_9 : f32 to vector<8x36x16xf32>
    %68 = arith.select %66, %56, %67 : vector<8x36x16xi1>, vector<8x36x16xf32>
    %c0_10 = arith.constant 0 : index
    %c0_11 = arith.constant 0 : index
    %c0_12 = arith.constant 0 : index
    %c0_13 = arith.constant 0 : index
    %69 = vector.load %arg5[%c0_10, %c0_11, %c0_12, %c0_13] : memref<1x3x16x16xf32, #tpu.memory_space<vmem>>, vector<1x3x16x16xf32>
    %70 = vector.shape_cast %69 : vector<1x3x16x16xf32> to vector<3x16x16xf32>
    %71 = vector.extract_strided_slice %68 {offsets = [0, 0, 0], sizes = [8, 34, 16], strides = [1, 1, 1]} : vector<8x36x16xf32> to vector<8x34x16xf32>
    %72 = vector.shape_cast %71 : vector<8x34x16xf32> to vector<272x16xf32>
    %73 = vector.extract_strided_slice %70 {offsets = [0, 0, 0], sizes = [1, 16, 16], strides = [1, 1, 1]} : vector<3x16x16xf32> to vector<1x16x16xf32>
    %74 = vector.shape_cast %73 : vector<1x16x16xf32> to vector<16x16xf32>
    %cst_14 = arith.constant dense<0.000000e+00> : vector<272x16xf32>
    %75 = tpu.matmul %72, %74, %cst_14 {dimension_numbers = #tpu.dot_dimension_numbers<[1], [0], [0], [1], [0, 0, 1, 1], [], []>} : vector<272x16xf32>, vector<16x16xf32>, vector<272x16xf32> -> vector<272x16xf32>
    %76 = vector.extract_strided_slice %68 {offsets = [0, 1, 0], sizes = [8, 34, 16], strides = [1, 1, 1]} : vector<8x36x16xf32> to vector<8x34x16xf32>
    %77 = vector.shape_cast %76 : vector<8x34x16xf32> to vector<272x16xf32>
    %78 = vector.extract_strided_slice %70 {offsets = [1, 0, 0], sizes = [1, 16, 16], strides = [1, 1, 1]} : vector<3x16x16xf32> to vector<1x16x16xf32>
    %79 = vector.shape_cast %78 : vector<1x16x16xf32> to vector<16x16xf32>
    %cst_15 = arith.constant dense<0.000000e+00> : vector<272x16xf32>
    %80 = tpu.matmul %77, %79, %cst_15 {dimension_numbers = #tpu.dot_dimension_numbers<[1], [0], [0], [1], [0, 0, 1, 1], [], []>} : vector<272x16xf32>, vector<16x16xf32>, vector<272x16xf32> -> vector<272x16xf32>
    %81 = arith.addf %75, %80 : vector<272x16xf32>
    %82 = vector.extract_strided_slice %68 {offsets = [0, 2, 0], sizes = [8, 34, 16], strides = [1, 1, 1]} : vector<8x36x16xf32> to vector<8x34x16xf32>
    %83 = vector.shape_cast %82 : vector<8x34x16xf32> to vector<272x16xf32>
    %84 = vector.extract_strided_slice %70 {offsets = [2, 0, 0], sizes = [1, 16, 16], strides = [1, 1, 1]} : vector<3x16x16xf32> to vector<1x16x16xf32>
    %85 = vector.shape_cast %84 : vector<1x16x16xf32> to vector<16x16xf32>
    %cst_16 = arith.constant dense<0.000000e+00> : vector<272x16xf32>
    %86 = tpu.matmul %83, %85, %cst_16 {dimension_numbers = #tpu.dot_dimension_numbers<[1], [0], [0], [1], [0, 0, 1, 1], [], []>} : vector<272x16xf32>, vector<16x16xf32>, vector<272x16xf32> -> vector<272x16xf32>
    %87 = arith.addf %81, %86 : vector<272x16xf32>
    %88 = vector.shape_cast %87 : vector<272x16xf32> to vector<8x34x16xf32>
    %c0_17 = arith.constant 0 : index
    %c0_18 = arith.constant 0 : index
    %c0_19 = arith.constant 0 : index
    %89 = vector.load %arg6[%c0_17, %c0_18, %c0_19] : memref<1x1x16xf32, #tpu.memory_space<vmem>>, vector<1x1x16xf32>
    %90 = vector.shape_cast %89 : vector<1x1x16xf32> to vector<1x16xf32>
    %91 = vector.shape_cast %90 : vector<1x16xf32> to vector<1x1x16xf32>
    %92 = vector.broadcast %91 : vector<1x1x16xf32> to vector<8x34x16xf32>
    %93 = arith.addf %88, %92 : vector<8x34x16xf32>
    %cst_20 = arith.constant 0.000000e+00 : f32
    %94 = vector.broadcast %cst_20 : f32 to vector<8x34x16xf32>
    %95 = arith.maximumf %93, %94 : vector<8x34x16xf32>
    %96 = vector.shape_cast %95 : vector<8x34x16xf32> to vector<8x544xf32>
    %c0_21 = arith.constant 0 : index
    %c0_22 = arith.constant 0 : index
    %c0_23 = arith.constant 0 : index
    %97 = vector.load %arg7[%c0_21, %c0_22, %c0_23] : memref<1x544x16xf32, #tpu.memory_space<vmem>>, vector<1x544x16xf32>
    %98 = vector.shape_cast %97 : vector<1x544x16xf32> to vector<544x16xf32>
    %cst_24 = arith.constant dense<0.000000e+00> : vector<8x16xf32>
    %99 = tpu.matmul %96, %98, %cst_24 {dimension_numbers = #tpu.dot_dimension_numbers<[1], [0], [0], [1], [0, 0, 1, 1], [], []>} : vector<8x544xf32>, vector<544x16xf32>, vector<8x16xf32> -> vector<8x16xf32>
    %c0_25 = arith.constant 0 : index
    %c0_26 = arith.constant 0 : index
    %c0_27 = arith.constant 0 : index
    %100 = vector.load %arg8[%c0_25, %c0_26, %c0_27] : memref<1x1x16xf32, #tpu.memory_space<vmem>>, vector<1x1x16xf32>
    %101 = vector.shape_cast %100 : vector<1x1x16xf32> to vector<1x16xf32>
    %102 = vector.broadcast %101 : vector<1x16xf32> to vector<8x16xf32>
    %103 = arith.addf %99, %102 : vector<8x16xf32>
    %cst_28 = arith.constant 0.000000e+00 : f32
    %104 = vector.broadcast %cst_28 : f32 to vector<8x16xf32>
    %105 = arith.maximumf %103, %104 : vector<8x16xf32>
    %c0_29 = arith.constant 0 : index
    %c0_30 = arith.constant 0 : index
    %c0_31 = arith.constant 0 : index
    %106 = vector.load %arg9[%c0_29, %c0_30, %c0_31] : memref<1x16x2xf32, #tpu.memory_space<vmem>>, vector<1x16x2xf32>
    %107 = vector.shape_cast %106 : vector<1x16x2xf32> to vector<16x2xf32>
    %cst_32 = arith.constant dense<0.000000e+00> : vector<8x2xf32>
    %108 = tpu.matmul %105, %107, %cst_32 {dimension_numbers = #tpu.dot_dimension_numbers<[1], [0], [0], [1], [0, 0, 1, 1], [], []>} : vector<8x16xf32>, vector<16x2xf32>, vector<8x2xf32> -> vector<8x2xf32>
    %c0_33 = arith.constant 0 : index
    %c0_34 = arith.constant 0 : index
    %c0_35 = arith.constant 0 : index
    %109 = vector.load %arg10[%c0_33, %c0_34, %c0_35] : memref<1x1x2xf32, #tpu.memory_space<vmem>>, vector<1x1x2xf32>
    %110 = vector.shape_cast %109 : vector<1x1x2xf32> to vector<1x2xf32>
    %111 = vector.broadcast %110 : vector<1x2xf32> to vector<8x2xf32>
    %112 = arith.addf %108, %111 : vector<8x2xf32>
    %113 = arith.index_cast %arg0 : i32 to index
    %c0_36 = arith.constant 0 : index
    %c0_37 = arith.constant 0 : index
    %114 = vector.load %arg11[%113, %c0_36, %c0_37] : memref<4x8x2xf32, #tpu.memory_space<vmem>>, vector<1x8x2xf32>
    %115 = vector.shape_cast %114 : vector<1x8x2xf32> to vector<8x2xf32>
    %116 = vector.shape_cast %112 : vector<8x2xf32> to vector<1x8x2xf32>
    tpu.vector_store %arg11[%113, %c0_36, %c0_37], %116 {strides = array<i32>} : memref<4x8x2xf32, #tpu.memory_space<vmem>>, vector<1x8x2xf32>,
    %c0_38 = arith.constant 0 : index
    %c19 = arith.constant 19 : index
    %117 = vector.load %arg12[%c0_38, %c19] : memref<8x40xf32, #tpu.memory_space<vmem>>, vector<8x16xf32>
    tpu.vector_store %arg12[%c0_38, %c19], %105 {strides = array<i32>} : memref<8x40xf32, #tpu.memory_space<vmem>>, vector<8x16xf32>,
    %c0_39 = arith.constant 0 : index
    %c35 = arith.constant 35 : index
    %118 = vector.load %arg12[%c0_39, %c35] : memref<8x40xf32, #tpu.memory_space<vmem>>, vector<8x2xf32>
    tpu.vector_store %arg12[%c0_39, %c35], %112 {strides = array<i32>} : memref<8x40xf32, #tpu.memory_space<vmem>>, vector<8x2xf32>,
    return
  }
  func.func @transform_0(%arg0: i32) -> (i32, i32) {
    %c0_i32 = arith.constant 0 : i32
    %c0_i32_0 = arith.constant 0 : i32
    %c0_i32_1 = arith.constant 0 : i32
    return %c0_i32, %c0_i32_0 : i32, i32
  }
  func.func @transform_1(%arg0: i32) -> (i32, i32, i32) {
    %c0_i32 = arith.constant 0 : i32
    %c0_i32_0 = arith.constant 0 : i32
    %c0_i32_1 = arith.constant 0 : i32
    return %arg0, %c0_i32, %c0_i32_0 : i32, i32, i32
  }
  func.func @transform_2(%arg0: i32) -> (i32, i32, i32) {
    %c0_i32 = arith.constant 0 : i32
    %c0_i32_0 = arith.constant 0 : i32
    %c0_i32_1 = arith.constant 0 : i32
    return %arg0, %c0_i32, %c0_i32_0 : i32, i32, i32
  }
  func.func @transform_3(%arg0: i32) -> (i32, i32, i32) {
    %c0_i32 = arith.constant 0 : i32
    %c0_i32_0 = arith.constant 0 : i32
    %c0_i32_1 = arith.constant 0 : i32
    return %arg0, %c0_i32, %c0_i32_0 : i32, i32, i32
  }
  func.func @transform_4(%arg0: i32) -> (i32, i32, i32, i32) {
    %c0_i32 = arith.constant 0 : i32
    %c0_i32_0 = arith.constant 0 : i32
    %c0_i32_1 = arith.constant 0 : i32
    %c0_i32_2 = arith.constant 0 : i32
    return %arg0, %c0_i32, %c0_i32_0, %c0_i32_1 : i32, i32, i32, i32
  }
  func.func @transform_5(%arg0: i32) -> (i32, i32, i32) {
    %c0_i32 = arith.constant 0 : i32
    %c0_i32_0 = arith.constant 0 : i32
    %c0_i32_1 = arith.constant 0 : i32
    return %arg0, %c0_i32, %c0_i32_0 : i32, i32, i32
  }
  func.func @transform_6(%arg0: i32) -> (i32, i32, i32) {
    %c0_i32 = arith.constant 0 : i32
    %c0_i32_0 = arith.constant 0 : i32
    %c0_i32_1 = arith.constant 0 : i32
    return %arg0, %c0_i32, %c0_i32_0 : i32, i32, i32
  }
  func.func @transform_7(%arg0: i32) -> (i32, i32, i32) {
    %c0_i32 = arith.constant 0 : i32
    %c0_i32_0 = arith.constant 0 : i32
    %c0_i32_1 = arith.constant 0 : i32
    return %arg0, %c0_i32, %c0_i32_0 : i32, i32, i32
  }
  func.func @transform_8(%arg0: i32) -> (i32, i32, i32) {
    %c0_i32 = arith.constant 0 : i32
    %c0_i32_0 = arith.constant 0 : i32
    %c0_i32_1 = arith.constant 0 : i32
    return %arg0, %c0_i32, %c0_i32_0 : i32, i32, i32
  }
  func.func @transform_9(%arg0: i32) -> (i32, i32, i32) {
    %c0_i32 = arith.constant 0 : i32
    %c0_i32_0 = arith.constant 0 : i32
    %c0_i32_1 = arith.constant 0 : i32
    return %arg0, %c0_i32, %c0_i32_0 : i32, i32, i32
  }
  func.func @transform_10(%arg0: i32) -> (i32, i32, i32) {
    %c0_i32 = arith.constant 0 : i32
    %c0_i32_0 = arith.constant 0 : i32
    %c0_i32_1 = arith.constant 0 : i32
    %c0_i32_2 = arith.constant 0 : i32
    return %c0_i32, %c0_i32_0, %c0_i32_1 : i32, i32, i32
  }
}

</mosaic_0001>

<bundles_post_ra>
// kernel: forecastnet_forward_pallas.1
= control target key start
LH: loop header
LB: loop body
LE: loop exit
PB: predicated region body
PF: predicated region fallthrough
CT: control target
= control target key end

     0   :  { %s6510_s12 = smov 0   ;;  %s10143_s0 = inlined_call_operand.vmem [shape: f32[8,40], index: 0, kind: input, shape index: {}]   ;;  %s10144_s1 = inlined_call_operand.vmem [shape: f32[4,8,2], index: 1, kind: input, shape index: {}]   ;;  %s10145_s2 = inlined_call_operand.vmem [shape: f32[4,5,16], index: 2, kind: input, shape index: {}]   ;;  %s10146_s3 = inlined_call_operand.vmem [shape: f32[4,1,16], index: 3, kind: input, shape index: {}]   ;;  %s10147_s4 = inlined_call_operand.vmem [shape: f32[4,3,16,16], index: 4, kind: input, shape index: {}]   ;;  %s10148_s5 = inlined_call_operand.vmem [shape: f32[4,1,16], index: 5, kind: input, shape index: {}]   ;;  %s10149_s6 = inlined_call_operand.vmem [shape: f32[4,544,16], index: 6, kind: input, shape index: {}]   ;;  %s10150_s7 = inlined_call_operand.vmem [shape: f32[4,1,16], index: 7, kind: input, shape index: {}]   ;;  %s10151_s8 = inlined_call_operand.vmem [shape: f32[4,16,2], index: 8, kind: input, shape index: {}]   ;;  %s10152_s9 = inlined_call_operand.vmem [shape: f32[4,1,2], index: 9, kind: input, shape index: {}]   ;;  %s10153_s10 = inlined_call_operand.vmem [shape: f32[4,8,2], index: 10, kind: output, shape index: {}]  }
   0x1   :  { %10315 = sst [smem:[#allocation83_spill]] %s10145_s2 }
   0x2   :  { %10316 = sst [smem:[#allocation84_spill]] %s10146_s3 }
   0x3 LB: > { %s6516_s13 = sadd.s32 4294967295, %s6443_s12   ;;  %p6034_p0 = scmp.ge.s32.totalorder %s6443_s12, 1  ;;  %s6443_s12 = sphi %s6510_s12, %s20_s12  }
   0x4   : > { %p377_p1 = scmp.lt.s32.totalorder %s6443_s12, 5 }
   0x6   : > { %p378_p2 = pnand %p6034_p0, %p377_p1 }
   0x8   : > { %381 = sbr.rel (%p378_p2) target bundleno = 3089 (0xc11), region = 60 }
   0xd   : > { %p444_p3 = scmp.lt.s32.totalorder %s6516_s13, 3  ;;  %p475_p4 = scmp.eq.s32.totalorder %s6516_s13, 0 }
   0xe   : > { %s10317_s3 = sld [smem:[#allocation84_spill]]  ;;  %p6040_p5 = scmp.ne.s32.totalorder %s6516_s13, 0 }
   0xf   : > { %s6523_s14 = scalar_select %p444_p3, %s6516_s13, 3 }
  0x10   : > { %s10318_s2 = sld [smem:[#allocation83_spill]] }
  0x11   : > { %s6035_s15 = sshll.u32 %s6523_s14, 3  ;;  %s6171_s22 = smul.u32 48, %s6523_s14 }
  0x12   : > { %s6542_s25 = scalar_lea.vmem %s10148_s5, %s6523_s14  ;;  %s6172_s26 = smul.u32 544, %s6523_s14 }
  0x13   : > { %s6548_s28 = scalar_lea.vmem %s10147_s4, %s6171_s22  ;;  %s466_s11 = scalar_lea.vmem %s10150_s7, %s6523_s14 }
  0x14   : > { %s6530_s18 = scalar_lea.vmem %s10317_s3, %s6523_s14  ;;  %s6164_s19 = sshll.u32 %s6523_s14, 4 }
  0x15   : > { %s6563_s24 = scalar_lea.vmem %s10151_s8, %s6164_s19  ;;  %s474_s22 = scalar_lea.vmem %s10152_s9, %s6523_s14 }
  0x16   : > { %s6535_s21 = scalar_lea.vmem %s10318_s2, %s6035_s15  ;;  %s6557_s15 = scalar_lea.vmem %s10149_s6, %s6172_s26 }
  0x17   : > { %478 = sbr.rel (%p6040_p5) target bundleno = 30 (0x1e), region = 64 }
  0x1c   : > { %v479_v0 = vld [vmem:[%s10143_s0] sm:$0xff]  ;;  %vm480_vm0 = vcmask 326656  }
  0x1d   : > { %481 = vst.msk [vmem:[#allocation2] sm:$0xff] %vm480_vm0, %v479_v0 }
  0x1e PF: > { %v485_v1 = vlaneseq  ;;  %v483_v36 = vld [vmem:[%s6535_s21] sm:$0x1f]  ;;  %s2141_s2 = scalar_select %p475_p4, 16, 34  ;;  %vm2364_vm1 = vcmask 1040384   ;;  %vm2365_vm2 = vcmask 1042434  }
  0x1f   : > { %v6722_v37 = vperm.slane %v483_v36, 0  ;;  %v6724_v38 = vperm.slane %v483_v36, 1  ;;  %v6728_v40 = vperm.slane %v483_v36, 2  ;;  %v6737_v46 = vperm.slane %v483_v36, 3  ;;  %v6748_v52 = vld [vmem:[%s6530_s18] ss:$0 sm:$0xff]  ;;  %vm2366_vm3 = vmor %vm2364_vm1, %vm2365_vm2 }
  0x20   : > { %v6573_v2 = vshrl.u32 %v485_v1, 7  ;;  %v6739_v48 = vperm.slane %v483_v36, 4  ;;  %v6751_v55 = vstv %s2141_s2  ;;  %vm2367_vm4 = vcmask 1044484   ;;  %s6446_s3 = smov 16   ;;  %s6448_s21 = smov 48  }
  0x21   : > { %vm2368_vm6 = vmor %vm2366_vm3, %vm2367_vm4  ;;  %vm2369_vm7 = vcmask 1046534   ;;  %vm2964_vm14 = vcmask 130048   ;;  %vm4618_vm0 = vcmask 1047556   ;;  %s6450_s26 = smov 80   ;;  %s6452_s29 = smov 112   ;;  %vm5663_vm1 = vcmask 261120  }
  0x22   : > { %10319 = vst [vmem:[#allocation3_spill] sm:$0xff] %v6573_v2  ;;  %v6576_v3 = vadd.s32 2, %v6573_v2  ;;  %v6579_v4 = vadd.s32 9, %v6573_v2  ;;  %v6582_v5 = vadd.s32 16, %v6573_v2  ;;  %v6596_v8 = vadd.s32 3, %v6573_v2  ;;  %vm6771_vm8 = vmor %vm2368_vm6, %vm2369_vm7  ;;  %s6453_s17 = smov 19  }
  0x23   : > { %v6599_v9 = vadd.s32 8, %v6573_v2  ;;  %v6602_v10 = vadd.s32 1, %v6573_v2  ;;  %v6611_v11 = vadd.s32 4, %v6573_v2  ;;  %v6614_v12 = vadd.s32 10, %v6573_v2  ;;  %s6454_s27 = smov 35  }
  0x24   : > { %10320 = vst [vmem:[#allocation4_spill] sm:$0xff] %v6576_v3  ;;  %6191 = vset.pattern.permute.xlu1 %v6576_v3  ;;  %6193 = vset.pattern.permute.xlu2 %v6579_v4  ;;  %v6587_v6 = vld [vmem:[#allocation2] sm:$0xff]  ;;  %v6623_v14 = vadd.s32 17, %v6573_v2  ;;  %v6629_v15 = vadd.s32 11, %v6573_v2  ;;  %v6638_v17 = vadd.s32 33, %v6573_v2  ;;  %v6644_v18 = vadd.s32 12, %v6573_v2 }
  0x25   : > { %6197 = vset.pattern.permute.xlu0 %v6582_v5  ;;  %v6590_v7 = vperm.slane %v6587_v6, 0  ;;  %10321 = vst [vmem:[#allocation5_spill] sm:$0xff] %v6599_v9  ;;  %v6617_v13 = vperm.slane %v6587_v6, 2  ;;  %v6632_v16 = vperm.slane %v6587_v6, 3  ;;  %v6647_v19 = vadd.s32 18, %v6573_v2 }
  0x26   : > { %10322 = vst [vmem:[#allocation6_spill] sm:$0xff] %v6611_v11  ;;  %v6653_v20 = vadd.s32 28, %v6573_v2  ;;  %v6659_v21 = vadd.s32 19, %v6573_v2  ;;  %v6662_v22 = vadd.s32 25, %v6573_v2  ;;  %v6671_v23 = vadd.s32 20, %v6573_v2 }
  0x27   : > { %10323 = vst [vmem:[#allocation7_spill] sm:$0xff] %v6623_v14  ;;  %v6674_v24 = vadd.s32 26, %v6573_v2  ;;  %v6677_v25 = vperm.slane %v6587_v6, 4  ;;  %v6683_v26 = vadd.s32 24, %v6573_v2  ;;  %v6689_v27 = vadd.s32 27, %v6573_v2 }
  0x28   : > { %10324 = vst [vmem:[#allocation8_spill] sm:$0xff] %v6629_v15  ;;  %v6695_v28 = vperm.slane %v6587_v6, 1  ;;  %v6701_v30 = vadd.s32 32, %v6573_v2  ;;  %v6714_v33 = vadd.s32 34, %v6573_v2  ;;  %v6735_v45 = vadd.s32 35, %v6573_v2 }
  0x29   : > { %10325 = vst [vmem:[#allocation9_spill] sm:$0xff] %v6638_v17  ;;  %vm6756_vm5 = vcmp.le.s32.totalorder %v6599_v9, %v6751_v55  ;;  %vm6815_vm9 = vcmp.le.s32.totalorder %v6582_v5, %v6751_v55  ;;  %vm6889_vm10 = vcmp.le.s32.totalorder %v6683_v26, %v6751_v55  ;;  %vm2148_vm11 = vcmp.ge.s32.totalorder %v6573_v2, 1 }
  0x2a   : > { %10326 = vst [vmem:[#allocation10_spill] sm:$0xff] %v6644_v18  ;;  %vm2154_vm12 = vcmp.le.s32.totalorder %v6573_v2, %v6751_v55  ;;  %vm7173_vm15 = vcmp.le.s32.totalorder %v6701_v30, %v6751_v55  ;;  %vm5665_vm2 = vcmask 392192   ;;  %vm5667_vm3 = vcmask 523264  }
  0x2b   : > { %10327 = vst [vmem:[#allocation11_spill] sm:$0xff] %v6659_v21  ;;  %vm6914_vm13 = vmand %vm2148_vm11, %vm2154_vm12  ;;  %vm5669_vm4 = vcmask 654336   ;;  %vm5673_vm6 = vcmask 916480   ;;  %vm5909_vm7 = vcmask 285848  }
  0x2c   : > { %783 = vperm.xlu2 %6193, %v6590_v7   ;;  %1098 = vperm.xlu1 %6191, %v6590_v7   ;;  %10328 = vst [vmem:[#allocation12_spill] sm:$0xff] %v6677_v25 }
  0x2d   : > { %501 = vperm.xlu0 %6197, %v6590_v7  }
  0x34   : > { %6194 = vset.pattern.permute.xlu2 %v6596_v8  ;;  %6192 = vset.pattern.permute.xlu1 %v6599_v9 }
  0x35   : > { %6198 = vset.pattern.permute.xlu0 %v6602_v10 }
  0x3c   : > { %1419 = vperm.xlu2 %6194, %v6590_v7   ;;  %495 = vperm.xlu1 %6192, %v6590_v7  }
  0x3d   : > { %777 = vperm.xlu0 %6198, %v6590_v7  }
  0x44   : > { %6196 = vset.pattern.permute.xlu2 %v6611_v11  ;;  %6195 = vset.pattern.permute.xlu1 %v6614_v12 }
  0x45   : > { %837 = vperm.xlu0 %6198, %v6617_v13  }
  0x4c   : > { %1740 = vperm.xlu2 %6196, %v6590_v7   ;;  %1104 = vperm.xlu1 %6195, %v6590_v7  }
  0x4d   : > { %6259 = vset.pattern.permute.xlu0 %v6623_v14 }
  0x54   : > { %6200 = vset.pattern.permute.xlu2 %v6629_v15  ;;  %6199 = vset.pattern.permute.xlu1 %v6623_v14 }
  0x55   : > { %879 = vperm.xlu0 %6259, %v6632_v16  }
  0x5c   : > { %1425 = vperm.xlu2 %6200, %v6590_v7   ;;  %789 = vperm.xlu1 %6199, %v6590_v7  }
  0x5d   : > { %6268 = vset.pattern.permute.xlu0 %v6638_v17 }
  0x64   : > { %6202 = vset.pattern.permute.xlu2 %v6644_v18  ;;  %6201 = vset.pattern.permute.xlu1 %v6647_v19 }
  0x65   : > { %891 = vperm.xlu0 %6268, %v6632_v16  }
  0x6c   : > { %1746 = vperm.xlu2 %6202, %v6590_v7   ;;  %1110 = vperm.xlu1 %6201, %v6590_v7  }
  0x6d   : > { %6273 = vset.pattern.permute.xlu0 %v6653_v20 }
  0x74   : > { %6204 = vset.pattern.permute.xlu2 %v6659_v21  ;;  %6203 = vset.pattern.permute.xlu1 %v6662_v22 }
  0x75   : > { %1848 = vperm.xlu0 %6273, %v6632_v16  }
  0x7c   : > { %1431 = vperm.xlu2 %6204, %v6590_v7   ;;  %795 = vperm.xlu1 %6203, %v6590_v7  }
  0x7d   : > { %6282 = vset.pattern.permute.xlu0 %v6596_v8 }
  0x84   : > { %6206 = vset.pattern.permute.xlu2 %v6671_v23  ;;  %6205 = vset.pattern.permute.xlu1 %v6674_v24 }
  0x85   : > { %1539 = vperm.xlu0 %6282, %v6677_v25  }
  0x86   : > { %v784_v29 = vpop.permute.xlu2 %783 }
  0x87   : > { %v1015_v43 = vmul.f32 %v6724_v38, %v784_v29 }
  0x8c   : > { %1752 = vperm.xlu2 %6206, %v6590_v7   ;;  %1116 = vperm.xlu1 %6205, %v6590_v7  }
  0x8d   : > { %6283 = vset.pattern.permute.xlu0 %v6683_v26 }
  0x94   : > { %6208 = vset.pattern.permute.xlu2 %v6689_v27  ;;  %6207 = vset.pattern.permute.xlu1 %v6602_v10 }
  0x95   : > { %507 = vperm.xlu0 %6283, %v6590_v7  }
  0x96   : > { %v6706_v31 = vpop.permute.xlu2 %1419 }
  0x9c   : > { %1437 = vperm.xlu2 %6208, %v6590_v7   ;;  %807 = vperm.xlu1 %6207, %v6695_v28  }
  0x9d   : > { %631 = vperm.xlu0 %6283, %v6677_v25  }
  0x9e   : > { %v6711_v32 = vpop.permute.xlu1 %1098 }
  0x9f   : > { %v502_v60 = vpop.permute.xlu0 %501 }
  0xa4   : > { %6210 = vset.pattern.permute.xlu2 %v6638_v17  ;;  %6209 = vset.pattern.permute.xlu1 %v6701_v30 }
  0xa5   : > { %6292 = vset.pattern.permute.xlu0 %v6701_v30 }
  0xa6   : > { %v6716_v34 = vpop.permute.xlu2 %1740 }
  0xac   : > { %801 = vperm.xlu2 %6210, %v6590_v7   ;;  %513 = vperm.xlu1 %6209, %v6590_v7  }
  0xad   : > { %637 = vperm.xlu0 %6292, %v6677_v25  }
  0xae   : > { %v496_v35 = vpop.permute.xlu1 %495 }
  0xaf   : > { %v734_v41 = vmul.f32 %v6722_v37, %v496_v35  ;;  %v6776_v35 = vperm.slane %v6587_v6, 5 }
  0xb1   : > { %v1055_v47 = vadd.f32 %v1015_v43, %v734_v41  ;;  %10334 = vst [vmem:[#allocation14_spill] sm:$0xff] %v6776_v35 }
  0xb4   : > { %6212 = vset.pattern.permute.xlu2 %v6714_v33  ;;  %6211 = vset.pattern.permute.xlu1 %v6653_v20 }
  0xb5   : > { %6293 = vset.pattern.permute.xlu0 %v6573_v2 }
  0xb6   : > { %v1426_v39 = vpop.permute.xlu2 %1425 }
  0xb7   : > { %v1657_v49 = vmul.f32 %v6737_v46, %v1426_v39 }
  0xbc   : > { %1122 = vperm.xlu2 %6212, %v6590_v7   ;;  %1758 = vperm.xlu1 %6211, %v6590_v7  }
  0xbd   : > { %489 = vperm.xlu0 %6293, %v6590_v7  }
  0xbe   : > { %v1105_v42 = vpop.permute.xlu1 %1104 }
  0xbf   : > { %v1336_v44 = vmul.f32 %v6728_v40, %v1105_v42 }
  0xc1   : > { %v1376_v50 = vadd.f32 %v1336_v44, %v1055_v47 }
  0xc3   : > { %v1697_v53 = vadd.f32 %v1657_v49, %v1376_v50 }
  0xc4   : > { %6214 = vset.pattern.permute.xlu2 %v6735_v45  ;;  %6213 = vset.pattern.permute.xlu1 %v6596_v8 }
  0xc5   : > { %520 = vperm.xlu0 %6293, %v6695_v28  }
  0xc6   : > { %v1747_v51 = vpop.permute.xlu2 %1746 }
  0xc7   : > { %v1978_v54 = vmul.f32 %v6739_v48, %v1747_v51 }
  0xc9   : > { %v2018_v56 = vadd.f32 %v1978_v54, %v1697_v53  ;;  %v6795_v53 = vpop.permute.xlu0 %777 }
  0xcb   : > { %v2062_v57 = vadd.f32 %v6748_v52, %v2018_v56  ;;  %v735_v56 = vmul.f32 %v6722_v37, %v502_v60 }
  0xcc   : > { %1443 = vperm.xlu2 %6214, %v6590_v7   ;;  %1449 = vperm.xlu1 %6213, %v6695_v28  }
  0xcd   : > { %v2102_v59 = vmax.f32 %v2062_v57, 0.0  ;;  %582 = vperm.xlu0 %6293, %v6632_v16  }
  0xce   : > { %v790_v51 = vpop.permute.xlu1 %789 }
  0xcf   : > { %v6765_v61 = vsel %vm6756_vm5, %v2102_v59, 0.0  ;;  %v1016_v57 = vmul.f32 %v6724_v38, %v790_v51 }
  0xd0   : > { %10331 = vst [vmem:[#allocation13_spill] sm:$0xff] %v6765_v61  ;;  %v10156_v62 = vrot.slane %v6765_v61, 2  ;;  %v10155_v63 = vrot.slane %v6765_v61, 4  ;;  %v10154_v0 = vrot.slane %v6765_v61, 6  ;;  %v10158_v1 = vrot.slane %v6765_v61, 7 }
  0xd2   : > { %v2384_v36 = vrot.slane %v10158_v1, 2  ;;  %v2385_v39 = vrot.slane %v10156_v62, 7  ;;  %v2388_v41 = vrot.slane %v10155_v63, 7  ;;  %v2391_v47 = vrot.slane %v10154_v0, 7 }
  0xd4   : > { %v2386_v42 = vsel %vm6771_vm8, %v2384_v36, %v2385_v39  ;;  %v2387_v43 = vrot.slane %v2385_v39, 2  ;;  %v2390_v44 = vrot.slane %v2388_v41, 2  ;;  %6216 = vset.pattern.permute.xlu2 %v6582_v5  ;;  %6215 = vset.pattern.permute.xlu1 %v6599_v9  ;;  %v1056_v39 = vadd.f32 %v1016_v57, %v735_v56 }
  0xd5   : > { %2795 = vst [vmem:[#allocation1 + $0x20] ss:$4 sm:$0xff] %v2386_v42  ;;  %644 = vperm.xlu0 %6293, %v6776_v35  }
  0xd6   : > { %v2389_v49 = vsel %vm6771_vm8, %v2387_v43, %v2388_v41  ;;  %v2392_v50 = vsel %vm6771_vm8, %v2390_v44, %v2391_v47  ;;  %v1432_v54 = vpop.permute.xlu2 %1431  ;;  %v6803_v41 = vpop.permute.xlu0 %837 }
  0xd7   : > { %2797 = vst [vmem:[#allocation1 + $0x21] ss:$4 sm:$0xff] %v2389_v49  ;;  %v1658_v42 = vmul.f32 %v6737_v46, %v1432_v54 }
  0xd8   : > { %2799 = vst [vmem:[#allocation1 + $0x22] ss:$4 sm:$0xff] %v2392_v50 }
  0xdc   : > { %532 = vperm.xlu2 %6216, %v6695_v28   ;;  %526 = vperm.xlu1 %6215, %v6695_v28  }
  0xdd   : > { %6298 = vset.pattern.permute.xlu0 %v6576_v3 }
  0xde   : > { %v1111_v59 = vpop.permute.xlu1 %1110  ;;  %v6810_v51 = vpop.permute.xlu0 %879 }
  0xdf   : > { %v1337_v36 = vmul.f32 %v6728_v40, %v1111_v59  ;;  %10335 = vst [vmem:[#allocation15_spill] sm:$0xff] %v6810_v51 }
  0xe1   : > { %v1377_v43 = vadd.f32 %v1337_v36, %v1056_v39  ;;  %v2393_v36 = vrot.slane %v2391_v47, 2 }
  0xe3   : > { %v1698_v44 = vadd.f32 %v1658_v42, %v1377_v43 }
  0xe4   : > { %6218 = vset.pattern.permute.xlu2 %v6623_v14  ;;  %6217 = vset.pattern.permute.xlu1 %v6579_v4 }
  0xe5   : > { %1128 = vperm.xlu0 %6298, %v6695_v28  }
  0xe6   : > { %v1753_v60 = vpop.permute.xlu2 %1752  ;;  %v6833_v43 = vpop.permute.xlu0 %891 }
  0xe7   : > { %v1979_v49 = vmul.f32 %v6739_v48, %v1753_v60  ;;  %10339 = vst [vmem:[#allocation17_spill] sm:$0xff] %v6833_v43  ;;  %v1335_v43 = vmul.f32 %v6728_v40, %v6711_v32  ;;  %v1977_v32 = vmul.f32 %v6739_v48, %v6716_v34 }
  0xe9   : > { %v2019_v50 = vadd.f32 %v1979_v49, %v1698_v44 }
  0xeb   : > { %v2063_v56 = vadd.f32 %v6748_v52, %v2019_v50 }
  0xec   : > { %819 = vperm.xlu2 %6218, %v6695_v28   ;;  %813 = vperm.xlu1 %6217, %v6695_v28  }
  0xed   : > { %v2103_v57 = vmax.f32 %v2063_v56, 0.0  ;;  %1188 = vperm.xlu0 %6298, %v6632_v16  }
  0xee   : > { %v6839_v47 = vpop.permute.xlu0 %1848  ;;  %v796_v44 = vpop.permute.xlu1 %795 }
  0xef   : > { %v6824_v59 = vsel %vm6815_vm9, %v2103_v57, 0.0  ;;  %10340 = vst [vmem:[#allocation18_spill] sm:$0xff] %v6839_v47 }
  0xf0   : > { %10338 = vst [vmem:[#allocation16_spill] sm:$0xff] %v6824_v59  ;;  %v10157_v39 = vrot.slane %v6824_v59, 7 }
  0xf2   : > { %v2395_v42 = vsel %vm6771_vm8, %v2393_v36, %v10157_v39 }
  0xf3   : > { %2801 = vst [vmem:[#allocation1 + $0x23] ss:$4 sm:$0xff] %v2395_v42  ;;  %v1017_v42 = vmul.f32 %v6724_v38, %v796_v44  ;;  %v1014_v44 = vmul.f32 %v6724_v38, %v6795_v53 }
  0xf4   : > { %6220 = vset.pattern.permute.xlu2 %v6647_v19  ;;  %6219 = vset.pattern.permute.xlu1 %v6614_v12 }
  0xf5   : > { %1248 = vperm.xlu0 %6298, %v6776_v35  }
  0xf6   : > { %v1438_v39 = vpop.permute.xlu2 %1437 }
  0xf7   : > { %v6844_v60 = vpop.permute.xlu0 %1539 }
  0xf8   : > { %10341 = vst [vmem:[#allocation19_spill] sm:$0xff] %v6844_v60 }
  0xfc   : > { %1140 = vperm.xlu2 %6220, %v6695_v28   ;;  %1134 = vperm.xlu1 %6219, %v6695_v28  }
  0xfd   : > { %6303 = vset.pattern.permute.xlu0 %v6611_v11  ;;  %v10173_v11 = vrot.slane %v6824_v59, 2 }
  0xfe   : > { %v1117_v50 = vpop.permute.xlu1 %1116 }
  0xff   : > { %v1338_v1 = vmul.f32 %v6728_v40, %v1117_v50  ;;  %v2216_v50 = vld [vmem:[%s6548_s28 + $0x10] sm:$0xff] }
 0x104   : > { %6222 = vset.pattern.permute.xlu2 %v6659_v21  ;;  %6221 = vset.pattern.permute.xlu1 %v6629_v15 }
 0x105   : > { %1770 = vperm.xlu0 %6303, %v6695_v28  }
 0x107   : > { %v508_v49 = vpop.permute.xlu0 %507 }
 0x108   : > { %v736_v36 = vmul.f32 %v6722_v37, %v508_v49  ;;  %v1659_v49 = vmul.f32 %v6737_v46, %v1438_v39  ;;  %v6879_v39 = vperm.slane %v6587_v6, 6 }
 0x10a   : > { %v1057_v62 = vadd.f32 %v1017_v42, %v736_v36  ;;  %v2217_v42 = vld [vmem:[%s6548_s28 + $0x18] sm:$0xff]  ;;  %10344 = vst [vmem:[#allocation22_spill] sm:$0xff] %v6879_v39 }
 0x10b   : > { %3047 = vmatpush.msra.mxu0 %v2217_v42  ;;  %6165 = vmatpush.msra.mxu3 %v2217_v42 }
 0x10c   : > { %1461 = vperm.xlu2 %6222, %v6695_v28   ;;  %1455 = vperm.xlu1 %6221, %v6695_v28  }
 0x10d   : > { %1800 = vperm.xlu0 %6303, %v6617_v13   ;;  %3048 = vmatpush.msra.mxu0 %v2216_v50 }
 0x10e   : > { %v6857_v57 = vpop.permute.xlu1 %807  ;;  %6166 = vmatpush.msra.mxu3 %v2216_v50 }
 0x10f   : > { %v6852_v56 = vpop.permute.xlu0 %631 }
 0x110   : > { %10342 = vst [vmem:[#allocation20_spill] sm:$0xff] %v6852_v56  ;;  %v1378_v56 = vadd.f32 %v1338_v1, %v1057_v62 }
 0x112   : > { %v1699_v60 = vadd.f32 %v1659_v49, %v1378_v56 }
 0x114   : > { %6224 = vset.pattern.permute.xlu2 %v6683_v26  ;;  %6223 = vset.pattern.permute.xlu1 %v6671_v23 }
 0x115   : > { %1890 = vperm.xlu0 %6303, %v6776_v35  }
 0x11c   : > { %538 = vperm.xlu2 %6224, %v6695_v28   ;;  %1782 = vperm.xlu1 %6223, %v6695_v28  }
 0x11d   : > { %6316 = vset.pattern.permute.xlu0 %v6671_v23 }
 0x11e   : > { %v6866_v63 = vpop.permute.xlu1 %513 }
 0x11f   : > { %v6864_v0 = vpop.permute.xlu0 %637 }
 0x120   : > { %10343 = vst [vmem:[#allocation21_spill] sm:$0xff] %v6864_v0 }
 0x124   : > { %6226 = vset.pattern.permute.xlu2 %v6662_v22  ;;  %6225 = vset.pattern.permute.xlu1 %v6573_v2 }
 0x125   : > { %1902 = vperm.xlu0 %6316, %v6776_v35  }
 0x12c   : > { %825 = vperm.xlu2 %6226, %v6695_v28   ;;  %551 = vperm.xlu1 %6225, %v6617_v13  }
 0x12d   : > { %6321 = vset.pattern.permute.xlu0 %v6579_v4 }
 0x12e   : > { %v1759_v0 = vpop.permute.xlu1 %1758 }
 0x12f   : > { %v490_v47 = vpop.permute.xlu0 %489  ;;  %v1980_v36 = vmul.f32 %v6739_v48, %v1759_v0  ;;  %v1656_v0 = vmul.f32 %v6737_v46, %v6706_v31 }
 0x130   : > { %v733_v62 = vmul.f32 %v6722_v37, %v490_v47 }
 0x131   : > { %v2020_v1 = vadd.f32 %v1980_v36, %v1699_v60 }
 0x132   : > { %v1054_v51 = vadd.f32 %v1014_v44, %v733_v62 }
 0x133   : > { %v2064_v53 = vadd.f32 %v6748_v52, %v2020_v1 }
 0x134   : > { %v1375_v56 = vadd.f32 %v1335_v43, %v1054_v51  ;;  %6228 = vset.pattern.permute.xlu2 %v6638_v17  ;;  %6227 = vset.pattern.permute.xlu1 %v6701_v30 }
 0x135   : > { %v2104_v6 = vmax.f32 %v2064_v53, 0.0  ;;  %963 = vperm.xlu0 %6321, %v6879_v39  }
 0x136   : > { %v1696_v60 = vadd.f32 %v1656_v0, %v1375_v56 }
 0x137   : > { %v6903_v31 = vsel %vm6889_vm10, %v2104_v6, 0.0 }
 0x138   : > { %10347 = vst [vmem:[#allocation23_spill] sm:$0xff] %v6903_v31  ;;  %v2017_v51 = vadd.f32 %v1977_v32, %v1696_v60  ;;  %v10161_v43 = vrot.slane %v6903_v31, 2  ;;  %v10160_v49 = vrot.slane %v6903_v31, 4  ;;  %v10159_v44 = vrot.slane %v6903_v31, 6 }
 0x139   : > { %v10162_v36 = vrot.slane %v6903_v31, 7  ;;  %v2803_v32 = vld.sshfl [vmem:[#allocation1 + $0x20] sm:$0xff pattern:$0x73625140] }
 0x13a   : > { %v2061_v34 = vadd.f32 %v6748_v52, %v2017_v51  ;;  %v2409_v42 = vrot.slane %v10161_v43, 7  ;;  %v2412_v62 = vrot.slane %v10160_v49, 7  ;;  %v6922_v6 = vrot.slane %v10159_v44, 7 }
 0x13b   : > { %v2408_v50 = vrot.slane %v10162_v36, 2 }
 0x13c   : > { %v2101_v53 = vmax.f32 %v2061_v34, 0.0  ;;  %v2411_v0 = vrot.slane %v2409_v42, 2  ;;  %v2414_v56 = vrot.slane %v2412_v62, 2  ;;  %831 = vperm.xlu2 %6228, %v6695_v28   ;;  %544 = vperm.xlu1 %6227, %v6695_v28   ;;  %v2417_v55 = vrot.slane %v6922_v6, 2 }
 0x13d   : > { %v2410_v60 = vsel %vm6771_vm8, %v2408_v50, %v2409_v42  ;;  %6322 = vset.pattern.permute.xlu0 %v6714_v33  ;;  %v6941_v50 = vpop.permute.xlu0 %520 }
 0x13e   : > { %v6931_v51 = vsel %vm6914_vm13, %v2101_v53, 0.0  ;;  %v2413_v34 = vsel %vm6771_vm8, %v2411_v0, %v2412_v62  ;;  %v2416_v44 = vsel %vm6771_vm8, %v2414_v56, %v6922_v6  ;;  %2808 = vst [vmem:[#allocation1 + $0x20] ss:$4 sm:$0xff] %v2410_v60 }
 0x13f   : > { %10350 = vst [vmem:[#allocation24_spill] sm:$0xff] %v6931_v51  ;;  %v10169_v49 = vrot.slane %v6931_v51, 2  ;;  %v10167_v43 = vrot.slane %v6931_v51, 4  ;;  %v10168_v42 = vrot.slane %v6931_v51, 6  ;;  %v6041_v53 = vrot.slane %v6931_v51, 9 }
 0x140   : > { %2809 = vst [vmem:[#allocation1 + $0x21] ss:$4 sm:$0xff] %v2413_v34 }
 0x141   : > { %2810 = vst [vmem:[#allocation1 + $0x22] ss:$4 sm:$0xff] %v2416_v44  ;;  %v2373_v62 = vrot.slane %v10169_v49, 7  ;;  %v2376_v0 = vrot.slane %v10167_v43, 7  ;;  %v2379_v56 = vrot.slane %v10168_v42, 7  ;;  %v10172_v49 = vrot.slane %v6824_v59, 6 }
 0x142   : > { %v2397_v44 = vrot.slane %v10173_v11, 7 }
 0x143   : > { %v2374_v60 = vsel %vm6771_vm8, %v6041_v53, %v2373_v62  ;;  %v2375_v36 = vrot.slane %v2373_v62, 2  ;;  %v2378_v25 = vrot.slane %v2376_v0, 2  ;;  %v2381_v34 = vrot.slane %v2379_v56, 2 }
 0x144   : > { %2787 = vst [vmem:[#allocation1] ss:$4 sm:$0xff] %v2374_v60  ;;  %6230 = vset.pattern.permute.xlu2 %v6576_v3  ;;  %6229 = vset.pattern.permute.xlu1 %v6674_v24  ;;  %v10351_v53 = vrot.slane %v6765_v61, 7  ;;  %v2399_v61 = vrot.slane %v2397_v44, 2 }
 0x145   : > { %v2377_v43 = vsel %vm6771_vm8, %v2375_v36, %v2376_v0  ;;  %v2380_v42 = vsel %vm6771_vm8, %v2378_v25, %v2379_v56  ;;  %1152 = vperm.xlu0 %6322, %v6695_v28   ;;  %v6965_v60 = vpop.permute.xlu0 %582  ;;  %v10353_v36 = vrot.slane %v6824_v59, 4  ;;  %v10354_v0 = vrot.slane %v6824_v59, 7 }
 0x146   : > { %v2383_v62 = vsel %vm6771_vm8, %v2381_v34, %v10351_v53  ;;  %2789 = vst [vmem:[#allocation1 + $0x1] ss:$4 sm:$0xff] %v2377_v43  ;;  %v2403_v34 = vrot.slane %v10172_v49, 7  ;;  %v10356_v59 = vrot.slane %v6903_v31, 7 }
 0x147   : > { %2791 = vst [vmem:[#allocation1 + $0x2] ss:$4 sm:$0xff] %v2380_v42  ;;  %v2400_v25 = vrot.slane %v10353_v36, 7  ;;  %v2396_v56 = vrot.slane %v10354_v0, 2  ;;  %v6983_v0 = vpop.permute.xlu2 %801 }
 0x148   : > { %10352 = vst [vmem:[#allocation25_spill] sm:$0xff] %v6965_v60  ;;  %v2405_v36 = vrot.slane %v2403_v34, 2 }
 0x149   : > { %2793 = vst [vmem:[#allocation1 + $0x3] ss:$4 sm:$0xff] %v2383_v62  ;;  %v2402_v43 = vrot.slane %v2400_v25, 2  ;;  %v2398_v42 = vsel %vm6771_vm8, %v2396_v56, %v2397_v44  ;;  %v2401_v62 = vsel %vm6771_vm8, %v2399_v61, %v2400_v25 }
 0x14a   : > { %v2407_v44 = vsel %vm6771_vm8, %v2405_v36, %v10356_v59  ;;  %v1450_v36 = vpop.permute.xlu1 %1449 }
 0x14b   : > { %v2404_v49 = vsel %vm6771_vm8, %v2402_v43, %v2403_v34  ;;  %v738_v43 = vmul.f32 %v6722_v37, %v6941_v50 }
 0x14c   : > { %1158 = vperm.xlu2 %6230, %v6617_v13   ;;  %1146 = vperm.xlu1 %6229, %v6695_v28  }
 0x14d   : > { %1272 = vperm.xlu0 %6322, %v6776_v35   ;;  %v6988_v11 = vpop.permute.xlu0 %644 }
 0x14e   : > { %10355 = vst [vmem:[#allocation26_spill] sm:$0xff] %v6988_v11 }
 0x14f   : > { %v6998_v61 = vpop.permute.xlu2 %1122 }
 0x150   : > { %v2802_v53 = vld.sshfl [vmem:[#allocation1] sm:$0xff pattern:$0x73625140] }
 0x151   : > { %2804 = vst [vmem:[#allocation1] ss:$4 sm:$0xff] %v2398_v42  ;;  %6057 = vmatmul.msk.f32.vlgmr.msra.gmra.mxu0 %vm2964_vm14, %v2802_v53  ;;  %v1019_v42 = vmul.f32 %v6724_v38, %v6857_v57  ;;  %v7031_v57 = vadd.s32 36, %v6573_v2 }
 0x152   : > { %2805 = vst [vmem:[#allocation1 + $0x1] ss:$4 sm:$0xff] %v2401_v62 }
 0x153   : > { %2806 = vst [vmem:[#allocation1 + $0x2] ss:$4 sm:$0xff] %v2404_v49  ;;  %v1059_v62 = vadd.f32 %v1019_v42, %v738_v43 }
 0x154   : > { %2807 = vst [vmem:[#allocation1 + $0x3] ss:$4 sm:$0xff] %v2407_v44  ;;  %6232 = vset.pattern.permute.xlu2 %v6596_v8  ;;  %6231 = vset.pattern.permute.xlu1 %v6689_v27 }
 0x155   : > { %6327 = vset.pattern.permute.xlu0 %v6644_v18 }
 0x157   : > { %v1129_v25 = vpop.permute.xlu0 %1128  ;;  %v7006_v56 = vpop.permute.xlu2 %1443 }
 0x158   : > { %v1340_v53 = vmul.f32 %v6728_v40, %v1129_v25 }
 0x159   : > { %6058 = vmatmul.msk.f32.gmra.mxu0 %vm2964_vm14, %v2803_v32 }
 0x15a   : > { %v1380_v44 = vadd.f32 %v1340_v53, %v1059_v62 }
 0x15b   : > { %v2812_v49 = vld.sshfl [vmem:[#allocation1] sm:$0xff pattern:$0x73625140] }
 0x15c   : > { %1479 = vperm.xlu2 %6232, %v6617_v13   ;;  %1467 = vperm.xlu1 %6231, %v6695_v28  }
 0x15d   : > { %1776 = vperm.xlu0 %6327, %v6695_v28  }
 0x15f   : > { %v7004_v59 = vpop.permute.xlu0 %1188  ;;  %v7011_v32 = vpop.permute.xlu2 %532 }
 0x160   : > { %10357 = vst [vmem:[#allocation27_spill] sm:$0xff] %v7004_v59 }
 0x161   : > { %6059 = vmatmul.msk.f32.gmra.mxu0 %vm2964_vm14, %v2812_v49  ;;  %v1661_v49 = vmul.f32 %v6737_v46, %v1450_v36 }
 0x163   : > { %v1701_v50 = vadd.f32 %v1661_v49, %v1380_v44 }
 0x164   : > { %6234 = vset.pattern.permute.xlu2 %v6653_v20  ;;  %6233 = vset.pattern.permute.xlu1 %v6735_v45 }
 0x165   : > { %1806 = vperm.xlu0 %6327, %v6617_v13  }
 0x167   : > { %v7016_v34 = vpop.permute.xlu0 %1248  ;;  %v7027_v31 = vpop.permute.xlu2 %819 }
 0x168   : > { %10358 = vst [vmem:[#allocation28_spill] sm:$0xff] %v7016_v34 }
 0x16c   : > { %1788 = vperm.xlu2 %6234, %v6695_v28   ;;  %1473 = vperm.xlu1 %6233, %v6695_v28  }
 0x16d   : > { %1836 = vperm.xlu0 %6327, %v6632_v16  }
 0x16f   : > { %v7037_v53 = vpop.permute.xlu2 %1140 }
 0x174   : > { %6236 = vset.pattern.permute.xlu2 %v6582_v5  ;;  %6235 = vset.pattern.permute.xlu1 %v6599_v9 }
 0x175   : > { %1926 = vperm.xlu0 %6327, %v6879_v39   ;;  %v7060_v39 = vpop.permute.xlu1 %526 }
 0x177   : > { %v1771_v51 = vpop.permute.xlu0 %1770  ;;  %v7067_v18 = vpop.permute.xlu2 %1461 }
 0x178   : > { %v1982_v34 = vmul.f32 %v6739_v48, %v1771_v51 }
 0x17a   : > { %v2022_v25 = vadd.f32 %v1982_v34, %v1701_v50 }
 0x17c   : > { %v2066_v43 = vadd.f32 %v6748_v52, %v2022_v25  ;;  %563 = vperm.xlu2 %6236, %v6617_v13   ;;  %557 = vperm.xlu1 %6235, %v6617_v13  }
 0x17d   : > { %6332 = vset.pattern.permute.xlu0 %v7031_v57 }
 0x17e   : > { %v2106_v42 = vmax.f32 %v2066_v43, 0.0 }
 0x180   : > { %v7041_v62 = vsel %vm6914_vm13, %v2106_v42, 0.0 }
 0x181   : > { %10359 = vst [vmem:[#allocation29_spill] sm:$0xff] %v7041_v62  ;;  %v10183_v51 = vrot.slane %v7041_v62, 2  ;;  %v10182_v36 = vrot.slane %v7041_v62, 4  ;;  %v10186_v34 = vrot.slane %v7041_v62, 6  ;;  %v6043_v44 = vrot.slane %v7041_v62, 9 }
 0x183   : > { %v2425_v49 = vrot.slane %v10183_v51, 7  ;;  %v2428_v50 = vrot.slane %v10182_v36, 7  ;;  %v7057_v11 = vrot.slane %v10186_v34, 7 }
 0x184   : > { %6238 = vset.pattern.permute.xlu2 %v6623_v14  ;;  %6237 = vset.pattern.permute.xlu1 %v6579_v4 }
 0x185   : > { %v2426_v25 = vsel %vm6771_vm8, %v6043_v44, %v2425_v49  ;;  %v2427_v43 = vrot.slane %v2425_v49, 2  ;;  %v2430_v42 = vrot.slane %v2428_v50, 2  ;;  %1764 = vperm.xlu0 %6332, %v6590_v7   ;;  %v814_v7 = vpop.permute.xlu1 %813  ;;  %v7072_v44 = vpop.permute.xlu2 %538 }
 0x186   : > { %2815 = vst [vmem:[#allocation1 + $0x1] ss:$4 sm:$0xff] %v2426_v25 }
 0x187   : > { %v2429_v36 = vsel %vm6771_vm8, %v2427_v43, %v2428_v50  ;;  %v2432_v51 = vsel %vm6771_vm8, %v2430_v42, %v7057_v11  ;;  %v1801_v50 = vpop.permute.xlu0 %1800 }
 0x188   : > { %2816 = vst [vmem:[#allocation1 + $0x2] ss:$4 sm:$0xff] %v2429_v36 }
 0x189   : > { %2817 = vst [vmem:[#allocation1 + $0x3] ss:$4 sm:$0xff] %v2432_v51 }
 0x18c   : > { %849 = vperm.xlu2 %6238, %v6617_v13   ;;  %843 = vperm.xlu1 %6237, %v6617_v13  }
 0x18d   : > { %1794 = vperm.xlu0 %6332, %v6695_v28   ;;  %v1135_v49 = vpop.permute.xlu1 %1134  ;;  %v7077_v25 = vpop.permute.xlu2 %825 }
 0x18f   : > { %v7082_v51 = vpop.permute.xlu0 %1890 }
 0x190   : > { %10360 = vst [vmem:[#allocation30_spill] sm:$0xff] %v7082_v51  ;;  %v1024_v51 = vmul.f32 %v6724_v38, %v6803_v41 }
 0x194   : > { %6240 = vset.pattern.permute.xlu2 %v6647_v19  ;;  %6239 = vset.pattern.permute.xlu1 %v6614_v12 }
 0x195   : > { %1854 = vperm.xlu0 %6332, %v6632_v16   ;;  %v1456_v28 = vpop.permute.xlu1 %1455 }
 0x196   : > { %v7084_v36 = vpop.permute.xlu2 %831 }
 0x197   : > { %v7089_v42 = vpop.permute.xlu0 %1902 }
 0x198   : > { %10361 = vst [vmem:[#allocation31_spill] sm:$0xff] %v7089_v42 }
 0x19c   : > { %1170 = vperm.xlu2 %6240, %v6617_v13   ;;  %1164 = vperm.xlu1 %6239, %v6617_v13  }
 0x19d   : > { %1914 = vperm.xlu0 %6332, %v6776_v35   ;;  %v1783_v43 = vpop.permute.xlu1 %1782 }
 0x1a4   : > { %6242 = vset.pattern.permute.xlu2 %v6659_v21  ;;  %6241 = vset.pattern.permute.xlu1 %v6629_v15 }
 0x1a5   : > { %6337 = vset.pattern.permute.xlu0 %v6599_v9  ;;  %v552_v34 = vpop.permute.xlu1 %551  ;;  %v1987_v9 = vmul.f32 %v6739_v48, %v1801_v50  ;;  %v1341_v50 = vmul.f32 %v6728_v40, %v1135_v49 }
 0x1a6   : > { %v1159_v62 = vpop.permute.xlu2 %1158  ;;  %v743_v35 = vmul.f32 %v6722_v37, %v552_v34  ;;  %v739_v34 = vmul.f32 %v6722_v37, %v7060_v39  ;;  %v737_v39 = vmul.f32 %v6722_v37, %v6866_v63 }
 0x1a7   : > { %v1345_v14 = vmul.f32 %v6728_v40, %v1159_v62  ;;  %v7100_v3 = vpop.permute.xlu0 %963  ;;  %v1021_v62 = vmul.f32 %v6724_v38, %v7027_v31  ;;  %v1018_v31 = vmul.f32 %v6724_v38, %v6983_v0  ;;  %v1339_v0 = vmul.f32 %v6728_v40, %v6998_v61 }
 0x1a8   : > { %v1064_v42 = vadd.f32 %v1024_v51, %v743_v35  ;;  %10362 = vst [vmem:[#allocation32_spill] sm:$0xff] %v7100_v3 }
 0x1a9   : > { %v1058_v63 = vadd.f32 %v1018_v31, %v737_v39 }
 0x1aa   : > { %v1385_v15 = vadd.f32 %v1345_v14, %v1064_v42 }
 0x1ac   : > { %1491 = vperm.xlu2 %6242, %v6617_v13   ;;  %1485 = vperm.xlu1 %6241, %v6617_v13  }
 0x1ad   : > { %588 = vperm.xlu0 %6337, %v6632_v16  }
 0x1ae   : > { %v545_v14 = vpop.permute.xlu1 %544 }
 0x1b4   : > { %6244 = vset.pattern.permute.xlu2 %v6683_v26  ;;  %6243 = vset.pattern.permute.xlu1 %v6671_v23 }
 0x1b6   : > { %v1480_v2 = vpop.permute.xlu2 %1479 }
 0x1b7   : > { %v1666_v21 = vmul.f32 %v6737_v46, %v1480_v2  ;;  %v7108_v41 = vpop.permute.xlu0 %1152 }
 0x1b9   : > { %v1706_v59 = vadd.f32 %v1666_v21, %v1385_v15  ;;  %v1020_v21 = vmul.f32 %v6724_v38, %v814_v7 }
 0x1bb   : > { %v7104_v60 = vadd.f32 %v1987_v9, %v1706_v59  ;;  %v740_v59 = vmul.f32 %v6722_v37, %v7011_v32  ;;  %v1060_v42 = vadd.f32 %v1020_v21, %v739_v34  ;;  %v1342_v32 = vmul.f32 %v6728_v40, %v7037_v53 }
 0x1bc   : > { %569 = vperm.xlu2 %6244, %v6617_v13   ;;  %1812 = vperm.xlu1 %6243, %v6617_v13   ;;  %v1984_v53 = vmul.f32 %v6739_v48, %v1783_v43 }
 0x1bd   : > { %v1061_v7 = vadd.f32 %v1021_v62, %v740_v59  ;;  %v1381_v49 = vadd.f32 %v1341_v50, %v1060_v42  ;;  %v741_v59 = vmul.f32 %v6722_v37, %v7072_v44  ;;  %v1022_v62 = vmul.f32 %v6724_v38, %v7077_v25 }
 0x1be   : > { %v1147_v51 = vpop.permute.xlu1 %1146 }
 0x1bf   : > { %v7112_v35 = vpop.permute.xlu0 %1272  ;;  %v1062_v43 = vadd.f32 %v1022_v62, %v741_v59  ;;  %v742_v59 = vmul.f32 %v6722_v37, %v545_v14 }
 0x1c0   : > { %10363 = vst [vmem:[#allocation33_spill] sm:$0xff] %v7112_v35  ;;  %v1662_v35 = vmul.f32 %v6737_v46, %v1456_v28  ;;  %v1663_v28 = vmul.f32 %v6737_v46, %v7067_v18  ;;  %v1660_v18 = vmul.f32 %v6737_v46, %v7006_v56 }
 0x1c2   : > { %v1702_v34 = vadd.f32 %v1662_v35, %v1381_v49  ;;  %v1379_v35 = vadd.f32 %v1339_v0, %v1058_v63 }
 0x1c4   : > { %6246 = vset.pattern.permute.xlu2 %v6701_v30  ;;  %6245 = vset.pattern.permute.xlu1 %v6662_v22 }
 0x1cc   : > { %575 = vperm.xlu2 %6246, %v6617_v13   ;;  %855 = vperm.xlu1 %6245, %v6617_v13  }
 0x1ce   : > { %v1468_v42 = vpop.permute.xlu1 %1467 }
 0x1cf   : > { %v1777_v2 = vpop.permute.xlu0 %1776  ;;  %v1664_v25 = vmul.f32 %v6737_v46, %v1468_v42 }
 0x1d0   : > { %v1983_v21 = vmul.f32 %v6739_v48, %v1777_v2 }
 0x1d2   : > { %v2023_v50 = vadd.f32 %v1983_v21, %v1702_v34  ;;  %v1023_v34 = vmul.f32 %v6724_v38, %v7084_v36  ;;  %v1344_v36 = vmul.f32 %v6728_v40, %v7108_v41 }
 0x1d4   : > { %6248 = vset.pattern.permute.xlu2 %v6602_v10  ;;  %6247 = vset.pattern.permute.xlu1 %v6638_v17  ;;  %v1382_v17 = vadd.f32 %v1342_v32, %v1061_v7  ;;  %v2067_v61 = vadd.f32 %v6748_v52, %v2023_v50  ;;  %v1789_v7 = vpop.permute.xlu2 %1788 }
 0x1d5   : > { %v1985_v49 = vmul.f32 %v6739_v48, %v1789_v7 }
 0x1d6   : > { %v1703_v2 = vadd.f32 %v1663_v28, %v1382_v17  ;;  %v1700_v17 = vadd.f32 %v1660_v18, %v1379_v35  ;;  %v2107_v21 = vmax.f32 %v2067_v61, 0.0 }
 0x1d7   : > { %v7118_v9 = vpop.permute.xlu0 %1806 }
 0x1d8   : > { %v2024_v44 = vadd.f32 %v1984_v53, %v1703_v2  ;;  %v7181_v14 = vsel %vm6756_vm5, %v2107_v21, 0.0  ;;  %v1063_v2 = vadd.f32 %v1023_v34, %v742_v59 }
 0x1d9   : > { %10367 = vst [vmem:[#allocation35_spill] sm:$0xff] %v7181_v14  ;;  %v10206_v41 = vrot.slane %v7181_v14, 2  ;;  %v10205_v7 = vrot.slane %v7181_v14, 4 }
 0x1da   : > { %v2068_v39 = vadd.f32 %v6748_v52, %v2024_v44  ;;  %v1384_v61 = vadd.f32 %v1344_v36, %v1063_v2 }
 0x1dc   : > { %867 = vperm.xlu2 %6248, %v6632_v16   ;;  %861 = vperm.xlu1 %6247, %v6617_v13  }
 0x1de   : > { %v1474_v0 = vpop.permute.xlu1 %1473 }
 0x1df   : > { %v7122_v15 = vpop.permute.xlu0 %1836  ;;  %v1665_v18 = vmul.f32 %v6737_v46, %v1474_v0 }
 0x1e1   : > { %v1705_v21 = vadd.f32 %v1665_v18, %v1384_v61 }
 0x1e4   : > { %6250 = vset.pattern.permute.xlu2 %v6714_v33  ;;  %6249 = vset.pattern.permute.xlu1 %v6674_v24 }
 0x1e7   : > { %v7139_v3 = vpop.permute.xlu0 %1926 }
 0x1e8   : > { %10364 = vst [vmem:[#allocation34_spill] sm:$0xff] %v7139_v3  ;;  %v1343_v3 = vmul.f32 %v6728_v40, %v1147_v51 }
 0x1ea   : > { %v1383_v32 = vadd.f32 %v1343_v3, %v1062_v43  ;;  %v2108_v3 = vmax.f32 %v2068_v39, 0.0 }
 0x1ec   : > { %1182 = vperm.xlu2 %6250, %v6617_v13   ;;  %1176 = vperm.xlu1 %6249, %v6617_v13   ;;  %v1704_v56 = vadd.f32 %v1664_v25, %v1383_v32  ;;  %v7191_v43 = vsel %vm6815_vm9, %v2108_v3, 0.0 }
 0x1ed   : > { %10368 = vst [vmem:[#allocation36_spill] sm:$0xff] %v7191_v43  ;;  %v10221_v39 = vrot.slane %v7191_v43, 2  ;;  %v2446_v0 = vrot.slane %v7191_v43, 7 }
 0x1ee   : > { %v2025_v62 = vadd.f32 %v1985_v49, %v1704_v56  ;;  %v2071_v56 = vadd.f32 %v6748_v52, %v7104_v60  ;;  %v2434_v49 = vrot.slane %v7181_v14, 7  ;;  %v2440_v60 = vrot.slane %v10205_v7, 7  ;;  %v7215_v3 = vpop.permute.xlu1 %557 }
 0x1f0   : > { %v2069_v25 = vadd.f32 %v6748_v52, %v2025_v62  ;;  %v2111_v2 = vmax.f32 %v2071_v56, 0.0  ;;  %v2436_v18 = vrot.slane %v2434_v49, 2 }
 0x1f2   : > { %v2109_v34 = vmax.f32 %v2069_v25, 0.0  ;;  %v7237_v7 = vsel %vm6914_vm13, %v2111_v2, 0.0 }
 0x1f3   : > { %10370 = vst [vmem:[#allocation38_spill] sm:$0xff] %v7237_v7 }
 0x1f4   : > { %6252 = vset.pattern.permute.xlu2 %v6735_v45  ;;  %6251 = vset.pattern.permute.xlu1 %v6689_v27 }
 0x1f7   : > { %v1765_v31 = vpop.permute.xlu0 %1764 }
 0x1f8   : > { %v1981_v51 = vmul.f32 %v6739_v48, %v1765_v31  ;;  %v10228_v31 = vrot.slane %v7181_v14, 6 }
 0x1fa   : > { %v2021_v28 = vadd.f32 %v1981_v51, %v1700_v17  ;;  %v2443_v36 = vrot.slane %v10228_v31, 7 }
 0x1fc   : > { %v2065_v53 = vadd.f32 %v6748_v52, %v2021_v28  ;;  %1503 = vperm.xlu2 %6252, %v6617_v13   ;;  %1497 = vperm.xlu1 %6251, %v6617_v13   ;;  %v2437_v28 = vrot.slane %v10206_v41, 7 }
 0x1fe   : > { %v2105_v50 = vmax.f32 %v2065_v53, 0.0  ;;  %v10212_v53 = vrot.slane %v7191_v43, 4  ;;  %v2439_v25 = vrot.slane %v2437_v28, 2 }
 0x1ff   : > { %v1795_v42 = vpop.permute.xlu0 %1794 }
 0x200   : > { %v7186_v44 = vsel %vm7173_vm15, %v2105_v50, 0.0  ;;  %v1986_v32 = vmul.f32 %v6739_v48, %v1795_v42  ;;  %v7220_v50 = vpop.permute.xlu2 %563  ;;  %v2449_v42 = vrot.slane %v10221_v39, 7  ;;  %v2452_v61 = vrot.slane %v10212_v53, 7 }
 0x201   : > { %v2418_v35 = vrot.slane %v7186_v44, 7  ;;  %v6042_v51 = vrot.slane %v7186_v44, 9 }
 0x202   : > { %v2026_v62 = vadd.f32 %v1986_v32, %v1705_v21  ;;  %v2442_v32 = vrot.slane %v2440_v60, 2  ;;  %v2445_v21 = vrot.slane %v2443_v36, 2  ;;  %v2454_v2 = vrot.slane %v2452_v61, 2 }
 0x203   : > { %v2419_v6 = vsel %vm6771_vm8, %v2417_v55, %v2418_v35  ;;  %v2420_v17 = vrot.slane %v2418_v35, 2  ;;  %v2433_v55 = vrot.slane %v7057_v11, 2  ;;  %v7227_v35 = vsel %vm6889_vm10, %v2109_v34, 0.0 }
 0x204   : > { %2811 = vst [vmem:[#allocation1 + $0x23] ss:$4 sm:$0xff] %v2419_v6  ;;  %6254 = vset.pattern.permute.xlu2 %v6653_v20  ;;  %6253 = vset.pattern.permute.xlu1 %v6596_v8  ;;  %v2070_v6 = vadd.f32 %v6748_v52, %v2026_v62  ;;  %v2451_v11 = vrot.slane %v2449_v42, 2  ;;  %v2438_v34 = vsel %vm6771_vm8, %v2436_v18, %v2437_v28  ;;  %v10208_v41 = vrot.slane %v7227_v35, 2 }
 0x205   : > { %v2422_v59 = vsel %vm6771_vm8, %v2420_v17, %v6042_v51  ;;  %10369 = vst [vmem:[#allocation37_spill] sm:$0xff] %v7227_v35  ;;  %v10209_v17 = vrot.slane %v7191_v43, 6  ;;  %v2448_v51 = vrot.slane %v2446_v0, 2  ;;  %v2435_v56 = vsel %vm6771_vm8, %v2433_v55, %v2434_v49  ;;  %v844_v55 = vpop.permute.xlu1 %843 }
 0x206   : > { %2814 = vst [vmem:[#allocation1] ss:$4 sm:$0xff] %v2422_v59  ;;  %v2441_v52 = vsel %vm6771_vm8, %v2439_v25, %v2440_v60  ;;  %v10207_v49 = vrot.slane %v7227_v35, 4  ;;  %v2444_v28 = vsel %vm6771_vm8, %v2442_v32, %v2443_v36  ;;  %v2110_v18 = vmax.f32 %v2070_v6, 0.0 }
 0x207   : > { %v2458_v60 = vrot.slane %v7227_v35, 7  ;;  %v2450_v25 = vsel %vm6771_vm8, %v2448_v51, %v2449_v42  ;;  %v2461_v36 = vrot.slane %v10208_v41, 7  ;;  %v2453_v32 = vsel %vm6771_vm8, %v2451_v11, %v2452_v61 }
 0x208   : > { %v2464_v6 = vrot.slane %v10207_v49, 7  ;;  %v10211_v42 = vrot.slane %v7227_v35, 6  ;;  %v7271_v51 = vsel %vm7173_vm15, %v2110_v18, 0.0  ;;  %v10215_v41 = vrot.slane %v7237_v7, 6 }
 0x209   : > { %10371 = vst [vmem:[#allocation39_spill] sm:$0xff] %v7271_v51  ;;  %v2460_v61 = vrot.slane %v2458_v60, 2  ;;  %v1025_v53 = vmul.f32 %v6724_v38, %v844_v55 }
 0x20b   : > { %v2813_v59 = vld.sshfl [vmem:[#allocation1 + $0x20] sm:$0xff pattern:$0x73625140] }
 0x20c   : > { %2818 = vst [vmem:[#allocation1 + $0x20] ss:$4 sm:$0xff] %v2435_v56  ;;  %6060 = vmatmul.msk.f32.gmra.mxu0 %vm2964_vm14, %v2813_v59  ;;  %1818 = vperm.xlu2 %6254, %v6617_v13   ;;  %v10210_v56 = vrot.slane %v7237_v7, 2  ;;  %v2447_v59 = vsel %vm6771_vm8, %v2445_v21, %v2446_v0  ;;  %v7264_v0 = vpop.permute.xlu2 %849 }
 0x20d   : > { %2819 = vst [vmem:[#allocation1 + $0x21] ss:$4 sm:$0xff] %v2438_v34  ;;  %v2822_v62 = vld.sshfl [vmem:[#allocation1] sm:$0xff pattern:$0x73625140]  ;;  %1509 = vperm.xlu1 %6253, %v6632_v16   ;;  %v2455_v34 = vrot.slane %v10209_v17, 7 }
 0x20e   : > { %2820 = vst [vmem:[#allocation1 + $0x22] ss:$4 sm:$0xff] %v2441_v52  ;;  %v2477_v52 = vrot.slane %v10210_v56, 7  ;;  %v6045_v17 = vrot.slane %v7237_v7, 9 }
 0x20f   : > { %2821 = vst [vmem:[#allocation1 + $0x23] ss:$4 sm:$0xff] %v2444_v28  ;;  %v2456_v21 = vsel %vm6771_vm8, %v2454_v2, %v2455_v34  ;;  %v2457_v11 = vrot.slane %v2455_v34, 2  ;;  %v2463_v28 = vrot.slane %v2461_v36, 2  ;;  %v10216_v2 = vrot.slane %v7237_v7, 4  ;;  %v1165_v34 = vpop.permute.xlu1 %1164 }
 0x210   : > { %2824 = vst [vmem:[#allocation1] ss:$4 sm:$0xff] %v2447_v59  ;;  %v2466_v59 = vrot.slane %v2464_v6, 2  ;;  %v2479_v49 = vrot.slane %v2477_v52, 2 }
 0x211   : > { %2825 = vst [vmem:[#allocation1 + $0x1] ss:$4 sm:$0xff] %v2450_v25  ;;  %v2470_v25 = vrot.slane %v7271_v51, 7  ;;  %v2459_v18 = vsel %vm6771_vm8, %v2457_v11, %v2458_v60  ;;  %v2465_v56 = vsel %vm6771_vm8, %v2463_v28, %v2464_v6  ;;  %v2480_v60 = vrot.slane %v10216_v2, 7 }
 0x212   : > { %2826 = vst [vmem:[#allocation1 + $0x2] ss:$4 sm:$0xff] %v2453_v32  ;;  %v2467_v32 = vrot.slane %v10211_v42, 7  ;;  %v744_v28 = vmul.f32 %v6722_v37, %v7215_v3 }
 0x213   : > { %2827 = vst [vmem:[#allocation1 + $0x3] ss:$4 sm:$0xff] %v2456_v21  ;;  %v2472_v42 = vrot.slane %v2470_v25, 2  ;;  %v2481_v6 = vsel %vm6771_vm8, %v2479_v49, %v2480_v60 }
 0x214   : > { %6061 = vmatmul.msk.f32.gmra.mxu0 %vm2964_vm14, %v2822_v62  ;;  %6256 = vset.pattern.permute.xlu2 %v7031_v57  ;;  %v2462_v62 = vsel %vm6771_vm8, %v2460_v61, %v2461_v36  ;;  %v2468_v11 = vsel %vm6771_vm8, %v2466_v59, %v2467_v32  ;;  %v2478_v36 = vsel %vm6771_vm8, %v6045_v17, %v2477_v52  ;;  %v6044_v59 = vrot.slane %v7271_v51, 9 }
 0x215   : > { %6255 = vset.pattern.permute.xlu1 %v6579_v4  ;;  %v2482_v17 = vrot.slane %v2480_v60, 2  ;;  %v1065_v3 = vadd.f32 %v1025_v53, %v744_v28  ;;  %v10372_v28 = vld [vmem:[#allocation6_spill] sm:$0xff] }
 0x216   : > { %v2823_v21 = vld.sshfl [vmem:[#allocation1 + $0x20] sm:$0xff pattern:$0x73625140]  ;;  %v2474_v49 = vsel %vm6771_vm8, %v2472_v42, %v6044_v59 }
 0x217   : > { %2828 = vst [vmem:[#allocation1 + $0x20] ss:$4 sm:$0xff] %v2459_v18  ;;  %v2469_v18 = vrot.slane %v2467_v32, 2  ;;  %v2483_v32 = vrot.slane %v10215_v41, 7 }
 0x218   : > { %2829 = vst [vmem:[#allocation1 + $0x21] ss:$4 sm:$0xff] %v2462_v62  ;;  %v1171_v62 = vpop.permute.xlu2 %1170 }
 0x219   : > { %2830 = vst [vmem:[#allocation1 + $0x22] ss:$4 sm:$0xff] %v2465_v56  ;;  %v1346_v56 = vmul.f32 %v6728_v40, %v1165_v34  ;;  %v2471_v55 = vsel %vm6771_vm8, %v2469_v18, %v2470_v25  ;;  %v1988_v25 = vmul.f32 %v6739_v48, %v7118_v9  ;;  %v2484_v34 = vsel %vm6771_vm8, %v2482_v17, %v2483_v32  ;;  %v7324_v18 = vld [vmem:[%s6530_s18] ss:$0 sm:$0xff] }
 0x21a   : > { %2831 = vst [vmem:[#allocation1 + $0x23] ss:$4 sm:$0xff] %v2468_v11  ;;  %v2832_v61 = vld.sshfl [vmem:[#allocation1] sm:$0xff pattern:$0x73625140]  ;;  %v1026_v9 = vmul.f32 %v6724_v38, %v7264_v0  ;;  %v1347_v17 = vmul.f32 %v6728_v40, %v1171_v62 }
 0x21b   : > { %2836 = vst [vmem:[#allocation1 + $0x2] ss:$4 sm:$0xff] %v2478_v36  ;;  %v745_v36 = vmul.f32 %v6722_v37, %v7220_v50 }
 0x21c   : > { %2837 = vst [vmem:[#allocation1 + $0x3] ss:$4 sm:$0xff] %v2481_v6  ;;  %6062 = vmatmul.msk.f32.gmra.mxu0 %vm2964_vm14, %v2823_v21  ;;  %1824 = vperm.xlu2 %6256, %v6617_v13   ;;  %v1386_v21 = vadd.f32 %v1346_v56, %v1065_v3  ;;  %v2485_v56 = vrot.slane %v2483_v32, 2 }
 0x21d   : > { %2834 = vst [vmem:[#allocation1] ss:$4 sm:$0xff] %v2471_v55  ;;  %873 = vperm.xlu1 %6255, %v6632_v16   ;;  %v1066_v55 = vadd.f32 %v1026_v9, %v745_v36 }
 0x21e   : > { %2835 = vst [vmem:[#allocation1 + $0x1] ss:$4 sm:$0xff] %v2474_v49  ;;  %v1486_v52 = vpop.permute.xlu1 %1485 }
 0x21f   : > { %v1667_v13 = vmul.f32 %v6737_v46, %v1486_v52 }
 0x220   : > { %v1492_v53 = vpop.permute.xlu2 %1491 }
 0x221   : > { %v2833_v42 = vld.sshfl [vmem:[#allocation1 + $0x20] sm:$0xff pattern:$0x73625140]  ;;  %v1707_v60 = vadd.f32 %v1667_v13, %v1386_v21  ;;  %v1668_v52 = vmul.f32 %v6737_v46, %v1492_v53 }
 0x222   : > { %2838 = vst [vmem:[#allocation1 + $0x20] ss:$4 sm:$0xff] %v2484_v34  ;;  %v1387_v34 = vadd.f32 %v1347_v17, %v1066_v55 }
 0x223   : > { %v2028_v11 = vadd.f32 %v1988_v25, %v1707_v60 }
 0x224   : > { %6063 = vmatmul.msk.f32.gmra.mxu0 %vm2964_vm14, %v2832_v61  ;;  %6258 = vset.pattern.permute.xlu2 %v6582_v5 }
 0x225   : > { %v2072_v6 = vadd.f32 %v7324_v18, %v2028_v11  ;;  %6257 = vset.pattern.permute.xlu1 %v10372_v28  ;;  %v2842_v55 = vld.sshfl [vmem:[#allocation1] sm:$0xff pattern:$0x73625140] }
 0x227   : > { %v2112_v59 = vmax.f32 %v2072_v6, 0.0  ;;  %v1708_v6 = vadd.f32 %v1668_v52, %v1387_v34 }
 0x228   : > { %v7338_v25 = vpop.permute.xlu2 %569 }
 0x229   : > { %v7331_v61 = vsel %vm6756_vm5, %v2112_v59, 0.0 }
 0x22a   : > { %10373 = vst [vmem:[#allocation6_spill] sm:$0xff] %v7331_v61  ;;  %v10217_v50 = vrot.slane %v7331_v61, 2  ;;  %v10220_v49 = vrot.slane %v7331_v61, 4  ;;  %v10219_v0 = vrot.slane %v7331_v61, 6  ;;  %v2486_v3 = vrot.slane %v7331_v61, 7 }
 0x22c   : > { %v2487_v32 = vsel %vm6771_vm8, %v2485_v56, %v2486_v3  ;;  %v2488_v62 = vrot.slane %v2486_v3, 2  ;;  %v2489_v21 = vrot.slane %v10217_v50, 7  ;;  %v2492_v13 = vrot.slane %v10220_v49, 7  ;;  %6064 = vmatmul.msk.f32.gmra.mxu0 %vm2964_vm14, %v2833_v42  ;;  %594 = vperm.xlu2 %6258, %v6632_v16  }
 0x22d   : > { %2839 = vst [vmem:[#allocation1 + $0x21] ss:$4 sm:$0xff] %v2487_v32  ;;  %1830 = vperm.xlu1 %6257, %v6632_v16   ;;  %v2495_v36 = vrot.slane %v10219_v0, 7 }
 0x22e   : > { %v2490_v60 = vsel %vm6771_vm8, %v2488_v62, %v2489_v21  ;;  %v2491_v53 = vrot.slane %v2489_v21, 2  ;;  %v2494_v11 = vrot.slane %v2492_v13, 2  ;;  %v1813_v9 = vpop.permute.xlu1 %1812 }
 0x22f   : > { %2840 = vst [vmem:[#allocation1 + $0x22] ss:$4 sm:$0xff] %v2490_v60  ;;  %v1989_v59 = vmul.f32 %v6739_v48, %v1813_v9  ;;  %v2497_v60 = vrot.slane %v2495_v36, 2 }
 0x230   : > { %v2493_v42 = vsel %vm6771_vm8, %v2491_v53, %v2492_v13  ;;  %v2496_v56 = vsel %vm6771_vm8, %v2494_v11, %v2495_v36  ;;  %v576_v32 = vpop.permute.xlu2 %575 }
 0x231   : > { %2841 = vst [vmem:[#allocation1 + $0x23] ss:$4 sm:$0xff] %v2493_v42  ;;  %v2029_v17 = vadd.f32 %v1989_v59, %v1708_v6  ;;  %v747_v2 = vmul.f32 %v6722_v37, %v576_v32 }
 0x232   : > { %2844 = vst [vmem:[#allocation1] ss:$4 sm:$0xff] %v2496_v56 }
 0x233   : > { %v2073_v3 = vadd.f32 %v7324_v18, %v2029_v17 }
 0x234   : > { %6065 = vmatmul.msk.f32.gmra.mxu0 %vm2964_vm14, %v2842_v55  ;;  %6261 = vset.pattern.permute.xlu2 %v6647_v19 }
 0x235   : > { %v2113_v52 = vmax.f32 %v2073_v3, 0.0  ;;  %6260 = vset.pattern.permute.xlu1 %v6614_v12 }
 0x237   : > { %v7364_v62 = vsel %vm6815_vm9, %v2113_v52, 0.0 }
 0x238   : > { %10374 = vst [vmem:[#allocation40_spill] sm:$0xff] %v7364_v62  ;;  %v10218_v21 = vrot.slane %v7364_v62, 2  ;;  %v10214_v13 = vrot.slane %v7364_v62, 4  ;;  %v10213_v34 = vrot.slane %v7364_v62, 6  ;;  %v2498_v53 = vrot.slane %v7364_v62, 7 }
 0x239   : > { %v2843_v6 = vld.sshfl [vmem:[#allocation1 + $0x20] sm:$0xff pattern:$0x73625140] }
 0x23a   : > { %v2501_v11 = vrot.slane %v10218_v21, 7  ;;  %v2504_v9 = vrot.slane %v10214_v13, 7  ;;  %v2499_v59 = vsel %vm6771_vm8, %v2497_v60, %v2498_v53  ;;  %v2500_v42 = vrot.slane %v2498_v53, 2  ;;  %v868_v60 = vpop.permute.xlu2 %867  ;;  %v10375_v53 = vld [vmem:[#allocation25_spill] sm:$0xff] }
 0x23b   : > { %v7378_v17 = vrot.slane %v10213_v34, 7  ;;  %2845 = vst [vmem:[#allocation1 + $0x1] ss:$4 sm:$0xff] %v2499_v59  ;;  %v1029_v59 = vmul.f32 %v6724_v38, %v868_v60  ;;  %v10376_v34 = vld [vmem:[#allocation27_spill] sm:$0xff] }
 0x23c   : > { %v2503_v56 = vrot.slane %v2501_v11, 2  ;;  %v2506_v55 = vrot.slane %v2504_v9, 2  ;;  %6066 = vmatmul.msk.f32.gmra.mxu0 %vm2964_vm14, %v2843_v6  ;;  %1200 = vperm.xlu2 %6261, %v6632_v16   ;;  %v2502_v36 = vsel %vm6771_vm8, %v2500_v42, %v2501_v11  ;;  %v748_v6 = vmul.f32 %v6722_v37, %v10375_v53  ;;  %v10377_v42 = vld [vmem:[#allocation11_spill] sm:$0xff] }
 0x23d   : > { %1194 = vperm.xlu1 %6260, %v6632_v16   ;;  %2846 = vst [vmem:[#allocation1 + $0x2] ss:$4 sm:$0xff] %v2502_v36  ;;  %v1350_v11 = vmul.f32 %v6728_v40, %v10376_v34  ;;  %v746_v53 = vmul.f32 %v6722_v37, %v7338_v25 }
 0x23e   : > { %v2505_v3 = vsel %vm6771_vm8, %v2503_v56, %v2504_v9  ;;  %v2508_v52 = vsel %vm6771_vm8, %v2506_v55, %v7378_v17  ;;  %v1069_v13 = vadd.f32 %v1029_v59, %v748_v6  ;;  %v10378_v9 = vld [vmem:[#allocation8_spill] sm:$0xff]  ;;  %v856_v36 = vpop.permute.xlu1 %855 }
 0x23f   : > { %2847 = vst [vmem:[#allocation1 + $0x3] ss:$4 sm:$0xff] %v2505_v3  ;;  %v1027_v60 = vmul.f32 %v6724_v38, %v856_v36 }
 0x240   : > { %2848 = vst [vmem:[#allocation1 + $0x20] ss:$4 sm:$0xff] %v2508_v52  ;;  %v7398_v55 = vadd.f32 %v1350_v11, %v1069_v13 }
 0x241   : > { %v1067_v11 = vadd.f32 %v1027_v60, %v746_v53 }
 0x244   : > { %6263 = vset.pattern.permute.xlu2 %v10377_v42 }
 0x245   : > { %6262 = vset.pattern.permute.xlu1 %v10378_v9 }
 0x246   : > { %v2852_v56 = vld.sshfl [vmem:[#allocation1] sm:$0xff pattern:$0x73625140]  ;;  %v1183_v34 = vpop.permute.xlu2 %1182 }
 0x247   : > { %6067 = vmatmul.msk.f32.gmra.mxu0 %vm2964_vm14, %v2852_v56  ;;  %v1349_v25 = vmul.f32 %v6728_v40, %v1183_v34 }
 0x24c   : > { %1521 = vperm.xlu2 %6263, %v6632_v16  }
 0x24d   : > { %1515 = vperm.xlu1 %6262, %v6632_v16  }
 0x24e   : > { %v862_v3 = vpop.permute.xlu1 %861 }
 0x24f   : > { %v1028_v56 = vmul.f32 %v6724_v38, %v862_v3 }
 0x251   : > { %v1068_v0 = vadd.f32 %v1028_v56, %v747_v2 }
 0x253   : > { %v1389_v3 = vadd.f32 %v1349_v25, %v1068_v0 }
 0x254   : > { %6265 = vset.pattern.permute.xlu2 %v6662_v22 }
 0x255   : > { %6264 = vset.pattern.permute.xlu1 %v6683_v26 }
 0x256   : > { %v1504_v52 = vpop.permute.xlu2 %1503 }
 0x257   : > { %v1670_v49 = vmul.f32 %v6737_v46, %v1504_v52 }
 0x259   : > { %v1710_v53 = vadd.f32 %v1670_v49, %v1389_v3 }
 0x25c   : > { %885 = vperm.xlu2 %6265, %v6632_v16  }
 0x25d   : > { %600 = vperm.xlu1 %6264, %v6632_v16  }
 0x25e   : > { %v1177_v13 = vpop.permute.xlu1 %1176 }
 0x25f   : > { %v1348_v6 = vmul.f32 %v6728_v40, %v1177_v13 }
 0x261   : > { %v1388_v50 = vadd.f32 %v1348_v6, %v1067_v11 }
 0x264   : > { %6267 = vset.pattern.permute.xlu2 %v6701_v30 }
 0x265   : > { %6266 = vset.pattern.permute.xlu1 %v6671_v23 }
 0x266   : > { %v1819_v59 = vpop.permute.xlu2 %1818 }
 0x267   : > { %v1990_v21 = vmul.f32 %v6739_v48, %v1819_v59 }
 0x26c   : > { %606 = vperm.xlu2 %6267, %v6632_v16  }
 0x26d   : > { %1842 = vperm.xlu1 %6266, %v6632_v16  }
 0x26e   : > { %v1498_v41 = vpop.permute.xlu1 %1497 }
 0x26f   : > { %v1669_v36 = vmul.f32 %v6737_v46, %v1498_v41  ;;  %v2509_v41 = vrot.slane %v7378_v17, 2 }
 0x271   : > { %v1709_v13 = vadd.f32 %v1669_v36, %v1388_v50 }
 0x273   : > { %v2030_v39 = vadd.f32 %v1990_v21, %v1709_v13 }
 0x274   : > { %6270 = vset.pattern.permute.xlu2 %v6714_v33 }
 0x275   : > { %v2074_v60 = vadd.f32 %v7324_v18, %v2030_v39  ;;  %6269 = vset.pattern.permute.xlu1 %v6674_v24 }
 0x276   : > { %v1825_v32 = vpop.permute.xlu2 %1824 }
 0x277   : > { %v2114_v6 = vmax.f32 %v2074_v60, 0.0  ;;  %v1991_v59 = vmul.f32 %v6739_v48, %v1825_v32 }
 0x279   : > { %v7427_v2 = vsel %vm6889_vm10, %v2114_v6, 0.0  ;;  %v2031_v50 = vadd.f32 %v1991_v59, %v1710_v53 }
 0x27a   : > { %10379 = vst [vmem:[#allocation25_spill] sm:$0xff] %v7427_v2  ;;  %v10225_v21 = vrot.slane %v7427_v2, 2  ;;  %v10227_v0 = vrot.slane %v7427_v2, 4  ;;  %v10226_v39 = vrot.slane %v7427_v2, 6  ;;  %v2510_v34 = vrot.slane %v7427_v2, 7 }
 0x27b   : > { %v2075_v49 = vadd.f32 %v7324_v18, %v2031_v50 }
 0x27c   : > { %v2511_v52 = vsel %vm6771_vm8, %v2509_v41, %v2510_v34  ;;  %v2512_v11 = vrot.slane %v2510_v34, 2  ;;  %v2513_v17 = vrot.slane %v10225_v21, 7  ;;  %v2516_v56 = vrot.slane %v10227_v0, 7  ;;  %1212 = vperm.xlu2 %6270, %v6632_v16  }
 0x27d   : > { %v2519_v36 = vrot.slane %v10226_v39, 7  ;;  %2849 = vst [vmem:[#allocation1 + $0x21] ss:$4 sm:$0xff] %v2511_v52  ;;  %v2115_v25 = vmax.f32 %v2075_v49, 0.0  ;;  %1206 = vperm.xlu1 %6269, %v6632_v16  }
 0x27e   : > { %v2514_v13 = vsel %vm6771_vm8, %v2512_v11, %v2513_v17  ;;  %v2515_v3 = vrot.slane %v2513_v17, 2  ;;  %v2518_v60 = vrot.slane %v2516_v56, 2 }
 0x27f   : > { %2850 = vst [vmem:[#allocation1 + $0x22] ss:$4 sm:$0xff] %v2514_v13  ;;  %v7448_v32 = vsel %vm7173_vm15, %v2115_v25, 0.0  ;;  %v2521_v59 = vrot.slane %v2519_v36, 2  ;;  %v1510_v17 = vpop.permute.xlu1 %1509 }
 0x280   : > { %10380 = vst [vmem:[#allocation27_spill] sm:$0xff] %v7448_v32  ;;  %v2517_v53 = vsel %vm6771_vm8, %v2515_v3, %v2516_v56  ;;  %v2520_v6 = vsel %vm6771_vm8, %v2518_v60, %v2519_v36  ;;  %v2522_v41 = vrot.slane %v7448_v32, 7  ;;  %v6046_v49 = vrot.slane %v7448_v32, 9  ;;  %v10381_v56 = vld [vmem:[#allocation5_spill] sm:$0xff]  ;;  %v10382_v36 = vld [vmem:[#allocation3_spill] sm:$0xff]  ;;  %v10383_v3 = vld [vmem:[#allocation12_spill] sm:$0xff] }
 0x281   : > { %2851 = vst [vmem:[#allocation1 + $0x23] ss:$4 sm:$0xff] %v2517_v53  ;;  %v1671_v13 = vmul.f32 %v6737_v46, %v1510_v17 }
 0x282   : > { %2854 = vst [vmem:[#allocation1] ss:$4 sm:$0xff] %v2520_v6  ;;  %v2523_v50 = vsel %vm6771_vm8, %v2521_v59, %v2522_v41  ;;  %v2524_v34 = vrot.slane %v2522_v41, 2  ;;  %v7472_v41 = vpop.permute.xlu0 %1854 }
 0x283   : > { %2855 = vst [vmem:[#allocation1 + $0x1] ss:$4 sm:$0xff] %v2523_v50  ;;  %v1711_v53 = vadd.f32 %v1671_v13, %v7398_v55 }
 0x284   : > { %v2526_v52 = vsel %vm6771_vm8, %v2524_v34, %v6046_v49  ;;  %6272 = vset.pattern.permute.xlu2 %v6735_v45 }
 0x285   : > { %2856 = vst [vmem:[#allocation1 + $0x2] ss:$4 sm:$0xff] %v2526_v52  ;;  %6271 = vset.pattern.permute.xlu1 %v6689_v27 }
 0x288   : > { %v2853_v11 = vld.sshfl [vmem:[#allocation1 + $0x20] sm:$0xff pattern:$0x73625140] }
 0x289   : > { %6068 = vmatmul.msk.f32.gmra.mxu0 %vm2964_vm14, %v2853_v11 }
 0x28c   : > { %1533 = vperm.xlu2 %6272, %v6632_v16  }
 0x28d   : > { %1527 = vperm.xlu1 %6271, %v6632_v16  }
 0x28f   : > { %v874_v25 = vpop.permute.xlu1 %873 }
 0x290   : > { %v1030_v0 = vmul.f32 %v6724_v38, %v874_v25 }
 0x294   : > { %6275 = vset.pattern.permute.xlu2 %v10381_v56 }
 0x295   : > { %6274 = vset.pattern.permute.xlu1 %v10382_v36 }
 0x29c   : > { %619 = vperm.xlu2 %6275, %v10383_v3  }
 0x29d   : > { %613 = vperm.xlu1 %6274, %v10383_v3  }
 0x29f   : > { %v1831_v60 = vpop.permute.xlu1 %1830 }
 0x2a0   : > { %v1992_v6 = vmul.f32 %v6739_v48, %v1831_v60  ;;  %v7490_v60 = vpop.permute.xlu0 %1914 }
 0x2a2   : > { %v2032_v59 = vadd.f32 %v1992_v6, %v1711_v53 }
 0x2a4   : > { %v2076_v16 = vadd.f32 %v7324_v18, %v2032_v59  ;;  %6277 = vset.pattern.permute.xlu2 %v6579_v4 }
 0x2a5   : > { %6276 = vset.pattern.permute.xlu1 %v6602_v10 }
 0x2a6   : > { %v2116_v50 = vmax.f32 %v2076_v16, 0.0 }
 0x2a8   : > { %v7479_v34 = vsel %vm6914_vm13, %v2116_v50, 0.0  ;;  %v595_v50 = vpop.permute.xlu2 %594 }
 0x2a9   : > { %10384 = vst [vmem:[#allocation11_spill] sm:$0xff] %v7479_v34  ;;  %v10222_v49 = vrot.slane %v7479_v34, 2  ;;  %v10223_v55 = vrot.slane %v7479_v34, 4  ;;  %v10224_v52 = vrot.slane %v7479_v34, 6  ;;  %v6047_v11 = vrot.slane %v7479_v34, 9 }
 0x2ab   : > { %v2529_v17 = vrot.slane %v10222_v49, 7  ;;  %v2532_v13 = vrot.slane %v10223_v55, 7  ;;  %v2535_v16 = vrot.slane %v10224_v52, 7  ;;  %v589_v52 = vpop.permute.xlu0 %588 }
 0x2ac   : > { %903 = vperm.xlu2 %6277, %v10383_v3  }
 0x2ad   : > { %v2530_v53 = vsel %vm6771_vm8, %v6047_v11, %v2529_v17  ;;  %v2531_v6 = vrot.slane %v2529_v17, 2  ;;  %v2534_v59 = vrot.slane %v2532_v13, 2  ;;  %897 = vperm.xlu1 %6276, %v10383_v3   ;;  %v10385_v17 = vld [vmem:[#allocation4_spill] sm:$0xff]  ;;  %v2537_v2 = vrot.slane %v2535_v16, 2 }
 0x2ae   : > { %2857 = vst [vmem:[#allocation1 + $0x3] ss:$4 sm:$0xff] %v2530_v53  ;;  %v749_v53 = vmul.f32 %v6722_v37, %v589_v52  ;;  %v10386_v52 = vld [vmem:[#allocation7_spill] sm:$0xff] }
 0x2af   : > { %v2533_v49 = vsel %vm6771_vm8, %v2531_v6, %v2532_v13  ;;  %v2536_v55 = vsel %vm6771_vm8, %v2534_v59, %v2535_v16  ;;  %v1195_v21 = vpop.permute.xlu1 %1194  ;;  %v1993_v6 = vmul.f32 %v6739_v48, %v7122_v15 }
 0x2b0   : > { %2858 = vst [vmem:[#allocation1 + $0x20] ss:$4 sm:$0xff] %v2533_v49  ;;  %v1201_v39 = vpop.permute.xlu2 %1200  ;;  %v1351_v13 = vmul.f32 %v6728_v40, %v1195_v21  ;;  %v1070_v49 = vadd.f32 %v1030_v0, %v749_v53 }
 0x2b1   : > { %2859 = vst [vmem:[#allocation1 + $0x21] ss:$4 sm:$0xff] %v2536_v55 }
 0x2b2   : > { %v1391_v59 = vadd.f32 %v1351_v13, %v1070_v49 }
 0x2b4   : > { %6279 = vset.pattern.permute.xlu2 %v6614_v12 }
 0x2b5   : > { %v2862_v11 = vld.sshfl [vmem:[#allocation1] sm:$0xff pattern:$0x73625140]  ;;  %6278 = vset.pattern.permute.xlu1 %v10385_v17 }
 0x2b6   : > { %6069 = vmatmul.msk.f32.gmra.mxu0 %vm2964_vm14, %v2862_v11 }
 0x2b8   : > { %v1522_v31 = vpop.permute.xlu2 %1521 }
 0x2bc   : > { %1224 = vperm.xlu2 %6279, %v10383_v3  }
 0x2bd   : > { %1218 = vperm.xlu1 %6278, %v10383_v3  }
 0x2bf   : > { %v1516_v55 = vpop.permute.xlu1 %1515 }
 0x2c0   : > { %v1672_v11 = vmul.f32 %v6737_v46, %v1516_v55  ;;  %v7519_v53 = vpop.permute.xlu2 %885 }
 0x2c2   : > { %v1712_v34 = vadd.f32 %v1672_v11, %v1391_v59 }
 0x2c4   : > { %v2033_v32 = vadd.f32 %v1993_v6, %v1712_v34  ;;  %6281 = vset.pattern.permute.xlu2 %v10386_v52 }
 0x2c5   : > { %6280 = vset.pattern.permute.xlu1 %v6582_v5 }
 0x2c6   : > { %v2077_v21 = vadd.f32 %v7324_v18, %v2033_v32 }
 0x2c8   : > { %v2117_v25 = vmax.f32 %v2077_v21, 0.0 }
 0x2ca   : > { %v7517_v0 = vsel %vm6756_vm5, %v2117_v25, 0.0 }
 0x2cb   : > { %10387 = vst [vmem:[#allocation8_spill] sm:$0xff] %v7517_v0  ;;  %v10236_v15 = vrot.slane %v7517_v0, 2  ;;  %v10235_v13 = vrot.slane %v7517_v0, 4  ;;  %v10237_v34 = vrot.slane %v7517_v0, 6  ;;  %v2538_v49 = vrot.slane %v7517_v0, 7 }
 0x2cc   : > { %909 = vperm.xlu2 %6281, %v10383_v3  }
 0x2cd   : > { %v2539_v32 = vsel %vm6771_vm8, %v2537_v2, %v2538_v49  ;;  %v2540_v16 = vrot.slane %v2538_v49, 2  ;;  %v2541_v55 = vrot.slane %v10236_v15, 7  ;;  %v2544_v6 = vrot.slane %v10235_v13, 7  ;;  %625 = vperm.xlu1 %6280, %v10383_v3   ;;  %v607_v13 = vpop.permute.xlu2 %606  ;;  %v10388_v15 = vld [vmem:[#allocation15_spill] sm:$0xff] }
 0x2ce   : > { %2860 = vst [vmem:[#allocation1 + $0x22] ss:$4 sm:$0xff] %v2539_v32  ;;  %v2547_v25 = vrot.slane %v10237_v34, 7  ;;  %v1031_v32 = vmul.f32 %v6724_v38, %v10388_v15 }
 0x2cf   : > { %v2542_v59 = vsel %vm6771_vm8, %v2540_v16, %v2541_v55  ;;  %v2543_v11 = vrot.slane %v2541_v55, 2  ;;  %v2546_v21 = vrot.slane %v2544_v6, 2  ;;  %v750_v16 = vmul.f32 %v6722_v37, %v595_v50  ;;  %v10389_v50 = vld [vmem:[#allocation17_spill] sm:$0xff] }
 0x2d0   : > { %2861 = vst [vmem:[#allocation1 + $0x23] ss:$4 sm:$0xff] %v2542_v59  ;;  %v7546_v59 = vpop.permute.xlu1 %600 }
 0x2d1   : > { %v2545_v2 = vsel %vm6771_vm8, %v2543_v11, %v2544_v6  ;;  %v2548_v49 = vsel %vm6771_vm8, %v2546_v21, %v2547_v25  ;;  %v1071_v34 = vadd.f32 %v1031_v32, %v750_v16  ;;  %v1352_v6 = vmul.f32 %v6728_v40, %v1201_v39 }
 0x2d2   : > { %2864 = vst [vmem:[#allocation1] ss:$4 sm:$0xff] %v2545_v2  ;;  %v1673_v21 = vmul.f32 %v6737_v46, %v1522_v31  ;;  %v1033_v2 = vmul.f32 %v6724_v38, %v10389_v50 }
 0x2d3   : > { %2865 = vst [vmem:[#allocation1 + $0x1] ss:$4 sm:$0xff] %v2548_v49  ;;  %v1392_v11 = vadd.f32 %v1352_v6, %v1071_v34  ;;  %v752_v49 = vmul.f32 %v6722_v37, %v607_v13  ;;  %v1996_v13 = vmul.f32 %v6739_v48, %v7472_v41 }
 0x2d4   : > { %6285 = vset.pattern.permute.xlu2 %v6647_v19 }
 0x2d5   : > { %6284 = vset.pattern.permute.xlu1 %v10378_v9  ;;  %v1713_v62 = vadd.f32 %v1673_v21, %v1392_v11  ;;  %v1073_v39 = vadd.f32 %v1033_v2, %v752_v49  ;;  %v2549_v11 = vrot.slane %v2547_v25, 2 }
 0x2d6   : > { %v1213_v15 = vpop.permute.xlu2 %1212 }
 0x2d7   : > { %v2863_v55 = vld.sshfl [vmem:[#allocation1 + $0x20] sm:$0xff pattern:$0x73625140]  ;;  %v1354_v34 = vmul.f32 %v6728_v40, %v1213_v15 }
 0x2d8   : > { %6070 = vmatmul.msk.f32.gmra.mxu0 %vm2964_vm14, %v2863_v55  ;;  %v10390_v55 = vld [vmem:[#allocation10_spill] sm:$0xff] }
 0x2d9   : > { %v1394_v61 = vadd.f32 %v1354_v34, %v1073_v39 }
 0x2dc   : > { %1230 = vperm.xlu2 %6285, %v10383_v3  }
 0x2dd   : > { %1545 = vperm.xlu1 %6284, %v10383_v3  }
 0x2df   : > { %v1843_v0 = vpop.permute.xlu1 %1842 }
 0x2e0   : > { %v1994_v32 = vmul.f32 %v6739_v48, %v1843_v0 }
 0x2e2   : > { %v2034_v16 = vadd.f32 %v1994_v32, %v1713_v62 }
 0x2e4   : > { %v2078_v31 = vadd.f32 %v7324_v18, %v2034_v16  ;;  %6287 = vset.pattern.permute.xlu2 %v10390_v55 }
 0x2e5   : > { %6286 = vset.pattern.permute.xlu1 %v10372_v28 }
 0x2e6   : > { %v2118_v6 = vmax.f32 %v2078_v31, 0.0  ;;  %v1534_v51 = vpop.permute.xlu2 %1533 }
 0x2e7   : > { %v1675_v50 = vmul.f32 %v6737_v46, %v1534_v51 }
 0x2e8   : > { %v7566_v62 = vsel %vm6815_vm9, %v2118_v6, 0.0 }
 0x2e9   : > { %10391 = vst [vmem:[#allocation5_spill] sm:$0xff] %v7566_v62  ;;  %v10248_v0 = vrot.slane %v7566_v62, 2  ;;  %v10247_v21 = vrot.slane %v7566_v62, 4  ;;  %v10246_v15 = vrot.slane %v7566_v62, 6  ;;  %v2550_v2 = vrot.slane %v7566_v62, 7 }
 0x2ea   : > { %v1715_v49 = vadd.f32 %v1675_v50, %v1394_v61 }
 0x2eb   : > { %v2551_v51 = vsel %vm6771_vm8, %v2549_v11, %v2550_v2  ;;  %v2552_v32 = vrot.slane %v2550_v2, 2  ;;  %v2553_v41 = vrot.slane %v10248_v0, 7  ;;  %v2556_v25 = vrot.slane %v10247_v21, 7 }
 0x2ec   : > { %2866 = vst [vmem:[#allocation1 + $0x2] ss:$4 sm:$0xff] %v2551_v51  ;;  %1866 = vperm.xlu2 %6287, %v10383_v3   ;;  %v2036_v39 = vadd.f32 %v1996_v13, %v1715_v49  ;;  %v2559_v61 = vrot.slane %v10246_v15, 7 }
 0x2ed   : > { %v2554_v16 = vsel %vm6771_vm8, %v2552_v32, %v2553_v41  ;;  %v2555_v34 = vrot.slane %v2553_v41, 2  ;;  %v2558_v31 = vrot.slane %v2556_v25, 2  ;;  %1860 = vperm.xlu1 %6286, %v10383_v3  }
 0x2ee   : > { %2867 = vst [vmem:[#allocation1 + $0x3] ss:$4 sm:$0xff] %v2554_v16  ;;  %v2080_v6 = vadd.f32 %v7324_v18, %v2036_v39  ;;  %v1032_v16 = vmul.f32 %v6724_v38, %v7519_v53 }
 0x2ef   : > { %v2557_v50 = vsel %vm6771_vm8, %v2555_v34, %v2556_v25  ;;  %v2560_v11 = vsel %vm6771_vm8, %v2558_v31, %v2559_v61  ;;  %v1207_v39 = vpop.permute.xlu1 %1206  ;;  %v751_v34 = vmul.f32 %v6722_v37, %v7546_v59 }
 0x2f0   : > { %2868 = vst [vmem:[#allocation1 + $0x20] ss:$4 sm:$0xff] %v2557_v50  ;;  %v2120_v13 = vmax.f32 %v2080_v6, 0.0  ;;  %v1353_v31 = vmul.f32 %v6728_v40, %v1207_v39  ;;  %v2561_v39 = vrot.slane %v2559_v61, 2 }
 0x2f1   : > { %2869 = vst [vmem:[#allocation1 + $0x21] ss:$4 sm:$0xff] %v2560_v11  ;;  %v1072_v6 = vadd.f32 %v1032_v16, %v751_v34  ;;  %v10393_v11 = vld [vmem:[#allocation18_spill] sm:$0xff] }
 0x2f2   : > { %v7591_v2 = vsel %vm7173_vm15, %v2120_v13, 0.0  ;;  %v1995_v13 = vmul.f32 %v6739_v48, %v10393_v11 }
 0x2f3   : > { %10392 = vst [vmem:[#allocation3_spill] sm:$0xff] %v7591_v2  ;;  %v2574_v49 = vrot.slane %v7591_v2, 7  ;;  %v6048_v51 = vrot.slane %v7591_v2, 9 }
 0x2f4   : > { %6289 = vset.pattern.permute.xlu2 %v10377_v42 }
 0x2f5   : > { %v2872_v32 = vld.sshfl [vmem:[#allocation1] sm:$0xff pattern:$0x73625140]  ;;  %v2576_v41 = vrot.slane %v2574_v49, 2  ;;  %6288 = vset.pattern.permute.xlu1 %v6662_v22 }
 0x2f6   : > { %6071 = vmatmul.msk.f32.gmra.mxu0 %vm2964_vm14, %v2872_v32 }
 0x2f7   : > { %v2578_v25 = vsel %vm6771_vm8, %v2576_v41, %v6048_v51  ;;  %v1393_v51 = vadd.f32 %v1353_v31, %v1072_v6 }
 0x2f8   : > { %2877 = vst [vmem:[#allocation1 + $0x3] ss:$4 sm:$0xff] %v2578_v25 }
 0x2fc   : > { %1551 = vperm.xlu2 %6289, %v10383_v3  }
 0x2fd   : > { %915 = vperm.xlu1 %6288, %v10383_v3  }
 0x2ff   : > { %v1528_v50 = vpop.permute.xlu1 %1527 }
 0x300   : > { %v1674_v32 = vmul.f32 %v6737_v46, %v1528_v50 }
 0x302   : > { %v1714_v41 = vadd.f32 %v1674_v32, %v1393_v51 }
 0x304   : > { %v2035_v25 = vadd.f32 %v1995_v13, %v1714_v41  ;;  %6291 = vset.pattern.permute.xlu2 %v6671_v23 }
 0x305   : > { %6290 = vset.pattern.permute.xlu1 %v6674_v24 }
 0x306   : > { %v2079_v53 = vadd.f32 %v7324_v18, %v2035_v25 }
 0x308   : > { %v2119_v59 = vmax.f32 %v2079_v53, 0.0 }
 0x30a   : > { %v7615_v16 = vsel %vm6889_vm10, %v2119_v59, 0.0 }
 0x30b   : > { %10394 = vst [vmem:[#allocation12_spill] sm:$0xff] %v7615_v16  ;;  %v10251_v34 = vrot.slane %v7615_v16, 2  ;;  %v10250_v31 = vrot.slane %v7615_v16, 4  ;;  %v10249_v6 = vrot.slane %v7615_v16, 6  ;;  %v2562_v50 = vrot.slane %v7615_v16, 7 }
 0x30c   : > { %1872 = vperm.xlu2 %6291, %v10383_v3  }
 0x30d   : > { %v2563_v11 = vsel %vm6771_vm8, %v2561_v39, %v2562_v50  ;;  %v2564_v13 = vrot.slane %v2562_v50, 2  ;;  %v2565_v61 = vrot.slane %v10251_v34, 7  ;;  %v2568_v51 = vrot.slane %v10250_v31, 7  ;;  %1236 = vperm.xlu1 %6290, %v10383_v3  }
 0x30e   : > { %v2571_v32 = vrot.slane %v10249_v6, 7  ;;  %2870 = vst [vmem:[#allocation1 + $0x22] ss:$4 sm:$0xff] %v2563_v11  ;;  %v10395_v11 = vld [vmem:[#allocation9_spill] sm:$0xff] }
 0x30f   : > { %v2566_v41 = vsel %vm6771_vm8, %v2564_v13, %v2565_v61  ;;  %v2567_v25 = vrot.slane %v2565_v61, 2  ;;  %v2570_v53 = vrot.slane %v2568_v51, 2 }
 0x310   : > { %v2573_v59 = vrot.slane %v2571_v32, 2  ;;  %2871 = vst [vmem:[#allocation1 + $0x23] ss:$4 sm:$0xff] %v2566_v41 }
 0x311   : > { %v2569_v39 = vsel %vm6771_vm8, %v2567_v25, %v2568_v51  ;;  %v2572_v50 = vsel %vm6771_vm8, %v2570_v53, %v2571_v32  ;;  %v620_v51 = vpop.permute.xlu2 %619  ;;  %v10396_v25 = vld [vmem:[#allocation14_spill] sm:$0xff] }
 0x312   : > { %v2575_v15 = vsel %vm6771_vm8, %v2573_v59, %v2574_v49  ;;  %2874 = vst [vmem:[#allocation1] ss:$4 sm:$0xff] %v2569_v39  ;;  %v614_v49 = vpop.permute.xlu1 %613  ;;  %v6433_v39 = vld [vmem:[#allocation2] sm:$0xff]  ;;  %v754_v21 = vmul.f32 %v6722_v37, %v620_v51 }
 0x313   : > { %2875 = vst [vmem:[#allocation1 + $0x1] ss:$4 sm:$0xff] %v2572_v50  ;;  %v7653_v50 = vperm.slane %v6433_v39, 7 }
 0x314   : > { %2876 = vst [vmem:[#allocation1 + $0x2] ss:$4 sm:$0xff] %v2575_v15  ;;  %6295 = vset.pattern.permute.xlu2 %v6689_v27 }
 0x315   : > { %6294 = vset.pattern.permute.xlu1 %v10395_v11  ;;  %712 = vperm.xlu0 %6337, %v7653_v50  }
 0x317   : > { %v2873_v13 = vld.sshfl [vmem:[#allocation1 + $0x20] sm:$0xff pattern:$0x73625140] }
 0x318   : > { %6072 = vmatmul.msk.f32.gmra.mxu0 %vm2964_vm14, %v2873_v13 }
 0x319   : > { %v904_v15 = vpop.permute.xlu2 %903 }
 0x31a   : > { %v1035_v0 = vmul.f32 %v6724_v38, %v904_v15  ;;  %v753_v15 = vmul.f32 %v6722_v37, %v614_v49 }
 0x31b   : > { %v2882_v61 = vld.sshfl [vmem:[#allocation1] sm:$0xff pattern:$0x73625140] }
 0x31c   : > { %1557 = vperm.xlu2 %6295, %v10383_v3   ;;  %v1075_v6 = vadd.f32 %v1035_v0, %v754_v21 }
 0x31d   : > { %921 = vperm.xlu1 %6294, %v10383_v3   ;;  %6350 = vset.pattern.permute.xlu0 %v6614_v12 }
 0x31f   : > { %v898_v41 = vpop.permute.xlu1 %897 }
 0x320   : > { %6073 = vmatmul.msk.f32.gmra.mxu0 %vm2964_vm14, %v2882_v61  ;;  %v1034_v0 = vmul.f32 %v6724_v38, %v898_v41  ;;  %v10397_v41 = vld [vmem:[#allocation19_spill] sm:$0xff] }
 0x321   : > { %v1225_v32 = vpop.permute.xlu2 %1224 }
 0x322   : > { %v1356_v31 = vmul.f32 %v6728_v40, %v1225_v32  ;;  %v1074_v32 = vadd.f32 %v1034_v0, %v753_v15 }
 0x324   : > { %6297 = vset.pattern.permute.xlu2 %v6653_v20  ;;  %v1396_v2 = vadd.f32 %v1356_v31, %v1075_v6 }
 0x325   : > { %6296 = vset.pattern.permute.xlu1 %v6714_v33  ;;  %1314 = vperm.xlu0 %6350, %v7653_v50  }
 0x329   : > { %v910_v53 = vpop.permute.xlu2 %909 }
 0x32c   : > { %1878 = vperm.xlu2 %6297, %v10383_v3  }
 0x32d   : > { %1242 = vperm.xlu1 %6296, %v10383_v3   ;;  %6355 = vset.pattern.permute.xlu0 %v6582_v5 }
 0x32f   : > { %v1219_v59 = vpop.permute.xlu1 %1218 }
 0x330   : > { %v1355_v31 = vmul.f32 %v6728_v40, %v1219_v59 }
 0x332   : > { %v1395_v49 = vadd.f32 %v1355_v31, %v1074_v32 }
 0x334   : > { %6300 = vset.pattern.permute.xlu2 %v6602_v10 }
 0x335   : > { %6299 = vset.pattern.permute.xlu1 %v10381_v56  ;;  %718 = vperm.xlu0 %6355, %v7653_v50  }
 0x336   : > { %v1231_v61 = vpop.permute.xlu2 %1230 }
 0x337   : > { %v1357_v14 = vmul.f32 %v6728_v40, %v1231_v61 }
 0x33c   : > { %927 = vperm.xlu2 %6300, %v10396_v25  }
 0x33d   : > { %650 = vperm.xlu1 %6299, %v10396_v25   ;;  %6356 = vset.pattern.permute.xlu0 %v6662_v22 }
 0x33f   : > { %v626_v13 = vpop.permute.xlu1 %625 }
 0x340   : > { %v755_v15 = vmul.f32 %v6722_v37, %v626_v13 }
 0x344   : > { %6302 = vset.pattern.permute.xlu2 %v6735_v45 }
 0x345   : > { %6301 = vset.pattern.permute.xlu1 %v6579_v4  ;;  %945 = vperm.xlu0 %6356, %v10396_v25  }
 0x346   : > { %v1867_v39 = vpop.permute.xlu2 %1866 }
 0x347   : > { %v1998_v16 = vmul.f32 %v6739_v48, %v1867_v39  ;;  %v1676_v39 = vmul.f32 %v6737_v46, %v10397_v41 }
 0x34c   : > { %1563 = vperm.xlu2 %6302, %v10383_v3  }
 0x34d   : > { %933 = vperm.xlu1 %6301, %v10396_v25   ;;  %1005 = vperm.xlu0 %6356, %v7653_v50  }
 0x34f   : > { %v1546_v34 = vpop.permute.xlu1 %1545 }
 0x350   : > { %v1677_v62 = vmul.f32 %v6737_v46, %v1546_v34 }
 0x352   : > { %v1717_v35 = vadd.f32 %v1677_v62, %v1396_v2 }
 0x354   : > { %v2038_v51 = vadd.f32 %v1998_v16, %v1717_v35  ;;  %6305 = vset.pattern.permute.xlu2 %v7031_v57 }
 0x355   : > { %6304 = vset.pattern.permute.xlu1 %v6614_v12  ;;  %6361 = vset.pattern.permute.xlu0 %v6671_v23 }
 0x356   : > { %v2082_v21 = vadd.f32 %v7324_v18, %v2038_v51 }
 0x358   : > { %v2122_v6 = vmax.f32 %v2082_v21, 0.0  ;;  %v1036_v21 = vmul.f32 %v6724_v38, %v910_v53 }
 0x35a   : > { %v7675_v62 = vsel %vm6756_vm5, %v2122_v6, 0.0  ;;  %v1552_v6 = vpop.permute.xlu2 %1551  ;;  %v1076_v13 = vadd.f32 %v1036_v21, %v755_v15 }
 0x35b   : > { %v10260_v35 = vrot.slane %v7675_v62, 2  ;;  %v10261_v2 = vrot.slane %v7675_v62, 4  ;;  %v10268_v16 = vrot.slane %v7675_v62, 6  ;;  %v2590_v34 = vrot.slane %v7675_v62, 7 }
 0x35c   : > { %1884 = vperm.xlu2 %6305, %v10383_v3  }
 0x35d   : > { %v2592_v59 = vrot.slane %v2590_v34, 2  ;;  %v2593_v51 = vrot.slane %v10260_v35, 7  ;;  %v2596_v0 = vrot.slane %v10261_v2, 7  ;;  %1254 = vperm.xlu1 %6304, %v10396_v25   ;;  %v2599_v41 = vrot.slane %v10268_v16, 7 }
 0x35e   : > { %v1716_v2 = vadd.f32 %v1676_v39, %v1395_v49 }
 0x35f   : > { %v2594_v31 = vsel %vm6771_vm8, %v2592_v59, %v2593_v51  ;;  %v2595_v3 = vrot.slane %v2593_v51, 2  ;;  %v2598_v32 = vrot.slane %v2596_v0, 2  ;;  %v1861_v35 = vpop.permute.xlu1 %1860  ;;  %v1678_v51 = vmul.f32 %v6737_v46, %v1552_v6 }
 0x360   : > { %2884 = vst [vmem:[#allocation1] ss:$4 sm:$0xff] %v2594_v31  ;;  %v1997_v7 = vmul.f32 %v6739_v48, %v1861_v35  ;;  %v1397_v35 = vadd.f32 %v1357_v14, %v1076_v13 }
 0x361   : > { %v2597_v43 = vsel %vm6771_vm8, %v2595_v3, %v2596_v0  ;;  %v2600_v53 = vsel %vm6771_vm8, %v2598_v32, %v2599_v41 }
 0x362   : > { %2885 = vst [vmem:[#allocation1 + $0x1] ss:$4 sm:$0xff] %v2597_v43  ;;  %v2037_v59 = vadd.f32 %v1997_v7, %v1716_v2  ;;  %v1718_v21 = vadd.f32 %v1678_v51, %v1397_v35 }
 0x363   : > { %2886 = vst [vmem:[#allocation1 + $0x2] ss:$4 sm:$0xff] %v2600_v53 }
 0x364   : > { %v2081_v16 = vadd.f32 %v7324_v18, %v2037_v59  ;;  %6307 = vset.pattern.permute.xlu2 %v10378_v9 }
 0x365   : > { %6306 = vset.pattern.permute.xlu1 %v6596_v8 }
 0x366   : > { %v2121_v39 = vmax.f32 %v2081_v16, 0.0  ;;  %v1873_v49 = vpop.permute.xlu2 %1872 }
 0x367   : > { %v1999_v0 = vmul.f32 %v6739_v48, %v1873_v49 }
 0x368   : > { %v7710_v43 = vsel %vm6914_vm13, %v2121_v39, 0.0 }
 0x369   : > { %v10274_v7 = vrot.slane %v7710_v43, 2  ;;  %v10273_v61 = vrot.slane %v7710_v43, 4  ;;  %v10272_v2 = vrot.slane %v7710_v43, 6  ;;  %v2039_v15 = vadd.f32 %v1999_v0, %v1718_v21 }
 0x36a   : > { %v6049_v6 = vrot.slane %v7710_v43, 9  ;;  %v2601_v21 = vrot.slane %v2599_v41, 2 }
 0x36b   : > { %v2581_v14 = vrot.slane %v10274_v7, 7  ;;  %v2584_v16 = vrot.slane %v10273_v61, 7  ;;  %v2587_v31 = vrot.slane %v10272_v2, 7  ;;  %v2083_v3 = vadd.f32 %v7324_v18, %v2039_v15  ;;  %v7826_v7 = vld [vmem:[%s6530_s18] ss:$0 sm:$0xff] }
 0x36c   : > { %1575 = vperm.xlu2 %6307, %v10396_v25  }
 0x36d   : > { %v2582_v32 = vsel %vm6771_vm8, %v6049_v6, %v2581_v14  ;;  %v2583_v53 = vrot.slane %v2581_v14, 2  ;;  %v2586_v13 = vrot.slane %v2584_v16, 2  ;;  %v2589_v59 = vrot.slane %v2587_v31, 2  ;;  %1569 = vperm.xlu1 %6306, %v10396_v25  }
 0x36e   : > { %2878 = vst [vmem:[#allocation1 + $0x20] ss:$4 sm:$0xff] %v2582_v32  ;;  %v2123_v51 = vmax.f32 %v2083_v3, 0.0 }
 0x36f   : > { %v2585_v35 = vsel %vm6771_vm8, %v2583_v53, %v2584_v16  ;;  %v2588_v39 = vsel %vm6771_vm8, %v2586_v13, %v2587_v31  ;;  %v2591_v49 = vsel %vm6771_vm8, %v2589_v59, %v2590_v34  ;;  %v916_v59 = vpop.permute.xlu1 %915 }
 0x370   : > { %2879 = vst [vmem:[#allocation1 + $0x21] ss:$4 sm:$0xff] %v2585_v35  ;;  %v7736_v0 = vsel %vm6815_vm9, %v2123_v51, 0.0 }
 0x371   : > { %10398 = vst [vmem:[#allocation4_spill] sm:$0xff] %v7736_v0  ;;  %v10271_v15 = vrot.slane %v7736_v0, 2  ;;  %v10270_v6 = vrot.slane %v7736_v0, 4  ;;  %v2602_v14 = vrot.slane %v7736_v0, 7  ;;  %v10269_v16 = vrot.slane %v7736_v0, 6 }
 0x372   : > { %2880 = vst [vmem:[#allocation1 + $0x22] ss:$4 sm:$0xff] %v2588_v39 }
 0x373   : > { %2881 = vst [vmem:[#allocation1 + $0x23] ss:$4 sm:$0xff] %v2591_v49  ;;  %v2603_v31 = vsel %vm6771_vm8, %v2601_v21, %v2602_v14  ;;  %v2605_v34 = vrot.slane %v10271_v15, 7  ;;  %v2608_v3 = vrot.slane %v10270_v6, 7  ;;  %v2604_v41 = vrot.slane %v2602_v14, 2  ;;  %v10399_v14 = vld [vmem:[#allocation20_spill] sm:$0xff] }
 0x374   : > { %2887 = vst [vmem:[#allocation1 + $0x3] ss:$4 sm:$0xff] %v2603_v31  ;;  %6309 = vset.pattern.permute.xlu2 %v6582_v5  ;;  %v2611_v13 = vrot.slane %v10269_v16, 7  ;;  %v756_v31 = vmul.f32 %v6722_v37, %v10399_v14 }
 0x375   : > { %v2607_v32 = vrot.slane %v2605_v34, 2  ;;  %v2610_v53 = vrot.slane %v2608_v3, 2  ;;  %6308 = vset.pattern.permute.xlu1 %v10390_v55  ;;  %v2606_v39 = vsel %vm6771_vm8, %v2604_v41, %v2605_v34 }
 0x376   : > { %v1558_v21 = vpop.permute.xlu2 %1557 }
 0x377   : > { %v2609_v51 = vsel %vm6771_vm8, %v2607_v32, %v2608_v3  ;;  %v2612_v49 = vsel %vm6771_vm8, %v2610_v53, %v2611_v13  ;;  %v1037_v3 = vmul.f32 %v6724_v38, %v916_v59 }
 0x379   : > { %v1077_v53 = vadd.f32 %v1037_v3, %v756_v31  ;;  %v2613_v3 = vrot.slane %v2611_v13, 2 }
 0x37a   : > { %v2883_v35 = vld.sshfl [vmem:[#allocation1 + $0x20] sm:$0xff pattern:$0x73625140] }
 0x37b   : > { %2888 = vst [vmem:[#allocation1 + $0x20] ss:$4 sm:$0xff] %v2606_v39  ;;  %6074 = vmatmul.msk.f32.gmra.mxu0 %vm2964_vm14, %v2883_v35  ;;  %v2892_v32 = vld.sshfl [vmem:[#allocation1] sm:$0xff pattern:$0x73625140] }
 0x37c   : > { %2889 = vst [vmem:[#allocation1 + $0x21] ss:$4 sm:$0xff] %v2609_v51  ;;  %656 = vperm.xlu2 %6309, %v10396_v25   ;;  %v1679_v51 = vmul.f32 %v6737_v46, %v1558_v21  ;;  %v10400_v21 = vld [vmem:[#allocation22_spill] sm:$0xff] }
 0x37d   : > { %2890 = vst [vmem:[#allocation1 + $0x22] ss:$4 sm:$0xff] %v2612_v49  ;;  %1896 = vperm.xlu1 %6308, %v10396_v25   ;;  %1932 = vperm.xlu0 %6361, %v10400_v21  }
 0x37f   : > { %v1237_v34 = vpop.permute.xlu1 %1236 }
 0x380   : > { %v1358_v41 = vmul.f32 %v6728_v40, %v1237_v34 }
 0x382   : > { %v1398_v35 = vadd.f32 %v1358_v41, %v1077_v53 }
 0x383   : > { %6075 = vmatmul.msk.f32.gmra.mxu0 %vm2964_vm14, %v2892_v32 }
 0x384   : > { %6311 = vset.pattern.permute.xlu2 %v10386_v52  ;;  %v1719_v39 = vadd.f32 %v1679_v51, %v1398_v35 }
 0x385   : > { %6310 = vset.pattern.permute.xlu1 %v6683_v26  ;;  %1962 = vperm.xlu0 %6361, %v7653_v50  }
 0x386   : > { %v1879_v59 = vpop.permute.xlu2 %1878 }
 0x387   : > { %v2000_v49 = vmul.f32 %v6739_v48, %v1879_v59 }
 0x389   : > { %v2040_v14 = vadd.f32 %v2000_v49, %v1719_v39 }
 0x38b   : > { %v2084_v34 = vadd.f32 %v7324_v18, %v2040_v14 }
 0x38c   : > { %939 = vperm.xlu2 %6311, %v10396_v25  }
 0x38d   : > { %v2124_v31 = vmax.f32 %v2084_v34, 0.0  ;;  %662 = vperm.xlu1 %6310, %v10396_v25   ;;  %6370 = vset.pattern.permute.xlu0 %v6735_v45 }
 0x38f   : > { %v7779_v41 = vsel %vm6889_vm10, %v2124_v31, 0.0 }
 0x390   : > { %v10283_v23 = vrot.slane %v7779_v41, 2  ;;  %v10282_v32 = vrot.slane %v7779_v41, 4  ;;  %v10275_v53 = vrot.slane %v7779_v41, 6  ;;  %v2614_v18 = vrot.slane %v7779_v41, 7 }
 0x392   : > { %v2615_v51 = vsel %vm6771_vm8, %v2613_v3, %v2614_v18  ;;  %v2616_v35 = vrot.slane %v2614_v18, 2  ;;  %v2617_v59 = vrot.slane %v10283_v23, 7  ;;  %v2620_v13 = vrot.slane %v10282_v32, 7 }
 0x393   : > { %2891 = vst [vmem:[#allocation1 + $0x23] ss:$4 sm:$0xff] %v2615_v51  ;;  %v2623_v34 = vrot.slane %v10275_v53, 7 }
 0x394   : > { %v2618_v39 = vsel %vm6771_vm8, %v2616_v35, %v2617_v59  ;;  %v2619_v49 = vrot.slane %v2617_v59, 2  ;;  %v2622_v14 = vrot.slane %v2620_v13, 2  ;;  %6313 = vset.pattern.permute.xlu2 %v6674_v24  ;;  %v10401_v35 = vld [vmem:[#allocation26_spill] sm:$0xff] }
 0x395   : > { %2894 = vst [vmem:[#allocation1] ss:$4 sm:$0xff] %v2618_v39  ;;  %6312 = vset.pattern.permute.xlu1 %v6647_v19  ;;  %v758_v59 = vmul.f32 %v6722_v37, %v10401_v35  ;;  %v10402_v39 = vld [vmem:[#allocation28_spill] sm:$0xff]  ;;  %1653 = vperm.xlu0 %6370, %v7653_v50   ;;  %v10403_v35 = vld [vmem:[#allocation21_spill] sm:$0xff] }
 0x396   : > { %v2621_v31 = vsel %vm6771_vm8, %v2619_v49, %v2620_v13  ;;  %v2624_v3 = vsel %vm6771_vm8, %v2622_v14, %v2623_v34  ;;  %v928_v51 = vpop.permute.xlu2 %927  ;;  %v1360_v49 = vmul.f32 %v6728_v40, %v10402_v39 }
 0x397   : > { %2895 = vst [vmem:[#allocation1 + $0x1] ss:$4 sm:$0xff] %v2621_v31  ;;  %v1039_v13 = vmul.f32 %v6724_v38, %v928_v51  ;;  %v922_v31 = vpop.permute.xlu1 %921 }
 0x398   : > { %2896 = vst [vmem:[#allocation1 + $0x2] ss:$4 sm:$0xff] %v2624_v3 }
 0x399   : > { %v1079_v14 = vadd.f32 %v1039_v13, %v758_v59  ;;  %v757_v59 = vmul.f32 %v6722_v37, %v10403_v35  ;;  %v1038_v13 = vmul.f32 %v6724_v38, %v922_v31 }
 0x39a   : > { %v2893_v18 = vld.sshfl [vmem:[#allocation1 + $0x20] sm:$0xff pattern:$0x73625140] }
 0x39b   : > { %6076 = vmatmul.msk.f32.gmra.mxu0 %vm2964_vm14, %v2893_v18  ;;  %v1400_v3 = vadd.f32 %v1360_v49, %v1079_v14  ;;  %v1078_v16 = vadd.f32 %v1038_v13, %v757_v59 }
 0x39c   : > { %1266 = vperm.xlu2 %6313, %v10396_v25  }
 0x39d   : > { %1260 = vperm.xlu1 %6312, %v10396_v25   ;;  %6427 = vset.pattern.permute.xlu0 %v7031_v57 }
 0x39f   : > { %v1243_v18 = vpop.permute.xlu1 %1242 }
 0x3a0   : > { %v1359_v39 = vmul.f32 %v6728_v40, %v1243_v18 }
 0x3a2   : > { %v1399_v49 = vadd.f32 %v1359_v39, %v1078_v16  ;;  %v2625_v16 = vrot.slane %v2623_v34, 2 }
 0x3a4   : > { %6315 = vset.pattern.permute.xlu2 %v6689_v27 }
 0x3a5   : > { %6314 = vset.pattern.permute.xlu1 %v10377_v42 }
 0x3a6   : > { %v1564_v51 = vpop.permute.xlu2 %1563 }
 0x3a7   : > { %v1680_v6 = vmul.f32 %v6737_v46, %v1564_v51 }
 0x3a9   : > { %v1720_v15 = vadd.f32 %v1680_v6, %v1399_v49 }
 0x3ac   : > { %1587 = vperm.xlu2 %6315, %v10396_v25  }
 0x3ad   : > { %1581 = vperm.xlu1 %6314, %v10396_v25  }
 0x3af   : > { %v651_v59 = vpop.permute.xlu1 %650 }
 0x3b4   : > { %6318 = vset.pattern.permute.xlu2 %v10382_v36 }
 0x3b5   : > { %6317 = vset.pattern.permute.xlu1 %v6653_v20 }
 0x3b6   : > { %v1885_v14 = vpop.permute.xlu2 %1884 }
 0x3b7   : > { %v2001_v2 = vmul.f32 %v6739_v48, %v1885_v14 }
 0x3b9   : > { %v2041_v61 = vadd.f32 %v2001_v2, %v1720_v15 }
 0x3bb   : > { %v2085_v35 = vadd.f32 %v7826_v7, %v2041_v61 }
 0x3bc   : > { %675 = vperm.xlu2 %6318, %v10400_v21  }
 0x3bd   : > { %v2125_v31 = vmax.f32 %v2085_v35, 0.0  ;;  %1908 = vperm.xlu1 %6317, %v10396_v25  }
 0x3bf   : > { %v7833_v18 = vsel %vm7173_vm15, %v2125_v31, 0.0  ;;  %v934_v34 = vpop.permute.xlu1 %933 }
 0x3c0   : > { %10404 = vst [vmem:[#allocation7_spill] sm:$0xff] %v7833_v18  ;;  %v2626_v51 = vrot.slane %v7833_v18, 7  ;;  %v6050_v15 = vrot.slane %v7833_v18, 9 }
 0x3c2   : > { %v2627_v6 = vsel %vm6771_vm8, %v2625_v16, %v2626_v51  ;;  %v2628_v2 = vrot.slane %v2626_v51, 2  ;;  %v1040_v51 = vmul.f32 %v6724_v38, %v934_v34 }
 0x3c3   : > { %2897 = vst [vmem:[#allocation1 + $0x3] ss:$4 sm:$0xff] %v2627_v6 }
 0x3c4   : > { %v2630_v61 = vsel %vm6771_vm8, %v2628_v2, %v6050_v15  ;;  %6320 = vset.pattern.permute.xlu2 %v6602_v10  ;;  %v759_v2 = vmul.f32 %v6722_v37, %v651_v59 }
 0x3c5   : > { %2898 = vst [vmem:[#allocation1 + $0x20] ss:$4 sm:$0xff] %v2630_v61  ;;  %6319 = vset.pattern.permute.xlu1 %v10381_v56  ;;  %v10405_v56 = vld [vmem:[#allocation30_spill] sm:$0xff] }
 0x3c6   : > { %v2002_v14 = vmul.f32 %v6739_v48, %v10405_v56  ;;  %v1080_v53 = vadd.f32 %v1040_v51, %v759_v2 }
 0x3ca   : > { %v2902_v13 = vld.sshfl [vmem:[#allocation1] sm:$0xff pattern:$0x73625140] }
 0x3cb   : > { %6077 = vmatmul.msk.f32.gmra.mxu0 %vm2964_vm14, %v2902_v13  ;;  %v1576_v13 = vpop.permute.xlu2 %1575 }
 0x3cc   : > { %957 = vperm.xlu2 %6320, %v10400_v21  }
 0x3cd   : > { %681 = vperm.xlu1 %6319, %v10400_v21  }
 0x3cf   : > { %v1255_v39 = vpop.permute.xlu1 %1254 }
 0x3d0   : > { %v1361_v15 = vmul.f32 %v6728_v40, %v1255_v39 }
 0x3d2   : > { %v1401_v34 = vadd.f32 %v1361_v15, %v1080_v53 }
 0x3d4   : > { %6324 = vset.pattern.permute.xlu2 %v10395_v11 }
 0x3d5   : > { %6323 = vset.pattern.permute.xlu1 %v6701_v30 }
 0x3dc   : > { %951 = vperm.xlu2 %6324, %v10396_v25  }
 0x3dd   : > { %668 = vperm.xlu1 %6323, %v10396_v25  }
 0x3df   : > { %v1570_v49 = vpop.permute.xlu1 %1569 }
 0x3e0   : > { %v1681_v35 = vmul.f32 %v6737_v46, %v1570_v49 }
 0x3e2   : > { %v1721_v31 = vadd.f32 %v1681_v35, %v1400_v3 }
 0x3e4   : > { %v2042_v16 = vadd.f32 %v2002_v14, %v1721_v31  ;;  %6326 = vset.pattern.permute.xlu2 %v6614_v12  ;;  %v1682_v14 = vmul.f32 %v6737_v46, %v1576_v13 }
 0x3e5   : > { %6325 = vset.pattern.permute.xlu1 %v10385_v17 }
 0x3e6   : > { %v2086_v6 = vadd.f32 %v7826_v7, %v2042_v16  ;;  %v1722_v2 = vadd.f32 %v1682_v14, %v1401_v34 }
 0x3e8   : > { %v2126_v61 = vmax.f32 %v2086_v6, 0.0 }
 0x3ea   : > { %v7861_v49 = vsel %vm6914_vm13, %v2126_v61, 0.0 }
 0x3eb   : > { %v10278_v3 = vrot.slane %v7861_v49, 2  ;;  %v10276_v12 = vrot.slane %v7861_v49, 4  ;;  %v10281_v56 = vrot.slane %v7861_v49, 6  ;;  %v6051_v59 = vrot.slane %v7861_v49, 9 }
 0x3ec   : > { %1284 = vperm.xlu2 %6326, %v10400_v21  }
 0x3ed   : > { %v2633_v39 = vrot.slane %v10278_v3, 7  ;;  %v2636_v35 = vrot.slane %v10276_v12, 7  ;;  %1278 = vperm.xlu1 %6325, %v10400_v21   ;;  %v2639_v53 = vrot.slane %v10281_v56, 7 }
 0x3ef   : > { %v2634_v31 = vsel %vm6771_vm8, %v6051_v59, %v2633_v39  ;;  %v2635_v16 = vrot.slane %v2633_v39, 2  ;;  %v2638_v51 = vrot.slane %v2636_v35, 2  ;;  %v1897_v6 = vpop.permute.xlu1 %1896  ;;  %v2641_v34 = vrot.slane %v2639_v53, 2 }
 0x3f0   : > { %2899 = vst [vmem:[#allocation1 + $0x21] ss:$4 sm:$0xff] %v2634_v31  ;;  %v2003_v15 = vmul.f32 %v6739_v48, %v1897_v6 }
 0x3f1   : > { %v2637_v61 = vsel %vm6771_vm8, %v2635_v16, %v2636_v35  ;;  %v2640_v13 = vsel %vm6771_vm8, %v2638_v51, %v2639_v53 }
 0x3f2   : > { %2900 = vst [vmem:[#allocation1 + $0x22] ss:$4 sm:$0xff] %v2637_v61  ;;  %v2043_v12 = vadd.f32 %v2003_v15, %v1722_v2 }
 0x3f3   : > { %2901 = vst [vmem:[#allocation1 + $0x23] ss:$4 sm:$0xff] %v2640_v13 }
 0x3f4   : > { %v2087_v59 = vadd.f32 %v7826_v7, %v2043_v12  ;;  %6329 = vset.pattern.permute.xlu2 %v10378_v9 }
 0x3f5   : > { %6328 = vset.pattern.permute.xlu1 %v6596_v8 }
 0x3f6   : > { %v2127_v39 = vmax.f32 %v2087_v59, 0.0 }
 0x3f8   : > { %v7888_v14 = vsel %vm6756_vm5, %v2127_v39, 0.0 }
 0x3f9   : > { %v10280_v35 = vrot.slane %v7888_v14, 2  ;;  %v10279_v31 = vrot.slane %v7888_v14, 4  ;;  %v10277_v16 = vrot.slane %v7888_v14, 6  ;;  %v2642_v51 = vrot.slane %v7888_v14, 7 }
 0x3fa   : > { %v2903_v6 = vld.sshfl [vmem:[#allocation1 + $0x20] sm:$0xff pattern:$0x73625140] }
 0x3fb   : > { %v2643_v12 = vsel %vm6771_vm8, %v2641_v34, %v2642_v51  ;;  %v2644_v2 = vrot.slane %v2642_v51, 2  ;;  %v2645_v53 = vrot.slane %v10280_v35, 7  ;;  %v2648_v15 = vrot.slane %v10279_v31, 7  ;;  %6078 = vmatmul.msk.f32.gmra.mxu0 %vm2964_vm14, %v2903_v6  ;;  %v7912_v6 = vpop.permute.xlu0 %712  ;;  %v10406_v31 = vld [vmem:[#allocation31_spill] sm:$0xff] }
 0x3fc   : > { %2904 = vst [vmem:[#allocation1] ss:$4 sm:$0xff] %v2643_v12  ;;  %1605 = vperm.xlu2 %6329, %v10400_v21   ;;  %v2651_v39 = vrot.slane %v10277_v16, 7  ;;  %v2004_v35 = vmul.f32 %v6739_v48, %v10406_v31 }
 0x3fd   : > { %v2646_v61 = vsel %vm6771_vm8, %v2644_v2, %v2645_v53  ;;  %v2647_v13 = vrot.slane %v2645_v53, 2  ;;  %v2650_v59 = vrot.slane %v2648_v15, 2  ;;  %1599 = vperm.xlu1 %6328, %v10400_v21   ;;  %v657_v2 = vpop.permute.xlu2 %656 }
 0x3fe   : > { %2905 = vst [vmem:[#allocation1 + $0x1] ss:$4 sm:$0xff] %v2646_v61  ;;  %v2653_v0 = vrot.slane %v2651_v39, 2 }
 0x3ff   : > { %v2649_v34 = vsel %vm6771_vm8, %v2647_v13, %v2648_v15  ;;  %v2652_v51 = vsel %vm6771_vm8, %v2650_v59, %v2651_v39  ;;  %v663_v15 = vpop.permute.xlu1 %662 }
 0x400   : > { %2906 = vst [vmem:[#allocation1 + $0x2] ss:$4 sm:$0xff] %v2649_v34  ;;  %v760_v34 = vmul.f32 %v6722_v37, %v657_v2 }
 0x401   : > { %2907 = vst [vmem:[#allocation1 + $0x3] ss:$4 sm:$0xff] %v2652_v51 }
 0x403   : > { %v7918_v53 = vpop.permute.xlu0 %1314 }
 0x404   : > { %6331 = vset.pattern.permute.xlu2 %v10372_v28 }
 0x405   : > { %6330 = vset.pattern.permute.xlu1 %v6735_v45  ;;  %v940_v61 = vpop.permute.xlu2 %939 }
 0x406   : > { %v1041_v51 = vmul.f32 %v6724_v38, %v940_v61 }
 0x408   : > { %v2912_v12 = vld.sshfl [vmem:[#allocation1] sm:$0xff pattern:$0x73625140] }
 0x409   : > { %6079 = vmatmul.msk.f32.gmra.mxu0 %vm2964_vm14, %v2912_v12 }
 0x40b   : > { %v7922_v59 = vpop.permute.xlu0 %718 }
 0x40c   : > { %1920 = vperm.xlu2 %6331, %v10400_v21  }
 0x40d   : > { %1593 = vperm.xlu1 %6330, %v10396_v25   ;;  %v1081_v25 = vadd.f32 %v1041_v51, %v760_v34  ;;  %v1267_v16 = vpop.permute.xlu2 %1266 }
 0x40e   : > { %v1363_v31 = vmul.f32 %v6728_v40, %v1267_v16 }
 0x40f   : > { %v1261_v13 = vpop.permute.xlu1 %1260 }
 0x410   : > { %v1362_v12 = vmul.f32 %v6728_v40, %v1261_v13  ;;  %v761_v13 = vmul.f32 %v6722_v37, %v663_v15 }
 0x413   : > { %v946_v23 = vpop.permute.xlu0 %945 }
 0x414   : > { %6334 = vset.pattern.permute.xlu2 %v6683_v26  ;;  %v1042_v61 = vmul.f32 %v6724_v38, %v946_v23 }
 0x415   : > { %6333 = vset.pattern.permute.xlu1 %v6582_v5  ;;  %v1402_v5 = vadd.f32 %v1362_v12, %v1081_v25  ;;  %v1588_v51 = vpop.permute.xlu2 %1587 }
 0x416   : > { %v1082_v12 = vadd.f32 %v1042_v61, %v761_v13 }
 0x418   : > { %v1403_v25 = vadd.f32 %v1363_v31, %v1082_v12 }
 0x41c   : > { %693 = vperm.xlu2 %6334, %v10400_v21  }
 0x41d   : > { %687 = vperm.xlu1 %6333, %v10400_v21  }
 0x41f   : > { %v1582_v3 = vpop.permute.xlu1 %1581 }
 0x420   : > { %v1683_v56 = vmul.f32 %v6737_v46, %v1582_v3 }
 0x422   : > { %v1723_v32 = vadd.f32 %v1683_v56, %v1402_v5 }
 0x424   : > { %v2044_v2 = vadd.f32 %v2004_v35, %v1723_v32  ;;  %6336 = vset.pattern.permute.xlu2 %v6662_v22  ;;  %v1684_v35 = vmul.f32 %v6737_v46, %v1588_v51  ;;  %v7959_v51 = vpop.permute.xlu2 %675 }
 0x425   : > { %6335 = vset.pattern.permute.xlu1 %v10386_v52 }
 0x426   : > { %v2088_v34 = vadd.f32 %v7826_v7, %v2044_v2 }
 0x428   : > { %v2128_v18 = vmax.f32 %v2088_v34, 0.0  ;;  %v1724_v34 = vadd.f32 %v1684_v35, %v1403_v25 }
 0x42a   : > { %v7940_v3 = vsel %vm6815_vm9, %v2128_v18, 0.0 }
 0x42b   : > { %v10290_v22 = vrot.slane %v7940_v3, 2  ;;  %v10288_v32 = vrot.slane %v7940_v3, 4  ;;  %v10293_v23 = vrot.slane %v7940_v3, 6  ;;  %v2654_v56 = vrot.slane %v7940_v3, 7 }
 0x42c   : > { %975 = vperm.xlu2 %6336, %v10400_v21  }
 0x42d   : > { %v2655_v16 = vsel %vm6771_vm8, %v2653_v0, %v2654_v56  ;;  %v2656_v39 = vrot.slane %v2654_v56, 2  ;;  %v2657_v18 = vrot.slane %v10290_v22, 7  ;;  %v2660_v15 = vrot.slane %v10288_v32, 7  ;;  %969 = vperm.xlu1 %6335, %v10400_v21  }
 0x42e   : > { %2908 = vst [vmem:[#allocation1 + $0x20] ss:$4 sm:$0xff] %v2655_v16  ;;  %v2663_v13 = vrot.slane %v10293_v23, 7 }
 0x42f   : > { %v2658_v5 = vsel %vm6771_vm8, %v2656_v39, %v2657_v18  ;;  %v2659_v2 = vrot.slane %v2657_v18, 2  ;;  %v2662_v61 = vrot.slane %v2660_v15, 2  ;;  %v1909_v0 = vpop.permute.xlu1 %1908 }
 0x430   : > { %2909 = vst [vmem:[#allocation1 + $0x21] ss:$4 sm:$0xff] %v2658_v5  ;;  %v2005_v56 = vmul.f32 %v6739_v48, %v1909_v0  ;;  %v2665_v39 = vrot.slane %v2663_v13, 2 }
 0x431   : > { %v2661_v32 = vsel %vm6771_vm8, %v2659_v2, %v2660_v15  ;;  %v2664_v31 = vsel %vm6771_vm8, %v2662_v61, %v2663_v13  ;;  %v958_v61 = vpop.permute.xlu2 %957 }
 0x432   : > { %2910 = vst [vmem:[#allocation1 + $0x22] ss:$4 sm:$0xff] %v2661_v32  ;;  %v2045_v12 = vadd.f32 %v2005_v56, %v1724_v34 }
 0x433   : > { %2911 = vst [vmem:[#allocation1 + $0x23] ss:$4 sm:$0xff] %v2664_v31 }
 0x434   : > { %v2089_v16 = vadd.f32 %v7826_v7, %v2045_v12  ;;  %6339 = vset.pattern.permute.xlu2 %v6674_v24 }
 0x435   : > { %6338 = vset.pattern.permute.xlu1 %v6647_v19 }
 0x436   : > { %v2129_v35 = vmax.f32 %v2089_v16, 0.0 }
 0x438   : > { %v7971_v18 = vsel %vm6889_vm10, %v2129_v35, 0.0 }
 0x439   : > { %10407 = vst [vmem:[#allocation15_spill] sm:$0xff] %v7971_v18  ;;  %v10292_v15 = vrot.slane %v7971_v18, 2  ;;  %v10291_v25 = vrot.slane %v7971_v18, 4  ;;  %v10289_v32 = vrot.slane %v7971_v18, 6  ;;  %v2666_v5 = vrot.slane %v7971_v18, 7 }
 0x43a   : > { %v2913_v2 = vld.sshfl [vmem:[#allocation1 + $0x20] sm:$0xff pattern:$0x73625140] }
 0x43b   : > { %v2667_v0 = vsel %vm6771_vm8, %v2665_v39, %v2666_v5  ;;  %v2668_v34 = vrot.slane %v2666_v5, 2  ;;  %v2669_v13 = vrot.slane %v10292_v15, 7  ;;  %v2672_v56 = vrot.slane %v10291_v25, 7  ;;  %6080 = vmatmul.msk.f32.gmra.mxu0 %vm2964_vm14, %v2913_v2  ;;  %v952_v2 = vpop.permute.xlu2 %951 }
 0x43c   : > { %2914 = vst [vmem:[#allocation1] ss:$4 sm:$0xff] %v2667_v0  ;;  %1296 = vperm.xlu2 %6339, %v10400_v21   ;;  %v7989_v35 = vrot.slane %v10289_v32, 7 }
 0x43d   : > { %v2670_v31 = vsel %vm6771_vm8, %v2668_v34, %v2669_v13  ;;  %v2671_v12 = vrot.slane %v2669_v13, 2  ;;  %v2674_v16 = vrot.slane %v2672_v56, 2  ;;  %1290 = vperm.xlu1 %6338, %v10400_v21   ;;  %v7999_v34 = vpop.f32.mrf.mxu0 }
 0x43e   : > { %2915 = vst [vmem:[#allocation1 + $0x1] ss:$4 sm:$0xff] %v2670_v31  ;;  %v10409_v31 = vld [vmem:[#allocation32_spill] sm:$0xff] }
 0x43f   : > { %v2673_v39 = vsel %vm6771_vm8, %v2671_v12, %v2672_v56  ;;  %v2676_v5 = vsel %vm6771_vm8, %v2674_v16, %v7989_v35  ;;  %10408 = vst [vmem:[#allocation17_spill] sm:$0xff] %v7999_v34  ;;  %v682_v13 = vpop.permute.xlu1 %681  ;;  %v1045_v12 = vmul.f32 %v6724_v38, %v10409_v31 }
 0x440   : > { %2916 = vst [vmem:[#allocation1 + $0x2] ss:$4 sm:$0xff] %v2673_v39  ;;  %v764_v16 = vmul.f32 %v6722_v37, %v682_v13 }
 0x441   : > { %2917 = vst [vmem:[#allocation1 + $0x3] ss:$4 sm:$0xff] %v2676_v5 }
 0x442   : > { %v1085_v5 = vadd.f32 %v1045_v12, %v764_v16 }
 0x444   : > { %6341 = vset.pattern.permute.xlu2 %v6689_v27 }
 0x445   : > { %6340 = vset.pattern.permute.xlu1 %v10377_v42 }
 0x446   : > { %v1285_v56 = vpop.permute.xlu2 %1284 }
 0x447   : > { %v1366_v39 = vmul.f32 %v6728_v40, %v1285_v56 }
 0x448   : > { %v2922_v0 = vld.sshfl [vmem:[#allocation1] sm:$0xff pattern:$0x73625140] }
 0x449   : > { %6081 = vmatmul.msk.f32.gmra.mxu0 %vm2964_vm14, %v2922_v0  ;;  %v10410_v0 = vld [vmem:[#allocation34_spill] sm:$0xff]  ;;  %v1406_v25 = vadd.f32 %v1366_v39, %v1085_v5 }
 0x44a   : > { %v2008_v22 = vmul.f32 %v6739_v48, %v10410_v0  ;;  %v763_v0 = vmul.f32 %v6722_v37, %v7959_v51 }
 0x44c   : > { %1617 = vperm.xlu2 %6341, %v10400_v21  }
 0x44d   : > { %1611 = vperm.xlu1 %6340, %v10400_v21  }
 0x44f   : > { %v669_v56 = vpop.permute.xlu1 %668 }
 0x454   : > { %6343 = vset.pattern.permute.xlu2 %v10382_v36 }
 0x455   : > { %6342 = vset.pattern.permute.xlu1 %v6653_v20 }
 0x456   : > { %v1606_v32 = vpop.permute.xlu2 %1605 }
 0x457   : > { %v1687_v15 = vmul.f32 %v6737_v46, %v1606_v32 }
 0x459   : > { %v1727_v23 = vadd.f32 %v1687_v15, %v1406_v25 }
 0x45b   : > { %v2048_v34 = vadd.f32 %v2008_v22, %v1727_v23 }
 0x45c   : > { %706 = vperm.xlu2 %6343, %v7653_v50  }
 0x45d   : > { %v2092_v13 = vadd.f32 %v7826_v7, %v2048_v34  ;;  %1938 = vperm.xlu1 %6342, %v10400_v21  }
 0x45f   : > { %v2132_v36 = vmax.f32 %v2092_v13, 0.0  ;;  %v1279_v39 = vpop.permute.xlu1 %1278 }
 0x460   : > { %v1365_v13 = vmul.f32 %v6728_v40, %v1279_v39  ;;  %v762_v39 = vmul.f32 %v6722_v37, %v669_v56 }
 0x461   : > { %v8018_v31 = vsel %vm6756_vm5, %v2132_v36, 0.0 }
 0x462   : > { %v10295_v12 = vrot.slane %v8018_v31, 2  ;;  %v10294_v16 = vrot.slane %v8018_v31, 4  ;;  %v2694_v32 = vrot.slane %v8018_v31, 7 }
 0x464   : > { %v2696_v15 = vrot.slane %v2694_v32, 2  ;;  %v2697_v22 = vrot.slane %v10295_v12, 7  ;;  %6345 = vset.pattern.permute.xlu2 %v6701_v30  ;;  %v8031_v34 = vrot.slane %v10294_v16, 7 }
 0x465   : > { %6344 = vset.pattern.permute.xlu1 %v6602_v10  ;;  %v1044_v10 = vmul.f32 %v6724_v38, %v958_v61  ;;  %v1043_v61 = vmul.f32 %v6724_v38, %v952_v2 }
 0x466   : > { %v2698_v23 = vsel %vm6771_vm8, %v2696_v15, %v2697_v22  ;;  %v2699_v25 = vrot.slane %v2697_v22, 2  ;;  %v1921_v36 = vpop.permute.xlu2 %1920 }
 0x467   : > { %2926 = vst [vmem:[#allocation1 + $0x2] ss:$4 sm:$0xff] %v2698_v23  ;;  %v1084_v15 = vadd.f32 %v1044_v10, %v763_v0 }
 0x468   : > { %v2701_v5 = vsel %vm6771_vm8, %v2699_v25, %v8031_v34  ;;  %v2007_v25 = vmul.f32 %v6739_v48, %v1921_v36 }
 0x469   : > { %2927 = vst [vmem:[#allocation1 + $0x3] ss:$4 sm:$0xff] %v2701_v5  ;;  %v1405_v23 = vadd.f32 %v1365_v13, %v1084_v15  ;;  %v1083_v15 = vadd.f32 %v1043_v61, %v762_v39  ;;  %v2006_v61 = vmul.f32 %v6739_v48, %v7490_v60 }
 0x46c   : > { %699 = vperm.xlu2 %6345, %v10400_v21  }
 0x46d   : > { %987 = vperm.xlu1 %6344, %v7653_v50  }
 0x46f   : > { %v1600_v22 = vpop.permute.xlu1 %1599 }
 0x470   : > { %v1686_v16 = vmul.f32 %v6737_v46, %v1600_v22 }
 0x472   : > { %v1726_v5 = vadd.f32 %v1686_v16, %v1405_v23 }
 0x474   : > { %v2047_v12 = vadd.f32 %v2007_v25, %v1726_v5  ;;  %6347 = vset.pattern.permute.xlu2 %v6579_v4  ;;  %v10411_v4 = vld [vmem:[#allocation33_spill] sm:$0xff] }
 0x475   : > { %6346 = vset.pattern.permute.xlu1 %v10395_v11  ;;  %v1364_v36 = vmul.f32 %v6728_v40, %v10411_v4 }
 0x476   : > { %v2091_v51 = vadd.f32 %v7826_v7, %v2047_v12 }
 0x477   : > { %v1404_v39 = vadd.f32 %v1364_v36, %v1083_v15 }
 0x478   : > { %v2131_v18 = vmax.f32 %v2091_v51, 0.0 }
 0x47a   : > { %v8051_v0 = vsel %vm6914_vm13, %v2131_v18, 0.0 }
 0x47b   : > { %v10298_v10 = vrot.slane %v8051_v0, 2  ;;  %v10300_v16 = vrot.slane %v8051_v0, 4  ;;  %v10299_v13 = vrot.slane %v8051_v0, 6  ;;  %v6053_v2 = vrot.slane %v8051_v0, 9 }
 0x47c   : > { %993 = vperm.xlu2 %6347, %v7653_v50  }
 0x47d   : > { %v2685_v56 = vrot.slane %v10298_v10, 7  ;;  %v2688_v18 = vrot.slane %v10300_v16, 7  ;;  %v2691_v12 = vrot.slane %v10299_v13, 7  ;;  %981 = vperm.xlu1 %6346, %v10400_v21  }
 0x47f   : > { %v2686_v22 = vsel %vm6771_vm8, %v6053_v2, %v2685_v56  ;;  %v2687_v23 = vrot.slane %v2685_v56, 2  ;;  %v2690_v25 = vrot.slane %v2688_v18, 2  ;;  %v2693_v5 = vrot.slane %v2691_v12, 2  ;;  %v1594_v51 = vpop.permute.xlu1 %1593 }
 0x480   : > { %2920 = vst [vmem:[#allocation1 + $0x22] ss:$4 sm:$0xff] %v2686_v22  ;;  %v1685_v4 = vmul.f32 %v6737_v46, %v1594_v51 }
 0x481   : > { %v2689_v10 = vsel %vm6771_vm8, %v2687_v23, %v2688_v18  ;;  %v2692_v13 = vsel %vm6771_vm8, %v2690_v25, %v2691_v12  ;;  %v2695_v2 = vsel %vm6771_vm8, %v2693_v5, %v2694_v32  ;;  %v2677_v18 = vrot.slane %v7989_v35, 2  ;;  %v8100_v23 = vpop.f32.mrf.mxu0 }
 0x482   : > { %2921 = vst [vmem:[#allocation1 + $0x23] ss:$4 sm:$0xff] %v2689_v10  ;;  %v1725_v56 = vadd.f32 %v1685_v4, %v1404_v39  ;;  %v2702_v35 = vrot.slane %v8031_v34, 2  ;;  %v694_v34 = vpop.permute.xlu2 %693 }
 0x483   : > { %2924 = vst [vmem:[#allocation1] ss:$4 sm:$0xff] %v2692_v13 }
 0x484   : > { %2925 = vst [vmem:[#allocation1 + $0x1] ss:$4 sm:$0xff] %v2695_v2  ;;  %v2046_v16 = vadd.f32 %v2006_v61, %v1725_v56  ;;  %6349 = vset.pattern.permute.xlu2 %v6714_v33  ;;  %v8114_v2 = vpop.permute.xlu0 %1005 }
 0x485   : > { %6348 = vset.pattern.permute.xlu1 %v10385_v17  ;;  %10412 = vst [vmem:[#allocation10_spill] sm:$0xff] %v8100_v23 }
 0x486   : > { %v2090_v60 = vadd.f32 %v7826_v7, %v2046_v16  ;;  %v10310_v16 = vrot.slane %v8018_v31, 6 }
 0x488   : > { %v2130_v36 = vmax.f32 %v2090_v60, 0.0  ;;  %v2703_v22 = vrot.slane %v10310_v16, 7 }
 0x489   : > { %v8107_v51 = vpop.f32.mrf.mxu0 }
 0x48a   : > { %v8083_v15 = vsel %vm7173_vm15, %v2130_v36, 0.0  ;;  %v2704_v25 = vsel %vm6771_vm8, %v2702_v35, %v2703_v22  ;;  %10413 = vst [vmem:[#allocation18_spill] sm:$0xff] %v8107_v51  ;;  %v976_v61 = vpop.permute.xlu2 %975 }
 0x48b   : > { %v2678_v32 = vrot.slane %v8083_v15, 7  ;;  %v6052_v12 = vrot.slane %v8083_v15, 9 }
 0x48c   : > { %1302 = vperm.xlu2 %6349, %v10400_v21  }
 0x48d   : > { %v2679_v10 = vsel %vm6771_vm8, %v2677_v18, %v2678_v32  ;;  %v2680_v13 = vrot.slane %v2678_v32, 2  ;;  %1308 = vperm.xlu1 %6348, %v7653_v50   ;;  %v1933_v18 = vpop.permute.xlu0 %1932 }
 0x48e   : > { %2918 = vst [vmem:[#allocation1 + $0x20] ss:$4 sm:$0xff] %v2679_v10 }
 0x48f   : > { %v2682_v17 = vsel %vm6771_vm8, %v2680_v13, %v6052_v12 }
 0x490   : > { %2919 = vst [vmem:[#allocation1 + $0x21] ss:$4 sm:$0xff] %v2682_v17 }
 0x494   : > { %6352 = vset.pattern.permute.xlu2 %v6735_v45  ;;  %v2932_v45 = vld.sshfl [vmem:[#allocation1] sm:$0xff pattern:$0x73625140] }
 0x495   : > { %6351 = vset.pattern.permute.xlu1 %v6596_v8  ;;  %v688_v8 = vpop.permute.xlu1 %687 }
 0x496   : > { %v1297_v4 = vpop.permute.xlu2 %1296 }
 0x497   : > { %v2923_v5 = vld.sshfl [vmem:[#allocation1 + $0x20] sm:$0xff pattern:$0x73625140] }
 0x498   : > { %2928 = vst [vmem:[#allocation1 + $0x20] ss:$4 sm:$0xff] %v2704_v25  ;;  %6082 = vmatmul.msk.f32.gmra.mxu0 %vm2964_vm14, %v2923_v5  ;;  %v1047_v5 = vmul.f32 %v6724_v38, %v976_v61 }
 0x49c   : > { %1623 = vperm.xlu2 %6352, %v10400_v21  }
 0x49d   : > { %1629 = vperm.xlu1 %6351, %v7653_v50  }
 0x49f   : > { %v970_v39 = vpop.permute.xlu1 %969 }
 0x4a0   : > { %6083 = vmatmul.msk.f32.gmra.mxu0 %vm2964_vm14, %v2932_v45  ;;  %v1046_v60 = vmul.f32 %v6724_v38, %v970_v39  ;;  %v2705_v39 = vrot.slane %v2703_v22, 2 }
 0x4a4   : > { %6354 = vset.pattern.permute.xlu2 %v10372_v28 }
 0x4a5   : > { %6353 = vset.pattern.permute.xlu1 %v10378_v9  ;;  %v765_v9 = vmul.f32 %v6722_v37, %v688_v8 }
 0x4a6   : > { %v1618_v28 = vpop.permute.xlu2 %1617 }
 0x4a7   : > { %v1086_v32 = vadd.f32 %v1046_v60, %v765_v9  ;;  %v1368_v60 = vmul.f32 %v6728_v40, %v1297_v4  ;;  %v1689_v61 = vmul.f32 %v6737_v46, %v1618_v28 }
 0x4ac   : > { %1950 = vperm.xlu2 %6354, %v7653_v50  }
 0x4ad   : > { %1635 = vperm.xlu1 %6353, %v7653_v50  }
 0x4af   : > { %v1291_v56 = vpop.permute.xlu1 %1290 }
 0x4b0   : > { %v1367_v36 = vmul.f32 %v6728_v40, %v1291_v56 }
 0x4b2   : > { %v1407_v13 = vadd.f32 %v1367_v36, %v1086_v32 }
 0x4b4   : > { %6358 = vset.pattern.permute.xlu2 %v7031_v57 }
 0x4b5   : > { %6357 = vset.pattern.permute.xlu1 %v10386_v52  ;;  %v2009_v52 = vmul.f32 %v6739_v48, %v1933_v18 }
 0x4b6   : > { %v8125_v35 = vpop.permute.xlu2 %706 }
 0x4bc   : > { %1944 = vperm.xlu2 %6358, %v10400_v21   ;;  %v766_v21 = vmul.f32 %v6722_v37, %v694_v34 }
 0x4bd   : > { %999 = vperm.xlu1 %6357, %v7653_v50  }
 0x4be   : > { %v1087_v56 = vadd.f32 %v1047_v5, %v766_v21 }
 0x4bf   : > { %v1612_v10 = vpop.permute.xlu1 %1611 }
 0x4c0   : > { %v1688_v12 = vmul.f32 %v6737_v46, %v1612_v10 }
 0x4c2   : > { %v1728_v17 = vadd.f32 %v1688_v12, %v1407_v13  ;;  %v1408_v13 = vadd.f32 %v1368_v60, %v1087_v56  ;;  %v769_v60 = vmul.f32 %v6722_v37, %v7912_v6 }
 0x4c4   : > { %v2049_v25 = vadd.f32 %v2009_v52, %v1728_v17  ;;  %6360 = vset.pattern.permute.xlu2 %v6683_v26  ;;  %v1729_v21 = vadd.f32 %v1689_v61, %v1408_v13 }
 0x4c5   : > { %6359 = vset.pattern.permute.xlu1 %v10390_v55 }
 0x4c6   : > { %v2093_v45 = vadd.f32 %v7826_v7, %v2049_v25  ;;  %v8143_v22 = vpop.permute.xlu2 %699 }
 0x4c8   : > { %v2133_v8 = vmax.f32 %v2093_v45, 0.0 }
 0x4ca   : > { %v8135_v9 = vsel %vm6815_vm9, %v2133_v8, 0.0 }
 0x4cb   : > { %v10309_v36 = vrot.slane %v8135_v9, 2  ;;  %v2339_v26 = vrot.slane %v8135_v9, 4  ;;  %v2340_v55 = vrot.slane %v8135_v9, 6  ;;  %v2706_v34 = vrot.slane %v8135_v9, 7 }
 0x4cc   : > { %724 = vperm.xlu2 %6360, %v7653_v50  }
 0x4cd   : > { %v2707_v4 = vsel %vm6771_vm8, %v2705_v39, %v2706_v34  ;;  %v2708_v18 = vrot.slane %v2706_v34, 2  ;;  %v2709_v32 = vrot.slane %v10309_v36, 7  ;;  %v2712_v10 = vrot.slane %v2339_v26, 7  ;;  %1956 = vperm.xlu1 %6359, %v7653_v50   ;;  %v10474_v36 = vld [vmem:[#allocation3_spill] sm:$0xff] }
 0x4ce   : > { %2929 = vst [vmem:[#allocation1 + $0x21] ss:$4 sm:$0xff] %v2707_v4  ;;  %v2715_v17 = vrot.slane %v2340_v55, 7 }
 0x4cf   : > { %v2710_v28 = vsel %vm6771_vm8, %v2708_v18, %v2709_v32  ;;  %v2711_v12 = vrot.slane %v2709_v32, 2  ;;  %v2714_v52 = vrot.slane %v2712_v10, 2  ;;  %v1939_v25 = vpop.permute.xlu1 %1938 }
 0x4d0   : > { %2930 = vst [vmem:[#allocation1 + $0x22] ss:$4 sm:$0xff] %v2710_v28  ;;  %v2010_v5 = vmul.f32 %v6739_v48, %v1939_v25  ;;  %v2717_v6 = vrot.slane %v2715_v17, 2 }
 0x4d1   : > { %v2713_v45 = vsel %vm6771_vm8, %v2711_v12, %v2712_v10  ;;  %v2716_v8 = vsel %vm6771_vm8, %v2714_v52, %v2715_v17  ;;  %v8174_v12 = vpop.f32.mrf.mxu0 }
 0x4d2   : > { %2931 = vst [vmem:[#allocation1 + $0x23] ss:$4 sm:$0xff] %v2713_v45  ;;  %v2050_v39 = vadd.f32 %v2010_v5, %v1729_v21 }
 0x4d3   : > { %2934 = vst [vmem:[#allocation1] ss:$4 sm:$0xff] %v2716_v8 }
 0x4d4   : > { %v2094_v56 = vadd.f32 %v7826_v7, %v2050_v39  ;;  %6363 = vset.pattern.permute.xlu2 %v6674_v24  ;;  %10414 = vst [vmem:[#allocation9_spill] sm:$0xff] %v8174_v12 }
 0x4d5   : > { %6362 = vset.pattern.permute.xlu1 %v6647_v19 }
 0x4d6   : > { %v2134_v34 = vmax.f32 %v2094_v56, 0.0  ;;  %v994_v61 = vpop.permute.xlu2 %993 }
 0x4d7   : > { %v1050_v4 = vmul.f32 %v6724_v38, %v994_v61 }
 0x4d8   : > { %v8169_v18 = vsel %vm6889_vm10, %v2134_v34, 0.0  ;;  %v1371_v34 = vmul.f32 %v6728_v40, %v7918_v53 }
 0x4d9   : > { %v2933_v32 = vld.sshfl [vmem:[#allocation1 + $0x20] sm:$0xff pattern:$0x73625140]  ;;  %v2341_v10 = vrot.slane %v8169_v18, 2  ;;  %v10308_v13 = vrot.slane %v8169_v18, 4  ;;  %v10307_v24 = vrot.slane %v8169_v18, 6  ;;  %v1090_v28 = vadd.f32 %v1050_v4, %v769_v60  ;;  %v8201_v4 = vpop.f32.mrf.mxu0 }
 0x4da   : > { %v2718_v19 = vrot.slane %v8169_v18, 7  ;;  %6084 = vmatmul.msk.f32.gmra.mxu0 %vm2964_vm14, %v2933_v32  ;;  %10415 = vst [vmem:[#allocation14_spill] sm:$0xff] %v8201_v4 }
 0x4db   : > { %v2721_v52 = vrot.slane %v2341_v10, 7  ;;  %v2724_v25 = vrot.slane %v10308_v13, 7  ;;  %v8187_v17 = vrot.slane %v10307_v24, 7  ;;  %v8204_v32 = vadd.f32 %v1371_v34, %v1090_v28 }
 0x4dc   : > { %v2719_v21 = vsel %vm6771_vm8, %v2717_v6, %v2718_v19  ;;  %v2720_v5 = vrot.slane %v2718_v19, 2  ;;  %1326 = vperm.xlu2 %6363, %v7653_v50  }
 0x4dd   : > { %v2723_v45 = vrot.slane %v2721_v52, 2  ;;  %v2726_v8 = vrot.slane %v2724_v25, 2  ;;  %2935 = vst [vmem:[#allocation1 + $0x1] ss:$4 sm:$0xff] %v2719_v21  ;;  %1320 = vperm.xlu1 %6362, %v7653_v50  }
 0x4de   : > { %v2722_v39 = vsel %vm6771_vm8, %v2720_v5, %v2721_v52 }
 0x4df   : > { %v2725_v56 = vsel %vm6771_vm8, %v2723_v45, %v2724_v25  ;;  %v2728_v60 = vsel %vm6771_vm8, %v2726_v8, %v8187_v17  ;;  %2936 = vst [vmem:[#allocation1 + $0x2] ss:$4 sm:$0xff] %v2722_v39  ;;  %v988_v53 = vpop.permute.xlu1 %987 }
 0x4e0   : > { %2937 = vst [vmem:[#allocation1 + $0x3] ss:$4 sm:$0xff] %v2725_v56  ;;  %v1049_v19 = vmul.f32 %v6724_v38, %v988_v53 }
 0x4e1   : > { %2938 = vst [vmem:[#allocation1 + $0x20] ss:$4 sm:$0xff] %v2728_v60 }
 0x4e4   : > { %6365 = vset.pattern.permute.xlu2 %v6689_v27 }
 0x4e5   : > { %6364 = vset.pattern.permute.xlu1 %v10377_v42 }
 0x4e6   : > { %v1303_v6 = vpop.permute.xlu2 %1302 }
 0x4e7   : > { %v2942_v61 = vld.sshfl [vmem:[#allocation1] sm:$0xff pattern:$0x73625140] }
 0x4e8   : > { %6085 = vmatmul.msk.f32.gmra.mxu0 %vm2964_vm14, %v2942_v61 }
 0x4ec   : > { %1647 = vperm.xlu2 %6365, %v7653_v50  }
 0x4ed   : > { %1641 = vperm.xlu1 %6364, %v7653_v50  }
 0x4ef   : > { %v982_v27 = vpop.permute.xlu1 %981 }
 0x4f0   : > { %v1048_v25 = vmul.f32 %v6724_v38, %v982_v27 }
 0x4f4   : > { %6367 = vset.pattern.permute.xlu2 %v6701_v30  ;;  %v768_v30 = vmul.f32 %v6722_v37, %v8125_v35  ;;  %v1369_v35 = vmul.f32 %v6728_v40, %v1303_v6 }
 0x4f5   : > { %6366 = vset.pattern.permute.xlu1 %v6653_v20 }
 0x4f6   : > { %v1624_v42 = vpop.permute.xlu2 %1623  ;;  %v1089_v21 = vadd.f32 %v1049_v19, %v768_v30 }
 0x4f7   : > { %v1690_v60 = vmul.f32 %v6737_v46, %v1624_v42 }
 0x4fc   : > { %730 = vperm.xlu2 %6367, %v7653_v50  }
 0x4fd   : > { %1968 = vperm.xlu1 %6366, %v7653_v50  }
 0x4ff   : > { %v1309_v28 = vpop.permute.xlu1 %1308 }
 0x500   : > { %v1370_v20 = vmul.f32 %v6728_v40, %v1309_v28 }
 0x502   : > { %v1410_v5 = vadd.f32 %v1370_v20, %v1089_v21 }
 0x504   : > { %6369 = vset.pattern.permute.xlu2 %v6714_v33  ;;  %v767_v33 = vmul.f32 %v6722_v37, %v8143_v22 }
 0x505   : > { %6368 = vset.pattern.permute.xlu1 %v10395_v11 }
 0x506   : > { %v1951_v52 = vpop.permute.xlu2 %1950  ;;  %v1088_v39 = vadd.f32 %v1048_v25, %v767_v33 }
 0x507   : > { %v2012_v45 = vmul.f32 %v6739_v48, %v1951_v52 }
 0x508   : > { %v1409_v61 = vadd.f32 %v1369_v35, %v1088_v39 }
 0x50a   : > { %v1730_v22 = vadd.f32 %v1690_v60, %v1409_v61 }
 0x50c   : > { %1332 = vperm.xlu2 %6369, %v7653_v50  }
 0x50d   : > { %1011 = vperm.xlu1 %6368, %v7653_v50  }
 0x50f   : > { %v1630_v11 = vpop.permute.xlu1 %1629 }
 0x510   : > { %v1691_v8 = vmul.f32 %v6737_v46, %v1630_v11 }
 0x512   : > { %v1731_v56 = vadd.f32 %v1691_v8, %v1410_v5 }
 0x514   : > { %v2052_v34 = vadd.f32 %v2012_v45, %v1731_v56  ;;  %v2729_v56 = vrot.slane %v8187_v17, 2 }
 0x515   : > { %6371 = vset.pattern.permute.xlu1 %v7031_v57 }
 0x516   : > { %v2096_v53 = vadd.f32 %v7826_v7, %v2052_v34  ;;  %v1945_v27 = vpop.permute.xlu2 %1944 }
 0x517   : > { %v2011_v28 = vmul.f32 %v6739_v48, %v1945_v27 }
 0x518   : > { %v2136_v19 = vmax.f32 %v2096_v53, 0.0 }
 0x519   : > { %v2051_v30 = vadd.f32 %v2011_v28, %v1730_v22  ;;  %v8263_v28 = vpop.f32.mrf.mxu0 }
 0x51a   : > { %v8232_v20 = vsel %vm6914_vm13, %v2136_v19, 0.0  ;;  %10416 = vst [vmem:[#allocation19_spill] sm:$0xff] %v8263_v28 }
 0x51b   : > { %v2344_v6 = vrot.slane %v8232_v20, 2  ;;  %v2345_v42 = vrot.slane %v8232_v20, 4  ;;  %v10314_v52 = vrot.slane %v8232_v20, 6  ;;  %v2095_v57 = vadd.f32 %v7826_v7, %v2051_v30 }
 0x51c   : > { %v6055_v25 = vrot.slane %v8232_v20, 9 }
 0x51d   : > { %v2737_v21 = vrot.slane %v2344_v6, 7  ;;  %v2740_v33 = vrot.slane %v2345_v42, 7  ;;  %1974 = vperm.xlu1 %6371, %v7653_v50   ;;  %v2135_v1 = vmax.f32 %v2095_v57, 0.0  ;;  %v2743_v8 = vrot.slane %v10314_v52, 7 }
 0x51f   : > { %v2738_v11 = vsel %vm6771_vm8, %v6055_v25, %v2737_v21  ;;  %v2739_v5 = vrot.slane %v2737_v21, 2  ;;  %v2742_v45 = vrot.slane %v2740_v33, 2  ;;  %v8250_v35 = vsel %vm7173_vm15, %v2135_v1, 0.0  ;;  %v1636_v17 = vpop.permute.xlu1 %1635 }
 0x520   : > { %2941 = vst [vmem:[#allocation1 + $0x23] ss:$4 sm:$0xff] %v2738_v11  ;;  %v2730_v60 = vrot.slane %v8250_v35, 7  ;;  %v6054_v53 = vrot.slane %v8250_v35, 9  ;;  %v1692_v30 = vmul.f32 %v6737_v46, %v1636_v17 }
 0x521   : > { %v2741_v39 = vsel %vm6771_vm8, %v2739_v5, %v2740_v33  ;;  %v2744_v50 = vsel %vm6771_vm8, %v2742_v45, %v2743_v8  ;;  %v2745_v5 = vrot.slane %v2743_v8, 2 }
 0x522   : > { %2944 = vst [vmem:[#allocation1] ss:$4 sm:$0xff] %v2741_v39  ;;  %v2731_v34 = vsel %vm6771_vm8, %v2729_v56, %v2730_v60  ;;  %v2732_v61 = vrot.slane %v2730_v60, 2  ;;  %v1732_v25 = vadd.f32 %v1692_v30, %v8204_v32 }
 0x523   : > { %2945 = vst [vmem:[#allocation1 + $0x1] ss:$4 sm:$0xff] %v2744_v50 }
 0x524   : > { %2939 = vst [vmem:[#allocation1 + $0x21] ss:$4 sm:$0xff] %v2731_v34  ;;  %v2734_v27 = vsel %vm6771_vm8, %v2732_v61, %v6054_v53 }
 0x525   : > { %2940 = vst [vmem:[#allocation1 + $0x22] ss:$4 sm:$0xff] %v2734_v27 }
 0x526   : > { %v725_v30 = vpop.permute.xlu2 %724 }
 0x52c   : > { %v2943_v22 = vld.sshfl [vmem:[#allocation1 + $0x20] sm:$0xff pattern:$0x73625140] }
 0x52d   : > { %6086 = vmatmul.msk.f32.gmra.mxu0 %vm2964_vm14, %v2943_v22 }
 0x52f   : > { %v1000_v19 = vpop.permute.xlu1 %999 }
 0x53f   : > { %v1957_v57 = vpop.permute.xlu1 %1956 }
 0x540   : > { %v2013_v21 = vmul.f32 %v6739_v48, %v1957_v57 }
 0x542   : > { %v2053_v33 = vadd.f32 %v2013_v21, %v1732_v25  ;;  %v770_v21 = vmul.f32 %v6722_v37, %v7922_v59 }
 0x544   : > { %v2097_v1 = vadd.f32 %v7826_v7, %v2053_v33  ;;  %v1051_v33 = vmul.f32 %v6724_v38, %v1000_v19 }
 0x546   : > { %v2137_v11 = vmax.f32 %v2097_v1, 0.0 }
 0x548   : > { %v8272_v45 = vsel %vm6756_vm5, %v2137_v11, 0.0  ;;  %v1963_v11 = vpop.permute.xlu0 %1962  ;;  %vm5671_vm5 = vcmask 785408  }
 0x549   : > { %v10306_v39 = vrot.slane %v8272_v45, 2  ;;  %v10305_v50 = vrot.slane %v8272_v45, 4  ;;  %v10304_v56 = vrot.slane %v8272_v45, 6  ;;  %v2746_v60 = vrot.slane %v8272_v45, 7 }
 0x54b   : > { %v2747_v32 = vsel %vm6771_vm8, %v2745_v5, %v2746_v60  ;;  %v2748_v34 = vrot.slane %v2746_v60, 2  ;;  %v2749_v7 = vrot.slane %v10306_v39, 7  ;;  %v2752_v58 = vrot.slane %v10305_v50, 7  ;;  %v1327_v60 = vpop.permute.xlu2 %1326 }
 0x54c   : > { %2946 = vst [vmem:[#allocation1 + $0x2] ss:$4 sm:$0xff] %v2747_v32  ;;  %v2755_v27 = vrot.slane %v10304_v56, 7  ;;  %v1091_v5 = vadd.f32 %v1051_v33, %v770_v21 }
 0x54d   : > { %v2750_v8 = vsel %vm6771_vm8, %v2748_v34, %v2749_v7  ;;  %v2751_v61 = vrot.slane %v2749_v7, 2  ;;  %v2754_v53 = vrot.slane %v2752_v58, 2 }
 0x54e   : > { %2947 = vst [vmem:[#allocation1 + $0x3] ss:$4 sm:$0xff] %v2750_v8  ;;  %v2757_v33 = vrot.slane %v2755_v27, 2 }
 0x54f   : > { %v2753_v22 = vsel %vm6771_vm8, %v2751_v61, %v2752_v58  ;;  %v2756_v17 = vsel %vm6771_vm8, %v2754_v53, %v2755_v27  ;;  %v1321_v25 = vpop.permute.xlu1 %1320  ;;  %v2014_v58 = vmul.f32 %v6739_v48, %v1963_v11  ;;  %v1052_v61 = vmul.f32 %v6724_v38, %v8114_v2 }
 0x550   : > { %2948 = vst [vmem:[#allocation1 + $0x20] ss:$4 sm:$0xff] %v2753_v22  ;;  %v1372_v1 = vmul.f32 %v6728_v40, %v1321_v25  ;;  %v771_v53 = vmul.f32 %v6722_v37, %v725_v30  ;;  %v8303_v22 = vld [vmem:[%s6530_s18] ss:$0 sm:$0xff]  ;;  %s6447_s18 = smov 32  }
 0x551   : > { %2949 = vst [vmem:[#allocation1 + $0x21] ss:$4 sm:$0xff] %v2756_v17 }
 0x552   : > { %v1412_v34 = vadd.f32 %v1372_v1, %v1091_v5  ;;  %v1092_v17 = vadd.f32 %v1052_v61, %v771_v53 }
 0x553   : > { %v1648_v21 = vpop.permute.xlu2 %1647 }
 0x555   : > { %v2952_v57 = vld.sshfl [vmem:[#allocation1] sm:$0xff pattern:$0x73625140] }
 0x556   : > { %6087 = vmatmul.msk.f32.vlgmr.msra.gmra.mxu3 %vm2964_vm14, %v2952_v57  ;;  %v1373_v57 = vmul.f32 %v6728_v40, %v1327_v60 }
 0x55f   : > { %v1642_v32 = vpop.permute.xlu1 %1641 }
 0x560   : > { %v1693_v7 = vmul.f32 %v6737_v46, %v1642_v32  ;;  %v1413_v32 = vadd.f32 %v1373_v57, %v1092_v17 }
 0x562   : > { %v1733_v8 = vadd.f32 %v1693_v7, %v1412_v34  ;;  %v1694_v34 = vmul.f32 %v6737_v46, %v1648_v21 }
 0x564   : > { %v2054_v59 = vadd.f32 %v2014_v58, %v1733_v8 }
 0x566   : > { %v2098_v19 = vadd.f32 %v8303_v22, %v2054_v59 }
 0x568   : > { %v2138_v25 = vmax.f32 %v2098_v19, 0.0  ;;  %v1734_v19 = vadd.f32 %v1694_v34, %v1413_v32 }
 0x56a   : > { %v8309_v1 = vsel %vm6815_vm9, %v2138_v25, 0.0  ;;  %vm5915_vm9 = vcmask 302360  }
 0x56b   : > { %v10313_v11 = vrot.slane %v8309_v1, 2  ;;  %v10312_v2 = vrot.slane %v8309_v1, 4  ;;  %v10311_v30 = vrot.slane %v8309_v1, 6  ;;  %v2758_v5 = vrot.slane %v8309_v1, 7 }
 0x56d   : > { %v2759_v60 = vsel %vm6771_vm8, %v2757_v33, %v2758_v5  ;;  %v2760_v7 = vrot.slane %v2758_v5, 2  ;;  %v2761_v54 = vrot.slane %v10313_v11, 7  ;;  %v2764_v27 = vrot.slane %v10312_v2, 7 }
 0x56e   : > { %2950 = vst [vmem:[#allocation1 + $0x22] ss:$4 sm:$0xff] %v2759_v60  ;;  %v2767_v53 = vrot.slane %v10311_v30, 7 }
 0x56f   : > { %v2762_v58 = vsel %vm6771_vm8, %v2760_v7, %v2761_v54  ;;  %v2763_v8 = vrot.slane %v2761_v54, 2  ;;  %v2766_v61 = vrot.slane %v2764_v27, 2  ;;  %v1969_v59 = vpop.permute.xlu1 %1968 }
 0x570   : > { %2951 = vst [vmem:[#allocation1 + $0x23] ss:$4 sm:$0xff] %v2762_v58  ;;  %v2015_v17 = vmul.f32 %v6739_v48, %v1969_v59  ;;  %v2769_v7 = vrot.slane %v2767_v53, 2 }
 0x571   : > { %v2765_v57 = vsel %vm6771_vm8, %v2763_v8, %v2764_v27  ;;  %v2768_v25 = vsel %vm6771_vm8, %v2766_v61, %v2767_v53  ;;  %v2215_v8 = vld [vmem:[%s6548_s28 + $0x8] sm:$0xff] }
 0x572   : > { %2954 = vst [vmem:[#allocation1] ss:$4 sm:$0xff] %v2765_v57  ;;  %v2055_v21 = vadd.f32 %v2015_v17, %v1734_v19  ;;  %3411 = vmatpush.msra.mxu1 %v2215_v8  ;;  %6167 = vmatpush.msrb.mxu3 %v2215_v8  ;;  %v731_v19 = vpop.permute.xlu2 %730  ;;  %v2214_v17 = vld [vmem:[%s6548_s28] sm:$0xff] }
 0x573   : > { %2955 = vst [vmem:[#allocation1 + $0x1] ss:$4 sm:$0xff] %v2768_v25 }
 0x574   : > { %v2099_v33 = vadd.f32 %v8303_v22, %v2055_v21  ;;  %3412 = vmatpush.msra.mxu1 %v2214_v17  ;;  %6168 = vmatpush.msrb.mxu3 %v2214_v17 }
 0x576   : > { %v2139_v5 = vmax.f32 %v2099_v33, 0.0 }
 0x577   : > { %v2953_v60 = vld.sshfl [vmem:[#allocation1 + $0x20] sm:$0xff pattern:$0x73625140] }
 0x578   : > { %v8334_v32 = vsel %vm6889_vm10, %v2139_v5, 0.0  ;;  %6088 = vmatmul.msk.f32.gmra.mxu3 %vm2964_vm14, %v2953_v60 }
 0x579   : > { %v10303_v34 = vrot.slane %v8334_v32, 2  ;;  %v10302_v54 = vrot.slane %v8334_v32, 4  ;;  %v10301_v27 = vrot.slane %v8334_v32, 6  ;;  %v2770_v58 = vrot.slane %v8334_v32, 7 }
 0x57a   : > { %v10530_v4 = vrot.slane %v8334_v32, 6 }
 0x57b   : > { %v2771_v61 = vsel %vm6771_vm8, %v2769_v7, %v2770_v58  ;;  %v2772_v53 = vrot.slane %v2770_v58, 2  ;;  %v2773_v47 = vrot.slane %v10303_v34, 7  ;;  %v2776_v59 = vrot.slane %v10302_v54, 7  ;;  %v10458_v34 = vld [vmem:[#allocation11_spill] sm:$0xff] }
 0x57c   : > { %2956 = vst [vmem:[#allocation1 + $0x2] ss:$4 sm:$0xff] %v2771_v61  ;;  %v2779_v33 = vrot.slane %v10301_v27, 7  ;;  %v1333_v61 = vpop.permute.xlu2 %1332  ;;  %v10421_v27 = vld [vmem:[#allocation16_spill] sm:$0xff]  ;;  %v10481_v16 = vrot.slane %v10458_v34, 2 }
 0x57d   : > { %v2774_v57 = vsel %vm6771_vm8, %v2772_v53, %v2773_v47  ;;  %v2775_v25 = vrot.slane %v2773_v47, 2  ;;  %v2778_v21 = vrot.slane %v2776_v59, 2  ;;  %v10417_v53 = vld [vmem:[#allocation24_spill] sm:$0xff]  ;;  %v772_v47 = vmul.f32 %v6722_v37, %v731_v19 }
 0x57e   : > { %2957 = vst [vmem:[#allocation1 + $0x3] ss:$4 sm:$0xff] %v2774_v57  ;;  %v10418_v17 = vrot.slane %v10417_v53, 2 }
 0x57f   : > { %v2777_v5 = vsel %vm6771_vm8, %v2775_v25, %v2776_v59  ;;  %v2780_v60 = vsel %vm6771_vm8, %v2778_v21, %v2779_v33  ;;  %v1012_v7 = vpop.permute.xlu1 %1011  ;;  %v10419_v59 = vrot.slane %v10417_v53, 4  ;;  %v1374_v25 = vmul.f32 %v6728_v40, %v1333_v61 }
 0x580   : > { %2958 = vst [vmem:[#allocation1 + $0x20] ss:$4 sm:$0xff] %v2777_v5  ;;  %v1053_v58 = vmul.f32 %v6724_v38, %v1012_v7  ;;  %v10420_v21 = vrot.slane %v10417_v53, 6  ;;  %v1654_v38 = vpop.permute.xlu0 %1653  ;;  %v10423_v61 = vrot.slane %v10421_v27, 4 }
 0x581   : > { %2959 = vst [vmem:[#allocation1 + $0x21] ss:$4 sm:$0xff] %v2780_v60  ;;  %v1695_v60 = vmul.f32 %v6737_v46, %v1654_v38 }
 0x582   : > { %v1093_v57 = vadd.f32 %v1053_v58, %v772_v47  ;;  %v10422_v58 = vrot.slane %v10421_v27, 2  ;;  %v10424_v47 = vrot.slane %v10421_v27, 6 }
 0x584   : > { %v1414_v5 = vadd.f32 %v1374_v25, %v1093_v57  ;;  %v2781_v25 = vrot.slane %v2779_v33, 2 }
 0x585   : > { %v2962_v8 = vld.sshfl [vmem:[#allocation1] sm:$0xff pattern:$0x73625140] }
 0x586   : > { %3152 = vst [vmem:[#allocation1] ss:$4 sm:$0xff] %v10417_v53  ;;  %6089 = vmatmul.msk.f32.gmra.mxu3 %vm2964_vm14, %v2962_v8  ;;  %v1735_v19 = vadd.f32 %v1695_v60, %v1414_v5  ;;  %v10425_v5 = vld [vmem:[#allocation29_spill] sm:$0xff] }
 0x587   : > { %3154 = vst [vmem:[#allocation1 + $0x1] ss:$4 sm:$0xff] %v10418_v17 }
 0x588   : > { %3156 = vst [vmem:[#allocation1 + $0x2] ss:$4 sm:$0xff] %v10419_v59 }
 0x589   : > { %3158 = vst [vmem:[#allocation1 + $0x3] ss:$4 sm:$0xff] %v10420_v21 }
 0x58f   : > { %v1975_v7 = vpop.permute.xlu1 %1974 }
 0x590   : > { %v3167_v37 = vld.sshfl [vmem:[#allocation1] sm:$0xff pattern:$0x73625140]  ;;  %v2016_v8 = vmul.f32 %v6739_v48, %v1975_v7  ;;  %v10427_v7 = vrot.slane %v10425_v5, 4 }
 0x591   : > { %3169 = vst [vmem:[#allocation1] ss:$4 sm:$0xff] %v10421_v27  ;;  %6091 = vmatmul.msk.f32.vlgmr.msra.gmra.mxu1 %vm2964_vm14, %v3167_v37  ;;  %v10428_v37 = vld [vmem:[#allocation35_spill] sm:$0xff] }
 0x592   : > { %3170 = vst [vmem:[#allocation1 + $0x1] ss:$4 sm:$0xff] %v10422_v58  ;;  %v2056_v40 = vadd.f32 %v2016_v8, %v1735_v19  ;;  %v10429_v19 = vrot.slane %v10428_v37, 6  ;;  %v10430_v8 = vld [vmem:[#allocation36_spill] sm:$0xff] }
 0x593   : > { %3171 = vst [vmem:[#allocation1 + $0x2] ss:$4 sm:$0xff] %v10423_v61  ;;  %v10432_v29 = vrot.slane %v10430_v8, 4  ;;  %v10433_v61 = vld [vmem:[#allocation13_spill] sm:$0xff]  ;;  %v10459_v56 = vrot.slane %v10430_v8, 6 }
 0x594   : > { %3172 = vst [vmem:[#allocation1 + $0x3] ss:$4 sm:$0xff] %v10424_v47  ;;  %v2100_v46 = vadd.f32 %v8303_v22, %v2056_v40  ;;  %v10426_v22 = vrot.slane %v10425_v5, 2  ;;  %v10431_v40 = vrot.slane %v10430_v8, 2  ;;  %v10434_v47 = vrot.slane %v10433_v61, 2 }
 0x596   : > { %v2140_v17 = vmax.f32 %v2100_v46, 0.0  ;;  %v10435_v46 = vrot.slane %v10433_v61, 4 }
 0x598   : > { %v8381_v48 = vsel %vm7173_vm15, %v2140_v17, 0.0  ;;  %v10436_v17 = vrot.slane %v10433_v61, 6 }
 0x599   : > { %v2782_v59 = vrot.slane %v8381_v48, 7  ;;  %v6056_v38 = vrot.slane %v8381_v48, 9 }
 0x59b   : > { %v3177_v57 = vld.sshfl [vmem:[#allocation1] sm:$0xff pattern:$0x73625140]  ;;  %v2784_v21 = vrot.slane %v2782_v59, 2  ;;  %v2783_v60 = vsel %vm6771_vm8, %v2781_v25, %v2782_v59  ;;  %v10437_v25 = vld [vmem:[#allocation38_spill] sm:$0xff] }
 0x59c   : > { %3179 = vst [vmem:[#allocation1] ss:$4 sm:$0xff] %v7186_v44 }
 0x59d   : > { %3180 = vst [vmem:[#allocation1 + $0x1] ss:$4 sm:$0xff] %v10425_v5  ;;  %v2786_v63 = vsel %vm6771_vm8, %v2784_v21, %v6056_v38  ;;  %v10438_v21 = vld [vmem:[#allocation37_spill] sm:$0xff]  ;;  %vm5904_vm8 = vcmask 15360  }
 0x59e   : > { %3181 = vst [vmem:[#allocation1 + $0x2] ss:$4 sm:$0xff] %v10426_v22  ;;  %v10439_v38 = vrot.slane %v10438_v21, 6  ;;  %v10441_v22 = vrot.slane %v10437_v25, 2 }
 0x59f   : > { %3182 = vst [vmem:[#allocation1 + $0x3] ss:$4 sm:$0xff] %v10427_v7  ;;  %v10442_v7 = vld [vmem:[#allocation23_spill] sm:$0xff] }
 0x5a0   : > { %2960 = vst [vmem:[#allocation1 + $0x22] ss:$4 sm:$0xff] %v2783_v60  ;;  %v10440_v60 = vld [vmem:[#allocation39_spill] sm:$0xff] }
 0x5a1   : > { %2961 = vst [vmem:[#allocation1 + $0x23] ss:$4 sm:$0xff] %v2786_v63 }
 0x5a6   : > { %v3187_v33 = vld.sshfl [vmem:[#allocation1] sm:$0xff pattern:$0x73625140] }
 0x5a7   : > { %3189 = vst [vmem:[#allocation1] ss:$4 sm:$0xff] %v10429_v19  ;;  %v10443_v19 = vrot.slane %v10442_v7, 2 }
 0x5a8   : > { %3190 = vst [vmem:[#allocation1 + $0x1] ss:$4 sm:$0xff] %v10430_v8  ;;  %v2963_v58 = vld.sshfl [vmem:[#allocation1 + $0x20] sm:$0xff pattern:$0x73625140] }
 0x5a9   : > { %3191 = vst [vmem:[#allocation1 + $0x2] ss:$4 sm:$0xff] %v10431_v40  ;;  %6090 = vmatmul.msk.f32.gmra.mxu3 %vm2964_vm14, %v2963_v58  ;;  %v10444_v58 = vrot.slane %v10442_v7, 4  ;;  %v10445_v40 = vrot.slane %v10442_v7, 6 }
 0x5aa   : > { %3192 = vst [vmem:[#allocation1 + $0x3] ss:$4 sm:$0xff] %v10432_v29 }
 0x5ab   : > { %3160 = vst [vmem:[#allocation1 + $0x20] ss:$4 sm:$0xff] %v10433_v61 }
 0x5ac   : > { %3162 = vst [vmem:[#allocation1 + $0x21] ss:$4 sm:$0xff] %v10434_v47  ;;  %v10446_v47 = vld [vmem:[#allocation6_spill] sm:$0xff] }
 0x5ad   : > { %3164 = vst [vmem:[#allocation1 + $0x22] ss:$4 sm:$0xff] %v10435_v46  ;;  %v10447_v46 = vrot.slane %v10446_v47, 4 }
 0x5ae   : > { %3166 = vst [vmem:[#allocation1 + $0x23] ss:$4 sm:$0xff] %v10436_v17  ;;  %v10448_v17 = vrot.slane %v10446_v47, 6 }
 0x5b1   : > { %v3197_v59 = vld.sshfl [vmem:[#allocation1] sm:$0xff pattern:$0x73625140] }
 0x5b2   : > { %3201 = vst [vmem:[#allocation1 + $0x2] ss:$4 sm:$0xff] %v10437_v25 }
 0x5b3   : > { %3199 = vst [vmem:[#allocation1] ss:$4 sm:$0xff] %v10439_v38  ;;  %v10449_v38 = vld [vmem:[#allocation40_spill] sm:$0xff] }
 0x5b4   : > { %3200 = vst [vmem:[#allocation1 + $0x1] ss:$4 sm:$0xff] %v10440_v60 }
 0x5b5   : > { %3202 = vst [vmem:[#allocation1 + $0x3] ss:$4 sm:$0xff] %v10441_v22  ;;  %v3168_v63 = vld.sshfl [vmem:[#allocation1 + $0x20] sm:$0xff pattern:$0x73625140] }
 0x5b6   : > { %3173 = vst [vmem:[#allocation1 + $0x20] ss:$4 sm:$0xff] %v10442_v7  ;;  %6092 = vmatmul.msk.f32.gmra.mxu1 %vm2964_vm14, %v3168_v63  ;;  %v10450_v63 = vrot.slane %v10449_v38, 2 }
 0x5b7   : > { %3174 = vst [vmem:[#allocation1 + $0x21] ss:$4 sm:$0xff] %v10443_v19  ;;  %v10451_v19 = vrot.slane %v10425_v5, 6 }
 0x5b8   : > { %3175 = vst [vmem:[#allocation1 + $0x22] ss:$4 sm:$0xff] %v10444_v58  ;;  %v10452_v58 = vrot.slane %v10428_v37, 2 }
 0x5b9   : > { %3176 = vst [vmem:[#allocation1 + $0x23] ss:$4 sm:$0xff] %v10445_v40  ;;  %v10453_v40 = vrot.slane %v10428_v37, 4 }
 0x5bc   : > { %v3207_v29 = vld.sshfl [vmem:[#allocation1] sm:$0xff pattern:$0x73625140] }
 0x5bd   : > { %3209 = vst [vmem:[#allocation1] ss:$4 sm:$0xff] %v10447_v46  ;;  %v10454_v46 = vld [vmem:[#allocation25_spill] sm:$0xff] }
 0x5be   : > { %6093 = vmatmul.msk.f32.gmra.mxu1 %vm2964_vm14, %v3177_v57  ;;  %3210 = vst [vmem:[#allocation1 + $0x1] ss:$4 sm:$0xff] %v10448_v17  ;;  %v10455_v17 = vrot.slane %v10454_v46, 4  ;;  %v10456_v54 = vrot.slane %v10454_v46, 6 }
 0x5bf   : > { %3211 = vst [vmem:[#allocation1 + $0x2] ss:$4 sm:$0xff] %v10449_v38 }
 0x5c0   : > { %v3178_v22 = vld.sshfl [vmem:[#allocation1 + $0x20] sm:$0xff pattern:$0x73625140]  ;;  %3212 = vst [vmem:[#allocation1 + $0x3] ss:$4 sm:$0xff] %v10450_v63  ;;  %v10457_v63 = vld [vmem:[#allocation27_spill] sm:$0xff] }
 0x5c1   : > { %3183 = vst [vmem:[#allocation1 + $0x20] ss:$4 sm:$0xff] %v10451_v19 }
 0x5c2   : > { %3184 = vst [vmem:[#allocation1 + $0x21] ss:$4 sm:$0xff] %v10428_v37 }
 0x5c3   : > { %3185 = vst [vmem:[#allocation1 + $0x22] ss:$4 sm:$0xff] %v10452_v58  ;;  %v10460_v58 = vrot.slane %v10438_v21, 2 }
 0x5c4   : > { %3186 = vst [vmem:[#allocation1 + $0x23] ss:$4 sm:$0xff] %v10453_v40 }
 0x5c6   : > { %6094 = vmatmul.msk.f32.gmra.mxu1 %vm2964_vm14, %v3178_v22  ;;  %v10461_v22 = vrot.slane %v10438_v21, 4 }
 0x5c7   : > { %v3217_v57 = vld.sshfl [vmem:[#allocation1] sm:$0xff pattern:$0x73625140] }
 0x5c8   : > { %3219 = vst [vmem:[#allocation1] ss:$4 sm:$0xff] %v10455_v17 }
 0x5c9   : > { %3220 = vst [vmem:[#allocation1 + $0x1] ss:$4 sm:$0xff] %v10456_v54  ;;  %v10462_v54 = vld [vmem:[#allocation8_spill] sm:$0xff] }
 0x5ca   : > { %3221 = vst [vmem:[#allocation1 + $0x2] ss:$4 sm:$0xff] %v10457_v63  ;;  %v10463_v17 = vrot.slane %v10462_v54, 2  ;;  %v10464_v50 = vrot.slane %v10462_v54, 4 }
 0x5cb   : > { %v3188_v19 = vld.sshfl [vmem:[#allocation1 + $0x20] sm:$0xff pattern:$0x73625140]  ;;  %3222 = vst [vmem:[#allocation1 + $0x3] ss:$4 sm:$0xff] %v10458_v34 }
 0x5cc   : > { %3193 = vst [vmem:[#allocation1 + $0x20] ss:$4 sm:$0xff] %v10459_v56  ;;  %v10465_v56 = vrot.slane %v10462_v54, 6 }
 0x5cd   : > { %3194 = vst [vmem:[#allocation1 + $0x21] ss:$4 sm:$0xff] %v10438_v21 }
 0x5ce   : > { %3195 = vst [vmem:[#allocation1 + $0x22] ss:$4 sm:$0xff] %v10460_v58  ;;  %6095 = vmatmul.msk.f32.gmra.mxu1 %vm2964_vm14, %v3187_v33  ;;  %v10466_v58 = vld [vmem:[#allocation5_spill] sm:$0xff]  ;;  %v10467_v33 = vrot.slane %v10446_v47, 2 }
 0x5cf   : > { %3196 = vst [vmem:[#allocation1 + $0x23] ss:$4 sm:$0xff] %v10461_v22  ;;  %v10468_v22 = vrot.slane %v10437_v25, 4  ;;  %v10489_v30 = vrot.slane %v10466_v58, 6 }
 0x5d2   : > { %v8454_v40 = vld.sshfl [vmem:[#allocation1] sm:$0xff pattern:$0x73625140] }
 0x5d3   : > { %3229 = vst [vmem:[#allocation1] ss:$4 sm:$0xff] %v10463_v17  ;;  %v10469_v17 = vrot.slane %v10437_v25, 6 }
 0x5d4   : > { %3230 = vst [vmem:[#allocation1 + $0x1] ss:$4 sm:$0xff] %v10464_v50 }
 0x5d5   : > { %3231 = vst [vmem:[#allocation1 + $0x2] ss:$4 sm:$0xff] %v10465_v56  ;;  %v10470_v56 = vld [vmem:[#allocation12_spill] sm:$0xff] }
 0x5d6   : > { %v3198_v39 = vld.sshfl [vmem:[#allocation1 + $0x20] sm:$0xff pattern:$0x73625140]  ;;  %6096 = vmatmul.msk.f32.gmra.mxu1 %vm2964_vm14, %v3188_v19  ;;  %3232 = vst [vmem:[#allocation1 + $0x3] ss:$4 sm:$0xff] %v10466_v58  ;;  %v10471_v24 = vrot.slane %v10470_v56, 2 }
 0x5d7   : > { %3205 = vst [vmem:[#allocation1 + $0x22] ss:$4 sm:$0xff] %v10446_v47  ;;  %v10472_v19 = vrot.slane %v10470_v56, 4  ;;  %v10473_v13 = vrot.slane %v10470_v56, 6 }
 0x5d8   : > { %3206 = vst [vmem:[#allocation1 + $0x23] ss:$4 sm:$0xff] %v10467_v33 }
 0x5d9   : > { %3203 = vst [vmem:[#allocation1 + $0x20] ss:$4 sm:$0xff] %v10468_v22  ;;  %v10475_v22 = vrot.slane %v10449_v38, 4 }
 0x5da   : > { %3204 = vst [vmem:[#allocation1 + $0x21] ss:$4 sm:$0xff] %v10469_v17  ;;  %v10476_v17 = vrot.slane %v10449_v38, 6 }
 0x5dd   : > { %v8471_v50 = vld.sshfl [vmem:[#allocation1] sm:$0xff pattern:$0x73625140] }
 0x5de   : > { %6097 = vmatmul.msk.f32.gmra.mxu1 %vm2964_vm14, %v3197_v59  ;;  %3239 = vst [vmem:[#allocation1] ss:$4 sm:$0xff] %v10471_v24  ;;  %v10477_v59 = vrot.slane %v10454_v46, 2 }
 0x5df   : > { %3240 = vst [vmem:[#allocation1 + $0x1] ss:$4 sm:$0xff] %v10472_v19  ;;  %v10479_v19 = vrot.slane %v7675_v62, 4 }
 0x5e0   : > { %3241 = vst [vmem:[#allocation1 + $0x2] ss:$4 sm:$0xff] %v10473_v13  ;;  %v10478_v13 = vrot.slane %v7675_v62, 2 }
 0x5e1   : > { %v3208_v33 = vld.sshfl [vmem:[#allocation1 + $0x20] sm:$0xff pattern:$0x73625140]  ;;  %3242 = vst [vmem:[#allocation1 + $0x3] ss:$4 sm:$0xff] %v10474_v36 }
 0x5e2   : > { %3213 = vst [vmem:[#allocation1 + $0x20] ss:$4 sm:$0xff] %v10475_v22 }
 0x5e3   : > { %3214 = vst [vmem:[#allocation1 + $0x21] ss:$4 sm:$0xff] %v10476_v17  ;;  %v10480_v17 = vrot.slane %v7675_v62, 6 }
 0x5e4   : > { %3215 = vst [vmem:[#allocation1 + $0x22] ss:$4 sm:$0xff] %v10454_v46 }
 0x5e5   : > { %3216 = vst [vmem:[#allocation1 + $0x23] ss:$4 sm:$0xff] %v10477_v59  ;;  %v10483_v59 = vrot.slane %v10458_v34, 6 }
 0x5e6   : > { %6098 = vmatmul.msk.f32.gmra.mxu1 %vm2964_vm14, %v3198_v39  ;;  %v10482_v39 = vrot.slane %v10458_v34, 4 }
 0x5e8   : > { %v8489_v24 = vld.sshfl [vmem:[#allocation1] sm:$0xff pattern:$0x73625140] }
 0x5e9   : > { %3249 = vst [vmem:[#allocation1] ss:$4 sm:$0xff] %v7675_v62 }
 0x5ea   : > { %3250 = vst [vmem:[#allocation1 + $0x1] ss:$4 sm:$0xff] %v10478_v13 }
 0x5eb   : > { %3251 = vst [vmem:[#allocation1 + $0x2] ss:$4 sm:$0xff] %v10479_v19  ;;  %v10484_v19 = vrot.slane %v7779_v41, 2 }
 0x5ec   : > { %v3218_v22 = vld.sshfl [vmem:[#allocation1 + $0x20] sm:$0xff pattern:$0x73625140]  ;;  %3252 = vst [vmem:[#allocation1 + $0x3] ss:$4 sm:$0xff] %v10480_v17 }
 0x5ed   : > { %3223 = vst [vmem:[#allocation1 + $0x20] ss:$4 sm:$0xff] %v10481_v16  ;;  %v10485_v16 = vrot.slane %v7779_v41, 4 }
 0x5ee   : > { %6099 = vmatmul.msk.f32.gmra.mxu1 %vm2964_vm14, %v3207_v29  ;;  %3224 = vst [vmem:[#allocation1 + $0x21] ss:$4 sm:$0xff] %v10482_v39  ;;  %v10486_v29 = vrot.slane %v7779_v41, 6  ;;  %v10487_v39 = vrot.slane %v10466_v58, 2 }
 0x5ef   : > { %3225 = vst [vmem:[#allocation1 + $0x22] ss:$4 sm:$0xff] %v10483_v59  ;;  %v10488_v59 = vrot.slane %v10466_v58, 4 }
 0x5f0   : > { %3226 = vst [vmem:[#allocation1 + $0x23] ss:$4 sm:$0xff] %v10462_v54 }
 0x5f3   : > { %v8506_v13 = vld.sshfl [vmem:[#allocation1] sm:$0xff pattern:$0x73625140] }
 0x5f4   : > { %3259 = vst [vmem:[#allocation1] ss:$4 sm:$0xff] %v7779_v41 }
 0x5f5   : > { %3260 = vst [vmem:[#allocation1 + $0x1] ss:$4 sm:$0xff] %v10484_v19  ;;  %v10490_v19 = vrot.slane %v7861_v49, 6 }
 0x5f6   : > { %6100 = vmatmul.msk.f32.gmra.mxu1 %vm2964_vm14, %v3208_v33  ;;  %3261 = vst [vmem:[#allocation1 + $0x2] ss:$4 sm:$0xff] %v10485_v16  ;;  %v10491_v16 = vrot.slane %v7888_v14, 2 }
 0x5f7   : > { %3262 = vst [vmem:[#allocation1 + $0x3] ss:$4 sm:$0xff] %v10486_v29  ;;  %v3228_v17 = vld.sshfl [vmem:[#allocation1 + $0x20] sm:$0xff pattern:$0x73625140]  ;;  %v10492_v29 = vrot.slane %v7888_v14, 4 }
 0x5f8   : > { %3233 = vst [vmem:[#allocation1 + $0x20] ss:$4 sm:$0xff] %v10487_v39 }
 0x5f9   : > { %3234 = vst [vmem:[#allocation1 + $0x21] ss:$4 sm:$0xff] %v10488_v59  ;;  %v10495_v59 = vrot.slane %v7710_v43, 6 }
 0x5fa   : > { %3235 = vst [vmem:[#allocation1 + $0x22] ss:$4 sm:$0xff] %v10489_v30  ;;  %v10493_v30 = vrot.slane %v7710_v43, 2 }
 0x5fb   : > { %3236 = vst [vmem:[#allocation1 + $0x23] ss:$4 sm:$0xff] %v10470_v56 }
 0x5fe   : > { %6101 = vmatmul.msk.f32.gmra.mxu1 %vm2964_vm14, %v3217_v57  ;;  %v8524_v33 = vld.sshfl [vmem:[#allocation1] sm:$0xff pattern:$0x73625140]  ;;  %v10494_v57 = vrot.slane %v7710_v43, 4 }
 0x5ff   : > { %3269 = vst [vmem:[#allocation1] ss:$4 sm:$0xff] %v10490_v19 }
 0x600   : > { %3270 = vst [vmem:[#allocation1 + $0x1] ss:$4 sm:$0xff] %v7888_v14 }
 0x601   : > { %3271 = vst [vmem:[#allocation1 + $0x2] ss:$4 sm:$0xff] %v10491_v16  ;;  %v10496_v16 = vrot.slane %v7940_v3, 6 }
 0x602   : > { %3272 = vst [vmem:[#allocation1 + $0x3] ss:$4 sm:$0xff] %v10492_v29  ;;  %v3238_v39 = vld.sshfl [vmem:[#allocation1 + $0x20] sm:$0xff pattern:$0x73625140]  ;;  %v10497_v29 = vld [vmem:[#allocation15_spill] sm:$0xff] }
 0x603   : > { %3243 = vst [vmem:[#allocation1 + $0x20] ss:$4 sm:$0xff] %v7710_v43  ;;  %v10498_v2 = vrot.slane %v10497_v29, 2 }
 0x604   : > { %3244 = vst [vmem:[#allocation1 + $0x21] ss:$4 sm:$0xff] %v10493_v30  ;;  %v10499_v30 = vrot.slane %v10497_v29, 4 }
 0x605   : > { %3245 = vst [vmem:[#allocation1 + $0x22] ss:$4 sm:$0xff] %v10494_v57 }
 0x606   : > { %6102 = vmatmul.msk.f32.gmra.mxu1 %vm2964_vm14, %v3218_v22  ;;  %3246 = vst [vmem:[#allocation1 + $0x23] ss:$4 sm:$0xff] %v10495_v59  ;;  %v10500_v22 = vld [vmem:[#allocation4_spill] sm:$0xff] }
 0x607   : > { %v10501_v57 = vrot.slane %v10500_v22, 2  ;;  %v10502_v59 = vrot.slane %v10500_v22, 4 }
 0x609   : > { %v8541_v19 = vld.sshfl [vmem:[#allocation1] sm:$0xff pattern:$0x73625140] }
 0x60a   : > { %3279 = vst [vmem:[#allocation1] ss:$4 sm:$0xff] %v10496_v16  ;;  %v10503_v16 = vrot.slane %v10500_v22, 6 }
 0x60b   : > { %3280 = vst [vmem:[#allocation1 + $0x1] ss:$4 sm:$0xff] %v10497_v29 }
 0x60c   : > { %3281 = vst [vmem:[#allocation1 + $0x2] ss:$4 sm:$0xff] %v10498_v2  ;;  %v10504_v2 = vrot.slane %v8051_v0, 4 }
 0x60d   : > { %3282 = vst [vmem:[#allocation1 + $0x3] ss:$4 sm:$0xff] %v10499_v30  ;;  %v3248_v11 = vld.sshfl [vmem:[#allocation1 + $0x20] sm:$0xff pattern:$0x73625140]  ;;  %v10505_v30 = vrot.slane %v8051_v0, 6 }
 0x60e   : > { %6103 = vmatmul.msk.f32.gmra.mxu1 %vm2964_vm14, %v8454_v40  ;;  %3253 = vst [vmem:[#allocation1 + $0x20] ss:$4 sm:$0xff] %v10500_v22  ;;  %v10506_v40 = vrot.slane %v8018_v31, 2 }
 0x60f   : > { %3254 = vst [vmem:[#allocation1 + $0x21] ss:$4 sm:$0xff] %v10501_v57 }
 0x610   : > { %3255 = vst [vmem:[#allocation1 + $0x22] ss:$4 sm:$0xff] %v10502_v59  ;;  %v10507_v59 = vld [vmem:[#allocation7_spill] sm:$0xff] }
 0x611   : > { %3256 = vst [vmem:[#allocation1 + $0x23] ss:$4 sm:$0xff] %v10503_v16  ;;  %v10508_v16 = vrot.slane %v7861_v49, 2 }
 0x614   : > { %v8559_v52 = vld.sshfl [vmem:[#allocation1] sm:$0xff pattern:$0x73625140] }
 0x615   : > { %3289 = vst [vmem:[#allocation1] ss:$4 sm:$0xff] %v10504_v2  ;;  %v10509_v2 = vrot.slane %v7861_v49, 4 }
 0x616   : > { %3290 = vst [vmem:[#allocation1 + $0x1] ss:$4 sm:$0xff] %v10505_v30  ;;  %6104 = vmatmul.msk.f32.gmra.mxu1 %vm2964_vm14, %v3228_v17 }
 0x617   : > { %3291 = vst [vmem:[#allocation1 + $0x2] ss:$4 sm:$0xff] %v8018_v31 }
 0x618   : > { %3292 = vst [vmem:[#allocation1 + $0x3] ss:$4 sm:$0xff] %v10506_v40  ;;  %v3258_v57 = vld.sshfl [vmem:[#allocation1 + $0x20] sm:$0xff pattern:$0x73625140]  ;;  %v10510_v40 = vrot.slane %v7888_v14, 6 }
 0x619   : > { %3263 = vst [vmem:[#allocation1 + $0x20] ss:$4 sm:$0xff] %v10507_v59 }
 0x61a   : > { %3264 = vst [vmem:[#allocation1 + $0x21] ss:$4 sm:$0xff] %v7861_v49 }
 0x61b   : > { %3265 = vst [vmem:[#allocation1 + $0x22] ss:$4 sm:$0xff] %v10508_v16  ;;  %v10514_v16 = vrot.slane %v10497_v29, 6 }
 0x61c   : > { %3266 = vst [vmem:[#allocation1 + $0x23] ss:$4 sm:$0xff] %v10509_v2  ;;  %v10516_v2 = vrot.slane %v8309_v1, 2 }
 0x61e   : > { %6105 = vmatmul.msk.f32.gmra.mxu1 %vm2964_vm14, %v8471_v50  ;;  %v10511_v50 = vrot.slane %v7940_v3, 2 }
 0x61f   : > { %v8577_v17 = vld.sshfl [vmem:[#allocation1] sm:$0xff pattern:$0x73625140] }
 0x620   : > { %3299 = vst [vmem:[#allocation1] ss:$4 sm:$0xff] %v2339_v26  ;;  %v10512_v26 = vrot.slane %v7940_v3, 4 }
 0x621   : > { %3300 = vst [vmem:[#allocation1 + $0x1] ss:$4 sm:$0xff] %v2340_v55 }
 0x622   : > { %3301 = vst [vmem:[#allocation1 + $0x2] ss:$4 sm:$0xff] %v8169_v18 }
 0x623   : > { %3302 = vst [vmem:[#allocation1 + $0x3] ss:$4 sm:$0xff] %v2341_v10  ;;  %v3268_v30 = vld.sshfl [vmem:[#allocation1 + $0x20] sm:$0xff pattern:$0x73625140]  ;;  %v10513_v10 = vrot.slane %v8232_v20, 6 }
 0x624   : > { %3273 = vst [vmem:[#allocation1 + $0x20] ss:$4 sm:$0xff] %v10510_v40  ;;  %v10518_v40 = vrot.slane %v8309_v1, 6 }
 0x625   : > { %3274 = vst [vmem:[#allocation1 + $0x21] ss:$4 sm:$0xff] %v7940_v3 }
 0x626   : > { %6106 = vmatmul.msk.f32.gmra.mxu1 %vm2964_vm14, %v3238_v39  ;;  %3275 = vst [vmem:[#allocation1 + $0x22] ss:$4 sm:$0xff] %v10511_v50 }
 0x627   : > { %3276 = vst [vmem:[#allocation1 + $0x23] ss:$4 sm:$0xff] %v10512_v26  ;;  %v10519_v26 = vrot.slane %v8018_v31, 4 }
 0x62a   : > { %v8594_v55 = vld.sshfl [vmem:[#allocation1] sm:$0xff pattern:$0x73625140] }
 0x62b   : > { %3309 = vst [vmem:[#allocation1] ss:$4 sm:$0xff] %v2344_v6  ;;  %v10515_v6 = vrot.slane %v8051_v0, 2 }
 0x62c   : > { %3310 = vst [vmem:[#allocation1 + $0x1] ss:$4 sm:$0xff] %v2345_v42 }
 0x62d   : > { %3311 = vst [vmem:[#allocation1 + $0x2] ss:$4 sm:$0xff] %v10513_v10  ;;  %v10520_v10 = vrot.slane %v8018_v31, 6 }
 0x62e   : > { %3312 = vst [vmem:[#allocation1 + $0x3] ss:$4 sm:$0xff] %v8272_v45  ;;  %6107 = vmatmul.msk.f32.gmra.mxu1 %vm2964_vm14, %v8489_v24  ;;  %v3278_v39 = vld.sshfl [vmem:[#allocation1 + $0x20] sm:$0xff pattern:$0x73625140]  ;;  %v10517_v24 = vrot.slane %v8309_v1, 4 }
 0x62f   : > { %3283 = vst [vmem:[#allocation1 + $0x20] ss:$4 sm:$0xff] %v10514_v16 }
 0x630   : > { %3284 = vst [vmem:[#allocation1 + $0x21] ss:$4 sm:$0xff] %v8083_v15 }
 0x631   : > { %3285 = vst [vmem:[#allocation1 + $0x22] ss:$4 sm:$0xff] %v8051_v0 }
 0x632   : > { %3286 = vst [vmem:[#allocation1 + $0x23] ss:$4 sm:$0xff] %v10515_v6 }
 0x635   : > { %v3317_v42 = vld.sshfl [vmem:[#allocation1] sm:$0xff pattern:$0x73625140] }
 0x636   : > { %6121 = vmatmul.msk.f32.vlgmr.msrb.gmra.mxu3 %vm2964_vm14, %v3317_v42  ;;  %3319 = vst [vmem:[#allocation1] ss:$4 sm:$0xff] %v10516_v2  ;;  %6108 = vmatmul.msk.f32.gmra.mxu1 %vm2964_vm14, %v3248_v11  ;;  %v10521_v11 = vrot.slane %v8135_v9, 2  ;;  %v10522_v42 = vrot.slane %v8169_v18, 4  ;;  %v10523_v2 = vrot.slane %v8169_v18, 6 }
 0x637   : > { %3320 = vst [vmem:[#allocation1 + $0x1] ss:$4 sm:$0xff] %v10517_v24 }
 0x638   : > { %3321 = vst [vmem:[#allocation1 + $0x2] ss:$4 sm:$0xff] %v10518_v40 }
 0x639   : > { %3322 = vst [vmem:[#allocation1 + $0x3] ss:$4 sm:$0xff] %v8334_v32  ;;  %v8620_v50 = vld.sshfl [vmem:[#allocation1 + $0x20] sm:$0xff pattern:$0x73625140] }
 0x63a   : > { %3293 = vst [vmem:[#allocation1 + $0x20] ss:$4 sm:$0xff] %v10519_v26  ;;  %v10524_v26 = vrot.slane %v8272_v45, 2 }
 0x63b   : > { %3294 = vst [vmem:[#allocation1 + $0x21] ss:$4 sm:$0xff] %v10520_v10 }
 0x63c   : > { %3295 = vst [vmem:[#allocation1 + $0x22] ss:$4 sm:$0xff] %v8135_v9 }
 0x63d   : > { %3296 = vst [vmem:[#allocation1 + $0x23] ss:$4 sm:$0xff] %v10521_v11 }
 0x63e   : > { %6109 = vmatmul.msk.f32.gmra.mxu1 %vm2964_vm14, %v8506_v13 }
 0x640   : > { %v3327_v16 = vld.sshfl [vmem:[#allocation1] sm:$0xff pattern:$0x73625140] }
 0x641   : > { %3516 = vst.sshfl [vmem:[#allocation1] sm:$0xff pattern:$0x73625140] %v10417_v53 }
 0x644   : > { %v8632_v6 = vld.sshfl [vmem:[#allocation1 + $0x20] sm:$0xff pattern:$0x73625140] }
 0x645   : > { %3303 = vst [vmem:[#allocation1 + $0x20] ss:$4 sm:$0xff] %v10522_v42  ;;  %v10526_v42 = vrot.slane %v8272_v45, 6 }
 0x646   : > { %3304 = vst [vmem:[#allocation1 + $0x21] ss:$4 sm:$0xff] %v10523_v2  ;;  %6110 = vmatmul.msk.f32.gmra.mxu1 %vm2964_vm14, %v3258_v57  ;;  %v10525_v57 = vrot.slane %v8272_v45, 4 }
 0x647   : > { %3305 = vst [vmem:[#allocation1 + $0x22] ss:$4 sm:$0xff] %v8250_v35 }
 0x648   : > { %3306 = vst [vmem:[#allocation1 + $0x23] ss:$4 sm:$0xff] %v8232_v20  ;;  %v8641_v24 = vld [vmem:[#allocation1 + $0x1] ss:$4 sm:$0xff]  ;;  %v8643_v13 = vld [vmem:[#allocation1 + $0x2] ss:$4 sm:$0xff] }
 0x649   : > { %v8645_v40 = vld [vmem:[#allocation1 + $0x3] ss:$4 sm:$0xff] }
 0x64a   : > { %3532 = vst.sshfl [vmem:[#allocation1] sm:$0xff pattern:$0x73625140] %v10421_v27 }
 0x64e   : > { %6111 = vmatmul.msk.f32.gmra.mxu1 %vm2964_vm14, %v8524_v33 }
 0x64f   : > { %v8650_v53 = vld.sshfl [vmem:[#allocation1 + $0x20] sm:$0xff pattern:$0x73625140] }
 0x650   : > { %3313 = vst [vmem:[#allocation1 + $0x20] ss:$4 sm:$0xff] %v10524_v26  ;;  %v10527_v26 = vrot.slane %v8334_v32, 2 }
 0x651   : > { %3314 = vst [vmem:[#allocation1 + $0x21] ss:$4 sm:$0xff] %v10525_v57  ;;  %v8656_v10 = vld [vmem:[#allocation1] ss:$4 sm:$0xff]  ;;  %v8658_v11 = vld [vmem:[#allocation1 + $0x1] ss:$4 sm:$0xff] }
 0x652   : > { %3315 = vst [vmem:[#allocation1 + $0x22] ss:$4 sm:$0xff] %v10526_v42  ;;  %v8662_v2 = vld [vmem:[#allocation1 + $0x2] ss:$4 sm:$0xff]  ;;  %v8664_v27 = vld [vmem:[#allocation1 + $0x3] ss:$4 sm:$0xff] }
 0x653   : > { %3316 = vst [vmem:[#allocation1 + $0x23] ss:$4 sm:$0xff] %v8309_v1  ;;  %v10528_v57 = vrot.slane %v8334_v32, 4 }
 0x654   : > { %3542 = vst.sshfl [vmem:[#allocation1] sm:$0xff pattern:$0x73625140] %v7186_v44 }
 0x656   : > { %6112 = vmatmul.msk.f32.gmra.mxu1 %vm2964_vm14, %v3268_v30 }
 0x65a   : > { %v3318_v33 = vld.sshfl [vmem:[#allocation1 + $0x20] sm:$0xff pattern:$0x73625140] }
 0x65b   : > { %6122 = vmatmul.msk.f32.gmra.mxu3 %vm2964_vm14, %v3318_v33  ;;  %3323 = vst [vmem:[#allocation1 + $0x20] ss:$4 sm:$0xff] %v10527_v26  ;;  %v8674_v42 = vld [vmem:[#allocation1] ss:$4 sm:$0xff]  ;;  %v8676_v28 = vld [vmem:[#allocation1 + $0x1] ss:$4 sm:$0xff] }
 0x65c   : > { %3324 = vst [vmem:[#allocation1 + $0x21] ss:$4 sm:$0xff] %v10528_v57 }
 0x65d   : > { %10529 = vst [vmem:[#allocation20_spill] sm:$0xff] %v8674_v42 }
 0x65e   : > { %3325 = vst [vmem:[#allocation1 + $0x22] ss:$4 sm:$0xff] %v10530_v4  ;;  %6113 = vmatmul.msk.f32.gmra.mxu1 %vm2964_vm14, %v8541_v19 }
 0x65f   : > { %3326 = vst [vmem:[#allocation1 + $0x23] ss:$4 sm:$0xff] %v8381_v48 }
 0x660   : > { %3549 = vst.sshfl [vmem:[#allocation1] sm:$0xff pattern:$0x73625140] %v10428_v37  ;;  %v8697_v37 = vpop.f32.mrf.mxu1 }
 0x661   : > { %10535 = vst [vmem:[#allocation30_spill] sm:$0xff] %v8697_v37 }
 0x663   : > { %6123 = vmatmul.msk.f32.gmra.mxu3 %vm2964_vm14, %v3327_v16 }
 0x666   : > { %v3328_v44 = vld.sshfl [vmem:[#allocation1 + $0x20] sm:$0xff pattern:$0x73625140]  ;;  %6114 = vmatmul.msk.f32.gmra.mxu1 %vm2964_vm14, %v3278_v39 }
 0x667   : > { %3517 = vst.sshfl [vmem:[#allocation1 + $0x20] sm:$0xff pattern:$0x73625140] %v10433_v61  ;;  %v8686_v30 = vld [vmem:[#allocation1] ss:$4 sm:$0xff] }
 0x668   : > { %10531 = vst [vmem:[#allocation22_spill] sm:$0xff] %v8686_v30  ;;  %v8689_v33 = vld [vmem:[#allocation1 + $0x1] ss:$4 sm:$0xff]  ;;  %v8691_v26 = vld [vmem:[#allocation1 + $0x2] ss:$4 sm:$0xff]  ;;  %v8719_v12 = vpop.f32.mrf.mxu1 }
 0x669   : > { %10532 = vst [vmem:[#allocation26_spill] sm:$0xff] %v8689_v33  ;;  %v8693_v4 = vld [vmem:[#allocation1 + $0x3] ss:$4 sm:$0xff] }
 0x66a   : > { %10533 = vst [vmem:[#allocation28_spill] sm:$0xff] %v8691_v26 }
 0x66b   : > { %10534 = vst [vmem:[#allocation21_spill] sm:$0xff] %v8693_v4  ;;  %6124 = vmatmul.msk.f32.gmra.mxu3 %vm2964_vm14, %v3328_v44 }
 0x66c   : > { %3559 = vst.sshfl [vmem:[#allocation1] sm:$0xff pattern:$0x73625140] %v10438_v21 }
 0x66d   : > { %10540 = vst [vmem:[#allocation24_spill] sm:$0xff] %v8719_v12 }
 0x66e   : > { %v8699_v19 = vld [vmem:[#allocation1 + $0x20] ss:$4 sm:$0xff]  ;;  %v8701_v16 = vld [vmem:[#allocation1 + $0x21] ss:$4 sm:$0xff]  ;;  %v8703_v61 = vld [vmem:[#allocation1 + $0x22] ss:$4 sm:$0xff]  ;;  %6115 = vmatmul.msk.f32.gmra.mxu1 %vm2964_vm14, %v8559_v52 }
 0x66f   : > { %v8705_v57 = vld [vmem:[#allocation1 + $0x23] ss:$4 sm:$0xff] }
 0x670   : > { %3533 = vst.sshfl [vmem:[#allocation1 + $0x20] sm:$0xff pattern:$0x73625140] %v10442_v7  ;;  %v8739_v12 = vpop.f32.mrf.mxu1 }
 0x671   : > { %10542 = vst [vmem:[#allocation29_spill] sm:$0xff] %v8739_v12 }
 0x673   : > { %v8710_v39 = vld [vmem:[#allocation1] ss:$4 sm:$0xff]  ;;  %v8712_v21 = vld [vmem:[#allocation1 + $0x1] ss:$4 sm:$0xff]  ;;  %v8714_v44 = vld [vmem:[#allocation1 + $0x2] ss:$4 sm:$0xff] }
 0x674   : > { %10536 = vst [vmem:[#allocation31_spill] sm:$0xff] %v8710_v39  ;;  %v8716_v37 = vld [vmem:[#allocation1 + $0x3] ss:$4 sm:$0xff] }
 0x675   : > { %10537 = vst [vmem:[#allocation32_spill] sm:$0xff] %v8712_v21 }
 0x676   : > { %10538 = vst [vmem:[#allocation34_spill] sm:$0xff] %v8714_v44  ;;  %6116 = vmatmul.msk.f32.gmra.mxu1 %vm2964_vm14, %v8620_v50 }
 0x677   : > { %10539 = vst [vmem:[#allocation33_spill] sm:$0xff] %v8716_v37  ;;  %v8721_v51 = vld [vmem:[#allocation1 + $0x20] ss:$4 sm:$0xff]  ;;  %v8723_v23 = vld [vmem:[#allocation1 + $0x21] ss:$4 sm:$0xff] }
 0x678   : > { %3567 = vst.sshfl [vmem:[#allocation1] sm:$0xff pattern:$0x73625140] %v10437_v25  ;;  %v8725_v4 = vld [vmem:[#allocation1 + $0x22] ss:$4 sm:$0xff]  ;;  %v8784_v42 = vpop.f32.mrf.mxu1 }
 0x679   : > { %v8729_v52 = vld [vmem:[#allocation1 + $0x23] ss:$4 sm:$0xff]  ;;  %10550 = vst [vmem:[#allocation6_spill] sm:$0xff] %v8784_v42 }
 0x67a   : > { %3545 = vst.sshfl [vmem:[#allocation1 + $0x20] sm:$0xff pattern:$0x73625140] %v10425_v5 }
 0x67e   : > { %6117 = vmatmul.msk.f32.gmra.mxu1 %vm2964_vm14, %v8577_v17 }
 0x67f   : > { %v8732_v7 = vld [vmem:[#allocation1 + $0x1] ss:$4 sm:$0xff]  ;;  %v8734_v37 = vld [vmem:[#allocation1 + $0x2] ss:$4 sm:$0xff]  ;;  %v8736_v25 = vld [vmem:[#allocation1 + $0x3] ss:$4 sm:$0xff] }
 0x680   : > { %10541 = vst [vmem:[#allocation16_spill] sm:$0xff] %v8736_v25 }
 0x681   : > { %3576 = vst.sshfl [vmem:[#allocation1] sm:$0xff pattern:$0x73625140] %v10449_v38  ;;  %v8743_v44 = vld [vmem:[#allocation1 + $0x21] ss:$4 sm:$0xff] }
 0x682   : > { %v8745_v50 = vld [vmem:[#allocation1 + $0x22] ss:$4 sm:$0xff]  ;;  %v8747_v21 = vld [vmem:[#allocation1 + $0x23] ss:$4 sm:$0xff] }
 0x683   : > { %3550 = vst.sshfl [vmem:[#allocation1 + $0x20] sm:$0xff pattern:$0x73625140] %v10430_v8 }
 0x686   : > { %6118 = vmatmul.msk.f32.gmra.mxu1 %vm2964_vm14, %v8632_v6 }
 0x688   : > { %v8750_v5 = vld [vmem:[#allocation1] ss:$4 sm:$0xff]  ;;  %v8752_v39 = vld [vmem:[#allocation1 + $0x1] ss:$4 sm:$0xff]  ;;  %v8754_v25 = vld [vmem:[#allocation1 + $0x2] ss:$4 sm:$0xff] }
 0x689   : > { %10543 = vst [vmem:[#allocation35_spill] sm:$0xff] %v8750_v5  ;;  %v8756_v38 = vld [vmem:[#allocation1 + $0x3] ss:$4 sm:$0xff] }
 0x68a   : > { %10544 = vst [vmem:[#allocation36_spill] sm:$0xff] %v8752_v39  ;;  %v8759_v12 = vld [vmem:[#allocation1 + $0x20] ss:$4 sm:$0xff]  ;;  %v8761_v17 = vld [vmem:[#allocation1 + $0x21] ss:$4 sm:$0xff] }
 0x68b   : > { %10545 = vst [vmem:[#allocation13_spill] sm:$0xff] %v8754_v25  ;;  %v8763_v26 = vld [vmem:[#allocation1 + $0x22] ss:$4 sm:$0xff]  ;;  %v8765_v33 = vld [vmem:[#allocation1 + $0x23] ss:$4 sm:$0xff] }
 0x68c   : > { %10546 = vst [vmem:[#allocation38_spill] sm:$0xff] %v8756_v38 }
 0x68d   : > { %3586 = vst.sshfl [vmem:[#allocation1] sm:$0xff pattern:$0x73625140] %v10457_v63 }
 0x68e   : > { %3560 = vst.sshfl [vmem:[#allocation1 + $0x20] sm:$0xff pattern:$0x73625140] %v10440_v60 }
 0x694   : > { %v8768_v8 = vld [vmem:[#allocation1] ss:$4 sm:$0xff]  ;;  %v8770_v30 = vld [vmem:[#allocation1 + $0x1] ss:$4 sm:$0xff] }
 0x695   : > { %10547 = vst [vmem:[#allocation37_spill] sm:$0xff] %v8770_v30  ;;  %v8773_v25 = vld [vmem:[#allocation1 + $0x20] ss:$4 sm:$0xff]  ;;  %v8775_v38 = vld [vmem:[#allocation1 + $0x21] ss:$4 sm:$0xff] }
 0x696   : > { %3593 = vst.sshfl [vmem:[#allocation1] sm:$0xff pattern:$0x73625140] %v10462_v54 }
 0x697   : > { %3568 = vst.sshfl [vmem:[#allocation1 + $0x20] sm:$0xff pattern:$0x73625140] %v10446_v47 }
 0x69d   : > { %v8778_v63 = vld [vmem:[#allocation1] ss:$4 sm:$0xff]  ;;  %v8780_v39 = vld [vmem:[#allocation1 + $0x1] ss:$4 sm:$0xff]  ;;  %v8782_v5 = vld [vmem:[#allocation1 + $0x2] ss:$4 sm:$0xff] }
 0x69e   : > { %10548 = vst [vmem:[#allocation39_spill] sm:$0xff] %v8778_v63  ;;  %v8788_v60 = vld [vmem:[#allocation1 + $0x3] ss:$4 sm:$0xff]  ;;  %v8791_v54 = vld [vmem:[#allocation1 + $0x20] ss:$4 sm:$0xff] }
 0x69f   : > { %10549 = vst [vmem:[#allocation23_spill] sm:$0xff] %v8780_v39  ;;  %v8793_v30 = vld [vmem:[#allocation1 + $0x21] ss:$4 sm:$0xff]  ;;  %v8795_v47 = vld [vmem:[#allocation1 + $0x22] ss:$4 sm:$0xff]  ;;  %v8800_v39 = vpop.f32.mrf.mxu1  ;;  %6119 = vmatmul.msk.f32.gmra.mxu1 %vm2964_vm14, %v8594_v55 }
 0x6a0   : > { %10551 = vst [vmem:[#allocation40_spill] sm:$0xff] %v8788_v60  ;;  %v8797_v63 = vld [vmem:[#allocation1 + $0x23] ss:$4 sm:$0xff] }
 0x6a1   : > { %3603 = vst.sshfl [vmem:[#allocation1] sm:$0xff pattern:$0x73625140] %v10470_v56 }
 0x6a2   : > { %10552 = vst [vmem:[#allocation25_spill] sm:$0xff] %v8791_v54 }
 0x6a3   : > { %10553 = vst [vmem:[#allocation27_spill] sm:$0xff] %v8793_v30 }
 0x6a4   : > { %10554 = vst [vmem:[#allocation11_spill] sm:$0xff] %v8795_v47 }
 0x6a5   : > { %3577 = vst.sshfl [vmem:[#allocation1 + $0x20] sm:$0xff pattern:$0x73625140] %v10454_v46 }
 0x6a6   : > { %10555 = vst [vmem:[#allocation8_spill] sm:$0xff] %v8800_v39 }
 0x6a7   : > { %v8821_v60 = vpop.f32.mrf.mxu1  ;;  %6120 = vmatmul.msk.f32.gmra.mxu1 %vm2964_vm14, %v8650_v53 }
 0x6a8   : > { %v8804_v6 = vld [vmem:[#allocation1] ss:$4 sm:$0xff]  ;;  %v8806_v42 = vld [vmem:[#allocation1 + $0x1] ss:$4 sm:$0xff]  ;;  %v8808_v56 = vld [vmem:[#allocation1 + $0x2] ss:$4 sm:$0xff] }
 0x6a9   : > { %10556 = vst [vmem:[#allocation5_spill] sm:$0xff] %v8804_v6  ;;  %v8810_v54 = vld [vmem:[#allocation1 + $0x3] ss:$4 sm:$0xff] }
 0x6aa   : > { %10557 = vst [vmem:[#allocation12_spill] sm:$0xff] %v8806_v42 }
 0x6ab   : > { %3611 = vst.sshfl [vmem:[#allocation1] sm:$0xff pattern:$0x73625140] %v7710_v43 }
 0x6ac   : > { %v8813_v47 = vld [vmem:[#allocation1 + $0x20] ss:$4 sm:$0xff]  ;;  %v8815_v30 = vld [vmem:[#allocation1 + $0x21] ss:$4 sm:$0xff]  ;;  %v8817_v46 = vld [vmem:[#allocation1 + $0x22] ss:$4 sm:$0xff] }
 0x6ad   : > { %10558 = vst [vmem:[#allocation3_spill] sm:$0xff] %v8815_v30  ;;  %v8819_v39 = vld [vmem:[#allocation1 + $0x23] ss:$4 sm:$0xff] }
 0x6ae   : > { %10559 = vst [vmem:[#allocation15_spill] sm:$0xff] %v8817_v46 }
 0x6af   : > { %10560 = vst [vmem:[#allocation4_spill] sm:$0xff] %v8821_v60 }
 0x6b0   : > { %3589 = vst.sshfl [vmem:[#allocation1 + $0x20] sm:$0xff pattern:$0x73625140] %v10458_v34 }
 0x6b2   : > { %v8826_v55 = vld [vmem:[#allocation1 + $0x1] ss:$4 sm:$0xff]  ;;  %v8828_v42 = vld [vmem:[#allocation1 + $0x2] ss:$4 sm:$0xff]  ;;  %v8830_v43 = vld [vmem:[#allocation1 + $0x3] ss:$4 sm:$0xff] }
 0x6b3   : > { %10561 = vst [vmem:[#allocation7_spill] sm:$0xff] %v8826_v55 }
 0x6b4   : > { %10562 = vst [vmem:[#allocation41_spill] sm:$0xff] %v8828_v42 }
 0x6b5   : > { %10563 = vst [vmem:[#allocation42_spill] sm:$0xff] %v8830_v43 }
 0x6b6   : > { %3620 = vst.sshfl [vmem:[#allocation1] sm:$0xff pattern:$0x73625140] %v10500_v22 }
 0x6b7   : > { %v8833_v6 = vld [vmem:[#allocation1 + $0x21] ss:$4 sm:$0xff]  ;;  %v8835_v46 = vld [vmem:[#allocation1 + $0x22] ss:$4 sm:$0xff]  ;;  %v8837_v30 = vld [vmem:[#allocation1 + $0x23] ss:$4 sm:$0xff] }
 0x6b8   : > { %10564 = vst [vmem:[#allocation43_spill] sm:$0xff] %v8835_v46 }
 0x6b9   : > { %10565 = vst [vmem:[#allocation44_spill] sm:$0xff] %v8837_v30 }
 0x6ba   : > { %3594 = vst.sshfl [vmem:[#allocation1 + $0x20] sm:$0xff pattern:$0x73625140] %v10466_v58 }
 0x6bd   : > { %v8840_v60 = vld [vmem:[#allocation1] ss:$4 sm:$0xff]  ;;  %v8842_v53 = vld [vmem:[#allocation1 + $0x1] ss:$4 sm:$0xff]  ;;  %v8844_v34 = vld [vmem:[#allocation1 + $0x2] ss:$4 sm:$0xff] }
 0x6be   : > { %10566 = vst [vmem:[#allocation45_spill] sm:$0xff] %v8840_v60  ;;  %v8846_v55 = vld [vmem:[#allocation1 + $0x3] ss:$4 sm:$0xff] }
 0x6bf   : > { %10567 = vst [vmem:[#allocation46_spill] sm:$0xff] %v8842_v53 }
 0x6c0   : > { %10568 = vst [vmem:[#allocation47_spill] sm:$0xff] %v8844_v34 }
 0x6c1   : > { %10569 = vst [vmem:[#allocation48_spill] sm:$0xff] %v8846_v55  ;;  %v8849_v43 = vld [vmem:[#allocation1 + $0x20] ss:$4 sm:$0xff]  ;;  %v8851_v22 = vld [vmem:[#allocation1 + $0x21] ss:$4 sm:$0xff] }
 0x6c2   : > { %3630 = vst.sshfl [vmem:[#allocation1] sm:$0xff pattern:$0x73625140] %v10507_v59  ;;  %v8853_v42 = vld [vmem:[#allocation1 + $0x22] ss:$4 sm:$0xff] }
 0x6c3   : > { %10570 = vst [vmem:[#allocation49_spill] sm:$0xff] %v8853_v42  ;;  %v8855_v46 = vld [vmem:[#allocation1 + $0x23] ss:$4 sm:$0xff] }
 0x6c4   : > { %10571 = vst [vmem:[#allocation50_spill] sm:$0xff] %v8855_v46 }
 0x6c5   : > { %3604 = vst.sshfl [vmem:[#allocation1 + $0x20] sm:$0xff pattern:$0x73625140] %v10474_v36 }
 0x6c9   : > { %v8858_v58 = vld [vmem:[#allocation1] ss:$4 sm:$0xff]  ;;  %v8860_v30 = vld [vmem:[#allocation1 + $0x1] ss:$4 sm:$0xff] }
 0x6ca   : > { %10572 = vst [vmem:[#allocation51_spill] sm:$0xff] %v8858_v58 }
 0x6cb   : > { %10573 = vst [vmem:[#allocation52_spill] sm:$0xff] %v8860_v30 }
 0x6cc   : > { %3637 = vst.sshfl [vmem:[#allocation1] sm:$0xff pattern:$0x73625140] %v7888_v14  ;;  %v8863_v34 = vld [vmem:[#allocation1 + $0x20] ss:$4 sm:$0xff] }
 0x6cd   : > { %v8865_v55 = vld [vmem:[#allocation1 + $0x21] ss:$4 sm:$0xff] }
 0x6ce   : > { %3612 = vst.sshfl [vmem:[#allocation1 + $0x20] sm:$0xff pattern:$0x73625140] %v7675_v62 }
 0x6d3   : > { %v8868_v59 = vld [vmem:[#allocation1] ss:$4 sm:$0xff]  ;;  %v8870_v53 = vld [vmem:[#allocation1 + $0x1] ss:$4 sm:$0xff]  ;;  %v8872_v42 = vld [vmem:[#allocation1 + $0x2] ss:$4 sm:$0xff] }
 0x6d4   : > { %10574 = vst [vmem:[#allocation53_spill] sm:$0xff] %v8868_v59  ;;  %v8874_v46 = vld [vmem:[#allocation1 + $0x3] ss:$4 sm:$0xff] }
 0x6d5   : > { %10575 = vst [vmem:[#allocation54_spill] sm:$0xff] %v8870_v53  ;;  %v8877_v36 = vld [vmem:[#allocation1 + $0x20] ss:$4 sm:$0xff]  ;;  %v8879_v30 = vld [vmem:[#allocation1 + $0x21] ss:$4 sm:$0xff] }
 0x6d6   : > { %10576 = vst [vmem:[#allocation55_spill] sm:$0xff] %v8872_v42  ;;  %v8881_v14 = vld [vmem:[#allocation1 + $0x22] ss:$4 sm:$0xff]  ;;  %v8883_v58 = vld [vmem:[#allocation1 + $0x23] ss:$4 sm:$0xff] }
 0x6d7   : > { %10577 = vst [vmem:[#allocation56_spill] sm:$0xff] %v8874_v46 }
 0x6d8   : > { %3647 = vst.sshfl [vmem:[#allocation1] sm:$0xff pattern:$0x73625140] %v10497_v29 }
 0x6d9   : > { %10578 = vst [vmem:[#allocation57_spill] sm:$0xff] %v8877_v36 }
 0x6da   : > { %3621 = vst.sshfl [vmem:[#allocation1 + $0x20] sm:$0xff pattern:$0x73625140] %v7779_v41 }
 0x6df   : > { %v8886_v62 = vld [vmem:[#allocation1] ss:$4 sm:$0xff]  ;;  %v8888_v59 = vld [vmem:[#allocation1 + $0x1] ss:$4 sm:$0xff]  ;;  %v8890_v53 = vld [vmem:[#allocation1 + $0x2] ss:$4 sm:$0xff] }
 0x6e0   : > { %10579 = vst [vmem:[#allocation58_spill] sm:$0xff] %v8886_v62  ;;  %v8892_v42 = vld [vmem:[#allocation1 + $0x3] ss:$4 sm:$0xff] }
 0x6e1   : > { %10580 = vst [vmem:[#allocation59_spill] sm:$0xff] %v8888_v59  ;;  %v8895_v29 = vld [vmem:[#allocation1 + $0x20] ss:$4 sm:$0xff]  ;;  %v8897_v36 = vld [vmem:[#allocation1 + $0x21] ss:$4 sm:$0xff] }
 0x6e2   : > { %10581 = vst [vmem:[#allocation60_spill] sm:$0xff] %v8890_v53  ;;  %v8899_v46 = vld [vmem:[#allocation1 + $0x22] ss:$4 sm:$0xff]  ;;  %v8901_v60 = vld [vmem:[#allocation1 + $0x23] ss:$4 sm:$0xff] }
 0x6e3   : > { %10582 = vst [vmem:[#allocation61_spill] sm:$0xff] %v8892_v42 }
 0x6e4   : > { %3655 = vst.sshfl [vmem:[#allocation1] sm:$0xff pattern:$0x73625140] %v8051_v0 }
 0x6e5   : > { %10583 = vst [vmem:[#allocation62_spill] sm:$0xff] %v8895_v29 }
 0x6e6   : > { %10584 = vst [vmem:[#allocation63_spill] sm:$0xff] %v8901_v60 }
 0x6e7   : > { %3633 = vst.sshfl [vmem:[#allocation1 + $0x20] sm:$0xff pattern:$0x73625140] %v7861_v49 }
 0x6eb   : > { %v8904_v41 = vld [vmem:[#allocation1 + $0x1] ss:$4 sm:$0xff]  ;;  %v8906_v62 = vld [vmem:[#allocation1 + $0x2] ss:$4 sm:$0xff]  ;;  %v8908_v59 = vld [vmem:[#allocation1 + $0x3] ss:$4 sm:$0xff] }
 0x6ec   : > { %10585 = vst [vmem:[#allocation64_spill] sm:$0xff] %v8904_v41 }
 0x6ed   : > { %10586 = vst [vmem:[#allocation65_spill] sm:$0xff] %v8906_v62 }
 0x6ee   : > { %3664 = vst.sshfl [vmem:[#allocation1] sm:$0xff pattern:$0x73625140] %v8135_v9  ;;  %v8911_v42 = vld [vmem:[#allocation1 + $0x21] ss:$4 sm:$0xff] }
 0x6ef   : > { %10587 = vst [vmem:[#allocation66_spill] sm:$0xff] %v8911_v42  ;;  %v8913_v0 = vld [vmem:[#allocation1 + $0x22] ss:$4 sm:$0xff]  ;;  %v8915_v29 = vld [vmem:[#allocation1 + $0x23] ss:$4 sm:$0xff] }
 0x6f0   : > { %10588 = vst [vmem:[#allocation67_spill] sm:$0xff] %v8913_v0 }
 0x6f1   : > { %3638 = vst.sshfl [vmem:[#allocation1 + $0x20] sm:$0xff pattern:$0x73625140] %v7940_v3 }
 0x6f5   : > { %v8918_v53 = vld [vmem:[#allocation1] ss:$4 sm:$0xff]  ;;  %v8920_v60 = vld [vmem:[#allocation1 + $0x1] ss:$4 sm:$0xff]  ;;  %v8922_v49 = vld [vmem:[#allocation1 + $0x2] ss:$4 sm:$0xff] }
 0x6f6   : > { %10589 = vst [vmem:[#allocation68_spill] sm:$0xff] %v8918_v53  ;;  %v8924_v41 = vld [vmem:[#allocation1 + $0x3] ss:$4 sm:$0xff] }
 0x6f7   : > { %10590 = vst [vmem:[#allocation69_spill] sm:$0xff] %v8920_v60 }
 0x6f8   : > { %10591 = vst [vmem:[#allocation70_spill] sm:$0xff] %v8922_v49  ;;  %v8927_v62 = vld [vmem:[#allocation1 + $0x20] ss:$4 sm:$0xff]  ;;  %v8929_v9 = vld [vmem:[#allocation1 + $0x21] ss:$4 sm:$0xff] }
 0x6f9   : > { %3674 = vst.sshfl [vmem:[#allocation1] sm:$0xff pattern:$0x73625140] %v8250_v35  ;;  %v8931_v42 = vld [vmem:[#allocation1 + $0x22] ss:$4 sm:$0xff] }
 0x6fa   : > { %10592 = vst [vmem:[#allocation71_spill] sm:$0xff] %v8929_v9  ;;  %v8933_v0 = vld [vmem:[#allocation1 + $0x23] ss:$4 sm:$0xff] }
 0x6fb   : > { %10593 = vst [vmem:[#allocation72_spill] sm:$0xff] %v8931_v42 }
 0x6fc   : > { %10594 = vst [vmem:[#allocation73_spill] sm:$0xff] %v8933_v0 }
 0x6fd   : > { %3648 = vst.sshfl [vmem:[#allocation1 + $0x20] sm:$0xff pattern:$0x73625140] %v8083_v15 }
 0x700   : > { %v8936_v3 = vld [vmem:[#allocation1] ss:$4 sm:$0xff]  ;;  %v8938_v53 = vld [vmem:[#allocation1 + $0x1] ss:$4 sm:$0xff] }
 0x701   : > { %10595 = vst [vmem:[#allocation74_spill] sm:$0xff] %v8936_v3 }
 0x702   : > { %10596 = vst [vmem:[#allocation75_spill] sm:$0xff] %v8938_v53 }
 0x703   : > { %3681 = vst.sshfl [vmem:[#allocation1] sm:$0xff pattern:$0x73625140] %v8272_v45 }
 0x704   : > { %v8941_v49 = vld [vmem:[#allocation1 + $0x20] ss:$4 sm:$0xff]  ;;  %v8943_v60 = vld [vmem:[#allocation1 + $0x21] ss:$4 sm:$0xff] }
 0x705   : > { %10597 = vst [vmem:[#allocation76_spill] sm:$0xff] %v8941_v49 }
 0x706   : > { %10598 = vst [vmem:[#allocation77_spill] sm:$0xff] %v8943_v60 }
 0x707   : > { %3656 = vst.sshfl [vmem:[#allocation1 + $0x20] sm:$0xff pattern:$0x73625140] %v8018_v31 }
 0x70a   : > { %v8946_v35 = vld [vmem:[#allocation1] ss:$4 sm:$0xff]  ;;  %v8948_v9 = vld [vmem:[#allocation1 + $0x1] ss:$4 sm:$0xff]  ;;  %v8950_v42 = vld [vmem:[#allocation1 + $0x2] ss:$4 sm:$0xff] }
 0x70b   : > { %10599 = vst [vmem:[#allocation78_spill] sm:$0xff] %v8950_v42  ;;  %v8952_v0 = vld [vmem:[#allocation1 + $0x3] ss:$4 sm:$0xff] }
 0x70c   : > { %10600 = vst [vmem:[#allocation79_spill] sm:$0xff] %v8952_v0 }
 0x70d   : > { %3691 = vst.sshfl [vmem:[#allocation1] sm:$0xff pattern:$0x73625140] %v8334_v32 }
 0x70e   : > { %v8955_v15 = vld [vmem:[#allocation1 + $0x20] ss:$4 sm:$0xff]  ;;  %v8957_v53 = vld [vmem:[#allocation1 + $0x21] ss:$4 sm:$0xff]  ;;  %v8959_v45 = vld [vmem:[#allocation1 + $0x22] ss:$4 sm:$0xff] }
 0x70f   : > { %v8961_v3 = vld [vmem:[#allocation1 + $0x23] ss:$4 sm:$0xff] }
 0x710   : > { %10601 = vst [vmem:[#allocation80_spill] sm:$0xff] %v8961_v3 }
 0x711   : > { %3665 = vst.sshfl [vmem:[#allocation1 + $0x20] sm:$0xff pattern:$0x73625140] %v8169_v18 }
 0x714   : > { %v8964_v31 = vld [vmem:[#allocation1] ss:$4 sm:$0xff]  ;;  %v8966_v60 = vld [vmem:[#allocation1 + $0x1] ss:$4 sm:$0xff]  ;;  %v8968_v49 = vld [vmem:[#allocation1 + $0x2] ss:$4 sm:$0xff] }
 0x715   : > { %10602 = vst [vmem:[#allocation81_spill] sm:$0xff] %v8968_v49  ;;  %v8970_v42 = vld [vmem:[#allocation1 + $0x3] ss:$4 sm:$0xff] }
 0x716   : > { %10603 = vst [vmem:[#allocation82_spill] sm:$0xff] %v8970_v42  ;;  %v2218_v42 = vld [vmem:[%s6548_s28 + $0x20] sm:$0xff] }
 0x717   : > { %3699 = vst [vmem:[#allocation1] ss:$4 sm:$0xff] %v8641_v24 }
 0x718   : > { %3701 = vst [vmem:[#allocation1 + $0x1] ss:$4 sm:$0xff] %v8643_v13  ;;  %v8976_v32 = vld [vmem:[#allocation1 + $0x20] ss:$4 sm:$0xff]  ;;  %v8978_v0 = vld [vmem:[#allocation1 + $0x21] ss:$4 sm:$0xff] }
 0x719   : > { %3703 = vst [vmem:[#allocation1 + $0x2] ss:$4 sm:$0xff] %v8645_v40  ;;  %v8980_v18 = vld [vmem:[#allocation1 + $0x22] ss:$4 sm:$0xff]  ;;  %v8982_v3 = vld [vmem:[#allocation1 + $0x23] ss:$4 sm:$0xff] }
 0x71a   : > { %3705 = vst [vmem:[#allocation1 + $0x3] ss:$4 sm:$0xff] %v8699_v19  ;;  %v2219_v19 = vld [vmem:[%s6548_s28 + $0x28] sm:$0xff]  ;;  %s6451_s28 = smov 96  }
 0x71b   : > { %3677 = vst.sshfl [vmem:[#allocation1 + $0x20] sm:$0xff pattern:$0x73625140] %v8232_v20  ;;  %3958 = vmatpush.msra.mxu2 %v2219_v19  ;;  %6169 = vmatpush.msra.mxu3 %v2219_v19  ;;  %v10621_v19 = vld [vmem:[#allocation11_spill] sm:$0xff] }
 0x71d   : > { %3959 = vmatpush.msra.mxu2 %v2218_v42  ;;  %6170 = vmatpush.msra.mxu3 %v2218_v42  ;;  %v10604_v42 = vld [vmem:[#allocation20_spill] sm:$0xff] }
 0x721   : > { %v3714_v49 = vld.sshfl [vmem:[#allocation1] sm:$0xff pattern:$0x73625140] }
 0x722   : > { %3716 = vst [vmem:[#allocation1] ss:$4 sm:$0xff] %v8658_v11  ;;  %v8989_v24 = vld [vmem:[#allocation1 + $0x21] ss:$4 sm:$0xff]  ;;  %v8991_v13 = vld [vmem:[#allocation1 + $0x22] ss:$4 sm:$0xff]  ;;  %6125 = vmatmul.msk.f32.vlgmr.msra.gmra.mxu2 %vm2964_vm14, %v3714_v49 }
 0x723   : > { %3717 = vst [vmem:[#allocation1 + $0x1] ss:$4 sm:$0xff] %v8662_v2  ;;  %v8993_v40 = vld [vmem:[#allocation1 + $0x23] ss:$4 sm:$0xff] }
 0x724   : > { %3718 = vst [vmem:[#allocation1 + $0x2] ss:$4 sm:$0xff] %v8664_v27  ;;  %v10619_v49 = vld [vmem:[#allocation25_spill] sm:$0xff] }
 0x725   : > { %3719 = vst [vmem:[#allocation1 + $0x3] ss:$4 sm:$0xff] %v8721_v51 }
 0x726   : > { %3682 = vst.sshfl [vmem:[#allocation1 + $0x20] sm:$0xff pattern:$0x73625140] %v8309_v1 }
 0x72c   : > { %v3724_v20 = vld.sshfl [vmem:[#allocation1] sm:$0xff pattern:$0x73625140] }
 0x72d   : > { %3726 = vst [vmem:[#allocation1] ss:$4 sm:$0xff] %v8676_v28  ;;  %v8998_v11 = vld [vmem:[#allocation1 + $0x20] ss:$4 sm:$0xff]  ;;  %v9000_v2 = vld [vmem:[#allocation1 + $0x21] ss:$4 sm:$0xff] }
 0x72e   : > { %3727 = vst [vmem:[#allocation1 + $0x1] ss:$4 sm:$0xff] %v8743_v44  ;;  %v9003_v51 = vld [vmem:[#allocation1 + $0x22] ss:$4 sm:$0xff]  ;;  %v9005_v27 = vld [vmem:[#allocation1 + $0x23] ss:$4 sm:$0xff] }
 0x72f   : > { %3728 = vst [vmem:[#allocation1 + $0x2] ss:$4 sm:$0xff] %v8745_v50  ;;  %v10614_v50 = vld [vmem:[#allocation32_spill] sm:$0xff] }
 0x730   : > { %3729 = vst [vmem:[#allocation1 + $0x3] ss:$4 sm:$0xff] %v8747_v21  ;;  %v10611_v21 = vld [vmem:[#allocation21_spill] sm:$0xff] }
 0x731   : > { %3692 = vst.sshfl [vmem:[#allocation1 + $0x20] sm:$0xff pattern:$0x73625140] %v8381_v48 }
 0x732   : > { %3711 = vst [vmem:[#allocation1 + $0x22] ss:$4 sm:$0xff] %v8705_v57  ;;  %v10608_v57 = vld [vmem:[#allocation22_spill] sm:$0xff] }
 0x733   : > { %3713 = vst [vmem:[#allocation1 + $0x23] ss:$4 sm:$0xff] %v8656_v10 }
 0x737   : > { %v3734_v28 = vld.sshfl [vmem:[#allocation1] sm:$0xff pattern:$0x73625140] }
 0x738   : > { %3736 = vst [vmem:[#allocation1] ss:$4 sm:$0xff] %v8759_v12  ;;  %v9016_v1 = vld [vmem:[#allocation1 + $0x20] ss:$4 sm:$0xff]  ;;  %v9019_v48 = vld [vmem:[#allocation1 + $0x21] ss:$4 sm:$0xff] }
 0x739   : > { %3737 = vst [vmem:[#allocation1 + $0x1] ss:$4 sm:$0xff] %v8761_v17  ;;  %v10616_v17 = vld [vmem:[#allocation33_spill] sm:$0xff] }
 0x73a   : > { %3738 = vst [vmem:[#allocation1 + $0x2] ss:$4 sm:$0xff] %v8763_v26  ;;  %v10605_v26 = vld [vmem:[#allocation35_spill] sm:$0xff] }
 0x73b   : > { %3739 = vst [vmem:[#allocation1 + $0x3] ss:$4 sm:$0xff] %v8765_v33 }
 0x73c   : > { %3707 = vst [vmem:[#allocation1 + $0x20] ss:$4 sm:$0xff] %v8701_v16  ;;  %v10606_v16 = vld [vmem:[#allocation36_spill] sm:$0xff] }
 0x73d   : > { %3709 = vst [vmem:[#allocation1 + $0x21] ss:$4 sm:$0xff] %v8703_v61  ;;  %v10607_v61 = vld [vmem:[#allocation13_spill] sm:$0xff] }
 0x742   : > { %v3744_v10 = vld.sshfl [vmem:[#allocation1] sm:$0xff pattern:$0x73625140] }
 0x743   : > { %3746 = vst [vmem:[#allocation1] ss:$4 sm:$0xff] %v8773_v25  ;;  %v10613_v25 = vld [vmem:[#allocation31_spill] sm:$0xff] }
 0x744   : > { %3747 = vst [vmem:[#allocation1 + $0x1] ss:$4 sm:$0xff] %v8775_v38  ;;  %v3715_v12 = vld.sshfl [vmem:[#allocation1 + $0x20] sm:$0xff pattern:$0x73625140]  ;;  %v10615_v38 = vld [vmem:[#allocation34_spill] sm:$0xff] }
 0x745   : > { %3748 = vst [vmem:[#allocation1 + $0x2] ss:$4 sm:$0xff] %v8732_v7  ;;  %6126 = vmatmul.msk.f32.gmra.mxu2 %vm2964_vm14, %v3715_v12 }
 0x746   : > { %3749 = vst [vmem:[#allocation1 + $0x3] ss:$4 sm:$0xff] %v8734_v37 }
 0x747   : > { %3720 = vst [vmem:[#allocation1 + $0x20] ss:$4 sm:$0xff] %v8723_v23  ;;  %v10609_v23 = vld [vmem:[#allocation26_spill] sm:$0xff] }
 0x748   : > { %3721 = vst [vmem:[#allocation1 + $0x21] ss:$4 sm:$0xff] %v8725_v4  ;;  %v10610_v4 = vld [vmem:[#allocation28_spill] sm:$0xff] }
 0x749   : > { %3722 = vst [vmem:[#allocation1 + $0x22] ss:$4 sm:$0xff] %v8729_v52  ;;  %v10612_v52 = vld [vmem:[#allocation37_spill] sm:$0xff] }
 0x74a   : > { %3723 = vst [vmem:[#allocation1 + $0x23] ss:$4 sm:$0xff] %v10604_v42  ;;  %v10629_v42 = vld [vmem:[#allocation23_spill] sm:$0xff] }
 0x74d   : > { %v3754_v33 = vld.sshfl [vmem:[#allocation1] sm:$0xff pattern:$0x73625140]  ;;  %6127 = vmatmul.msk.f32.gmra.mxu2 %vm2964_vm14, %v3724_v20  ;;  %v10620_v20 = vld [vmem:[#allocation27_spill] sm:$0xff] }
 0x74e   : > { %3756 = vst [vmem:[#allocation1] ss:$4 sm:$0xff] %v8797_v63 }
 0x74f   : > { %3757 = vst [vmem:[#allocation1 + $0x1] ss:$4 sm:$0xff] %v10605_v26 }
 0x750   : > { %3758 = vst [vmem:[#allocation1 + $0x2] ss:$4 sm:$0xff] %v10606_v16  ;;  %v10633_v16 = vld [vmem:[#allocation50_spill] sm:$0xff] }
 0x751   : > { %3759 = vst [vmem:[#allocation1 + $0x3] ss:$4 sm:$0xff] %v10607_v61  ;;  %v3725_v37 = vld.sshfl [vmem:[#allocation1 + $0x20] sm:$0xff pattern:$0x73625140] }
 0x752   : > { %3730 = vst [vmem:[#allocation1 + $0x20] ss:$4 sm:$0xff] %v10608_v57  ;;  %v10634_v61 = vld [vmem:[#allocation5_spill] sm:$0xff] }
 0x753   : > { %3731 = vst [vmem:[#allocation1 + $0x21] ss:$4 sm:$0xff] %v10609_v23  ;;  %v10636_v57 = vld [vmem:[#allocation53_spill] sm:$0xff]  ;;  %v10638_v23 = vld [vmem:[#allocation55_spill] sm:$0xff] }
 0x754   : > { %3732 = vst [vmem:[#allocation1 + $0x22] ss:$4 sm:$0xff] %v10610_v4 }
 0x755   : > { %3733 = vst [vmem:[#allocation1 + $0x23] ss:$4 sm:$0xff] %v10611_v21  ;;  %6128 = vmatmul.msk.f32.gmra.mxu2 %vm2964_vm14, %v3725_v37  ;;  %v10635_v37 = vld [vmem:[#allocation12_spill] sm:$0xff] }
 0x756   : > { %v10639_v21 = vld [vmem:[#allocation56_spill] sm:$0xff] }
 0x758   : > { %v3764_v44 = vld.sshfl [vmem:[#allocation1] sm:$0xff pattern:$0x73625140] }
 0x759   : > { %3766 = vst [vmem:[#allocation1] ss:$4 sm:$0xff] %v8819_v39  ;;  %v10617_v39 = vld [vmem:[#allocation40_spill] sm:$0xff] }
 0x75a   : > { %3767 = vst [vmem:[#allocation1 + $0x1] ss:$4 sm:$0xff] %v8768_v8 }
 0x75b   : > { %3768 = vst [vmem:[#allocation1 + $0x2] ss:$4 sm:$0xff] %v10612_v52  ;;  %v10640_v52 = vld [vmem:[#allocation7_spill] sm:$0xff] }
 0x75c   : > { %3769 = vst [vmem:[#allocation1 + $0x3] ss:$4 sm:$0xff] %v8833_v6  ;;  %v3735_v7 = vld.sshfl [vmem:[#allocation1 + $0x20] sm:$0xff pattern:$0x73625140]  ;;  %v10618_v6 = vld [vmem:[#allocation16_spill] sm:$0xff] }
 0x75d   : > { %3740 = vst [vmem:[#allocation1 + $0x20] ss:$4 sm:$0xff] %v10613_v25  ;;  %6129 = vmatmul.msk.f32.gmra.mxu2 %vm2964_vm14, %v3734_v28  ;;  %v10623_v28 = vld [vmem:[#allocation3_spill] sm:$0xff]  ;;  %v10642_v25 = vld [vmem:[#allocation42_spill] sm:$0xff] }
 0x75e   : > { %3741 = vst [vmem:[#allocation1 + $0x21] ss:$4 sm:$0xff] %v10614_v50 }
 0x75f   : > { %3742 = vst [vmem:[#allocation1 + $0x22] ss:$4 sm:$0xff] %v10615_v38  ;;  %v10644_v38 = vld [vmem:[#allocation58_spill] sm:$0xff] }
 0x760   : > { %3743 = vst [vmem:[#allocation1 + $0x23] ss:$4 sm:$0xff] %v10616_v17  ;;  %v10645_v17 = vld [vmem:[#allocation59_spill] sm:$0xff] }
 0x763   : > { %v3774_v63 = vld.sshfl [vmem:[#allocation1] sm:$0xff pattern:$0x73625140] }
 0x764   : > { %3776 = vst [vmem:[#allocation1] ss:$4 sm:$0xff] %v8782_v5 }
 0x765   : > { %3777 = vst [vmem:[#allocation1 + $0x1] ss:$4 sm:$0xff] %v10617_v39  ;;  %6130 = vmatmul.msk.f32.gmra.mxu2 %vm2964_vm14, %v3735_v7  ;;  %v10641_v7 = vld [vmem:[#allocation41_spill] sm:$0xff]  ;;  %v10646_v39 = vld [vmem:[#allocation60_spill] sm:$0xff] }
 0x766   : > { %3778 = vst [vmem:[#allocation1 + $0x2] ss:$4 sm:$0xff] %v8849_v43 }
 0x767   : > { %3779 = vst [vmem:[#allocation1 + $0x3] ss:$4 sm:$0xff] %v8851_v22  ;;  %v3745_v8 = vld.sshfl [vmem:[#allocation1 + $0x20] sm:$0xff pattern:$0x73625140]  ;;  %v10622_v22 = vld [vmem:[#allocation38_spill] sm:$0xff] }
 0x768   : > { %3750 = vst [vmem:[#allocation1 + $0x20] ss:$4 sm:$0xff] %v10618_v6  ;;  %v10647_v6 = vld [vmem:[#allocation61_spill] sm:$0xff] }
 0x769   : > { %3751 = vst [vmem:[#allocation1 + $0x21] ss:$4 sm:$0xff] %v10619_v49  ;;  %v10648_v49 = vld [vmem:[#allocation46_spill] sm:$0xff] }
 0x76a   : > { %3752 = vst [vmem:[#allocation1 + $0x22] ss:$4 sm:$0xff] %v10620_v20  ;;  %v10649_v20 = vld [vmem:[#allocation47_spill] sm:$0xff] }
 0x76b   : > { %3753 = vst [vmem:[#allocation1 + $0x23] ss:$4 sm:$0xff] %v10621_v19  ;;  %v10650_v19 = vld [vmem:[#allocation48_spill] sm:$0xff] }
 0x76d   : > { %6131 = vmatmul.msk.f32.gmra.mxu2 %vm2964_vm14, %v3744_v10  ;;  %v10624_v10 = vld [vmem:[#allocation15_spill] sm:$0xff] }
 0x76e   : > { %v9062_v5 = vld.sshfl [vmem:[#allocation1] sm:$0xff pattern:$0x73625140] }
 0x76f   : > { %3786 = vst [vmem:[#allocation1] ss:$4 sm:$0xff] %v8808_v56  ;;  %v10625_v56 = vld [vmem:[#allocation45_spill] sm:$0xff] }
 0x770   : > { %3787 = vst [vmem:[#allocation1 + $0x1] ss:$4 sm:$0xff] %v8810_v54 }
 0x771   : > { %3788 = vst [vmem:[#allocation1 + $0x2] ss:$4 sm:$0xff] %v8863_v34  ;;  %v10628_v34 = vld [vmem:[#allocation39_spill] sm:$0xff] }
 0x772   : > { %v3755_v43 = vld.sshfl [vmem:[#allocation1 + $0x20] sm:$0xff pattern:$0x73625140]  ;;  %3789 = vst [vmem:[#allocation1 + $0x3] ss:$4 sm:$0xff] %v8865_v55  ;;  %v10627_v55 = vld [vmem:[#allocation44_spill] sm:$0xff] }
 0x773   : > { %3760 = vst [vmem:[#allocation1 + $0x20] ss:$4 sm:$0xff] %v10622_v22 }
 0x774   : > { %3761 = vst [vmem:[#allocation1 + $0x21] ss:$4 sm:$0xff] %v8813_v47  ;;  %v10626_v47 = vld [vmem:[#allocation43_spill] sm:$0xff] }
 0x775   : > { %3762 = vst [vmem:[#allocation1 + $0x22] ss:$4 sm:$0xff] %v10623_v28  ;;  %6132 = vmatmul.msk.f32.gmra.mxu2 %vm2964_vm14, %v3745_v8  ;;  %v10652_v28 = vld [vmem:[#allocation52_spill] sm:$0xff] }
 0x776   : > { %3763 = vst [vmem:[#allocation1 + $0x23] ss:$4 sm:$0xff] %v10624_v10  ;;  %v10653_v10 = vld [vmem:[#allocation66_spill] sm:$0xff] }
 0x779   : > { %v9073_v12 = vld.sshfl [vmem:[#allocation1] sm:$0xff pattern:$0x73625140] }
 0x77a   : > { %3796 = vst [vmem:[#allocation1] ss:$4 sm:$0xff] %v8879_v30  ;;  %v10630_v30 = vld [vmem:[#allocation63_spill] sm:$0xff] }
 0x77b   : > { %3797 = vst [vmem:[#allocation1 + $0x1] ss:$4 sm:$0xff] %v8881_v14  ;;  %v10631_v14 = vld [vmem:[#allocation51_spill] sm:$0xff] }
 0x77c   : > { %3798 = vst [vmem:[#allocation1 + $0x2] ss:$4 sm:$0xff] %v8883_v58 }
 0x77d   : > { %v3765_v54 = vld.sshfl [vmem:[#allocation1 + $0x20] sm:$0xff pattern:$0x73625140]  ;;  %3799 = vst [vmem:[#allocation1 + $0x3] ss:$4 sm:$0xff] %v10625_v56  ;;  %6133 = vmatmul.msk.f32.gmra.mxu2 %vm2964_vm14, %v3754_v33 }
 0x77e   : > { %3770 = vst [vmem:[#allocation1 + $0x20] ss:$4 sm:$0xff] %v10626_v47  ;;  %v10632_v33 = vld [vmem:[#allocation49_spill] sm:$0xff]  ;;  %v10664_v47 = vld [vmem:[#allocation70_spill] sm:$0xff] }
 0x77f   : > { %3771 = vst [vmem:[#allocation1 + $0x21] ss:$4 sm:$0xff] %v10627_v55 }
 0x780   : > { %3772 = vst [vmem:[#allocation1 + $0x22] ss:$4 sm:$0xff] %v10628_v34 }
 0x781   : > { %3773 = vst [vmem:[#allocation1 + $0x23] ss:$4 sm:$0xff] %v10629_v42 }
 0x784   : > { %v9084_v26 = vld.sshfl [vmem:[#allocation1] sm:$0xff pattern:$0x73625140] }
 0x785   : > { %3806 = vst [vmem:[#allocation1] ss:$4 sm:$0xff] %v8897_v36  ;;  %6134 = vmatmul.msk.f32.gmra.mxu2 %vm2964_vm14, %v3755_v43  ;;  %v10651_v43 = vld [vmem:[#allocation62_spill] sm:$0xff] }
 0x786   : > { %3807 = vst [vmem:[#allocation1 + $0x1] ss:$4 sm:$0xff] %v8899_v46  ;;  %v10637_v46 = vld [vmem:[#allocation54_spill] sm:$0xff] }
 0x787   : > { %3808 = vst [vmem:[#allocation1 + $0x2] ss:$4 sm:$0xff] %v10630_v30 }
 0x788   : > { %v3775_v58 = vld.sshfl [vmem:[#allocation1 + $0x20] sm:$0xff pattern:$0x73625140]  ;;  %3809 = vst [vmem:[#allocation1 + $0x3] ss:$4 sm:$0xff] %v10631_v14  ;;  %v10669_v14 = vld [vmem:[#allocation75_spill] sm:$0xff] }
 0x789   : > { %3780 = vst [vmem:[#allocation1 + $0x20] ss:$4 sm:$0xff] %v10632_v33  ;;  %v10671_v33 = vld [vmem:[#allocation29_spill] sm:$0xff] }
 0x78a   : > { %3781 = vst [vmem:[#allocation1 + $0x21] ss:$4 sm:$0xff] %v10633_v16 }
 0x78b   : > { %3782 = vst [vmem:[#allocation1 + $0x22] ss:$4 sm:$0xff] %v10634_v61 }
 0x78c   : > { %3783 = vst [vmem:[#allocation1 + $0x23] ss:$4 sm:$0xff] %v10635_v37 }
 0x78d   : > { %6135 = vmatmul.msk.f32.gmra.mxu2 %vm2964_vm14, %v3764_v44  ;;  %v10643_v44 = vld [vmem:[#allocation57_spill] sm:$0xff] }
 0x78f   : > { %v9096_v36 = vld.sshfl [vmem:[#allocation1] sm:$0xff pattern:$0x73625140] }
 0x790   : > { %3816 = vst [vmem:[#allocation1] ss:$4 sm:$0xff] %v10636_v57 }
 0x791   : > { %3817 = vst [vmem:[#allocation1 + $0x1] ss:$4 sm:$0xff] %v10637_v46 }
 0x792   : > { %3818 = vst [vmem:[#allocation1 + $0x2] ss:$4 sm:$0xff] %v10638_v23  ;;  %v10673_v23 = vld [vmem:[#allocation79_spill] sm:$0xff] }
 0x793   : > { %v3785_v4 = vld.sshfl [vmem:[#allocation1 + $0x20] sm:$0xff pattern:$0x73625140]  ;;  %3819 = vst [vmem:[#allocation1 + $0x3] ss:$4 sm:$0xff] %v10639_v21 }
 0x794   : > { %3790 = vst [vmem:[#allocation1 + $0x20] ss:$4 sm:$0xff] %v10640_v52 }
 0x795   : > { %3791 = vst [vmem:[#allocation1 + $0x21] ss:$4 sm:$0xff] %v10641_v7  ;;  %6136 = vmatmul.msk.f32.gmra.mxu2 %vm2964_vm14, %v3765_v54  ;;  %v10654_v54 = vld [vmem:[#allocation67_spill] sm:$0xff] }
 0x796   : > { %3792 = vst [vmem:[#allocation1 + $0x22] ss:$4 sm:$0xff] %v10642_v25  ;;  %v10677_v25 = vld [vmem:[#allocation30_spill] sm:$0xff] }
 0x797   : > { %3793 = vst [vmem:[#allocation1 + $0x23] ss:$4 sm:$0xff] %v10643_v44 }
 0x79a   : > { %v9107_v50 = vld.sshfl [vmem:[#allocation1] sm:$0xff pattern:$0x73625140] }
 0x79b   : > { %3826 = vst [vmem:[#allocation1] ss:$4 sm:$0xff] %v10644_v38 }
 0x79c   : > { %3827 = vst [vmem:[#allocation1 + $0x1] ss:$4 sm:$0xff] %v10645_v17  ;;  %v9207_v17 = vld [vmem:[%s6542_s25] ss:$0 sm:$0xff] }
 0x79d   : > { %3828 = vst [vmem:[#allocation1 + $0x2] ss:$4 sm:$0xff] %v10646_v39  ;;  %6137 = vmatmul.msk.f32.gmra.mxu2 %vm2964_vm14, %v3774_v63 }
 0x79e   : > { %v3795_v8 = vld.sshfl [vmem:[#allocation1 + $0x20] sm:$0xff pattern:$0x73625140]  ;;  %3829 = vst [vmem:[#allocation1 + $0x3] ss:$4 sm:$0xff] %v10647_v6  ;;  %v10679_v6 = vld [vmem:[#allocation8_spill] sm:$0xff] }
 0x79f   : > { %3800 = vst [vmem:[#allocation1 + $0x20] ss:$4 sm:$0xff] %v10648_v49 }
 0x7a0   : > { %3801 = vst [vmem:[#allocation1 + $0x21] ss:$4 sm:$0xff] %v10649_v20 }
 0x7a1   : > { %3802 = vst [vmem:[#allocation1 + $0x22] ss:$4 sm:$0xff] %v10650_v19 }
 0x7a2   : > { %3803 = vst [vmem:[#allocation1 + $0x23] ss:$4 sm:$0xff] %v10651_v43  ;;  %v9217_v43 = vrot.slane %v9207_v17, 4 }
 0x7a5   : > { %v9118_v22 = vld.sshfl [vmem:[#allocation1] sm:$0xff pattern:$0x73625140]  ;;  %6138 = vmatmul.msk.f32.gmra.mxu2 %vm2964_vm14, %v3775_v58  ;;  %v10668_v58 = vld [vmem:[#allocation74_spill] sm:$0xff] }
 0x7a6   : > { %3836 = vst [vmem:[#allocation1] ss:$4 sm:$0xff] %v8908_v59  ;;  %v10655_v59 = vld [vmem:[#allocation71_spill] sm:$0xff] }
 0x7a7   : > { %3837 = vst [vmem:[#allocation1 + $0x1] ss:$4 sm:$0xff] %v8955_v15  ;;  %v10657_v15 = vld [vmem:[#allocation73_spill] sm:$0xff] }
 0x7a8   : > { %3838 = vst [vmem:[#allocation1 + $0x2] ss:$4 sm:$0xff] %v8957_v53 }
 0x7a9   : > { %v3805_v63 = vld.sshfl [vmem:[#allocation1 + $0x20] sm:$0xff pattern:$0x73625140]  ;;  %3839 = vst [vmem:[#allocation1 + $0x3] ss:$4 sm:$0xff] %v8959_v45 }
 0x7aa   : > { %3810 = vst [vmem:[#allocation1 + $0x20] ss:$4 sm:$0xff] %v10652_v28 }
 0x7ab   : > { %3811 = vst [vmem:[#allocation1 + $0x21] ss:$4 sm:$0xff] %v10653_v10  ;;  %v10681_v10 = vld [vmem:[#allocation82_spill] sm:$0xff] }
 0x7ac   : > { %3812 = vst [vmem:[#allocation1 + $0x22] ss:$4 sm:$0xff] %v10654_v54 }
 0x7ad   : > { %3813 = vst [vmem:[#allocation1 + $0x23] ss:$4 sm:$0xff] %v8915_v29  ;;  %6139 = vmatmul.msk.f32.gmra.mxu2 %vm2964_vm14, %v9062_v5  ;;  %v10656_v29 = vld [vmem:[#allocation72_spill] sm:$0xff]  ;;  %v9166_v5 = vpop.f32.mrf.mxu1 }
 0x7b0   : > { %v9131_v56 = vld.sshfl [vmem:[#allocation1] sm:$0xff pattern:$0x73625140] }
 0x7b1   : > { %3846 = vst [vmem:[#allocation1] ss:$4 sm:$0xff] %v8924_v41  ;;  %v10658_v41 = vld [vmem:[#allocation76_spill] sm:$0xff] }
 0x7b2   : > { %3847 = vst [vmem:[#allocation1 + $0x1] ss:$4 sm:$0xff] %v8976_v32  ;;  %v10660_v32 = vld [vmem:[#allocation64_spill] sm:$0xff] }
 0x7b3   : > { %3848 = vst [vmem:[#allocation1 + $0x2] ss:$4 sm:$0xff] %v8978_v0  ;;  %v10659_v0 = vld [vmem:[#allocation77_spill] sm:$0xff] }
 0x7b4   : > { %v3815_v53 = vld.sshfl [vmem:[#allocation1 + $0x20] sm:$0xff pattern:$0x73625140]  ;;  %3849 = vst [vmem:[#allocation1 + $0x3] ss:$4 sm:$0xff] %v8980_v18 }
 0x7b5   : > { %3820 = vst [vmem:[#allocation1 + $0x20] ss:$4 sm:$0xff] %v8927_v62  ;;  %6140 = vmatmul.msk.f32.gmra.mxu2 %vm2964_vm14, %v3785_v4  ;;  %v10661_v18 = vld [vmem:[#allocation65_spill] sm:$0xff]  ;;  %v9179_v30 = vpop.f32.mrf.mxu1 }
 0x7b6   : > { %3821 = vst [vmem:[#allocation1 + $0x21] ss:$4 sm:$0xff] %v10655_v59  ;;  %v10674_v4 = vld [vmem:[#allocation9_spill] sm:$0xff]  ;;  %v3068_v59 = vpop.f32.mrf.mxu0 }
 0x7b7   : > { %3822 = vst [vmem:[#allocation1 + $0x22] ss:$4 sm:$0xff] %v10656_v29 }
 0x7b8   : > { %3823 = vst [vmem:[#allocation1 + $0x23] ss:$4 sm:$0xff] %v10657_v15 }
 0x7bb   : > { %v9142_v45 = vld.sshfl [vmem:[#allocation1] sm:$0xff pattern:$0x73625140] }
 0x7bc   : > { %3856 = vst [vmem:[#allocation1] ss:$4 sm:$0xff] %v8991_v13 }
 0x7bd   : > { %3857 = vst [vmem:[#allocation1 + $0x1] ss:$4 sm:$0xff] %v8993_v40  ;;  %6141 = vmatmul.msk.f32.gmra.mxu2 %vm2964_vm14, %v9073_v12  ;;  %v10663_v40 = vld [vmem:[#allocation69_spill] sm:$0xff]  ;;  %v3961_v12 = vpop.f32.mrf.mxu2  ;;  %v9191_v57 = vpop.f32.mrf.mxu1 }
 0x7be   : > { %3858 = vst [vmem:[#allocation1 + $0x2] ss:$4 sm:$0xff] %v8946_v35  ;;  %v10662_v35 = vld [vmem:[#allocation80_spill] sm:$0xff] }
 0x7bf   : > { %v9149_v62 = vld.sshfl [vmem:[#allocation1 + $0x20] sm:$0xff pattern:$0x73625140]  ;;  %3859 = vst [vmem:[#allocation1 + $0x3] ss:$4 sm:$0xff] %v8948_v9 }
 0x7c0   : > { %3830 = vst [vmem:[#allocation1 + $0x20] ss:$4 sm:$0xff] %v10658_v41 }
 0x7c1   : > { %3831 = vst [vmem:[#allocation1 + $0x21] ss:$4 sm:$0xff] %v10659_v0 }
 0x7c2   : > { %3832 = vst [vmem:[#allocation1 + $0x22] ss:$4 sm:$0xff] %v10660_v32 }
 0x7c3   : > { %3833 = vst [vmem:[#allocation1 + $0x23] ss:$4 sm:$0xff] %v10661_v18  ;;  %v6445_v18 = vmov 1934713408  }
 0x7c5   : > { %6142 = vmatmul.msk.f32.gmra.mxu2 %vm2964_vm14, %v3795_v8  ;;  %v9209_v39 = vpop.f32.mrf.mxu1  ;;  %v10678_v8 = vld [vmem:[#allocation14_spill] sm:$0xff] }
 0x7c6   : > { %v3864_v13 = vld.sshfl [vmem:[#allocation1] sm:$0xff pattern:$0x73625140]  ;;  %v3427_v49 = vadd.f32 %v10679_v6, %v10678_v8 }
 0x7c7   : > { %3866 = vst [vmem:[#allocation1] ss:$4 sm:$0xff] %v9003_v51  ;;  %6155 = vmatmul.msk.f32.vlgmr.msra.gmra.mxu3 %vm2964_vm14, %v3864_v13  ;;  %v10665_v51 = vld [vmem:[#allocation68_spill] sm:$0xff]  ;;  %v4621_v13 = vunpack.c.l.s4 %v6445_v18 }
 0x7c8   : > { %3867 = vst [vmem:[#allocation1 + $0x1] ss:$4 sm:$0xff] %v9005_v27  ;;  %v10666_v27 = vld [vmem:[#allocation10_spill] sm:$0xff]  ;;  %v3964_v34 = vpop.f32.mrf.mxu2 }
 0x7c9   : > { %3868 = vst [vmem:[#allocation1 + $0x2] ss:$4 sm:$0xff] %v8964_v31  ;;  %v10667_v31 = vld [vmem:[#allocation24_spill] sm:$0xff] }
 0x7ca   : > { %v9161_v9 = vld.sshfl [vmem:[#allocation1 + $0x20] sm:$0xff pattern:$0x73625140]  ;;  %3869 = vst [vmem:[#allocation1 + $0x3] ss:$4 sm:$0xff] %v8966_v60  ;;  %v3418_v55 = vadd.f32 %v10667_v31, %v10666_v27  ;;  %v10683_v27 = vld [vmem:[#allocation4_spill] sm:$0xff] }
 0x7cb   : > { %3840 = vst [vmem:[#allocation1 + $0x20] ss:$4 sm:$0xff] %v10662_v35 }
 0x7cc   : > { %3842 = vst [vmem:[#allocation1 + $0x22] ss:$4 sm:$0xff] %v10663_v40  ;;  %v9176_v60 = vadd.f32 %v3964_v34, %v3418_v55 }
 0x7cd   : > { %3843 = vst [vmem:[#allocation1 + $0x23] ss:$4 sm:$0xff] %v10664_v47  ;;  %6143 = vmatmul.msk.f32.gmra.mxu2 %vm2964_vm14, %v9084_v26  ;;  %v10670_v26 = vld [vmem:[#allocation18_spill] sm:$0xff] }
 0x7ce   : > { %3841 = vst [vmem:[#allocation1 + $0x21] ss:$4 sm:$0xff] %v10665_v51  ;;  %v3421_v16 = vadd.f32 %v10671_v33, %v10670_v26  ;;  %v10682_v51 = vld [vmem:[#allocation19_spill] sm:$0xff]  ;;  %v4349_v6 = vadd.f32 %v9207_v17, %v9176_v60 }
 0x7cf   : > { %v3430_v31 = vadd.f32 %v10683_v27, %v10682_v51 }
 0x7d0   : > { %v3967_v61 = vpop.f32.mrf.mxu2 }
 0x7d1   : > { %v9187_v37 = vadd.f32 %v3967_v61, %v3421_v16  ;;  %v3874_v47 = vld.sshfl [vmem:[#allocation1] sm:$0xff pattern:$0x73625140]  ;;  %v9245_v16 = vunpack.c.0.s8 %v4621_v13  ;;  %v4136_v13 = vrot.slane %v9176_v60, 6 }
 0x7d5   : > { %v9174_v42 = vld.sshfl [vmem:[#allocation1 + $0x20] sm:$0xff pattern:$0x73625140]  ;;  %6144 = vmatmul.msk.f32.gmra.mxu2 %vm2964_vm14, %v3805_v63 }
 0x7d6   : > { %3850 = vst [vmem:[#allocation1 + $0x20] ss:$4 sm:$0xff] %v8982_v3  ;;  %v10672_v3 = vld [vmem:[#allocation78_spill] sm:$0xff]  ;;  %v10680_v63 = vld [vmem:[#allocation81_spill] sm:$0xff] }
 0x7d7   : > { %3851 = vst [vmem:[#allocation1 + $0x21] ss:$4 sm:$0xff] %v10668_v58 }
 0x7d8   : > { %3852 = vst [vmem:[#allocation1 + $0x22] ss:$4 sm:$0xff] %v10669_v14  ;;  %v3970_v52 = vpop.f32.mrf.mxu2  ;;  %v9242_v14 = vpop.f32.mrf.mxu1 }
 0x7d9   : > { %3853 = vst [vmem:[#allocation1 + $0x23] ss:$4 sm:$0xff] %v8989_v24  ;;  %v10675_v24 = vld [vmem:[#allocation6_spill] sm:$0xff] }
 0x7da   : > { %v3424_v21 = vadd.f32 %v10675_v24, %v10674_v4 }
 0x7dc   : > { %v9201_v7 = vadd.f32 %v3970_v52, %v3424_v21  ;;  %v4134_v52 = vrot.slane %v9176_v60, 2 }
 0x7dd   : > { %6145 = vmatmul.msk.f32.gmra.mxu2 %vm2964_vm14, %v9096_v36  ;;  %v10676_v36 = vld [vmem:[#allocation17_spill] sm:$0xff] }
 0x7de   : > { %v3415_v44 = vadd.f32 %v10677_v25, %v10676_v36  ;;  %v4135_v36 = vrot.slane %v9176_v60, 4  ;;  %v4138_v60 = vrot.slane %v9187_v37, 4 }
 0x7e0   : > { %v9193_v46 = vld.sshfl [vmem:[#allocation1 + $0x20] sm:$0xff pattern:$0x73625140]  ;;  %v4063_v38 = vadd.f32 %v3961_v12, %v3415_v44  ;;  %v3973_v28 = vpop.f32.mrf.mxu2  ;;  %v9277_v51 = vpop.f32.mrf.mxu1 }
 0x7e1   : > { %3860 = vst [vmem:[#allocation1 + $0x20] ss:$4 sm:$0xff] %v10672_v3  ;;  %v9222_v54 = vadd.f32 %v3973_v28, %v3427_v49  ;;  %v3433_v28 = vadd.f32 %v9166_v5, %v3068_v59  ;;  %v4137_v5 = vrot.slane %v9187_v37, 2 }
 0x7e2   : > { %3861 = vst [vmem:[#allocation1 + $0x21] ss:$4 sm:$0xff] %v10673_v23  ;;  %v4132_v19 = vrot.slane %v4063_v38, 4  ;;  %v4133_v40 = vrot.slane %v4063_v38, 6 }
 0x7e3   : > { %3862 = vst [vmem:[#allocation1 + $0x22] ss:$4 sm:$0xff] %v8998_v11  ;;  %v4131_v11 = vrot.slane %v4063_v38, 2  ;;  %v4143_v29 = vrot.slane %v9222_v54, 2  ;;  %v4144_v15 = vrot.slane %v9222_v54, 4  ;;  %v4145_v41 = vrot.slane %v9222_v54, 6 }
 0x7e4   : > { %3863 = vst [vmem:[#allocation1 + $0x23] ss:$4 sm:$0xff] %v9000_v2  ;;  %v9214_v2 = vrot.slane %v9207_v17, 2  ;;  %v4347_v32 = vadd.f32 %v9217_v43, %v4132_v19 }
 0x7e5   : > { %6146 = vmatmul.msk.f32.gmra.mxu2 %vm2964_vm14, %v3815_v53  ;;  %v4345_v53 = vadd.f32 %v9207_v17, %v4063_v38 }
 0x7e6   : > { %v4346_v0 = vadd.f32 %v9214_v2, %v4131_v11  ;;  %v4363_v35 = vadd.f32 %v9214_v2, %v4144_v15  ;;  %v4483_v33 = vmax.f32 %v4347_v32, 0.0 }
 0x7e7   : > { %v4481_v12 = vmax.f32 %v4345_v53, 0.0  ;;  %v4351_v53 = vadd.f32 %v9217_v43, %v4135_v36  ;;  %v4355_v36 = vadd.f32 %v9217_v43, %v4138_v60  ;;  %v4357_v60 = vadd.f32 %v9207_v17, %v9201_v7 }
 0x7e8   : > { %v4499_v34 = vmax.f32 %v4363_v35, 0.0  ;;  %v4482_v26 = vmax.f32 %v4346_v0, 0.0  ;;  %v3976_v61 = vpop.f32.mrf.mxu2 }
 0x7e9   : > { %v4068_v24 = vadd.f32 %v3976_v61, %v3430_v31  ;;  %v4487_v31 = vmax.f32 %v4351_v53, 0.0 }
 0x7ea   : > { %v4650_v23 = vrot.slane %v4499_v34, 4 }
 0x7eb   : > { %v3865_v20 = vld.sshfl [vmem:[#allocation1 + $0x20] sm:$0xff pattern:$0x73625140]  ;;  %v4146_v8 = vrot.slane %v4068_v24, 2  ;;  %v4147_v49 = vrot.slane %v4068_v24, 4  ;;  %v4148_v11 = vrot.slane %v4068_v24, 6 }
 0x7ec   : > { %6156 = vmatmul.msk.f32.gmra.mxu3 %vm2964_vm14, %v3865_v20  ;;  %3870 = vst [vmem:[#allocation1 + $0x20] ss:$4 sm:$0xff] %v10680_v63  ;;  %v9254_v44 = vsel %vm4618_vm0, %v4650_v23, %v4482_v26  ;;  %v3071_v20 = vpop.f32.mrf.mxu0 }
 0x7ed   : > { %3871 = vst [vmem:[#allocation1 + $0x21] ss:$4 sm:$0xff] %v10681_v10  ;;  %6147 = vmatmul.msk.f32.gmra.mxu2 %vm2964_vm14, %v9107_v50  ;;  %v4362_v50 = vadd.f32 %v9207_v17, %v4143_v29  ;;  %v4366_v63 = vadd.f32 %v9207_v17, %v4146_v8  ;;  %v4350_v10 = vadd.f32 %v9214_v2, %v4134_v52 }
 0x7ee   : > { %3872 = vst [vmem:[#allocation1 + $0x22] ss:$4 sm:$0xff] %v9016_v1  ;;  %v4364_v1 = vadd.f32 %v9217_v43, %v4145_v41  ;;  %v4367_v29 = vadd.f32 %v9214_v2, %v4147_v49  ;;  %v4368_v0 = vadd.f32 %v9217_v43, %v4148_v11 }
 0x7ef   : > { %3873 = vst [vmem:[#allocation1 + $0x23] ss:$4 sm:$0xff] %v9019_v48  ;;  %v9238_v48 = vrot.slane %v9207_v17, 6  ;;  %v4498_v55 = vmax.f32 %v4362_v50, 0.0  ;;  %v4502_v18 = vmax.f32 %v4366_v63, 0.0  ;;  %v4485_v50 = vmax.f32 %v4349_v6, 0.0 }
 0x7f0   : > { %v4500_v58 = vmax.f32 %v4364_v1, 0.0  ;;  %v4503_v59 = vmax.f32 %v4367_v29, 0.0  ;;  %v3979_v35 = vpop.f32.mrf.mxu2  ;;  %v4504_v1 = vmax.f32 %v4368_v0, 0.0  ;;  %v4486_v27 = vmax.f32 %v4350_v10, 0.0 }
 0x7f1   : > { %v4617_v3 = vrot.slane %v4498_v55, 4  ;;  %v4348_v21 = vadd.f32 %v9238_v48, %v4133_v40  ;;  %v4365_v19 = vadd.f32 %v9238_v48, %v4068_v24  ;;  %v4352_v61 = vadd.f32 %v9238_v48, %v4136_v13 }
 0x7f2   : > { %v4682_v4 = vrot.slane %v4500_v58, 4  ;;  %v4778_v55 = vrot.slane %v4503_v59, 4  ;;  %v4810_v26 = vrot.slane %v4504_v1, 4  ;;  %v3436_v6 = vadd.f32 %v9179_v30, %v3071_v20 }
 0x7f3   : > { %v4619_v25 = vsel %vm4618_vm0, %v4617_v3, %v4481_v12  ;;  %v4484_v15 = vmax.f32 %v4348_v21, 0.0  ;;  %v4501_v32 = vmax.f32 %v4365_v19, 0.0  ;;  %v4746_v12 = vrot.slane %v4502_v18, 4 }
 0x7f4   : > { %6157 = vmatmul.msk.f32.gmra.mxu3 %vm2964_vm14, %v3874_v47  ;;  %v9257_v38 = vsel %vm4618_vm0, %v4682_v4, %v4483_v33  ;;  %v4069_v47 = vadd.f32 %v3979_v35, %v3433_v28  ;;  %v9290_v3 = vsel %vm4618_vm0, %v4778_v55, %v4486_v27  ;;  %v4354_v4 = vadd.f32 %v9214_v2, %v4137_v5  ;;  %v3074_v8 = vpop.f32.mrf.mxu0  ;;  %v9310_v35 = vpop.f32.mrf.mxu1 }
 0x7f5   : > { %6148 = vmatmul.msk.f32.gmra.mxu2 %vm2964_vm14, %v9149_v62  ;;  %v9262_v62 = vperm.slane %v4619_v25, %v9245_v16  ;;  %v4714_v40 = vrot.slane %v4501_v32, 4  ;;  %v9284_v58 = vsel %vm4618_vm0, %v4746_v12, %v4485_v50  ;;  %v9294_v24 = vsel %vm4618_vm0, %v4810_v26, %v4487_v31 }
 0x7f6   : > { %v3875_v41 = vld.sshfl [vmem:[#allocation1 + $0x20] sm:$0xff pattern:$0x73625140]  ;;  %v4149_v33 = vrot.slane %v4069_v47, 2  ;;  %v4150_v23 = vrot.slane %v4069_v47, 4  ;;  %10684 = vst [vmem:[#allocation20_spill] sm:$0xff] %v9294_v24  ;;  %v4369_v52 = vadd.f32 %v9238_v48, %v4069_v47 }
 0x7f7   : > { %5166 = vst [vmem:[#allocation1] ss:$4 sm:$0xff] %v9262_v62  ;;  %v9281_v34 = vsel %vm4618_vm0, %v4714_v40, %v4484_v15  ;;  %v4151_v21 = vrot.slane %v4069_v47, 6  ;;  %v4488_v63 = vmax.f32 %v4352_v61, 0.0  ;;  %v4139_v28 = vrot.slane %v9187_v37, 6 }
 0x7f8   : > { %v4370_v25 = vadd.f32 %v9207_v17, %v4149_v33  ;;  %v4371_v49 = vadd.f32 %v9214_v2, %v4150_v23  ;;  %v4505_v19 = vmax.f32 %v4369_v52, 0.0  ;;  %v3982_v29 = vpop.f32.mrf.mxu2  ;;  %v4490_v15 = vmax.f32 %v4354_v4, 0.0 }
 0x7f9   : > { %v4372_v11 = vadd.f32 %v9217_v43, %v4151_v21  ;;  %v4491_v18 = vmax.f32 %v4355_v36, 0.0  ;;  %v4140_v30 = vrot.slane %v9201_v7, 2  ;;  %v4070_v13 = vadd.f32 %v3982_v29, %v3436_v6 }
 0x7fa   : > { %v4506_v53 = vmax.f32 %v4370_v25, 0.0  ;;  %v4842_v32 = vrot.slane %v4505_v19, 4  ;;  %v4141_v50 = vrot.slane %v9201_v7, 4  ;;  %v4356_v1 = vadd.f32 %v9238_v48, %v4139_v28 }
 0x7fb   : > { %v4508_v0 = vmax.f32 %v4372_v11, 0.0  ;;  %v4153_v12 = vrot.slane %v4070_v13, 4  ;;  %v4154_v31 = vrot.slane %v4070_v13, 6  ;;  %v4358_v55 = vadd.f32 %v9214_v2, %v4140_v30 }
 0x7fc   : > { %6158 = vmatmul.msk.f32.gmra.mxu3 %vm2964_vm14, %v3875_v41  ;;  %v4507_v41 = vmax.f32 %v4371_v49, 0.0  ;;  %v4874_v20 = vrot.slane %v4506_v53, 4  ;;  %v9308_v5 = vsel %vm4618_vm0, %v4842_v32, %v4488_v63  ;;  %v4373_v26 = vadd.f32 %v9238_v48, %v4070_v13  ;;  %v3077_v25 = vpop.f32.mrf.mxu0 }
 0x7fd   : > { %6149 = vmatmul.msk.f32.gmra.mxu2 %vm2964_vm14, %v9118_v22  ;;  %v4353_v22 = vadd.f32 %v9207_v17, %v9187_v37  ;;  %10685 = vst [vmem:[#allocation35_spill] sm:$0xff] %v9308_v5  ;;  %v4938_v59 = vrot.slane %v4508_v0, 4  ;;  %v4359_v33 = vadd.f32 %v9217_v43, %v4141_v50  ;;  %v4376_v23 = vadd.f32 %v9217_v43, %v4154_v31 }
 0x7fe   : > { %v4906_v37 = vrot.slane %v4507_v41, 4  ;;  %v3439_v4 = vadd.f32 %v9191_v57, %v3074_v8  ;;  %v4492_v21 = vmax.f32 %v4356_v1, 0.0  ;;  %v4509_v52 = vmax.f32 %v4373_v26, 0.0 }
 0x7ff   : > { %v4489_v10 = vmax.f32 %v4353_v22, 0.0  ;;  %v9320_v27 = vsel %vm4618_vm0, %v4938_v59, %v4491_v18  ;;  %v4375_v22 = vadd.f32 %v9214_v2, %v4153_v12  ;;  %v4142_v6 = vrot.slane %v9201_v7, 6  ;;  %v3453_v18 = vpop.f32.mrf.mxu1 }
 0x800   : > { %v9317_v47 = vsel %vm4618_vm0, %v4906_v37, %v4490_v15  ;;  %10688 = vst [vmem:[#allocation22_spill] sm:$0xff] %v9320_v27  ;;  %v3985_v36 = vpop.f32.mrf.mxu2  ;;  %v4512_v19 = vmax.f32 %v4376_v23, 0.0  ;;  %v4493_v63 = vmax.f32 %v4357_v60, 0.0  ;;  %v4494_v28 = vmax.f32 %v4358_v55, 0.0 }
 0x801   : > { %v9314_v40 = vsel %vm4618_vm0, %v4874_v20, %v4489_v10  ;;  %10687 = vst [vmem:[#allocation13_spill] sm:$0xff] %v9317_v47  ;;  %v4511_v11 = vmax.f32 %v4375_v22, 0.0  ;;  %v4970_v10 = vrot.slane %v4509_v52, 4  ;;  %v4071_v53 = vadd.f32 %v3985_v36, %v3439_v4 }
 0x802   : > { %10686 = vst [vmem:[#allocation36_spill] sm:$0xff] %v9314_v40  ;;  %v4495_v29 = vmax.f32 %v4359_v33, 0.0  ;;  %v5066_v57 = vrot.slane %v4512_v19, 4  ;;  %v4360_v30 = vadd.f32 %v9238_v48, %v4142_v6 }
 0x803   : > { %v5034_v41 = vrot.slane %v4511_v11, 4  ;;  %v9335_v8 = vsel %vm4618_vm0, %v4970_v10, %v4492_v21  ;;  %v4155_v0 = vrot.slane %v4071_v53, 2  ;;  %v4377_v20 = vadd.f32 %v9238_v48, %v4071_v53 }
 0x804   : > { %10689 = vst [vmem:[#allocation26_spill] sm:$0xff] %v9335_v8  ;;  %v3080_v1 = vpop.f32.mrf.mxu0  ;;  %v4496_v31 = vmax.f32 %v4360_v30, 0.0  ;;  %v4156_v19 = vrot.slane %v4071_v53, 4 }
 0x805   : > { %6150 = vmatmul.msk.f32.gmra.mxu2 %vm2964_vm14, %v9161_v9  ;;  %v4152_v9 = vrot.slane %v4070_v13, 2  ;;  %v9341_v32 = vsel %vm4618_vm0, %v5034_v41, %v4494_v28  ;;  %v4361_v13 = vadd.f32 %v9207_v17, %v9222_v54  ;;  %v4378_v50 = vadd.f32 %v9207_v17, %v4155_v0 }
 0x806   : > { %10691 = vst [vmem:[#allocation21_spill] sm:$0xff] %v9341_v32  ;;  %v4513_v37 = vmax.f32 %v4377_v20, 0.0  ;;  %v3445_v22 = vadd.f32 %v9242_v14, %v3080_v1 }
 0x807   : > { %v4374_v61 = vadd.f32 %v9207_v17, %v4152_v9  ;;  %v3442_v9 = vadd.f32 %v9209_v39, %v3077_v25  ;;  %v4514_v12 = vmax.f32 %v4378_v50, 0.0  ;;  %v4497_v55 = vmax.f32 %v4361_v13, 0.0  ;;  %v3456_v23 = vpop.f32.mrf.mxu1 }
 0x808   : > { %v3988_v59 = vpop.f32.mrf.mxu2  ;;  %v5098_v60 = vrot.slane %v4513_v37, 4 }
 0x809   : > { %v4510_v49 = vmax.f32 %v4374_v61, 0.0  ;;  %v5130_v26 = vrot.slane %v4514_v12, 4  ;;  %v9354_v33 = vadd.f32 %v3988_v59, %v3442_v9 }
 0x80a   : > { %v9357_v61 = vsel %vm4618_vm0, %v5098_v60, %v4496_v31 }
 0x80b   : > { %v5002_v15 = vrot.slane %v4510_v49, 4  ;;  %10693 = vst [vmem:[#allocation31_spill] sm:$0xff] %v9357_v61  ;;  %v9360_v54 = vsel %vm4618_vm0, %v5130_v26, %v4497_v55  ;;  %v4158_v41 = vrot.slane %v9354_v33, 2  ;;  %v4381_v37 = vadd.f32 %v9217_v43, %v9354_v33 }
 0x80c   : > { %10694 = vst [vmem:[#allocation32_spill] sm:$0xff] %v9360_v54  ;;  %v3083_v4 = vpop.f32.mrf.mxu0 }
 0x80d   : > { %6151 = vmatmul.msk.f32.gmra.mxu2 %vm2964_vm14, %v9131_v56  ;;  %v9338_v7 = vsel %vm4618_vm0, %v5002_v15, %v4493_v63  ;;  %v9344_v56 = vsel %vm4618_vm0, %v5066_v57, %v4495_v29  ;;  %v4157_v29 = vrot.slane %v4071_v53, 6  ;;  %v4382_v9 = vadd.f32 %v9238_v48, %v4158_v41 }
 0x80e   : > { %10690 = vst [vmem:[#allocation28_spill] sm:$0xff] %v9338_v7 }
 0x80f   : > { %10692 = vst [vmem:[#allocation37_spill] sm:$0xff] %v9344_v56  ;;  %v9372_v6 = vpop.f32.mrf.mxu1  ;;  %v4380_v50 = vadd.f32 %v9214_v2, %v4157_v29 }
 0x810   : > { %v3991_v39 = vpop.f32.mrf.mxu2 }
 0x811   : > { %v9363_v21 = vadd.f32 %v3991_v39, %v3445_v22 }
 0x814   : > { %v3086_v36 = vpop.f32.mrf.mxu0 }
 0x815   : > { %6152 = vmatmul.msk.f32.gmra.mxu2 %vm2964_vm14, %v9174_v42  ;;  %v3448_v42 = vadd.f32 %v9277_v51, %v3083_v4  ;;  %v3451_v14 = vadd.f32 %v9310_v35, %v3086_v36  ;;  %v4379_v51 = vadd.f32 %v9207_v17, %v4156_v19  ;;  %v4159_v35 = vrot.slane %v9354_v33, 4 }
 0x816   : > { %v4160_v36 = vrot.slane %v9354_v33, 6  ;;  %v4517_v19 = vmax.f32 %v4381_v37, 0.0 }
 0x817   : > { %v9378_v28 = vpop.f32.mrf.mxu1  ;;  %v4515_v30 = vmax.f32 %v4379_v51, 0.0  ;;  %v4383_v12 = vadd.f32 %v9207_v17, %v4159_v35 }
 0x818   : > { %v3994_v52 = vpop.f32.mrf.mxu2 }
 0x819   : > { %v9368_v25 = vadd.f32 %v3994_v52, %v3448_v42  ;;  %v4516_v42 = vmax.f32 %v4380_v50, 0.0  ;;  %v4519_v51 = vmax.f32 %v4383_v12, 0.0  ;;  %v4384_v50 = vadd.f32 %v9214_v2, %v4160_v36 }
 0x81a   : > { %v4163_v36 = vrot.slane %v9363_v21, 6 }
 0x81c   : > { %v3089_v11 = vpop.f32.mrf.mxu0 }
 0x81d   : > { %6153 = vmatmul.msk.f32.gmra.mxu2 %vm2964_vm14, %v9142_v45  ;;  %v3454_v15 = vadd.f32 %v3453_v18, %v3089_v11 }
 0x81f   : > { %v9397_v4 = vpop.f32.mrf.mxu1 }
 0x820   : > { %v3997_v49 = vpop.f32.mrf.mxu2 }
 0x821   : > { %v9375_v63 = vadd.f32 %v3997_v49, %v3451_v14 }
 0x823   : > { %v4169_v45 = vrot.slane %v9375_v63, 6 }
 0x824   : > { %v3092_v0 = vpop.f32.mrf.mxu0 }
 0x825   : > { %6154 = vmatmul.msk.f32.gmra.mxu2 %vm2964_vm14, %v9193_v46  ;;  %v4396_v10 = vadd.f32 %v9207_v17, %v4169_v45  ;;  %v3457_v39 = vadd.f32 %v3456_v23, %v3092_v0  ;;  %v4518_v45 = vmax.f32 %v4382_v9, 0.0  ;;  %v4162_v0 = vrot.slane %v9363_v21, 4 }
 0x827   : > { %v4532_v46 = vmax.f32 %v4396_v10, 0.0  ;;  %v4387_v12 = vadd.f32 %v9207_v17, %v4162_v0  ;;  %v4164_v0 = vrot.slane %v9368_v25, 2 }
 0x828   : > { %v4000_v57 = vpop.f32.mrf.mxu2 }
 0x829   : > { %v4626_v20 = vrot.slane %v4532_v46, 4  ;;  %v4076_v13 = vadd.f32 %v4000_v57, %v3454_v15  ;;  %v4161_v57 = vrot.slane %v9363_v21, 2 }
 0x82b   : > { %v4627_v59 = vsel %vm4618_vm0, %v4626_v20, %v4515_v30  ;;  %v4170_v1 = vrot.slane %v4076_v13, 2  ;;  %v4171_v53 = vrot.slane %v4076_v13, 4  ;;  %v4172_v18 = vrot.slane %v4076_v13, 6 }
 0x82c   : > { %v9391_v31 = vperm.slane %v4627_v59, %v9245_v16  ;;  %v4397_v60 = vadd.f32 %v9214_v2, %v4076_v13  ;;  %v3095_v15 = vpop.f32.mrf.mxu0  ;;  %v4386_v9 = vadd.f32 %v9238_v48, %v4161_v57 }
 0x82d   : > { %v4398_v55 = vadd.f32 %v9217_v43, %v4170_v1  ;;  %v4399_v26 = vadd.f32 %v9238_v48, %v4171_v53  ;;  %v4400_v22 = vadd.f32 %v9207_v17, %v4172_v18  ;;  %v4385_v18 = vadd.f32 %v9217_v43, %v9363_v21 }
 0x82e   : > { %5168 = vst [vmem:[#allocation1 + $0x1] ss:$4 sm:$0xff] %v9391_v31  ;;  %v4533_v52 = vmax.f32 %v4397_v60, 0.0 }
 0x82f   : > { %v4534_v14 = vmax.f32 %v4398_v55, 0.0  ;;  %v4535_v49 = vmax.f32 %v4399_v26, 0.0  ;;  %v4536_v11 = vmax.f32 %v4400_v22, 0.0  ;;  %v3460_v55 = vadd.f32 %v9372_v6, %v3095_v15 }
 0x830   : > { %v4658_v10 = vrot.slane %v4533_v52, 4  ;;  %v4003_v29 = vpop.f32.mrf.mxu2  ;;  %v4520_v52 = vmax.f32 %v4384_v50, 0.0 }
 0x831   : > { %v4690_v46 = vrot.slane %v4534_v14, 4  ;;  %v4722_v41 = vrot.slane %v4535_v49, 4  ;;  %v4754_v23 = vrot.slane %v4536_v11, 4  ;;  %v4077_v35 = vadd.f32 %v4003_v29, %v3457_v39 }
 0x832   : > { %v9404_v30 = vsel %vm4618_vm0, %v4658_v10, %v4516_v42  ;;  %v9425_v42 = vpop.f32.mrf.mxu1  ;;  %v4521_v10 = vmax.f32 %v4385_v18, 0.0  ;;  %v4522_v29 = vmax.f32 %v4386_v9, 0.0  ;;  %v9443_v9 = vpop.f32.mrf.mxu3 }
 0x833   : > { %v9407_v33 = vsel %vm4618_vm0, %v4690_v46, %v4517_v19  ;;  %v9410_v20 = vsel %vm4618_vm0, %v4722_v41, %v4518_v45  ;;  %v9413_v13 = vsel %vm4618_vm0, %v4754_v23, %v4519_v51  ;;  %v4173_v37 = vrot.slane %v4077_v35, 2 }
 0x834   : > { %v4174_v59 = vrot.slane %v4077_v35, 4  ;;  %v4175_v1 = vrot.slane %v4077_v35, 6  ;;  %v4401_v53 = vadd.f32 %v9214_v2, %v4077_v35  ;;  %v4523_v46 = vmax.f32 %v4387_v12, 0.0  ;;  %v3098_v15 = vpop.f32.mrf.mxu0 }
 0x835   : > { %v4402_v60 = vadd.f32 %v9217_v43, %v4173_v37 }
 0x836   : > { %v4403_v26 = vadd.f32 %v9238_v48, %v4174_v59  ;;  %v4404_v22 = vadd.f32 %v9207_v17, %v4175_v1  ;;  %v4537_v39 = vmax.f32 %v4401_v53, 0.0  ;;  %v4165_v59 = vrot.slane %v9368_v25, 4 }
 0x837   : > { %v4538_v14 = vmax.f32 %v4402_v60, 0.0  ;;  %v4388_v60 = vadd.f32 %v9214_v2, %v4163_v36 }
 0x838   : > { %v4006_v49 = vpop.f32.mrf.mxu2  ;;  %v4539_v11 = vmax.f32 %v4403_v26, 0.0  ;;  %v4540_v19 = vmax.f32 %v4404_v22, 0.0  ;;  %v4786_v45 = vrot.slane %v4537_v39, 4 }
 0x839   : > { %v4078_v51 = vadd.f32 %v4006_v49, %v3460_v55  ;;  %v4818_v6 = vrot.slane %v4538_v14, 4  ;;  %v4389_v55 = vadd.f32 %v9217_v43, %v9368_v25  ;;  %v4391_v14 = vadd.f32 %v9207_v17, %v4165_v59 }
 0x83a   : > { %v9429_v41 = vsel %vm4618_vm0, %v4786_v45, %v4520_v52  ;;  %v4850_v23 = vrot.slane %v4539_v11, 4  ;;  %v4882_v35 = vrot.slane %v4540_v19, 4  ;;  %v4390_v52 = vadd.f32 %v9238_v48, %v4164_v0  ;;  %v3471_v49 = vpop.f32.mrf.mxu1 }
 0x83b   : > { %v4176_v57 = vrot.slane %v4078_v51, 2  ;;  %v9433_v21 = vsel %vm4618_vm0, %v4818_v6, %v4521_v10  ;;  %v4177_v50 = vrot.slane %v4078_v51, 4  ;;  %v4178_v37 = vrot.slane %v4078_v51, 6 }
 0x83c   : > { %10695 = vst [vmem:[#allocation34_spill] sm:$0xff] %v9433_v21  ;;  %v9437_v1 = vsel %vm4618_vm0, %v4850_v23, %v4522_v29  ;;  %v9440_v53 = vsel %vm4618_vm0, %v4882_v35, %v4523_v46  ;;  %v4405_v18 = vadd.f32 %v9214_v2, %v4078_v51  ;;  %v9453_v45 = vpop.f32.mrf.mxu0  ;;  %v4524_v51 = vmax.f32 %v4388_v60, 0.0 }
 0x83d   : > { %10696 = vst [vmem:[#allocation33_spill] sm:$0xff] %v9437_v1  ;;  %v4406_v12 = vadd.f32 %v9217_v43, %v4176_v57  ;;  %v4407_v26 = vadd.f32 %v9238_v48, %v4177_v50  ;;  %v4408_v22 = vadd.f32 %v9207_v17, %v4178_v37  ;;  %v4525_v10 = vmax.f32 %v4389_v55, 0.0  ;;  %v9456_v50 = vpop.f32.mrf.mxu3 }
 0x83e   : > { %10697 = vst [vmem:[#allocation40_spill] sm:$0xff] %v9440_v53  ;;  %v4541_v39 = vmax.f32 %v4405_v18, 0.0  ;;  %v3463_v23 = vadd.f32 %v9378_v28, %v3098_v15  ;;  %v4526_v35 = vmax.f32 %v4390_v52, 0.0  ;;  %v4527_v57 = vmax.f32 %v4391_v14, 0.0 }
 0x83f   : > { %v4542_v11 = vmax.f32 %v4406_v12, 0.0  ;;  %v4543_v36 = vmax.f32 %v4407_v26, 0.0  ;;  %v4544_v29 = vmax.f32 %v4408_v22, 0.0  ;;  %v4166_v12 = vrot.slane %v9368_v25, 6 }
 0x840   : > { %v4009_v19 = vpop.f32.mrf.mxu2  ;;  %v4914_v46 = vrot.slane %v4541_v39, 4  ;;  %v4167_v60 = vrot.slane %v9375_v63, 2  ;;  %v4168_v55 = vrot.slane %v9375_v63, 4 }
 0x841   : > { %v4946_v6 = vrot.slane %v4542_v11, 4  ;;  %v4978_v59 = vrot.slane %v4543_v36, 4  ;;  %v5010_v18 = vrot.slane %v4544_v29, 4  ;;  %v4079_v26 = vadd.f32 %v4009_v19, %v3463_v23 }
 0x842   : > { %v9459_v0 = vsel %vm4618_vm0, %v4914_v46, %v4524_v51  ;;  %v4392_v14 = vadd.f32 %v9214_v2, %v4166_v12  ;;  %v4393_v11 = vadd.f32 %v9217_v43, %v9375_v63  ;;  %v4394_v25 = vadd.f32 %v9238_v48, %v4167_v60 }
 0x843   : > { %10698 = vst [vmem:[#allocation16_spill] sm:$0xff] %v9459_v0  ;;  %v9462_v37 = vsel %vm4618_vm0, %v4946_v6, %v4525_v10  ;;  %v9468_v28 = vsel %vm4618_vm0, %v4978_v59, %v4526_v35  ;;  %v9471_v15 = vsel %vm4618_vm0, %v5010_v18, %v4527_v57  ;;  %v4179_v22 = vrot.slane %v4079_v26, 2  ;;  %v3474_v10 = vpop.f32.mrf.mxu1 }
 0x844   : > { %10699 = vst [vmem:[#allocation25_spill] sm:$0xff] %v9462_v37  ;;  %v4180_v39 = vrot.slane %v4079_v26, 4  ;;  %v4181_v52 = vrot.slane %v4079_v26, 6  ;;  %v4409_v51 = vadd.f32 %v9214_v2, %v4079_v26  ;;  %v4395_v36 = vadd.f32 %v9207_v17, %v4168_v55  ;;  %v3104_v23 = vpop.f32.mrf.mxu0 }
 0x845   : > { %10700 = vst [vmem:[#allocation27_spill] sm:$0xff] %v9468_v28  ;;  %v4410_v29 = vadd.f32 %v9217_v43, %v4179_v22  ;;  %v9482_v57 = vpop.f32.mrf.mxu3  ;;  %v4528_v12 = vmax.f32 %v4392_v14, 0.0  ;;  %v4529_v60 = vmax.f32 %v4393_v11, 0.0  ;;  %v4530_v26 = vmax.f32 %v4394_v25, 0.0 }
 0x846   : > { %10701 = vst [vmem:[#allocation11_spill] sm:$0xff] %v9471_v15  ;;  %v4411_v46 = vadd.f32 %v9238_v48, %v4180_v39  ;;  %v4412_v19 = vadd.f32 %v9207_v17, %v4181_v52  ;;  %v4545_v35 = vmax.f32 %v4409_v51, 0.0  ;;  %v4531_v61 = vmax.f32 %v4395_v36, 0.0 }
 0x847   : > { %v4546_v59 = vmax.f32 %v4410_v29, 0.0  ;;  %v3469_v14 = vadd.f32 %v9425_v42, %v3104_v23  ;;  %v3466_v23 = vadd.f32 %v9397_v4, %v9453_v45 }
 0x848   : > { %v4012_v6 = vpop.f32.mrf.mxu2  ;;  %v4547_v63 = vmax.f32 %v4411_v46, 0.0  ;;  %v4548_v18 = vmax.f32 %v4412_v19, 0.0  ;;  %v5042_v54 = vrot.slane %v4545_v35, 4 }
 0x849   : > { %v5074_v55 = vrot.slane %v4546_v59, 4 }
 0x84a   : > { %v5106_v56 = vrot.slane %v4547_v63, 4  ;;  %v5138_v22 = vrot.slane %v4548_v18, 4  ;;  %v9485_v39 = vsel %vm4618_vm0, %v5042_v54, %v4528_v12 }
 0x84b   : > { %10702 = vst [vmem:[#allocation38_spill] sm:$0xff] %v9485_v39  ;;  %v9488_v52 = vsel %vm4618_vm0, %v5074_v55, %v4529_v60  ;;  %v3477_v19 = vpop.f32.mrf.mxu1  ;;  %v4080_v55 = vadd.f32 %v4012_v6, %v3466_v23 }
 0x84c   : > { %10703 = vst [vmem:[#allocation3_spill] sm:$0xff] %v9488_v52  ;;  %v9491_v51 = vsel %vm4618_vm0, %v5106_v56, %v4530_v26  ;;  %v9494_v29 = vsel %vm4618_vm0, %v5138_v22, %v4531_v61  ;;  %v3107_v25 = vpop.f32.mrf.mxu0 }
 0x84d   : > { %10704 = vst [vmem:[#allocation15_spill] sm:$0xff] %v9491_v51  ;;  %v9499_v46 = vpop.f32.mrf.mxu3  ;;  %v3472_v54 = vadd.f32 %v3471_v49, %v3107_v25 }
 0x84e   : > { %10705 = vst [vmem:[#allocation45_spill] sm:$0xff] %v9494_v29 }
 0x850   : > { %v4015_v11 = vpop.f32.mrf.mxu2 }
 0x851   : > { %v9497_v36 = vadd.f32 %v4015_v11, %v3469_v14  ;;  %v4182_v14 = vrot.slane %v4080_v55, 2  ;;  %v4183_v11 = vrot.slane %v4080_v55, 4 }
 0x853   : > { %v3480_v56 = vpop.f32.mrf.mxu1  ;;  %v4414_v4 = vadd.f32 %v9214_v2, %v4182_v14  ;;  %v4415_v45 = vadd.f32 %v9217_v43, %v4183_v11  ;;  %v4185_v14 = vrot.slane %v9497_v36, 2  ;;  %v4186_v11 = vrot.slane %v9497_v36, 4 }
 0x854   : > { %v3110_v59 = vpop.f32.mrf.mxu0 }
 0x855   : > { %v9503_v18 = vpop.f32.mrf.mxu3  ;;  %v3475_v12 = vadd.f32 %v3474_v10, %v3110_v59  ;;  %v4413_v10 = vadd.f32 %v9207_v17, %v4080_v55  ;;  %v4550_v15 = vmax.f32 %v4414_v4, 0.0  ;;  %v4551_v7 = vmax.f32 %v4415_v45, 0.0 }
 0x856   : > { %v4187_v4 = vrot.slane %v9497_v36, 6  ;;  %v4417_v45 = vadd.f32 %v9207_v17, %v9497_v36 }
 0x858   : > { %v4018_v35 = vpop.f32.mrf.mxu2 }
 0x859   : > { %v9501_v63 = vadd.f32 %v4018_v35, %v3472_v54 }
 0x85b   : > { %v3483_v22 = vpop.f32.mrf.mxu1 }
 0x85c   : > { %v3113_v60 = vpop.f32.mrf.mxu0 }
 0x85d   : > { %v9507_v42 = vpop.f32.mrf.mxu3  ;;  %v3478_v49 = vadd.f32 %v3477_v19, %v3113_v60 }
 0x860   : > { %v4021_v61 = vpop.f32.mrf.mxu2 }
 0x861   : > { %v9505_v26 = vadd.f32 %v4021_v61, %v3475_v12 }
 0x863   : > { %v9524_v32 = vpop.f32.mrf.mxu1 }
 0x864   : > { %v3116_v54 = vpop.f32.mrf.mxu0 }
 0x865   : > { %v9517_v29 = vpop.f32.mrf.mxu3  ;;  %v3481_v23 = vadd.f32 %v3480_v56, %v3116_v54 }
 0x868   : > { %v4024_v25 = vpop.f32.mrf.mxu2 }
 0x869   : > { %v9511_v35 = vadd.f32 %v4024_v25, %v3478_v49  ;;  %v4184_v49 = vrot.slane %v4080_v55, 6  ;;  %v4549_v25 = vmax.f32 %v4413_v10, 0.0 }
 0x86b   : > { %v4194_v59 = vrot.slane %v9511_v35, 2  ;;  %v4195_v12 = vrot.slane %v9511_v35, 4  ;;  %v4196_v61 = vrot.slane %v9511_v35, 6  ;;  %v4416_v10 = vadd.f32 %v9238_v48, %v4184_v49 }
 0x86c   : > { %v4553_v49 = vmax.f32 %v4417_v45, 0.0 }
 0x86d   : > { %v4430_v6 = vadd.f32 %v9207_v17, %v4194_v59  ;;  %v4431_v19 = vadd.f32 %v9214_v2, %v4195_v12  ;;  %v4432_v60 = vadd.f32 %v9217_v43, %v4196_v61  ;;  %v3119_v59 = vpop.f32.mrf.mxu0 }
 0x86f   : > { %v4566_v51 = vmax.f32 %v4430_v6, 0.0  ;;  %v4567_v52 = vmax.f32 %v4431_v19, 0.0  ;;  %v4568_v39 = vmax.f32 %v4432_v60, 0.0  ;;  %v4552_v6 = vmax.f32 %v4416_v10, 0.0 }
 0x870   : > { %v4027_v28 = vpop.f32.mrf.mxu2  ;;  %v4420_v19 = vadd.f32 %v9238_v48, %v4187_v4 }
 0x871   : > { %v4634_v8 = vrot.slane %v4566_v51, 4  ;;  %v4666_v12 = vrot.slane %v4567_v52, 4  ;;  %v4698_v37 = vrot.slane %v4568_v39, 4  ;;  %v4085_v61 = vadd.f32 %v4027_v28, %v3481_v23 }
 0x872   : > { %v4418_v51 = vadd.f32 %v9214_v2, %v4185_v14  ;;  %v4419_v39 = vadd.f32 %v9217_v43, %v4186_v11 }
 0x873   : > { %v4635_v56 = vsel %vm4618_vm0, %v4634_v8, %v4549_v25  ;;  %v9530_v55 = vsel %vm4618_vm0, %v4666_v12, %v4550_v15  ;;  %v9533_v54 = vsel %vm4618_vm0, %v4698_v37, %v4551_v7  ;;  %v4197_v8 = vrot.slane %v4085_v61, 2  ;;  %v9544_v15 = vpop.f32.mrf.mxu3  ;;  %v3489_v12 = vpop.f32.mrf.mxu1 }
 0x874   : > { %v9542_v28 = vperm.slane %v4635_v56, %v9245_v16  ;;  %v4198_v52 = vrot.slane %v4085_v61, 4  ;;  %v4199_v7 = vrot.slane %v4085_v61, 6  ;;  %v3484_v37 = vadd.f32 %v3483_v22, %v3119_v59 }
 0x875   : > { %v4433_v36 = vadd.f32 %v9238_v48, %v4085_v61  ;;  %v3122_v23 = vpop.f32.mrf.mxu0  ;;  %v4554_v25 = vmax.f32 %v4418_v51, 0.0  ;;  %v4555_v14 = vmax.f32 %v4419_v39, 0.0  ;;  %v4434_v11 = vadd.f32 %v9207_v17, %v4197_v8 }
 0x876   : > { %5170 = vst [vmem:[#allocation1 + $0x2] ss:$4 sm:$0xff] %v9542_v28  ;;  %v4435_v56 = vadd.f32 %v9214_v2, %v4198_v52  ;;  %v4436_v27 = vadd.f32 %v9217_v43, %v4199_v7  ;;  %v4188_v22 = vrot.slane %v9501_v63, 2  ;;  %v4189_v59 = vrot.slane %v9501_v63, 4 }
 0x877   : > { %v4569_v0 = vmax.f32 %v4433_v36, 0.0  ;;  %v4421_v61 = vadd.f32 %v9207_v17, %v9501_v63  ;;  %v4570_v10 = vmax.f32 %v4434_v11, 0.0 }
 0x878   : > { %v4030_v60 = vpop.f32.mrf.mxu2  ;;  %v4571_v4 = vmax.f32 %v4435_v56, 0.0  ;;  %v4572_v45 = vmax.f32 %v4436_v27, 0.0  ;;  %v4422_v5 = vadd.f32 %v9214_v2, %v4188_v22  ;;  %v4423_v56 = vadd.f32 %v9217_v43, %v4189_v59 }
 0x879   : > { %v4086_v47 = vadd.f32 %v4030_v60, %v3484_v37  ;;  %v4730_v51 = vrot.slane %v4569_v0, 4  ;;  %v4762_v8 = vrot.slane %v4570_v10, 4  ;;  %v3505_v22 = vadd.f32 %v9503_v18, %v9443_v9 }
 0x87a   : > { %v4794_v36 = vrot.slane %v4571_v4, 4  ;;  %v4826_v60 = vrot.slane %v4572_v45, 4  ;;  %v3487_v59 = vadd.f32 %v9524_v32, %v3122_v23 }
 0x87b   : > { %v4200_v39 = vrot.slane %v4086_v47, 2  ;;  %v4201_v53 = vrot.slane %v4086_v47, 4  ;;  %v4202_v40 = vrot.slane %v4086_v47, 6  ;;  %v4437_v52 = vadd.f32 %v9238_v48, %v4086_v47  ;;  %v4051_v7 = vpop.f32.mrf.mxu3 }
 0x87c   : > { %v9558_v37 = vsel %vm4618_vm0, %v4730_v51, %v4552_v6  ;;  %v9563_v11 = vsel %vm4618_vm0, %v4762_v8, %v4553_v49  ;;  %v9569_v47 = vsel %vm4618_vm0, %v4794_v36, %v4554_v25  ;;  %v9572_v6 = vsel %vm4618_vm0, %v4826_v60, %v4555_v14  ;;  %v3492_v14 = vpop.f32.mrf.mxu1 }
 0x87d   : > { %v4438_v1 = vadd.f32 %v9207_v17, %v4200_v39  ;;  %v4439_v27 = vadd.f32 %v9214_v2, %v4201_v53  ;;  %v4440_v0 = vadd.f32 %v9217_v43, %v4202_v40  ;;  %10706 = vst [vmem:[#allocation43_spill] sm:$0xff] %v9572_v6  ;;  %v4573_v10 = vmax.f32 %v4437_v52, 0.0  ;;  %v3125_v45 = vpop.f32.mrf.mxu0 }
 0x87e   : > { %v4556_v49 = vmax.f32 %v4420_v19, 0.0  ;;  %v4190_v53 = vrot.slane %v9501_v63, 6  ;;  %v4557_v25 = vmax.f32 %v4421_v61, 0.0  ;;  %v4558_v36 = vmax.f32 %v4422_v5, 0.0 }
 0x87f   : > { %v4574_v51 = vmax.f32 %v4438_v1, 0.0  ;;  %v4575_v39 = vmax.f32 %v4439_v27, 0.0  ;;  %v4576_v40 = vmax.f32 %v4440_v0, 0.0  ;;  %v4858_v8 = vrot.slane %v4573_v10, 4 }
 0x880   : > { %v4033_v4 = vpop.f32.mrf.mxu2  ;;  %v4559_v60 = vmax.f32 %v4423_v56, 0.0  ;;  %v9581_v9 = vadd.f32 %v4051_v7, %v3505_v22  ;;  %v4191_v1 = vrot.slane %v9505_v26, 2  ;;  %v4192_v63 = vrot.slane %v9505_v26, 4 }
 0x881   : > { %v4890_v21 = vrot.slane %v4574_v51, 4  ;;  %v9579_v52 = vsel %vm4618_vm0, %v4858_v8, %v4556_v49  ;;  %v4922_v6 = vrot.slane %v4575_v39, 4  ;;  %v4954_v24 = vrot.slane %v4576_v40, 4 }
 0x882   : > { %v4424_v5 = vadd.f32 %v9238_v48, %v4190_v53  ;;  %v4087_v61 = vadd.f32 %v4033_v4, %v3487_v59  ;;  %v3508_v7 = vadd.f32 %v9507_v42, %v9456_v50  ;;  %v3490_v27 = vadd.f32 %v3489_v12, %v3125_v45 }
 0x883   : > { %v9586_v18 = vsel %vm4618_vm0, %v4890_v21, %v4557_v25  ;;  %v4054_v32 = vpop.f32.mrf.mxu3  ;;  %v9590_v19 = vsel %vm4618_vm0, %v4922_v6, %v4558_v36  ;;  %v9593_v23 = vsel %vm4618_vm0, %v4954_v24, %v4559_v60  ;;  %v4425_v0 = vadd.f32 %v9207_v17, %v9505_v26 }
 0x884   : > { %v4203_v56 = vrot.slane %v4087_v61, 2  ;;  %v4204_v21 = vrot.slane %v4087_v61, 4  ;;  %v4205_v10 = vrot.slane %v4087_v61, 6  ;;  %v4223_v49 = vrot.slane %v9581_v9, 6 }
 0x885   : > { %v4426_v6 = vadd.f32 %v9214_v2, %v4191_v1  ;;  %v4427_v51 = vadd.f32 %v9217_v43, %v4192_v63  ;;  %v4441_v24 = vadd.f32 %v9238_v48, %v4087_v61  ;;  %v4560_v4 = vmax.f32 %v4424_v5, 0.0  ;;  %v3128_v12 = vpop.f32.mrf.mxu0  ;;  %v3495_v61 = vpop.f32.mrf.mxu1 }
 0x886   : > { %v4442_v53 = vadd.f32 %v9207_v17, %v4203_v56  ;;  %v4443_v50 = vadd.f32 %v9214_v2, %v4204_v21  ;;  %v4444_v42 = vadd.f32 %v9217_v43, %v4205_v10  ;;  %v4094_v45 = vadd.f32 %v4054_v32, %v3508_v7 }
 0x887   : > { %v4193_v39 = vrot.slane %v9505_v26, 6  ;;  %v4577_v40 = vmax.f32 %v4441_v24, 0.0  ;;  %v4561_v59 = vmax.f32 %v4425_v0, 0.0  ;;  %v4562_v1 = vmax.f32 %v4426_v6, 0.0 }
 0x888   : > { %v4036_v22 = vpop.f32.mrf.mxu2  ;;  %v4578_v25 = vmax.f32 %v4442_v53, 0.0  ;;  %v4579_v36 = vmax.f32 %v4443_v50, 0.0  ;;  %v4580_v60 = vmax.f32 %v4444_v42, 0.0  ;;  %v4563_v63 = vmax.f32 %v4427_v51, 0.0 }
 0x889   : > { %v9607_v8 = vadd.f32 %v4036_v22, %v3490_v27  ;;  %v4986_v5 = vrot.slane %v4577_v40, 4  ;;  %v4428_v32 = vadd.f32 %v9238_v48, %v4193_v39  ;;  %v9617_v27 = vld [vmem:[%s6542_s25] ss:$0 sm:$0xff]  ;;  %v4224_v42 = vrot.slane %v4094_v45, 2  ;;  %s6449_s25 = smov 64  }
 0x88a   : > { %v5018_v56 = vrot.slane %v4578_v25, 4  ;;  %v5050_v21 = vrot.slane %v4579_v36, 4  ;;  %v5082_v10 = vrot.slane %v4580_v60, 4  ;;  %v4429_v6 = vadd.f32 %v9617_v27, %v9511_v35 }
 0x88b   : > { %v4206_v17 = vrot.slane %v9607_v8, 2  ;;  %v4445_v26 = vadd.f32 %v9238_v48, %v9607_v8  ;;  %v9614_v7 = vsel %vm4618_vm0, %v4986_v5, %v4560_v4  ;;  %v4057_v22 = vpop.f32.mrf.mxu3  ;;  %v4468_v4 = vadd.f32 %v9617_v27, %v4223_v49 }
 0x88c   : > { %v9623_v51 = vsel %vm4618_vm0, %v5018_v56, %v4561_v59  ;;  %v9626_v24 = vsel %vm4618_vm0, %v5050_v21, %v4562_v1  ;;  %v9629_v53 = vsel %vm4618_vm0, %v5082_v10, %v4563_v63  ;;  %v3511_v40 = vadd.f32 %v9517_v29, %v9482_v57 }
 0x88d   : > { %v4446_v0 = vadd.f32 %v9617_v27, %v4206_v17  ;;  %10707 = vst [vmem:[#allocation44_spill] sm:$0xff] %v9623_v51  ;;  %v4581_v39 = vmax.f32 %v4445_v26, 0.0  ;;  %v3493_v25 = vadd.f32 %v3492_v14, %v3128_v12  ;;  %v4225_v36 = vrot.slane %v4094_v45, 4  ;;  %v3131_v60 = vpop.f32.mrf.mxu0 }
 0x88e   : > { %10708 = vst [vmem:[#allocation39_spill] sm:$0xff] %v9626_v24  ;;  %v4226_v59 = vrot.slane %v4094_v45, 6  ;;  %v4469_v5 = vadd.f32 %v9214_v2, %v4094_v45  ;;  %v4564_v1 = vmax.f32 %v4428_v32, 0.0  ;;  %v4095_v56 = vadd.f32 %v4057_v22, %v3511_v40 }
 0x88f   : > { %10709 = vst [vmem:[#allocation23_spill] sm:$0xff] %v9629_v53  ;;  %v4582_v35 = vmax.f32 %v4446_v0, 0.0  ;;  %v5114_v17 = vrot.slane %v4581_v39, 4  ;;  %v4565_v63 = vmax.f32 %v4429_v6, 0.0  ;;  %v4604_v49 = vmax.f32 %v4468_v4, 0.0  ;;  %v3498_v6 = vpop.f32.mrf.mxu1 }
 0x890   : > { %v4039_v50 = vpop.f32.mrf.mxu2  ;;  %v4470_v26 = vadd.f32 %v9217_v43, %v4224_v42  ;;  %v4471_v53 = vadd.f32 %v9238_v48, %v4225_v36  ;;  %v4472_v12 = vadd.f32 %v9617_v27, %v4226_v59  ;;  %v4605_v45 = vmax.f32 %v4469_v5, 0.0 }
 0x891   : > { %v5146_v21 = vrot.slane %v4582_v35, 4  ;;  %v9635_v10 = vadd.f32 %v4039_v50, %v3493_v25  ;;  %v9640_v57 = vsel %vm4618_vm0, %v5114_v17, %v4564_v1  ;;  %v3514_v0 = vadd.f32 %v9544_v15, %v9499_v46 }
 0x892   : > { %10710 = vst [vmem:[#allocation63_spill] sm:$0xff] %v9640_v57  ;;  %v3496_v22 = vadd.f32 %v3495_v61, %v3131_v60  ;;  %v4227_v50 = vrot.slane %v4095_v56, 2  ;;  %v4770_v39 = vrot.slane %v4604_v49, 4  ;;  %v4606_v40 = vmax.f32 %v4470_v26, 0.0 }
 0x893   : > { %v9643_v29 = vsel %vm4618_vm0, %v5146_v21, %v4565_v63  ;;  %v4210_v14 = vrot.slane %v9635_v10, 4  ;;  %v4211_v32 = vrot.slane %v9635_v10, 6  ;;  %v4228_v25 = vrot.slane %v4095_v56, 4  ;;  %v4060_v5 = vpop.f32.mrf.mxu3 }
 0x894   : > { %10711 = vst [vmem:[#allocation51_spill] sm:$0xff] %v9643_v29  ;;  %v4607_v35 = vmax.f32 %v4471_v53, 0.0  ;;  %v4473_v59 = vadd.f32 %v9214_v2, %v4095_v56  ;;  %v4608_v21 = vmax.f32 %v4472_v12, 0.0  ;;  %v4802_v46 = vrot.slane %v4605_v45, 4 }
 0x895   : > { %v4451_v4 = vadd.f32 %v9617_v27, %v4210_v14  ;;  %v4452_v36 = vadd.f32 %v9214_v2, %v4211_v32  ;;  %v3134_v63 = vpop.f32.mrf.mxu0  ;;  %v4229_v15 = vrot.slane %v4095_v56, 6  ;;  %v4474_v14 = vadd.f32 %v9217_v43, %v4227_v50 }
 0x896   : > { %v3499_v60 = vadd.f32 %v3498_v6, %v3134_v63  ;;  %v4834_v29 = vrot.slane %v4606_v40, 4  ;;  %v4475_v53 = vadd.f32 %v9238_v48, %v4228_v25  ;;  %v4096_v32 = vadd.f32 %v4060_v5, %v3514_v0 }
 0x897   : > { %v4587_v1 = vmax.f32 %v4451_v4, 0.0  ;;  %v4588_v61 = vmax.f32 %v4452_v36, 0.0  ;;  %v4866_v45 = vrot.slane %v4607_v35, 4  ;;  %v4898_v6 = vrot.slane %v4608_v21, 4 }
 0x898   : > { %v4042_v42 = vpop.f32.mrf.mxu2  ;;  %v4476_v50 = vadd.f32 %v9617_v27, %v4229_v15  ;;  %v4611_v5 = vmax.f32 %v4475_v53, 0.0 }
 0x899   : > { %v4090_v17 = vadd.f32 %v4042_v42, %v3496_v22  ;;  %v9655_v49 = vsel %vm4618_vm0, %v4770_v39, %v4587_v1  ;;  %v9659_v57 = vsel %vm4618_vm0, %v4802_v46, %v4588_v61  ;;  %v4609_v22 = vmax.f32 %v4473_v59, 0.0  ;;  %v3501_v46 = vpop.f32.mrf.mxu1 }
 0x89a   : > { %v4610_v39 = vmax.f32 %v4474_v14, 0.0  ;;  %v4230_v1 = vrot.slane %v4096_v32, 2  ;;  %v4477_v59 = vadd.f32 %v9214_v2, %v4096_v32  ;;  %v4612_v61 = vmax.f32 %v4476_v50, 0.0 }
 0x89b   : > { %v4212_v26 = vrot.slane %v4090_v17, 2  ;;  %v4213_v4 = vrot.slane %v4090_v17, 4  ;;  %v4214_v12 = vrot.slane %v4090_v17, 6  ;;  %v4453_v56 = vadd.f32 %v9217_v43, %v4090_v17 }
 0x89c   : > { %v4930_v17 = vrot.slane %v4609_v22, 4  ;;  %v4231_v14 = vrot.slane %v4096_v32, 4 }
 0x89d   : > { %v4454_v42 = vadd.f32 %v9238_v48, %v4212_v26  ;;  %v4455_v40 = vadd.f32 %v9617_v27, %v4213_v4  ;;  %v4456_v25 = vadd.f32 %v9214_v2, %v4214_v12  ;;  %v4589_v0 = vmax.f32 %v4453_v56, 0.0  ;;  %v3137_v12 = vpop.f32.mrf.mxu0 }
 0x89e   : > { %v4232_v56 = vrot.slane %v4096_v32, 6  ;;  %v3502_v22 = vadd.f32 %v3501_v46, %v3137_v12  ;;  %v4479_v32 = vadd.f32 %v9238_v48, %v4231_v14 }
 0x89f   : > { %v4590_v63 = vmax.f32 %v4454_v42, 0.0  ;;  %v4591_v35 = vmax.f32 %v4455_v40, 0.0  ;;  %v4592_v21 = vmax.f32 %v4456_v25, 0.0  ;;  %v9668_v15 = vsel %vm4618_vm0, %v4834_v29, %v4589_v0 }
 0x8a0   : > { %v4045_v36 = vpop.f32.mrf.mxu2  ;;  %v4478_v40 = vadd.f32 %v9217_v43, %v4230_v1  ;;  %v4613_v25 = vmax.f32 %v4477_v59, 0.0  ;;  %v4962_v0 = vrot.slane %v4610_v39, 4 }
 0x8a1   : > { %v9671_v26 = vsel %vm4618_vm0, %v4866_v45, %v4590_v63  ;;  %v4091_v4 = vadd.f32 %v4045_v36, %v3499_v60  ;;  %v9674_v53 = vsel %vm4618_vm0, %v4898_v6, %v4591_v35  ;;  %v9677_v42 = vsel %vm4618_vm0, %v4930_v17, %v4592_v21 }
 0x8a2   : > { %v4994_v63 = vrot.slane %v4611_v5, 4  ;;  %v5026_v60 = vrot.slane %v4612_v61, 4  ;;  %v4480_v36 = vadd.f32 %v9617_v27, %v4232_v56  ;;  %v4614_v35 = vmax.f32 %v4478_v40, 0.0 }
 0x8a3   : > { %v4215_v29 = vrot.slane %v4091_v4, 2  ;;  %v4216_v50 = vrot.slane %v4091_v4, 4  ;;  %v4217_v24 = vrot.slane %v4091_v4, 6  ;;  %v4457_v45 = vadd.f32 %v9217_v43, %v4091_v4 }
 0x8a4   : > { %v5058_v39 = vrot.slane %v4613_v25, 4  ;;  %v4207_v4 = vrot.slane %v9607_v8, 4 }
 0x8a5   : > { %v4458_v6 = vadd.f32 %v9238_v48, %v4215_v29  ;;  %v4459_v17 = vadd.f32 %v9617_v27, %v4216_v50  ;;  %v4460_v46 = vadd.f32 %v9214_v2, %v4217_v24  ;;  %v4593_v1 = vmax.f32 %v4457_v45, 0.0 }
 0x8a6   : > { %v4615_v29 = vmax.f32 %v4479_v32, 0.0  ;;  %v4616_v24 = vmax.f32 %v4480_v36, 0.0 }
 0x8a7   : > { %v4594_v21 = vmax.f32 %v4458_v6, 0.0  ;;  %v4595_v5 = vmax.f32 %v4459_v17, 0.0  ;;  %v4596_v61 = vmax.f32 %v4460_v46, 0.0  ;;  %v9688_v14 = vsel %vm4618_vm0, %v4962_v0, %v4593_v1 }
 0x8a8   : > { %v4048_v59 = vpop.f32.mrf.mxu2  ;;  %v4447_v6 = vadd.f32 %v9617_v27, %v4207_v4  ;;  %v5090_v17 = vrot.slane %v4614_v35, 4  ;;  %v5122_v46 = vrot.slane %v4615_v29, 4  ;;  %v5154_v1 = vrot.slane %v4616_v24, 4 }
 0x8a9   : > { %v4092_v12 = vadd.f32 %v4048_v59, %v3502_v22  ;;  %v9691_v56 = vsel %vm4618_vm0, %v4994_v63, %v4594_v21  ;;  %v9694_v45 = vsel %vm4618_vm0, %v5026_v60, %v4595_v5  ;;  %v9697_v40 = vsel %vm4618_vm0, %v5058_v39, %v4596_v61 }
 0x8aa   : > { %v4583_v5 = vmax.f32 %v4447_v6, 0.0  ;;  %v4624_v35 = vrot.slane %v9262_v62, 4  ;;  %v4632_v29 = vrot.slane %v9391_v31, 4  ;;  %v4208_v24 = vrot.slane %v9607_v8, 6 }
 0x8ab   : > { %v4218_v50 = vrot.slane %v4092_v12, 2  ;;  %v4219_v51 = vrot.slane %v4092_v12, 4  ;;  %v4220_v22 = vrot.slane %v4092_v12, 6  ;;  %v4461_v25 = vadd.f32 %v9217_v43, %v4092_v12 }
 0x8ac   : > { %v4465_v6 = vadd.f32 %v9214_v2, %v9581_v9  ;;  %v4448_v62 = vadd.f32 %v9214_v2, %v4208_v24  ;;  %v4671_v2 = vperm.slane %v9530_v55, %v9245_v16 }
 0x8ad   : > { %v4462_v0 = vadd.f32 %v9238_v48, %v4218_v50  ;;  %v4463_v32 = vadd.f32 %v9617_v27, %v4219_v51  ;;  %v4464_v63 = vadd.f32 %v9617_v27, %v4220_v22  ;;  %v4597_v36 = vmax.f32 %v4461_v25, 0.0 }
 0x8ae   : > { %v4640_v50 = vrot.slane %v9542_v28, 4  ;;  %v4625_v25 = vsel %vm4618_vm0, 0.0, %v4624_v35  ;;  %v4601_v28 = vmax.f32 %v4465_v6, 0.0  ;;  %v4584_v8 = vmax.f32 %v4448_v62, 0.0 }
 0x8af   : > { %v4598_v60 = vmax.f32 %v4462_v0, 0.0  ;;  %v4599_v59 = vmax.f32 %v4463_v32, 0.0  ;;  %v4600_v21 = vmax.f32 %v4464_v63, 0.0  ;;  %v9705_v39 = vsel %vm4618_vm0, %v5090_v17, %v4597_v36 }
 0x8b0   : > { %v4633_v32 = vsel %vm4618_vm0, 0.0, %v4632_v29  ;;  %v4641_v63 = vsel %vm4618_vm0, 0.0, %v4640_v50  ;;  %v4674_v17 = vrot.slane %v4601_v28, 4  ;;  %v4449_v50 = vadd.f32 %v9217_v43, %v9635_v10 }
 0x8b1   : > { %v4642_v12 = vrot.slane %v4600_v21, 4  ;;  %v9708_v4 = vsel %vm4618_vm0, %v5122_v46, %v4598_v60  ;;  %v9711_v61 = vsel %vm4618_vm0, %v5154_v1, %v4599_v59  ;;  %v4655_v46 = vperm.slane %v9254_v44, %v9245_v16 }
 0x8b2   : > { %v4675_v36 = vsel %vm4618_vm0, %v4674_v17, %v4584_v8  ;;  %v4663_v1 = vperm.slane %v9404_v30, %v9245_v16  ;;  %v4695_v62 = vperm.slane %v9407_v33, %v9245_v16  ;;  %v4222_v17 = vrot.slane %v9581_v9, 4 }
 0x8b3   : > { %v4643_v27 = vsel %vm4618_vm0, %v4642_v12, %v4583_v5  ;;  %v4679_v59 = vperm.slane %v4675_v36, %v9245_v16  ;;  %v4656_v21 = vrot.slane %v4655_v46, 4  ;;  %v4221_v5 = vrot.slane %v9581_v9, 2 }
 0x8b4   : > { %v4647_v51 = vperm.slane %v4643_v27, %v9245_v16  ;;  %v4664_v44 = vrot.slane %v4663_v1, 4  ;;  %v4672_v12 = vrot.slane %v4671_v2, 4  ;;  %v4209_v36 = vrot.slane %v9635_v10, 2 }
 0x8b5   : > { %v4680_v27 = vrot.slane %v4679_v59, 4  ;;  %v4466_v30 = vadd.f32 %v9217_v43, %v4221_v5  ;;  %v4703_v43 = vperm.slane %v9533_v54, %v9245_v16 }
 0x8b6   : > { %5172 = vst [vmem:[#allocation1 + $0x3] ss:$4 sm:$0xff] %v4647_v51  ;;  %v4648_v22 = vrot.slane %v4647_v51, 4  ;;  %v4657_v51 = vsel %vm4618_vm0, 0.0, %v4656_v21  ;;  %v4665_v55 = vsel %vm4618_vm0, 0.0, %v4664_v44  ;;  %v4673_v29 = vsel %vm4618_vm0, 0.0, %v4672_v12 }
 0x8b7   : > { %v4681_v24 = vsel %vm4618_vm0, 0.0, %v4680_v27  ;;  %v4450_v5 = vadd.f32 %v9238_v48, %v4209_v36  ;;  %v4719_v27 = vperm.slane %v9281_v34, %v9245_v16 }
 0x8b8   : > { %v4649_v31 = vsel %vm4618_vm0, 0.0, %v4648_v22  ;;  %v4602_v22 = vmax.f32 %v4466_v30, 0.0  ;;  %v4727_v30 = vperm.slane %v9410_v20, %v9245_v16 }
 0x8b9   : > { %v4586_v10 = vmax.f32 %v4450_v5, 0.0 }
 0x8ba   : > { %v4706_v6 = vrot.slane %v4602_v22, 4 }
 0x8bd   : > { %v9722_v0 = vld.sshfl [vmem:[#allocation1] sm:$0xff pattern:$0x73625140] }
 0x8be   : > { %5179 = vst [vmem:[#allocation1] ss:$4 sm:$0xff] %v4625_v25  ;;  %v4585_v25 = vmax.f32 %v4449_v50, 0.0  ;;  %v4720_v50 = vrot.slane %v4719_v27, 4 }
 0x8bf   : > { %5181 = vst [vmem:[#allocation1 + $0x1] ss:$4 sm:$0xff] %v4633_v32  ;;  %v4687_v32 = vperm.slane %v9257_v38, %v9245_v16  ;;  %v4696_v38 = vrot.slane %v4695_v62, 4 }
 0x8c0   : > { %5183 = vst [vmem:[#allocation1 + $0x2] ss:$4 sm:$0xff] %v4641_v63  ;;  %v4707_v63 = vsel %vm4618_vm0, %v4706_v6, %v4585_v25  ;;  %v4721_v25 = vsel %vm4618_vm0, 0.0, %v4720_v50 }
 0x8c1   : > { %5185 = vst [vmem:[#allocation1 + $0x3] ss:$4 sm:$0xff] %v4649_v31  ;;  %v4711_v28 = vperm.slane %v4707_v63, %v9245_v16  ;;  %v4688_v8 = vrot.slane %v4687_v32, 4  ;;  %v4697_v54 = vsel %vm4618_vm0, 0.0, %v4696_v38  ;;  %v4751_v63 = vperm.slane %v9284_v58, %v9245_v16 }
 0x8c3   : > { %v4689_v33 = vsel %vm4618_vm0, 0.0, %v4688_v8  ;;  %v4775_v8 = vperm.slane %v9655_v49, %v9245_v16  ;;  %v4783_v49 = vperm.slane %v9290_v3, %v9245_v16 }
 0x8c5   : > { %v4776_v36 = vrot.slane %v4775_v8, 4  ;;  %v4784_v3 = vrot.slane %v4783_v49, 4 }
 0x8c8   : > { %v9733_v60 = vld.sshfl [vmem:[#allocation1] sm:$0xff pattern:$0x73625140] }
 0x8c9   : > { %5194 = vst [vmem:[#allocation1] ss:$4 sm:$0xff] %v4655_v46  ;;  %v4704_v46 = vrot.slane %v4703_v43, 4 }
 0x8ca   : > { %5196 = vst [vmem:[#allocation1 + $0x1] ss:$4 sm:$0xff] %v4663_v1  ;;  %v4712_v1 = vrot.slane %v4711_v28, 4 }
 0x8cb   : > { %5198 = vst [vmem:[#allocation1 + $0x2] ss:$4 sm:$0xff] %v4671_v2  ;;  %v4467_v2 = vadd.f32 %v9238_v48, %v4222_v17  ;;  %v4705_v21 = vsel %vm4618_vm0, 0.0, %v4704_v46  ;;  %v4735_v48 = vperm.slane %v9558_v37, %v9245_v16  ;;  %v4752_v17 = vrot.slane %v4751_v63, 4 }
 0x8cc   : > { %5200 = vst [vmem:[#allocation1 + $0x3] ss:$4 sm:$0xff] %v4679_v59  ;;  %v4713_v9 = vsel %vm4618_vm0, 0.0, %v4712_v1 }
 0x8cd   : > { %v4603_v44 = vmax.f32 %v4467_v2, 0.0  ;;  %v4736_v22 = vrot.slane %v4735_v48, 4  ;;  %v4753_v58 = vsel %vm4618_vm0, 0.0, %v4752_v17  ;;  %v4791_v2 = vperm.slane %v9429_v41, %v9245_v16 }
 0x8cf   : > { %v4738_v12 = vrot.slane %v4603_v44, 4  ;;  %v4792_v44 = vrot.slane %v4791_v2, 4 }
 0x8d3   : > { %v9741_v35 = vld.sshfl [vmem:[#allocation1] sm:$0xff pattern:$0x73625140] }
 0x8d4   : > { %5209 = vst [vmem:[#allocation1] ss:$4 sm:$0xff] %v4657_v51  ;;  %v4739_v51 = vsel %vm4618_vm0, %v4738_v12, %v4586_v10  ;;  %v4785_v12 = vsel %vm4618_vm0, 0.0, %v4784_v3 }
 0x8d5   : > { %5211 = vst [vmem:[#allocation1 + $0x1] ss:$4 sm:$0xff] %v4665_v55 }
 0x8d6   : > { %5213 = vst [vmem:[#allocation1 + $0x2] ss:$4 sm:$0xff] %v4673_v29  ;;  %v4743_v29 = vperm.slane %v4739_v51, %v9245_v16 }
 0x8d7   : > { %5215 = vst [vmem:[#allocation1 + $0x3] ss:$4 sm:$0xff] %v4681_v24  ;;  %v4728_v24 = vrot.slane %v4727_v30, 4 }
 0x8d8   : > { %v4744_v34 = vrot.slane %v4743_v29, 4 }
 0x8d9   : > { %v4729_v20 = vsel %vm4618_vm0, 0.0, %v4728_v24 }
 0x8da   : > { %v4745_v37 = vsel %vm4618_vm0, 0.0, %v4744_v34 }
 0x8de   : > { %v9753_v31 = vld.sshfl [vmem:[#allocation1] sm:$0xff pattern:$0x73625140] }
 0x8df   : > { %5224 = vst [vmem:[#allocation1] ss:$4 sm:$0xff] %v4687_v32  ;;  %v4737_v32 = vsel %vm4618_vm0, 0.0, %v4736_v22 }
 0x8e0   : > { %5226 = vst [vmem:[#allocation1 + $0x1] ss:$4 sm:$0xff] %v4695_v62  ;;  %v4759_v62 = vperm.slane %v9413_v13, %v9245_v16 }
 0x8e1   : > { %5228 = vst [vmem:[#allocation1 + $0x2] ss:$4 sm:$0xff] %v4703_v43 }
 0x8e2   : > { %5230 = vst [vmem:[#allocation1 + $0x3] ss:$4 sm:$0xff] %v4711_v28  ;;  %v4767_v28 = vperm.slane %v9563_v11, %v9245_v16  ;;  %v4760_v38 = vrot.slane %v4759_v62, 4 }
 0x8e4   : > { %v4768_v46 = vrot.slane %v4767_v28, 4  ;;  %v4761_v13 = vsel %vm4618_vm0, 0.0, %v4760_v38  ;;  %v10715_v38 = vld [vmem:[#allocation35_spill] sm:$0xff] }
 0x8e6   : > { %v4769_v11 = vsel %vm4618_vm0, 0.0, %v4768_v46  ;;  %v4847_v46 = vperm.slane %v10715_v38, %v9245_v16 }
 0x8e9   : > { %v9762_v59 = vld.sshfl [vmem:[#allocation1] sm:$0xff pattern:$0x73625140] }
 0x8ea   : > { %5239 = vst [vmem:[#allocation1] ss:$4 sm:$0xff] %v4689_v33  ;;  %v4777_v33 = vsel %vm4618_vm0, 0.0, %v4776_v36  ;;  %v10716_v36 = vld [vmem:[#allocation33_spill] sm:$0xff] }
 0x8eb   : > { %5241 = vst [vmem:[#allocation1 + $0x1] ss:$4 sm:$0xff] %v4697_v54 }
 0x8ec   : > { %5243 = vst [vmem:[#allocation1 + $0x2] ss:$4 sm:$0xff] %v4705_v21  ;;  %v4799_v21 = vperm.slane %v9569_v47, %v9245_v16  ;;  %v4793_v47 = vsel %vm4618_vm0, 0.0, %v4792_v44  ;;  %v10717_v44 = vld [vmem:[#allocation36_spill] sm:$0xff] }
 0x8ed   : > { %5245 = vst [vmem:[#allocation1 + $0x3] ss:$4 sm:$0xff] %v4713_v9  ;;  %v4807_v9 = vperm.slane %v9659_v57, %v9245_v16 }
 0x8ee   : > { %v4800_v10 = vrot.slane %v4799_v21, 4 }
 0x8ef   : > { %v4808_v41 = vrot.slane %v4807_v9, 4 }
 0x8f0   : > { %v4801_v57 = vsel %vm4618_vm0, 0.0, %v4800_v10  ;;  %v4879_v10 = vperm.slane %v10717_v44, %v9245_v16 }
 0x8f1   : > { %v4809_v51 = vsel %vm4618_vm0, 0.0, %v4808_v41  ;;  %v10718_v41 = vld [vmem:[#allocation40_spill] sm:$0xff] }
 0x8f4   : > { %v9773_v55 = vld.sshfl [vmem:[#allocation1] sm:$0xff pattern:$0x73625140] }
 0x8f5   : > { %5254 = vst [vmem:[#allocation1] ss:$4 sm:$0xff] %v4719_v27 }
 0x8f6   : > { %5256 = vst [vmem:[#allocation1 + $0x1] ss:$4 sm:$0xff] %v4727_v30  ;;  %v10712_v30 = vld [vmem:[#allocation20_spill] sm:$0xff] }
 0x8f7   : > { %5258 = vst [vmem:[#allocation1 + $0x2] ss:$4 sm:$0xff] %v4735_v48  ;;  %v4815_v48 = vperm.slane %v10712_v30, %v9245_v16 }
 0x8f8   : > { %5260 = vst [vmem:[#allocation1 + $0x3] ss:$4 sm:$0xff] %v4743_v29  ;;  %v10713_v29 = vld [vmem:[#allocation34_spill] sm:$0xff] }
 0x8f9   : > { %v4823_v50 = vperm.slane %v10713_v29, %v9245_v16 }
 0x8ff   : > { %v9779_v6 = vld.sshfl [vmem:[#allocation1] sm:$0xff pattern:$0x73625140] }
 0x900   : > { %5269 = vst [vmem:[#allocation1] ss:$4 sm:$0xff] %v4721_v25  ;;  %v4839_v25 = vperm.slane %v9668_v15, %v9245_v16 }
 0x901   : > { %5271 = vst [vmem:[#allocation1 + $0x1] ss:$4 sm:$0xff] %v4729_v20  ;;  %v4816_v20 = vrot.slane %v4815_v48, 4 }
 0x902   : > { %5273 = vst [vmem:[#allocation1 + $0x2] ss:$4 sm:$0xff] %v4737_v32  ;;  %v4824_v32 = vrot.slane %v4823_v50, 4 }
 0x903   : > { %5275 = vst [vmem:[#allocation1 + $0x3] ss:$4 sm:$0xff] %v4745_v37 }
 0x90a   : > { %v9788_v43 = vld.sshfl [vmem:[#allocation1] sm:$0xff pattern:$0x73625140] }
 0x90b   : > { %5284 = vst [vmem:[#allocation1] ss:$4 sm:$0xff] %v4751_v63  ;;  %v4840_v63 = vrot.slane %v4839_v25, 4 }
 0x90c   : > { %5286 = vst [vmem:[#allocation1 + $0x1] ss:$4 sm:$0xff] %v4759_v62  ;;  %v4817_v62 = vsel %vm4618_vm0, 0.0, %v4816_v20  ;;  %v10720_v20 = vld [vmem:[#allocation16_spill] sm:$0xff] }
 0x90d   : > { %5288 = vst [vmem:[#allocation1 + $0x2] ss:$4 sm:$0xff] %v4767_v28  ;;  %v4841_v17 = vsel %vm4618_vm0, 0.0, %v4840_v63  ;;  %v4927_v63 = vperm.slane %v9590_v19, %v9245_v16 }
 0x90e   : > { %5290 = vst [vmem:[#allocation1 + $0x3] ss:$4 sm:$0xff] %v4775_v8  ;;  %v4825_v8 = vsel %vm4618_vm0, 0.0, %v4824_v32  ;;  %v4919_v32 = vperm.slane %v10720_v20, %v9245_v16  ;;  %v5700_v20 = vld [vmem:[%s6557_s15 + $0x18] sm:$0xff] }
 0x915   : > { %v9795_v1 = vld.sshfl [vmem:[#allocation1] sm:$0xff pattern:$0x73625140] }
 0x916   : > { %5297 = vst [vmem:[#allocation1] ss:$4 sm:$0xff] %v4753_v58  ;;  %v4855_v58 = vperm.slane %v10716_v36, %v9245_v16 }
 0x917   : > { %5299 = vst [vmem:[#allocation1 + $0x1] ss:$4 sm:$0xff] %v4761_v13 }
 0x918   : > { %5301 = vst [vmem:[#allocation1 + $0x2] ss:$4 sm:$0xff] %v4769_v11 }
 0x919   : > { %5303 = vst [vmem:[#allocation1 + $0x3] ss:$4 sm:$0xff] %v4777_v33  ;;  %v4871_v33 = vperm.slane %v9671_v26, %v9245_v16 }
 0x920   : > { %v5304_v54 = vld.sshfl [vmem:[#allocation1] sm:$0xff pattern:$0x73625140] }
 0x921   : > { %v6372_v5 = vpack.i.bf16 %v5304_v54, %v9733_v60  ;;  %5312 = vst [vmem:[#allocation1] ss:$4 sm:$0xff] %v4783_v49  ;;  %v4848_v49 = vrot.slane %v4847_v46, 4 }
 0x922   : > { %5314 = vst [vmem:[#allocation1 + $0x1] ss:$4 sm:$0xff] %v4791_v2  ;;  %v4856_v2 = vrot.slane %v4855_v58, 4 }
 0x923   : > { %6373 = vrot.lane.b32.xlu2 %v6372_v5, %s6446_s3  ;;  %5316 = vst [vmem:[#allocation1 + $0x2] ss:$4 sm:$0xff] %v4799_v21  ;;  %v4872_v21 = vrot.slane %v4871_v33, 4  ;;  %v4849_v5 = vsel %vm4618_vm0, 0.0, %v4848_v49 }
 0x924   : > { %5318 = vst [vmem:[#allocation1 + $0x3] ss:$4 sm:$0xff] %v4807_v9 }
 0x925   : > { %v4873_v3 = vsel %vm4618_vm0, 0.0, %v4872_v21  ;;  %v5707_v21 = vld [vmem:[%s6557_s15 + $0x50] sm:$0xff] }
 0x92b   : > { %v5319_v27 = vld.sshfl [vmem:[#allocation1] sm:$0xff pattern:$0x73625140] }
 0x92c   : > { %v6377_v60 = vpack.i.bf16 %v5319_v27, %v9741_v35  ;;  %5327 = vst [vmem:[#allocation1] ss:$4 sm:$0xff] %v4785_v12  ;;  %v10714_v35 = vld [vmem:[#allocation43_spill] sm:$0xff]  ;;  %v4887_v12 = vperm.slane %v10718_v41, %v9245_v16 }
 0x92d   : > { %5329 = vst [vmem:[#allocation1 + $0x1] ss:$4 sm:$0xff] %v4793_v47  ;;  %v4831_v22 = vperm.slane %v10714_v35, %v9245_v16  ;;  %v5711_v35 = vld [vmem:[%s6557_s15 + $0x70] sm:$0xff] }
 0x92e   : > { %6378 = vrot.lane.b32.xlu1 %v6377_v60, %s6447_s18  ;;  %5331 = vst [vmem:[#allocation1 + $0x2] ss:$4 sm:$0xff] %v4801_v57  ;;  %v4903_v60 = vperm.slane %v9674_v53, %v9245_v16  ;;  %v4880_v57 = vrot.slane %v4879_v10, 4 }
 0x92f   : > { %5333 = vst [vmem:[#allocation1 + $0x3] ss:$4 sm:$0xff] %v4809_v51  ;;  %v4832_v37 = vrot.slane %v4831_v22, 4  ;;  %v4888_v51 = vrot.slane %v4887_v12, 4 }
 0x931   : > { %v4833_v15 = vsel %vm4618_vm0, 0.0, %v4832_v37  ;;  %v4889_v29 = vsel %vm4618_vm0, 0.0, %v4888_v51  ;;  %v4991_v51 = vperm.slane %v9614_v7, %v9245_v16 }
 0x936   : > { %v5334_v24 = vld.sshfl [vmem:[#allocation1] sm:$0xff pattern:$0x73625140] }
 0x937   : > { %v6382_v34 = vpack.i.bf16 %v5334_v24, %v9753_v31  ;;  %5342 = vst [vmem:[#allocation1] ss:$4 sm:$0xff] %v4815_v48  ;;  %v4904_v48 = vrot.slane %v4903_v60, 4  ;;  %v5712_v24 = vld [vmem:[%s6557_s15 + $0x78] sm:$0xff] }
 0x938   : > { %5344 = vst [vmem:[#allocation1 + $0x1] ss:$4 sm:$0xff] %v4823_v50  ;;  %5772 = vmatpush.msrb.mxu3 %v5712_v24 }
 0x939   : > { %6383 = vrot.lane.b32.xlu2 %v6382_v34, %s6448_s21  ;;  %5346 = vst [vmem:[#allocation1 + $0x2] ss:$4 sm:$0xff] %v4831_v22  ;;  %v4905_v50 = vsel %vm4618_vm0, 0.0, %v4904_v48  ;;  %v5710_v22 = vld [vmem:[%s6557_s15 + $0x68] sm:$0xff]  ;;  %v10719_v34 = vld [vmem:[#allocation13_spill] sm:$0xff] }
 0x93a   : > { %5348 = vst [vmem:[#allocation1 + $0x3] ss:$4 sm:$0xff] %v4839_v25  ;;  %v4911_v25 = vperm.slane %v10719_v34, %v9245_v16  ;;  %5773 = vmatpush.msrb.mxu3 %v5711_v35  ;;  %v5702_v34 = vld [vmem:[%s6557_s15 + $0x28] sm:$0xff] }
 0x93c   : > { %5774 = vmatpush.msrb.mxu3 %v5710_v22  ;;  %v5703_v22 = vld [vmem:[%s6557_s15 + $0x30] sm:$0xff] }
 0x941   : > { %v5349_v28 = vld.sshfl [vmem:[#allocation1] sm:$0xff pattern:$0x73625140] }
 0x942   : > { %v6387_v31 = vpack.i.bf16 %v5349_v28, %v9762_v59  ;;  %5357 = vst [vmem:[#allocation1] ss:$4 sm:$0xff] %v4817_v62  ;;  %v4863_v59 = vperm.slane %v9579_v52, %v9245_v16  ;;  %v4857_v52 = vsel %vm4618_vm0, 0.0, %v4856_v2  ;;  %v4935_v62 = vperm.slane %v9677_v42, %v9245_v16  ;;  %v5709_v28 = vld [vmem:[%s6557_s15 + $0x60] sm:$0xff] }
 0x943   : > { %5359 = vst [vmem:[#allocation1 + $0x1] ss:$4 sm:$0xff] %v4825_v8  ;;  %5775 = vmatpush.msrb.mxu3 %v5709_v28  ;;  %v4912_v8 = vrot.slane %v4911_v25, 4  ;;  %v4959_v2 = vperm.slane %v9593_v23, %v9245_v16 }
 0x944   : > { %6388 = vrot.lane.b32.xlu0 %v6387_v31, %s6449_s25  ;;  %5361 = vst [vmem:[#allocation1 + $0x2] ss:$4 sm:$0xff] %v4833_v15  ;;  %v4864_v54 = vrot.slane %v4863_v59, 4  ;;  %v4920_v31 = vrot.slane %v4919_v32, 4  ;;  %v4928_v15 = vrot.slane %v4927_v63, 4 }
 0x945   : > { %5363 = vst [vmem:[#allocation1 + $0x3] ss:$4 sm:$0xff] %v4841_v17  ;;  %v4936_v17 = vrot.slane %v4935_v62, 4  ;;  %v4913_v38 = vsel %vm4618_vm0, 0.0, %v4912_v8 }
 0x946   : > { %v4865_v26 = vsel %vm4618_vm0, 0.0, %v4864_v54  ;;  %v4921_v19 = vsel %vm4618_vm0, 0.0, %v4920_v31  ;;  %v4929_v36 = vsel %vm4618_vm0, 0.0, %v4928_v15  ;;  %v4967_v54 = vperm.slane %v9688_v14, %v9245_v16  ;;  %v10727_v31 = vld [vmem:[#allocation44_spill] sm:$0xff] }
 0x947   : > { %v4937_v42 = vsel %vm4618_vm0, 0.0, %v4936_v17  ;;  %v5023_v15 = vperm.slane %v10727_v31, %v9245_v16  ;;  %v5031_v17 = vperm.slane %v9694_v45, %v9245_v16 }
 0x948   : > { %v4968_v44 = vrot.slane %v4967_v54, 4 }
 0x94c   : > { %v5364_v13 = vld.sshfl [vmem:[#allocation1] sm:$0xff pattern:$0x73625140] }
 0x94d   : > { %v6392_v11 = vpack.i.bf16 %v5364_v13, %v9773_v55  ;;  %5372 = vst [vmem:[#allocation1] ss:$4 sm:$0xff] %v4847_v46  ;;  %v10721_v13 = vld [vmem:[#allocation22_spill] sm:$0xff] }
 0x94e   : > { %5374 = vst [vmem:[#allocation1 + $0x1] ss:$4 sm:$0xff] %v4855_v58  ;;  %v5708_v58 = vld [vmem:[%s6557_s15 + $0x58] sm:$0xff] }
 0x94f   : > { %6393 = vrot.lane.b32.xlu1 %v6392_v11, %s6450_s26  ;;  %5376 = vst [vmem:[#allocation1 + $0x2] ss:$4 sm:$0xff] %v4863_v59  ;;  %5776 = vmatpush.msrb.mxu3 %v5708_v58  ;;  %v4943_v59 = vperm.slane %v10721_v13, %v9245_v16  ;;  %v10722_v11 = vld [vmem:[#allocation25_spill] sm:$0xff]  ;;  %v5728_v13 = vld [vmem:[%s6557_s15 + $0xf8] sm:$0xff] }
 0x950   : > { %5378 = vst [vmem:[#allocation1 + $0x3] ss:$4 sm:$0xff] %v4871_v33  ;;  %v4951_v33 = vperm.slane %v10722_v11, %v9245_v16  ;;  %v5032_v11 = vrot.slane %v5031_v17, 4 }
 0x951   : > { %5777 = vmatpush.msrb.mxu3 %v5707_v21 }
 0x952   : > { %v5033_v21 = vsel %vm4618_vm0, 0.0, %v5032_v11  ;;  %v5718_v11 = vld [vmem:[%s6557_s15 + $0xa8] sm:$0xff] }
 0x957   : > { %v5379_v9 = vld.sshfl [vmem:[#allocation1] sm:$0xff pattern:$0x73625140] }
 0x958   : > { %v6397_v55 = vpack.i.bf16 %v5379_v9, %v9779_v6  ;;  %5387 = vst [vmem:[#allocation1] ss:$4 sm:$0xff] %v4849_v5  ;;  %v4895_v6 = vperm.slane %v9586_v18, %v9245_v16  ;;  %v4881_v18 = vsel %vm4618_vm0, 0.0, %v4880_v57  ;;  %v5706_v5 = vld [vmem:[%s6557_s15 + $0x48] sm:$0xff]  ;;  %v5705_v9 = vld [vmem:[%s6557_s15 + $0x40] sm:$0xff] }
 0x959   : > { %5389 = vst [vmem:[#allocation1 + $0x1] ss:$4 sm:$0xff] %v4857_v52  ;;  %v4944_v52 = vrot.slane %v4943_v59, 4  ;;  %5778 = vmatpush.msrb.mxu3 %v5706_v5  ;;  %v5727_v5 = vld [vmem:[%s6557_s15 + $0xf0] sm:$0xff] }
 0x95a   : > { %6398 = vrot.lane.b32.xlu2 %v6397_v55, %s6451_s28  ;;  %5391 = vst [vmem:[#allocation1 + $0x2] ss:$4 sm:$0xff] %v4865_v26  ;;  %v4896_v30 = vrot.slane %v4895_v6, 4  ;;  %v4952_v55 = vrot.slane %v4951_v33, 4  ;;  %v5704_v26 = vld [vmem:[%s6557_s15 + $0x38] sm:$0xff] }
 0x95b   : > { %5393 = vst [vmem:[#allocation1 + $0x3] ss:$4 sm:$0xff] %v4873_v3  ;;  %v4960_v3 = vrot.slane %v4959_v2, 4  ;;  %5779 = vmatpush.msrb.mxu3 %v5705_v9  ;;  %v4945_v23 = vsel %vm4618_vm0, 0.0, %v4944_v52  ;;  %v5726_v9 = vld [vmem:[%s6557_s15 + $0xe8] sm:$0xff]  ;;  %v5725_v52 = vld [vmem:[%s6557_s15 + $0xe0] sm:$0xff] }
 0x95c   : > { %v4897_v53 = vsel %vm4618_vm0, 0.0, %v4896_v30  ;;  %v4953_v14 = vsel %vm4618_vm0, 0.0, %v4952_v55  ;;  %v4999_v30 = vperm.slane %v9691_v56, %v9245_v16 }
 0x95d   : > { %5780 = vmatpush.msrb.mxu3 %v5704_v26  ;;  %v4961_v41 = vsel %vm4618_vm0, 0.0, %v4960_v3  ;;  %v5724_v26 = vld [vmem:[%s6557_s15 + $0xd8] sm:$0xff]  ;;  %v10728_v3 = vld [vmem:[#allocation21_spill] sm:$0xff] }
 0x95f   : > { %5781 = vmatpush.msrb.mxu3 %v5703_v22 }
 0x961   : > { %5782 = vmatpush.msrb.mxu3 %v5702_v34 }
 0x962   : > { %v5394_v27 = vld.sshfl [vmem:[#allocation1] sm:$0xff pattern:$0x73625140] }
 0x963   : > { %v6402_v47 = vpack.i.bf16 %v5394_v27, %v9788_v43  ;;  %5402 = vst [vmem:[#allocation1] ss:$4 sm:$0xff] %v4879_v10  ;;  %v10723_v27 = vld [vmem:[#allocation26_spill] sm:$0xff] }
 0x964   : > { %5404 = vst [vmem:[#allocation1 + $0x1] ss:$4 sm:$0xff] %v4887_v12  ;;  %v4969_v12 = vsel %vm4618_vm0, 0.0, %v4968_v44  ;;  %v5039_v44 = vperm.slane %v10728_v3, %v9245_v16 }
 0x965   : > { %6403 = vrot.lane.b32.xlu0 %v6402_v47, %s6452_s29  ;;  %5406 = vst [vmem:[#allocation1 + $0x2] ss:$4 sm:$0xff] %v4895_v6  ;;  %v4975_v6 = vperm.slane %v10723_v27, %v9245_v16  ;;  %v10724_v47 = vld [vmem:[#allocation27_spill] sm:$0xff] }
 0x966   : > { %5408 = vst [vmem:[#allocation1 + $0x3] ss:$4 sm:$0xff] %v4903_v60  ;;  %v4983_v60 = vperm.slane %v10724_v47, %v9245_v16  ;;  %v10730_v27 = vld [vmem:[#allocation39_spill] sm:$0xff] }
 0x967   : > { %v4976_v48 = vrot.slane %v4975_v6, 4 }
 0x96d   : > { %v9859_v43 = vld.sshfl [vmem:[#allocation1] sm:$0xff pattern:$0x73625140] }
 0x96e   : > { %5415 = vst [vmem:[#allocation1] ss:$4 sm:$0xff] %v4881_v18  ;;  %v4984_v18 = vrot.slane %v4983_v60, 4 }
 0x96f   : > { %5417 = vst [vmem:[#allocation1 + $0x1] ss:$4 sm:$0xff] %v4889_v29  ;;  %v4992_v29 = vrot.slane %v4991_v51, 4 }
 0x970   : > { %5419 = vst [vmem:[#allocation1 + $0x2] ss:$4 sm:$0xff] %v4897_v53  ;;  %v5000_v53 = vrot.slane %v4999_v30, 4  ;;  %v4985_v7 = vsel %vm4618_vm0, 0.0, %v4984_v18  ;;  %v5722_v18 = vld [vmem:[%s6557_s15 + $0xc8] sm:$0xff] }
 0x971   : > { %5421 = vst [vmem:[#allocation1 + $0x3] ss:$4 sm:$0xff] %v4905_v50  ;;  %v4977_v50 = vsel %vm4618_vm0, 0.0, %v4976_v48  ;;  %v4993_v56 = vsel %vm4618_vm0, 0.0, %v4992_v29  ;;  %v5723_v48 = vld [vmem:[%s6557_s15 + $0xd0] sm:$0xff] }
 0x972   : > { %v5001_v35 = vsel %vm4618_vm0, 0.0, %v5000_v53 }
 0x978   : > { %v9871_v37 = vld.sshfl [vmem:[#allocation1] sm:$0xff pattern:$0x73625140] }
 0x979   : > { %5430 = vst [vmem:[#allocation1] ss:$4 sm:$0xff] %v4911_v25  ;;  %v5701_v25 = vld [vmem:[%s6557_s15 + $0x20] sm:$0xff] }
 0x97a   : > { %5432 = vst [vmem:[#allocation1 + $0x1] ss:$4 sm:$0xff] %v4919_v32  ;;  %v10725_v32 = vld [vmem:[#allocation28_spill] sm:$0xff]  ;;  %5783 = vmatpush.msrb.mxu3 %v5701_v25 }
 0x97b   : > { %5434 = vst [vmem:[#allocation1 + $0x2] ss:$4 sm:$0xff] %v4927_v63  ;;  %v5007_v63 = vperm.slane %v10725_v32, %v9245_v16 }
 0x97c   : > { %5436 = vst [vmem:[#allocation1 + $0x3] ss:$4 sm:$0xff] %v4935_v62  ;;  %v10726_v62 = vld [vmem:[#allocation11_spill] sm:$0xff]  ;;  %5784 = vmatpush.msrb.mxu3 %v5700_v20 }
 0x97d   : > { %v5015_v28 = vperm.slane %v10726_v62, %v9245_v16  ;;  %v9948_v55 = vpop.permute.xlu2 %6373 }
 0x97f   : > { %v5016_v58 = vrot.slane %v5015_v28, 4 }
 0x983   : > { %v9879_v46 = vld.sshfl [vmem:[#allocation1] sm:$0xff pattern:$0x73625140] }
 0x984   : > { %5445 = vst [vmem:[#allocation1] ss:$4 sm:$0xff] %v4913_v38  ;;  %v5699_v38 = vld [vmem:[%s6557_s15 + $0x10] sm:$0xff] }
 0x985   : > { %5447 = vst [vmem:[#allocation1 + $0x1] ss:$4 sm:$0xff] %v4921_v19  ;;  %v5698_v19 = vld [vmem:[%s6557_s15 + $0x8] sm:$0xff]  ;;  %5785 = vmatpush.msrb.mxu3 %v5699_v38 }
 0x986   : > { %5449 = vst [vmem:[#allocation1 + $0x2] ss:$4 sm:$0xff] %v4929_v36  ;;  %v5008_v36 = vrot.slane %v5007_v63, 4 }
 0x987   : > { %5451 = vst [vmem:[#allocation1 + $0x3] ss:$4 sm:$0xff] %v4937_v42  ;;  %v5697_v42 = vld [vmem:[%s6557_s15] sm:$0xff]  ;;  %5786 = vmatpush.msrb.mxu3 %v5698_v19 }
 0x989   : > { %5787 = vmatpush.msrb.mxu3 %v5697_v42  ;;  %v5720_v42 = vld [vmem:[%s6557_s15 + $0xb8] sm:$0xff] }
 0x98b   : > { %5792 = vmatpush.msra.mxu3 %v5728_v13 }
 0x98d   : > { %5793 = vmatpush.msra.mxu3 %v5727_v5  ;;  %v10731_v5 = vld [vmem:[#allocation37_spill] sm:$0xff] }
 0x98e   : > { %v9889_v49 = vld.sshfl [vmem:[#allocation1] sm:$0xff pattern:$0x73625140] }
 0x98f   : > { %5460 = vst [vmem:[#allocation1] ss:$4 sm:$0xff] %v4943_v59  ;;  %v5024_v59 = vrot.slane %v5023_v15, 4  ;;  %5794 = vmatpush.msra.mxu3 %v5726_v9  ;;  %v5071_v9 = vperm.slane %v10731_v5, %v9245_v16  ;;  %v5159_v5 = vperm.slane %v9711_v61, %v9245_v16 }
 0x990   : > { %5462 = vst [vmem:[#allocation1 + $0x1] ss:$4 sm:$0xff] %v4951_v33  ;;  %v5009_v33 = vsel %vm4618_vm0, 0.0, %v5008_v36 }
 0x991   : > { %5464 = vst [vmem:[#allocation1 + $0x2] ss:$4 sm:$0xff] %v4959_v2  ;;  %v5017_v2 = vsel %vm4618_vm0, 0.0, %v5016_v58  ;;  %5795 = vmatpush.msra.mxu3 %v5725_v52  ;;  %v5719_v58 = vld [vmem:[%s6557_s15 + $0xb0] sm:$0xff] }
 0x992   : > { %5466 = vst [vmem:[#allocation1 + $0x3] ss:$4 sm:$0xff] %v4967_v54  ;;  %v5025_v54 = vsel %vm4618_vm0, 0.0, %v5024_v59 }
 0x993   : > { %5796 = vmatpush.msra.mxu3 %v5724_v26  ;;  %v10732_v26 = vld [vmem:[#allocation3_spill] sm:$0xff] }
 0x994   : > { %v5079_v3 = vperm.slane %v10732_v26, %v9245_v16  ;;  %v5743_v26 = vld [vmem:[%s6557_s15 + $0x170] sm:$0xff] }
 0x995   : > { %5797 = vmatpush.msra.mxu3 %v5723_v48  ;;  %v5714_v48 = vld [vmem:[%s6557_s15 + $0x88] sm:$0xff] }
 0x997   : > { %5798 = vmatpush.msra.mxu3 %v5722_v18  ;;  %v5080_v18 = vrot.slane %v5079_v3, 4 }
 0x999   : > { %v9900_v10 = vld.sshfl [vmem:[#allocation1] sm:$0xff pattern:$0x73625140] }
 0x99a   : > { %5475 = vst [vmem:[#allocation1] ss:$4 sm:$0xff] %v4945_v23  ;;  %v10729_v23 = vld [vmem:[#allocation38_spill] sm:$0xff] }
 0x99b   : > { %5477 = vst [vmem:[#allocation1 + $0x1] ss:$4 sm:$0xff] %v4953_v14  ;;  %v5047_v14 = vperm.slane %v10729_v23, %v9245_v16  ;;  %v10733_v23 = vld [vmem:[#allocation23_spill] sm:$0xff] }
 0x99c   : > { %5479 = vst [vmem:[#allocation1 + $0x2] ss:$4 sm:$0xff] %v4961_v41 }
 0x99d   : > { %5481 = vst [vmem:[#allocation1 + $0x3] ss:$4 sm:$0xff] %v4969_v12 }
 0x9a0   : > { %v9955_v41 = vpop.permute.xlu1 %6378 }
 0x9a1   : > { %v6380_v29 = vunpack.i.l.bf16 %v9955_v41  ;;  %v6381_v52 = vunpack.i.h.bf16 %v9955_v41  ;;  %v5095_v41 = vperm.slane %v9705_v39, %v9245_v16  ;;  %v5715_v39 = vld [vmem:[%s6557_s15 + $0x90] sm:$0xff] }
 0x9a4   : > { %v9909_v57 = vld.sshfl [vmem:[#allocation1] sm:$0xff pattern:$0x73625140] }
 0x9a5   : > { %5490 = vst [vmem:[#allocation1] ss:$4 sm:$0xff] %v4975_v6  ;;  %v5055_v6 = vperm.slane %v10730_v27, %v9245_v16 }
 0x9a6   : > { %5492 = vst [vmem:[#allocation1 + $0x1] ss:$4 sm:$0xff] %v4983_v60  ;;  %v5063_v60 = vperm.slane %v9697_v40, %v9245_v16  ;;  %v5048_v40 = vrot.slane %v5047_v14, 4 }
 0x9a7   : > { %5494 = vst [vmem:[#allocation1 + $0x2] ss:$4 sm:$0xff] %v4991_v51  ;;  %v6375_v51 = vunpack.i.l.bf16 %v9948_v55 }
 0x9a8   : > { %5496 = vst [vmem:[#allocation1 + $0x3] ss:$4 sm:$0xff] %v4999_v30  ;;  %v9964_v30 = vpop.permute.xlu2 %6383  ;;  %v5064_v22 = vrot.slane %v5063_v60, 4 }
 0x9a9   : > { %v6385_v32 = vunpack.i.l.bf16 %v9964_v30 }
 0x9aa   : > { %v5065_v38 = vsel %vm4618_vm0, 0.0, %v5064_v22  ;;  %v5081_v22 = vsel %vm4618_vm0, 0.0, %v5080_v18  ;;  %v5732_v18 = vld [vmem:[%s6557_s15 + $0x118] sm:$0xff] }
 0x9af   : > { %v9916_v24 = vld.sshfl [vmem:[#allocation1] sm:$0xff pattern:$0x73625140] }
 0x9b0   : > { %5505 = vst [vmem:[#allocation1] ss:$4 sm:$0xff] %v4977_v50  ;;  %v5721_v50 = vld [vmem:[%s6557_s15 + $0xc0] sm:$0xff] }
 0x9b1   : > { %5507 = vst [vmem:[#allocation1 + $0x1] ss:$4 sm:$0xff] %v4985_v7  ;;  %5799 = vmatpush.msra.mxu3 %v5721_v50  ;;  %v5713_v50 = vld [vmem:[%s6557_s15 + $0x80] sm:$0xff] }
 0x9b2   : > { %5509 = vst [vmem:[#allocation1 + $0x2] ss:$4 sm:$0xff] %v4993_v56  ;;  %v5056_v56 = vrot.slane %v5055_v6, 4 }
 0x9b3   : > { %5511 = vst [vmem:[#allocation1 + $0x3] ss:$4 sm:$0xff] %v5001_v35  ;;  %v5662_v35 = vsel %vm2964_vm14, %v9722_v0, %v6375_v51  ;;  %5800 = vmatpush.msra.mxu3 %v5720_v42 }
 0x9b4   : > { %v5664_v34 = vsel %vm5663_vm1, %v5662_v35, %v6380_v29  ;;  %v5057_v31 = vsel %vm4618_vm0, 0.0, %v5056_v56 }
 0x9b5   : > { %5801 = vmatpush.msra.mxu3 %v5719_v58 }
 0x9b6   : > { %v9969_v53 = vpop.permute.xlu0 %6388 }
 0x9b7   : > { %v6390_v25 = vunpack.i.l.bf16 %v9969_v53  ;;  %5802 = vmatpush.msra.mxu3 %v5718_v11  ;;  %v6391_v27 = vunpack.i.h.bf16 %v9969_v53  ;;  %v10738_v11 = vld [vmem:[#allocation45_spill] sm:$0xff] }
 0x9ba   : > { %v9929_v8 = vld.sshfl [vmem:[#allocation1] sm:$0xff pattern:$0x73625140] }
 0x9bb   : > { %5520 = vst [vmem:[#allocation1] ss:$4 sm:$0xff] %v5007_v63 }
 0x9bc   : > { %5522 = vst [vmem:[#allocation1 + $0x1] ss:$4 sm:$0xff] %v5015_v28  ;;  %v5049_v28 = vsel %vm4618_vm0, 0.0, %v5048_v40  ;;  %v5096_v40 = vrot.slane %v5095_v41, 4 }
 0x9bd   : > { %5524 = vst [vmem:[#allocation1 + $0x2] ss:$4 sm:$0xff] %v5023_v15  ;;  %v9984_v15 = vpop.permute.xlu2 %6398 }
 0x9be   : > { %5526 = vst [vmem:[#allocation1 + $0x3] ss:$4 sm:$0xff] %v5031_v17  ;;  %v5666_v17 = vsel %vm5665_vm2, %v5664_v34, %v6385_v32  ;;  %v6400_v36 = vunpack.i.l.bf16 %v9984_v15  ;;  %v5097_v32 = vsel %vm4618_vm0, 0.0, %v5096_v40  ;;  %v5758_v40 = vld [vmem:[%s6557_s15 + $0x1e8] sm:$0xff] }
 0x9bf   : > { %v5668_v19 = vsel %vm5667_vm3, %v5666_v17, %v6390_v25 }
 0x9c1   : > { %v9972_v7 = vpop.permute.xlu1 %6393 }
 0x9c2   : > { %v6395_v62 = vunpack.i.l.bf16 %v9972_v7 }
 0x9c5   : > { %v9940_v45 = vld.sshfl [vmem:[#allocation1] sm:$0xff pattern:$0x73625140] }
 0x9c6   : > { %5533 = vst [vmem:[#allocation1] ss:$4 sm:$0xff] %v5009_v33 }
 0x9c7   : > { %5535 = vst [vmem:[#allocation1 + $0x1] ss:$4 sm:$0xff] %v5017_v2 }
 0x9c8   : > { %5537 = vst [vmem:[#allocation1 + $0x2] ss:$4 sm:$0xff] %v5025_v54  ;;  %v6376_v54 = vunpack.i.h.bf16 %v9948_v55  ;;  %v5087_v55 = vperm.slane %v10733_v23, %v9245_v16  ;;  %v5742_v23 = vld [vmem:[%s6557_s15 + $0x168] sm:$0xff] }
 0x9c9   : > { %5539 = vst [vmem:[#allocation1 + $0x3] ss:$4 sm:$0xff] %v5033_v21  ;;  %v5717_v21 = vld [vmem:[%s6557_s15 + $0xa0] sm:$0xff] }
 0x9ca   : > { %5803 = vmatpush.msra.mxu3 %v5717_v21  ;;  %v5088_v53 = vrot.slane %v5087_v55, 4 }
 0x9d0   : > { %v5540_v12 = vld.sshfl [vmem:[#allocation1] sm:$0xff pattern:$0x73625140] }
 0x9d1   : > { %v6407_v47 = vpack.i.bf16 %v5540_v12, %v9871_v37  ;;  %5548 = vst [vmem:[#allocation1] ss:$4 sm:$0xff] %v5039_v44  ;;  %v5040_v37 = vrot.slane %v5039_v44, 4  ;;  %v5675_v12 = vsel %vm2964_vm14, %v9795_v1, %v6376_v54  ;;  %v5072_v1 = vrot.slane %v5071_v9, 4  ;;  %v10739_v54 = vld [vmem:[#allocation51_spill] sm:$0xff] }
 0x9d2   : > { %5550 = vst [vmem:[#allocation1 + $0x1] ss:$4 sm:$0xff] %v5047_v14  ;;  %v5151_v21 = vperm.slane %v10739_v54, %v9245_v16 }
 0x9d3   : > { %6408 = vrot.lane.b32.xlu1 %v6407_v47, %s6446_s3  ;;  %5552 = vst [vmem:[#allocation1 + $0x2] ss:$4 sm:$0xff] %v5055_v6  ;;  %v5041_v20 = vsel %vm4618_vm0, 0.0, %v5040_v37  ;;  %v6386_v6 = vunpack.i.h.bf16 %v9964_v30  ;;  %v5716_v47 = vld [vmem:[%s6557_s15 + $0x98] sm:$0xff]  ;;  %v6401_v30 = vunpack.i.h.bf16 %v9984_v15  ;;  %v5127_v15 = vperm.slane %v9708_v4, %v9245_v16 }
 0x9d4   : > { %5554 = vst [vmem:[#allocation1 + $0x3] ss:$4 sm:$0xff] %v5063_v60  ;;  %5804 = vmatpush.msra.mxu3 %v5716_v47  ;;  %v5737_v47 = vld [vmem:[%s6557_s15 + $0x140] sm:$0xff] }
 0x9d6   : > { %5805 = vmatpush.msra.mxu3 %v5715_v39 }
 0x9d7   : > { %v6404_v13 = vpop.permute.xlu0 %6403 }
 0x9d8   : > { %v6405_v59 = vunpack.i.l.bf16 %v6404_v13  ;;  %v6406_v37 = vunpack.i.h.bf16 %v6404_v13  ;;  %5806 = vmatpush.msra.mxu3 %v5714_v48  ;;  %v10737_v13 = vld [vmem:[#allocation32_spill] sm:$0xff]  ;;  %v5733_v48 = vld [vmem:[%s6557_s15 + $0x120] sm:$0xff] }
 0x9da   : > { %5807 = vmatpush.msra.mxu3 %v5713_v50  ;;  %v5759_v50 = vld [vmem:[%s6557_s15 + $0x1f0] sm:$0xff] }
 0x9db   : > { %v5555_v63 = vld.sshfl [vmem:[#allocation1] sm:$0xff pattern:$0x73625140] }
 0x9dc   : > { %v6412_v0 = vpack.i.bf16 %v5555_v63, %v9879_v46  ;;  %5563 = vst [vmem:[#allocation1] ss:$4 sm:$0xff] %v5041_v20  ;;  %v5670_v46 = vsel %vm5669_vm4, %v5668_v19, %v6395_v62  ;;  %v5089_v20 = vsel %vm4618_vm0, 0.0, %v5088_v53  ;;  %v10735_v62 = vld [vmem:[#allocation15_spill] sm:$0xff]  ;;  %v5729_v53 = vld [vmem:[%s6557_s15 + $0x100] sm:$0xff] }
 0x9dd   : > { %5565 = vst [vmem:[#allocation1 + $0x1] ss:$4 sm:$0xff] %v5049_v28  ;;  %v5672_v33 = vsel %vm5671_vm5, %v5670_v46, %v6400_v36  ;;  %v5128_v46 = vrot.slane %v5127_v15, 4 }
 0x9de   : > { %6413 = vrot.lane.b32.xlu2 %v6412_v0, %s6447_s18  ;;  %5567 = vst [vmem:[#allocation1 + $0x2] ss:$4 sm:$0xff] %v5057_v31  ;;  %v5674_v2 = vsel %vm5673_vm6, %v5672_v33, %v6405_v59  ;;  %v10736_v0 = vld [vmem:[#allocation63_spill] sm:$0xff]  ;;  %v5135_v59 = vperm.slane %v10737_v13, %v9245_v16  ;;  %v5143_v33 = vperm.slane %v10738_v11, %v9245_v16 }
 0x9df   : > { %5569 = vst [vmem:[#allocation1 + $0x3] ss:$4 sm:$0xff] %v5065_v38  ;;  %5788 = vmatmul.f32.vlgmr.msrb.gmra.mxu3 %v5674_v2  ;;  %v5119_v31 = vperm.slane %v10736_v0, %v9245_v16  ;;  %v5129_v4 = vsel %vm4618_vm0, 0.0, %v5128_v46 }
 0x9e1   : > { %v5120_v19 = vrot.slane %v5119_v31, 4 }
 0x9e3   : > { %v5121_v58 = vsel %vm4618_vm0, 0.0, %v5120_v19 }
 0x9e6   : > { %5483 = vrot.lane.b32.xlu2 %v9909_v57, %s6450_s26  ;;  %v5570_v44 = vld.sshfl [vmem:[#allocation1] sm:$0xff pattern:$0x73625140]  ;;  %v5676_v57 = vsel %vm5663_vm1, %v5675_v12, %v6381_v52  ;;  %v5744_v52 = vld [vmem:[%s6557_s15 + $0x178] sm:$0xff] }
 0x9e7   : > { %v6417_v14 = vpack.i.bf16 %v5570_v44, %v9889_v49  ;;  %5578 = vst [vmem:[#allocation1] ss:$4 sm:$0xff] %v5071_v9  ;;  %v6396_v49 = vunpack.i.h.bf16 %v9972_v7  ;;  %v5677_v60 = vsel %vm5665_vm2, %v5676_v57, %v6386_v6  ;;  %v5073_v7 = vsel %vm4618_vm0, 0.0, %v5072_v1  ;;  %5812 = vmatpush.msrb.mxu3 %v5744_v52  ;;  %v5739_v6 = vld [vmem:[%s6557_s15 + $0x150] sm:$0xff] }
 0x9e8   : > { %5580 = vst [vmem:[#allocation1 + $0x1] ss:$4 sm:$0xff] %v5079_v3  ;;  %v5678_v51 = vsel %vm5667_vm3, %v5677_v60, %v6391_v27  ;;  %v5136_v9 = vrot.slane %v5135_v59, 4  ;;  %v5144_v3 = vrot.slane %v5143_v33, 4  ;;  %v5152_v44 = vrot.slane %v5151_v21, 4  ;;  %v5740_v27 = vld [vmem:[%s6557_s15 + $0x158] sm:$0xff] }
 0x9e9   : > { %6418 = vrot.lane.b32.xlu0 %v6417_v14, %s6448_s21  ;;  %5582 = vst [vmem:[#allocation1 + $0x2] ss:$4 sm:$0xff] %v5087_v55  ;;  %v5679_v29 = vsel %vm5669_vm4, %v5678_v51, %v6396_v49  ;;  %v5160_v55 = vrot.slane %v5159_v5, 4  ;;  %5813 = vmatpush.msrb.mxu3 %v5743_v26  ;;  %v5738_v49 = vld [vmem:[%s6557_s15 + $0x148] sm:$0xff]  ;;  %v5736_v60 = vld [vmem:[%s6557_s15 + $0x138] sm:$0xff]  ;;  %v5735_v1 = vld [vmem:[%s6557_s15 + $0x130] sm:$0xff] }
 0x9ea   : > { %5584 = vst [vmem:[#allocation1 + $0x3] ss:$4 sm:$0xff] %v5095_v41  ;;  %v5680_v35 = vsel %vm5671_vm5, %v5679_v29, %v6401_v30  ;;  %v5137_v14 = vsel %vm4618_vm0, 0.0, %v5136_v9  ;;  %v5145_v61 = vsel %vm4618_vm0, 0.0, %v5144_v3  ;;  %v5153_v12 = vsel %vm4618_vm0, 0.0, %v5152_v44  ;;  %v5734_v51 = vld [vmem:[%s6557_s15 + $0x128] sm:$0xff] }
 0x9eb   : > { %v5681_v25 = vsel %vm5673_vm6, %v5680_v35, %v6406_v37  ;;  %5814 = vmatpush.msrb.mxu3 %v5742_v23  ;;  %v5161_v57 = vsel %vm4618_vm0, 0.0, %v5160_v55  ;;  %v5731_v29 = vld [vmem:[%s6557_s15 + $0x110] sm:$0xff]  ;;  %v5730_v37 = vld [vmem:[%s6557_s15 + $0x108] sm:$0xff]  ;;  %v5760_v30 = vld [vmem:[%s6557_s15 + $0x1f8] sm:$0xff] }
 0x9ec   : > { %5808 = vmatmul.f32.vlgmr.msra.gmra.mxu3 %v5681_v25  ;;  %v5755_v35 = vld [vmem:[%s6557_s15 + $0x1d0] sm:$0xff]  ;;  %v5752_v25 = vld [vmem:[%s6557_s15 + $0x1b8] sm:$0xff]  ;;  %v5761_v9 = vld [vmem:[%s6557_s15 + $0x200] sm:$0xff] }
 0x9f1   : > { %5498 = vrot.lane.b32.xlu0 %v9916_v24, %s6451_s28  ;;  %v5585_v56 = vld.sshfl [vmem:[#allocation1] sm:$0xff pattern:$0x73625140]  ;;  %v10734_v24 = vld [vmem:[#allocation31_spill] sm:$0xff] }
 0x9f2   : > { %v6422_v34 = vpack.i.bf16 %v5585_v56, %v9900_v10  ;;  %5593 = vst [vmem:[#allocation1] ss:$4 sm:$0xff] %v5073_v7  ;;  %v5103_v63 = vperm.slane %v10734_v24, %v9245_v16  ;;  %v5111_v10 = vperm.slane %v10735_v62, %v9245_v16  ;;  %v5741_v16 = vld [vmem:[%s6557_s15 + $0x160] sm:$0xff]  ;;  %v5756_v56 = vld [vmem:[%s6557_s15 + $0x1d8] sm:$0xff] }
 0x9f3   : > { %5595 = vst [vmem:[#allocation1 + $0x1] ss:$4 sm:$0xff] %v5081_v22  ;;  %5815 = vmatpush.msrb.mxu3 %v5741_v16  ;;  %v5757_v7 = vld [vmem:[%s6557_s15 + $0x1e0] sm:$0xff]  ;;  %v5754_v22 = vld [vmem:[%s6557_s15 + $0x1c8] sm:$0xff] }
 0x9f4   : > { %6423 = vrot.lane.b32.xlu1 %v6422_v34, %s6449_s25  ;;  %5597 = vst [vmem:[#allocation1 + $0x2] ss:$4 sm:$0xff] %v5089_v20  ;;  %v5104_v17 = vrot.slane %v5103_v63, 4  ;;  %v5112_v38 = vrot.slane %v5111_v10, 4  ;;  %v5753_v34 = vld [vmem:[%s6557_s15 + $0x1c0] sm:$0xff]  ;;  %v5751_v20 = vld [vmem:[%s6557_s15 + $0x1b0] sm:$0xff] }
 0x9f5   : > { %5599 = vst [vmem:[#allocation1 + $0x3] ss:$4 sm:$0xff] %v5097_v32  ;;  %5816 = vmatpush.msrb.mxu3 %v5740_v27  ;;  %v5750_v32 = vld [vmem:[%s6557_s15 + $0x1a8] sm:$0xff] }
 0x9f6   : > { %v5105_v36 = vsel %vm4618_vm0, 0.0, %v5104_v17 }
 0x9f7   : > { %5817 = vmatpush.msrb.mxu3 %v5739_v6 }
 0x9f9   : > { %5818 = vmatpush.msrb.mxu3 %v5738_v49 }
 0x9fb   : > { %5819 = vmatpush.msrb.mxu3 %v5737_v47 }
 0x9fc   : > { %v5600_v28 = vld.sshfl [vmem:[#allocation1] sm:$0xff pattern:$0x73625140]  ;;  %5513 = vrot.lane.b32.xlu1 %v9929_v8, %s6452_s29  ;;  %v5113_v8 = vsel %vm4618_vm0, 0.0, %v5112_v38  ;;  %v5747_v38 = vld [vmem:[%s6557_s15 + $0x190] sm:$0xff] }
 0x9fd   : > { %5601 = vrot.lane.b32.xlu2 %v5600_v28, %s6450_s26  ;;  %5608 = vst [vmem:[#allocation1] ss:$4 sm:$0xff] %v5103_v63  ;;  %5820 = vmatpush.msrb.mxu3 %v5736_v60  ;;  %v5749_v28 = vld [vmem:[%s6557_s15 + $0x1a0] sm:$0xff] }
 0x9fe   : > { %5610 = vst [vmem:[#allocation1 + $0x1] ss:$4 sm:$0xff] %v5111_v10 }
 0x9ff   : > { %5612 = vst [vmem:[#allocation1 + $0x2] ss:$4 sm:$0xff] %v5119_v31  ;;  %5821 = vmatpush.msrb.mxu3 %v5735_v1  ;;  %v5873_v1 = vld [vmem:[%s6563_s24] sm:$0xff] }
 0xa00   : > { %5614 = vst [vmem:[#allocation1 + $0x3] ss:$4 sm:$0xff] %v5127_v15  ;;  %v5748_v15 = vld [vmem:[%s6557_s15 + $0x198] sm:$0xff] }
 0xa01   : > { %5822 = vmatpush.msrb.mxu3 %v5734_v51 }
 0xa03   : > { %5823 = vmatpush.msrb.mxu3 %v5733_v48 }
 0xa05   : > { %5824 = vmatpush.msrb.mxu3 %v5732_v18  ;;  %v6430_v18 = vld [vmem:[%s466_s11] ss:$0 sm:$0xff]  ;;  %s6161_s11 = sshll.u32 %s6516_s13, 3 }
 0xa07   : > { %v5615_v42 = vld.sshfl [vmem:[#allocation1] sm:$0xff pattern:$0x73625140]  ;;  %5825 = vmatpush.msrb.mxu3 %v5731_v29 }
 0xa08   : > { %5616 = vrot.lane.b32.xlu0 %v5615_v42, %s6451_s28  ;;  %5623 = vst [vmem:[#allocation1] ss:$4 sm:$0xff] %v5105_v36  ;;  %v5746_v42 = vld [vmem:[%s6557_s15 + $0x188] sm:$0xff] }
 0xa09   : > { %5625 = vst [vmem:[#allocation1 + $0x1] ss:$4 sm:$0xff] %v5113_v8  ;;  %5826 = vmatpush.msrb.mxu3 %v5730_v37 }
 0xa0a   : > { %5627 = vst [vmem:[#allocation1 + $0x2] ss:$4 sm:$0xff] %v5121_v58 }
 0xa0b   : > { %5629 = vst [vmem:[#allocation1 + $0x3] ss:$4 sm:$0xff] %v5129_v4  ;;  %5827 = vmatpush.msrb.mxu3 %v5729_v53 }
 0xa0d   : > { %5832 = vmatpush.msra.mxu3 %v5760_v30 }
 0xa0f   : > { %5833 = vmatpush.msra.mxu3 %v5759_v50 }
 0xa11   : > { %5834 = vmatpush.msra.mxu3 %v5758_v40 }
 0xa12   : > { %v5630_v2 = vld.sshfl [vmem:[#allocation1] sm:$0xff pattern:$0x73625140] }
 0xa13   : > { %5631 = vrot.lane.b32.xlu1 %v5630_v2, %s6452_s29  ;;  %5638 = vst [vmem:[#allocation1] ss:$4 sm:$0xff] %v5135_v59  ;;  %5835 = vmatpush.msra.mxu3 %v5757_v7  ;;  %v5764_v2 = vld [vmem:[%s6557_s15 + $0x218] sm:$0xff] }
 0xa14   : > { %5640 = vst [vmem:[#allocation1 + $0x1] ss:$4 sm:$0xff] %v5143_v33 }
 0xa15   : > { %5642 = vst [vmem:[#allocation1 + $0x2] ss:$4 sm:$0xff] %v5151_v21  ;;  %5836 = vmatpush.msra.mxu3 %v5756_v56  ;;  %v5763_v21 = vld [vmem:[%s6557_s15 + $0x210] sm:$0xff] }
 0xa16   : > { %5644 = vst [vmem:[#allocation1 + $0x3] ss:$4 sm:$0xff] %v5159_v5  ;;  %v5762_v5 = vld [vmem:[%s6557_s15 + $0x208] sm:$0xff] }
 0xa17   : > { %5837 = vmatpush.msra.mxu3 %v5755_v35  ;;  %v6431_v35 = vld [vmem:[%s474_s22] ss:$0 sm:$0xff] }
 0xa19   : > { %5838 = vmatpush.msra.mxu3 %v5754_v22 }
 0xa1b   : > { %5839 = vmatpush.msra.mxu3 %v5753_v34 }
 0xa1d   : > { %v10065_v41 = vld.sshfl [vmem:[#allocation1] sm:$0xff pattern:$0x73625140]  ;;  %5840 = vmatpush.msra.mxu3 %v5752_v25 }
 0xa1e   : > { %5651 = vst [vmem:[#allocation1] ss:$4 sm:$0xff] %v5137_v14 }
 0xa1f   : > { %5653 = vst [vmem:[#allocation1 + $0x1] ss:$4 sm:$0xff] %v5145_v61  ;;  %5841 = vmatpush.msra.mxu3 %v5751_v20 }
 0xa20   : > { %5655 = vst [vmem:[#allocation1 + $0x2] ss:$4 sm:$0xff] %v5153_v12 }
 0xa21   : > { %5657 = vst [vmem:[#allocation1 + $0x3] ss:$4 sm:$0xff] %v5161_v57  ;;  %5842 = vmatpush.msra.mxu3 %v5750_v32 }
 0xa23   : > { %5843 = vmatpush.msra.mxu3 %v5749_v28 }
 0xa25   : > { %5844 = vmatpush.msra.mxu3 %v5748_v15 }
 0xa27   : > { %5845 = vmatpush.msra.mxu3 %v5747_v38 }
 0xa28   : > { %v5658_v39 = vld.sshfl [vmem:[#allocation1] sm:$0xff pattern:$0x73625140] }
 0xa29   : > { %5659 = vrot.lane.b32.xlu2 %v5658_v39, %s6446_s3  ;;  %5846 = vmatpush.msra.mxu3 %v5746_v42  ;;  %v5874_v39 = vld [vmem:[%s6563_s24 + $0x8] sm:$0xff]  ;;  %s5903_s24 = scalar_lea.vmem %s10153_s10, %s6161_s11 }
 0xa38   : > { %v6414_v63 = vpop.permute.xlu2 %6413 }
 0xa39   : > { %v6415_v17 = vunpack.i.l.bf16 %v6414_v63  ;;  %v6416_v44 = vunpack.i.h.bf16 %v6414_v63 }
 0xa40   : > { %v5484_v4 = vpop.permute.xlu2 %5483 }
 0xa45   : > { %v6409_v24 = vpop.permute.xlu1 %6408 }
 0xa46   : > { %v6410_v62 = vunpack.i.l.bf16 %v6409_v24  ;;  %v6411_v52 = vunpack.i.h.bf16 %v6409_v24 }
 0xa48   : > { %v5682_v0 = vsel %vm2964_vm14, %v9859_v43, %v6410_v62  ;;  %v5745_v43 = vld [vmem:[%s6557_s15 + $0x180] sm:$0xff]  ;;  %v5689_v26 = vsel %vm2964_vm14, %v9940_v45, %v6411_v52 }
 0xa49   : > { %v5683_v46 = vsel %vm5663_vm1, %v5682_v0, %v6415_v17  ;;  %5847 = vmatpush.msra.mxu3 %v5745_v43  ;;  %v5690_v55 = vsel %vm5663_vm1, %v5689_v26, %v6416_v44 }
 0xa57   : > { %v5602_v12 = vpop.permute.xlu2 %5601 }
 0xa5b   : > { %v6419_v10 = vpop.permute.xlu0 %6418 }
 0xa5c   : > { %v6420_v31 = vunpack.i.l.bf16 %v6419_v10  ;;  %v6421_v3 = vunpack.i.h.bf16 %v6419_v10 }
 0xa5e   : > { %v5684_v8 = vsel %vm5665_vm2, %v5683_v46, %v6420_v31  ;;  %v5691_v14 = vsel %vm5665_vm2, %v5690_v55, %v6421_v3 }
 0xa62   : > { %v5789_v60 = vpop.f32.mrf.mxu3 }
 0xa63   : > { %v5499_v59 = vpop.permute.xlu0 %5498  ;;  %v5790_v37 = vadd.f32 %v6430_v18, %v5789_v60 }
 0xa66   : > { %v6424_v19 = vpop.permute.xlu1 %6423 }
 0xa67   : > { %v6425_v36 = vunpack.i.l.bf16 %v6424_v19  ;;  %v6426_v23 = vunpack.i.h.bf16 %v6424_v19 }
 0xa69   : > { %v5685_v58 = vsel %vm5667_vm3, %v5684_v8, %v6425_v36  ;;  %v5692_v16 = vsel %vm5667_vm3, %v5691_v14, %v6426_v23 }
 0xa6a   : > { %v5686_v13 = vsel %vm5669_vm4, %v5685_v58, %v5484_v4  ;;  %v5693_v57 = vsel %vm5669_vm4, %v5692_v16, %v5602_v12 }
 0xa6b   : > { %v5687_v33 = vsel %vm5671_vm5, %v5686_v13, %v5499_v59 }
 0xa6e   : > { %v5514_v11 = vpop.permute.xlu1 %5513 }
 0xa6f   : > { %v5688_v54 = vsel %vm5673_vm6, %v5687_v33, %v5514_v11  ;;  %v5809_v51 = vpop.f32.mrf.mxu3 }
 0xa70   : > { %5828 = vmatmul.f32.vlgmr.msrb.gmra.mxu3 %v5688_v54  ;;  %v5810_v53 = vadd.f32 %v5809_v51, %v5790_v37 }
 0xa71   : > { %5864 = vmatpush.msrb.mxu3 %v5764_v2 }
 0xa73   : > { %5865 = vmatpush.msrb.mxu3 %v5763_v21 }
 0xa75   : > { %5866 = vmatpush.msrb.mxu3 %v5762_v5 }
 0xa77   : > { %5867 = vmatpush.msrb.mxu3 %v5761_v9 }
 0xa7a   : > { %v5617_v61 = vpop.permute.xlu0 %5616 }
 0xa7b   : > { %v5694_v27 = vsel %vm5671_vm5, %v5693_v57, %v5617_v61 }
 0xa83   : > { %v5660_v49 = vpop.permute.xlu2 %5659 }
 0xa84   : > { %v5696_v47 = vsel %vm2964_vm14, %v10065_v41, %v5660_v49 }
 0xa85   : > { %v5632_v6 = vpop.permute.xlu1 %5631 }
 0xa86   : > { %v5695_v45 = vsel %vm5673_vm6, %v5694_v27, %v5632_v6 }
 0xa87   : > { %5848 = vmatmul.f32.vlgmr.msra.gmra.mxu3 %v5695_v45 }
 0xa88   : > { %5896 = vmatpush.msra.mxu3 %v5874_v39 }
 0xa8a   : > { %5897 = vmatpush.msra.mxu3 %v5873_v1 }
 0xa8f   : > { %6159 = vmatmul.msk.f32.vlgmr.msrb.gmra.mxu3 %vm5663_vm1, %v5696_v47 }
 0xaf3   : > { %v5829_v48 = vpop.f32.mrf.mxu3 }
 0xaf4   : > { %v5830_v41 = vadd.f32 %v5829_v48, %v5810_v53 }
 0xb0a   : > { %v5849_v29 = vpop.f32.mrf.mxu3 }
 0xb0b   : > { %v5850_v30 = vadd.f32 %v5849_v29, %v5830_v41 }
 0xb12   : > { %v5869_v50 = vpop.f32.mrf.mxu3 }
 0xb13   : > { %v5870_v40 = vadd.f32 %v5869_v50, %v5850_v30 }
 0xb15   : > { %v5872_v7 = vmax.f32 %v5870_v40, 0.0 }
 0xb17   : > { %5906 = vrot.lane.b32.xlu0 %v5872_v7, %s6453_s17  ;;  %6160 = vmatmul.msk.f32.vlgmr.msra.gmra.mxu3 %vm2964_vm14, %v5872_v7 }
 0xb89   : > { %v5907_v56 = vpop.permute.xlu0 %5906 }
 0xb8a   : > { %5910 = vst.msk [vmem:[#allocation2] sm:$0xff] %vm5909_vm7, %v5907_v56 }
 0xb9a   : > { %v5899_v22 = vpop.f32.mrf.mxu3 }
 0xb9b   : > { %v5900_v34 = vadd.f32 %v6431_v35, %v5899_v22 }
 0xb9d   : > { %5905 = vst.msk [vmem:[%s5903_s24] sm:$0xff] %vm5904_vm8, %v5900_v34  ;;  %5912 = vrot.lane.b32.xlu1 %v5900_v34, %s6454_s27 }
 0xc0f   : > { %v5913_v25 = vpop.permute.xlu1 %5912 }
 0xc10   : > { %5916 = vst.msk [vmem:[#allocation2] sm:$0xff] %vm5915_vm9, %v5913_v25 }
 0xc11 PF: > { %s20_s12 = sadd.s32 1, %s6443_s12  }
 0xc12   : > { %p17_p6 = scmp.ge.s32.totalorder %s20_s12, 6  }
 0xc14   :  { %19 = sbr.rel (!%p17_p6) target bundleno = 3 (0x3), region = 245 }

</bundles_post_ra>
